<compile_context>
chip_gen: v7x
topology: tpu7x:2x2x1
jax: 0.10.0
libtpu: 0.0.40
codegen_flags: <defaults>
</compile_context>

<pallas_src>
import numpy as np
import jax
import jax.numpy as jnp
from jax.experimental import pallas as pl
from jax.experimental.pallas import tpu as pltpu

N_CH = 8        # conv output channels
N_TAP = 9       # 3x3 conv taps
N_POOL = 36     # 6x6 pooled spatial positions after the 2nd max-pool
G_PAD = 40      # per-channel row stride in the pooled scratch (8-aligned)
N_CLS = 10      # classifier outputs
FLAT = N_CH * G_PAD   # 320 rows fed to the classifier matmul


def _round_up(v, m):
    return ((v + m - 1) // m) * m


def _cdiv(a, b):
    return -(-a // b)


def _choose_batch_tile(n, max_tb=512):
    """Batch tile: multiple of 128, <= max_tb, minimal padding; prefer >=2
    grid steps when there is enough work (v7x megacore sharding)."""
    n128 = _round_up(max(n, 1), 128)
    steps = _cdiv(n128, max_tb)
    if steps == 1 and n128 >= 512:
        steps = 2               # let the parallel batch axis use both v7x TCs
    tb = _round_up(_cdiv(n128, steps), 128)
    return tb, steps * tb       # (batch tile, padded batch)


def _cnn_kernel(x_ref, w1_ref, b1_ref, w2_ref, b2_ref, out_ref, pooled_ref):
    # x_ref:      (4, 9, 36, TB) im2col of the *pooled* 14x14 image
    #             [k = 2nd-pool window pos, tap, pooled output pos, batch]
    # w1_ref:     (9, 8)   SMEM conv weight  [tap, out_channel]
    # b1_ref:     (8,)     SMEM conv bias
    # w2_ref:     (10, 320) VMEM linear weight, column = channel*G_PAD + pos
    #             (pad columns 36..39 of each channel are zero)
    # b2_ref:     (10, 1)  VMEM linear bias
    # out_ref:    (10, TB) log-softmax output, batch on the lane axis
    # pooled_ref: (320, TB) VMEM scratch, flattened pooled conv activations
    tb = pooled_ref.shape[1]
    zpad = jnp.zeros((G_PAD - N_POOL, tb), jnp.float32)   # hoisted, reused 8x

    # --- Conv2d(1,8,3) as 9 scalar-broadcast FMAs per channel (VPU),
    #     + bias, ReLU, then MaxPool2d(2,2) = max over the k axis ---
    for c in range(N_CH):
        acc = x_ref[:, 0] * w1_ref[0, c]
        for t in range(1, N_TAP):
            acc = acc + x_ref[:, t] * w1_ref[t, c]
        acc = jnp.maximum(acc + b1_ref[c], 0.0)            # (4, 36, TB)
        q = jnp.max(acc, axis=0)                           # (36, TB) 2nd pool
        pooled_ref[c * G_PAD:c * G_PAD + N_POOL, :] = q
        # keep the matmul NaN-free: pad rows are multiplied by zero weights
        pooled_ref[c * G_PAD + N_POOL:(c + 1) * G_PAD, :] = zpad

    # --- Flatten + Linear(288,10) as one MXU matmul: (10,320) @ (320,TB) ---
    y = jnp.dot(w2_ref[...], pooled_ref[...],
                preferred_element_type=jnp.float32) + b2_ref[...]   # (10, TB)

    # --- log_softmax over the class (sublane) axis ---
    m = jnp.max(y, axis=0, keepdims=True)
    s = y - m
    lse = jnp.log(jnp.sum(jnp.exp(s), axis=0, keepdims=True))
    out_ref[...] = s - lse


def _build_pooled_im2col_indices():
    # Indices into the POOLED 14x14 image, axes: [k, t, g]
    k = np.arange(4).reshape(4, 1, 1)                 # 2nd-pool window (ao, bo)
    t = np.arange(N_TAP).reshape(1, N_TAP, 1)         # conv tap (di, dj)
    g = np.arange(N_POOL).reshape(1, 1, N_POOL)       # pooled output pixel (pi, pj)
    pi, pj = g // 6, g % 6
    ao, bo = k // 2, k % 2
    di, dj = t // 3, t % 3
    rows = 2 * pi + ao + di                           # (4, 9, 36), values in [0, 14)
    cols = 2 * pj + bo + dj
    return rows, cols


_ROWS, _COLS = _build_pooled_im2col_indices()


def cnn_model_small_forward(x, conv_w, conv_b, lin_w, lin_b, max_block_batch=512):
    """x: (N, 1, 28, 28) float32 (NCHW, same convention as PyTorch)."""
    x = x.astype(jnp.float32)
    n = x.shape[0]
    tb, n_pad = _choose_batch_tile(n, max_block_batch)

    # ---- wrapper glue on the SMALL raw tensor (3.1 KB/sample) ----
    x2 = jnp.pad(x[:, 0], ((0, n_pad - n), (0, 0), (0, 0)))           # (n_pad, 28, 28)
    # First MaxPool2d(2,2) hoisted here (perf review): the im2col below would
    # otherwise replicate every pre-pool pixel 4x in the kernel's HBM stream.
    pooled = jnp.max(x2.reshape(n_pad, 14, 2, 14, 2), axis=(2, 4))     # (n_pad, 14, 14)
    # batch -> lane axis while the tensor is tiny, so the inflated im2col
    # never needs an XLA transpose
    pooled = jnp.transpose(pooled, (1, 2, 0))                          # (14, 14, n_pad)
    xcol = pooled[_ROWS, _COLS]                                        # (4, 9, 36, n_pad)

    w1m = conv_w.reshape(N_CH, N_TAP).T.astype(jnp.float32)            # (9, 8) [tap, ch]
    b1m = conv_b.reshape(N_CH).astype(jnp.float32)                     # (8,)
    w2m = jnp.pad(lin_w.reshape(N_CLS, N_CH, N_POOL).astype(jnp.float32),
                  ((0, 0), (0, 0), (0, G_PAD - N_POOL))
                  ).reshape(N_CLS, FLAT)                               # (10, 320)
    b2m = lin_b.reshape(N_CLS, 1).astype(jnp.float32)                  # (10, 1)

    # ---- advisory cost estimate so XLA overlaps the glue with the kernel ----
    flops = int((2 * N_CH * N_TAP * 4 * N_POOL       # conv mul+add
                 + 2 * N_CLS * FLAT                  # classifier matmul
                 + 4 * N_CH * N_POOL + 2 * N_CH * 4 * N_POOL  # pools / relu / bias
                 + 8 * N_CLS) * n_pad)               # log_softmax adds/maxes
    bytes_accessed = int((4 * N_TAP * N_POOL + N_CLS) * 4 * n_pad
                         + N_CLS * FLAT * 4 + (N_TAP * N_CH + N_CH + N_CLS) * 4)
    cost = pl.CostEstimate(flops=flops, transcendentals=int(11 * n_pad),
                           bytes_accessed=bytes_accessed)

    # ---- VMEM sized to need (double-buffered input block + scratch + out) ----
    xblock_bytes = 4 * N_TAP * N_POOL * tb * 4
    vmem_need = (2 * xblock_bytes + 2 * N_CLS * tb * 4 + FLAT * tb * 4
                 + N_CLS * FLAT * 4 + N_CLS * 4)
    vmem_limit = int(min(100 * 1024 * 1024, vmem_need + 4 * 1024 * 1024))

    out = pl.pallas_call(
        _cnn_kernel,
        out_shape=jax.ShapeDtypeStruct((N_CLS, n_pad), jnp.float32),
        grid=(n_pad // tb,),
        in_specs=[
            pl.BlockSpec((4, N_TAP, N_POOL, tb), lambda i: (0, 0, 0, i)),
            pl.BlockSpec(memory_space=pltpu.MemorySpace.SMEM),   # conv weight
            pl.BlockSpec(memory_space=pltpu.MemorySpace.SMEM),   # conv bias
            pl.BlockSpec((N_CLS, FLAT), lambda i: (0, 0)),       # linear weight
            pl.BlockSpec((N_CLS, 1), lambda i: (0, 0)),          # linear bias
        ],
        out_specs=pl.BlockSpec((N_CLS, tb), lambda i: (0, i)),
        scratch_shapes=[pltpu.VMEM((FLAT, tb), jnp.float32)],
        compiler_params=pltpu.CompilerParams(
            dimension_semantics=("parallel",),
            vmem_limit_bytes=vmem_limit),
        cost_estimate=cost,
    )(xcol, w1m, b1m, w2m, b2m)

    return out.T[:n]                                             # (N, 10)


def reference_forward(x, conv_w, conv_b, lin_w, lin_b):
    """Pure-JAX reference matching the PyTorch module exactly."""
    p = jax.lax.reduce_window(x, -jnp.inf, jax.lax.max,
                              (1, 1, 2, 2), (1, 1, 2, 2), "VALID")
    c = jax.lax.conv_general_dilated(
        p, conv_w, window_strides=(1, 1), padding="VALID",
        dimension_numbers=("NCHW", "OIHW", "NCHW"),
        precision=jax.lax.Precision.HIGHEST)
    c = jnp.maximum(c + conv_b[None, :, None, None], 0.0)
    q = jax.lax.reduce_window(c, -jnp.inf, jax.lax.max,
                              (1, 1, 2, 2), (1, 1, 2, 2), "VALID")
    f = q.reshape(q.shape[0], -1)
    y = jnp.dot(f, lin_w.T, precision=jax.lax.Precision.HIGHEST) + lin_b
    return jax.nn.log_softmax(y, axis=1)


if __name__ == "__main__":
    key = jax.random.PRNGKey(0)
    kx, kw1, kb1, kw2, kb2 = jax.random.split(key, 5)

    # Deterministic synthetic inputs (shapes implied by the module).
    x = jax.random.normal(kx, (2, 1, 28, 28), jnp.float32)
    conv_w = 0.1 * jax.random.normal(kw1, (8, 1, 3, 3), jnp.float32)
    conv_b = 0.1 * jax.random.normal(kb1, (8,), jnp.float32)
    lin_w = 0.05 * jax.random.normal(kw2, (10, 288), jnp.float32)
    lin_b = 0.05 * jax.random.normal(kb2, (10,), jnp.float32)

    out = jax.block_until_ready(
        cnn_model_small_forward(x, conv_w, conv_b, lin_w, lin_b))
    ref = jax.block_until_ready(
        reference_forward(x, conv_w, conv_b, lin_w, lin_b))

    if not np.allclose(np.asarray(out), np.asarray(ref), rtol=1e-3, atol=1e-3):
        raise AssertionError("Pallas kernel does not match reference forward")
    print("KERNEL_OK")
</pallas_src>

<mosaic_0001>
module attributes {stable_mosaic.version = 11 : i64} {
  func.func @_cnn_kernel(%arg0: i32, %arg1: memref<4x9x36x128xf32, #tpu.memory_space<vmem>>, %arg2: memref<9x8xf32, #tpu.memory_space<smem>>, %arg3: memref<8xf32, #tpu.memory_space<smem>>, %arg4: memref<10x320xf32, #tpu.memory_space<vmem>>, %arg5: memref<10x1xf32, #tpu.memory_space<vmem>>, %arg6: memref<10x128xf32, #tpu.memory_space<vmem>>, %arg7: memref<320x128xf32, #tpu.memory_space<vmem>>) attributes {dimension_semantics = [#tpu.dimension_semantics<parallel>], iteration_bounds = array<i64: 1>, scalar_prefetch = 0 : i64, scratch_operands = 1 : i64, tpu.core_type = #tpu.core_type<tc>, window_params = [{transform_indices = @transform_0, window_bounds = array<i64: 4, 9, 36, 128>}, {transform_indices = @transform_1, window_bounds = array<i64: 9, 8>}, {transform_indices = @transform_2, window_bounds = array<i64: 8>}, {pipeline_mode = #tpu.pipeline_mode<synchronous>, transform_indices = @transform_3, window_bounds = array<i64: 10, 320>}, {pipeline_mode = #tpu.pipeline_mode<synchronous>, transform_indices = @transform_4, window_bounds = array<i64: 10, 1>}, {transform_indices = @transform_5, window_bounds = array<i64: 10, 128>}]} {
    %cst = arith.constant 0.000000e+00 : f32
    %0 = vector.broadcast %cst : f32 to vector<4x128xf32>
    %c0 = arith.constant 0 : index
    %c0_0 = arith.constant 0 : index
    %c0_1 = arith.constant 0 : index
    %c0_2 = arith.constant 0 : index
    %1 = vector.load %arg1[%c0, %c0_0, %c0_1, %c0_2] : memref<4x9x36x128xf32, #tpu.memory_space<vmem>>, vector<4x1x36x128xf32>
    %2 = vector.shape_cast %1 : vector<4x1x36x128xf32> to vector<4x36x128xf32>
    %c0_3 = arith.constant 0 : index
    %c0_4 = arith.constant 0 : index
    %3 = memref.load %arg2[%c0_3, %c0_4] : memref<9x8xf32, #tpu.memory_space<smem>>
    %4 = vector.broadcast %3 : f32 to vector<4x36x128xf32>
    %5 = arith.mulf %2, %4 : vector<4x36x128xf32>
    %c0_5 = arith.constant 0 : index
    %c1 = arith.constant 1 : index
    %c0_6 = arith.constant 0 : index
    %c0_7 = arith.constant 0 : index
    %6 = vector.load %arg1[%c0_5, %c1, %c0_6, %c0_7] : memref<4x9x36x128xf32, #tpu.memory_space<vmem>>, vector<4x1x36x128xf32>
    %7 = vector.shape_cast %6 : vector<4x1x36x128xf32> to vector<4x36x128xf32>
    %c1_8 = arith.constant 1 : index
    %c0_9 = arith.constant 0 : index
    %8 = memref.load %arg2[%c1_8, %c0_9] : memref<9x8xf32, #tpu.memory_space<smem>>
    %9 = vector.broadcast %8 : f32 to vector<4x36x128xf32>
    %10 = arith.mulf %7, %9 : vector<4x36x128xf32>
    %11 = arith.addf %5, %10 : vector<4x36x128xf32>
    %c0_10 = arith.constant 0 : index
    %c2 = arith.constant 2 : index
    %c0_11 = arith.constant 0 : index
    %c0_12 = arith.constant 0 : index
    %12 = vector.load %arg1[%c0_10, %c2, %c0_11, %c0_12] : memref<4x9x36x128xf32, #tpu.memory_space<vmem>>, vector<4x1x36x128xf32>
    %13 = vector.shape_cast %12 : vector<4x1x36x128xf32> to vector<4x36x128xf32>
    %c2_13 = arith.constant 2 : index
    %c0_14 = arith.constant 0 : index
    %14 = memref.load %arg2[%c2_13, %c0_14] : memref<9x8xf32, #tpu.memory_space<smem>>
    %15 = vector.broadcast %14 : f32 to vector<4x36x128xf32>
    %16 = arith.mulf %13, %15 : vector<4x36x128xf32>
    %17 = arith.addf %11, %16 : vector<4x36x128xf32>
    %c0_15 = arith.constant 0 : index
    %c3 = arith.constant 3 : index
    %c0_16 = arith.constant 0 : index
    %c0_17 = arith.constant 0 : index
    %18 = vector.load %arg1[%c0_15, %c3, %c0_16, %c0_17] : memref<4x9x36x128xf32, #tpu.memory_space<vmem>>, vector<4x1x36x128xf32>
    %19 = vector.shape_cast %18 : vector<4x1x36x128xf32> to vector<4x36x128xf32>
    %c3_18 = arith.constant 3 : index
    %c0_19 = arith.constant 0 : index
    %20 = memref.load %arg2[%c3_18, %c0_19] : memref<9x8xf32, #tpu.memory_space<smem>>
    %21 = vector.broadcast %20 : f32 to vector<4x36x128xf32>
    %22 = arith.mulf %19, %21 : vector<4x36x128xf32>
    %23 = arith.addf %17, %22 : vector<4x36x128xf32>
    %c0_20 = arith.constant 0 : index
    %c4 = arith.constant 4 : index
    %c0_21 = arith.constant 0 : index
    %c0_22 = arith.constant 0 : index
    %24 = vector.load %arg1[%c0_20, %c4, %c0_21, %c0_22] : memref<4x9x36x128xf32, #tpu.memory_space<vmem>>, vector<4x1x36x128xf32>
    %25 = vector.shape_cast %24 : vector<4x1x36x128xf32> to vector<4x36x128xf32>
    %c4_23 = arith.constant 4 : index
    %c0_24 = arith.constant 0 : index
    %26 = memref.load %arg2[%c4_23, %c0_24] : memref<9x8xf32, #tpu.memory_space<smem>>
    %27 = vector.broadcast %26 : f32 to vector<4x36x128xf32>
    %28 = arith.mulf %25, %27 : vector<4x36x128xf32>
    %29 = arith.addf %23, %28 : vector<4x36x128xf32>
    %c0_25 = arith.constant 0 : index
    %c5 = arith.constant 5 : index
    %c0_26 = arith.constant 0 : index
    %c0_27 = arith.constant 0 : index
    %30 = vector.load %arg1[%c0_25, %c5, %c0_26, %c0_27] : memref<4x9x36x128xf32, #tpu.memory_space<vmem>>, vector<4x1x36x128xf32>
    %31 = vector.shape_cast %30 : vector<4x1x36x128xf32> to vector<4x36x128xf32>
    %c5_28 = arith.constant 5 : index
    %c0_29 = arith.constant 0 : index
    %32 = memref.load %arg2[%c5_28, %c0_29] : memref<9x8xf32, #tpu.memory_space<smem>>
    %33 = vector.broadcast %32 : f32 to vector<4x36x128xf32>
    %34 = arith.mulf %31, %33 : vector<4x36x128xf32>
    %35 = arith.addf %29, %34 : vector<4x36x128xf32>
    %c0_30 = arith.constant 0 : index
    %c6 = arith.constant 6 : index
    %c0_31 = arith.constant 0 : index
    %c0_32 = arith.constant 0 : index
    %36 = vector.load %arg1[%c0_30, %c6, %c0_31, %c0_32] : memref<4x9x36x128xf32, #tpu.memory_space<vmem>>, vector<4x1x36x128xf32>
    %37 = vector.shape_cast %36 : vector<4x1x36x128xf32> to vector<4x36x128xf32>
    %c6_33 = arith.constant 6 : index
    %c0_34 = arith.constant 0 : index
    %38 = memref.load %arg2[%c6_33, %c0_34] : memref<9x8xf32, #tpu.memory_space<smem>>
    %39 = vector.broadcast %38 : f32 to vector<4x36x128xf32>
    %40 = arith.mulf %37, %39 : vector<4x36x128xf32>
    %41 = arith.addf %35, %40 : vector<4x36x128xf32>
    %c0_35 = arith.constant 0 : index
    %c7 = arith.constant 7 : index
    %c0_36 = arith.constant 0 : index
    %c0_37 = arith.constant 0 : index
    %42 = vector.load %arg1[%c0_35, %c7, %c0_36, %c0_37] : memref<4x9x36x128xf32, #tpu.memory_space<vmem>>, vector<4x1x36x128xf32>
    %43 = vector.shape_cast %42 : vector<4x1x36x128xf32> to vector<4x36x128xf32>
    %c7_38 = arith.constant 7 : index
    %c0_39 = arith.constant 0 : index
    %44 = memref.load %arg2[%c7_38, %c0_39] : memref<9x8xf32, #tpu.memory_space<smem>>
    %45 = vector.broadcast %44 : f32 to vector<4x36x128xf32>
    %46 = arith.mulf %43, %45 : vector<4x36x128xf32>
    %47 = arith.addf %41, %46 : vector<4x36x128xf32>
    %c0_40 = arith.constant 0 : index
    %c8 = arith.constant 8 : index
    %c0_41 = arith.constant 0 : index
    %c0_42 = arith.constant 0 : index
    %48 = vector.load %arg1[%c0_40, %c8, %c0_41, %c0_42] : memref<4x9x36x128xf32, #tpu.memory_space<vmem>>, vector<4x1x36x128xf32>
    %49 = vector.shape_cast %48 : vector<4x1x36x128xf32> to vector<4x36x128xf32>
    %c8_43 = arith.constant 8 : index
    %c0_44 = arith.constant 0 : index
    %50 = memref.load %arg2[%c8_43, %c0_44] : memref<9x8xf32, #tpu.memory_space<smem>>
    %51 = vector.broadcast %50 : f32 to vector<4x36x128xf32>
    %52 = arith.mulf %49, %51 : vector<4x36x128xf32>
    %53 = arith.addf %47, %52 : vector<4x36x128xf32>
    %c0_45 = arith.constant 0 : index
    %54 = memref.load %arg3[%c0_45] : memref<8xf32, #tpu.memory_space<smem>>
    %55 = vector.broadcast %54 : f32 to vector<4x36x128xf32>
    %56 = arith.addf %53, %55 : vector<4x36x128xf32>
    %cst_46 = arith.constant 0.000000e+00 : f32
    %57 = vector.broadcast %cst_46 : f32 to vector<4x36x128xf32>
    %58 = arith.maximumf %56, %57 : vector<4x36x128xf32>
    %cst_47 = arith.constant dense<0xFF800000> : vector<36x128xf32>
    %59 = vector.multi_reduction <maximumf>, %58, %cst_47 [0] : vector<4x36x128xf32> to vector<36x128xf32>
    %c0_48 = arith.constant 0 : index
    %c0_49 = arith.constant 0 : index
    %60 = vector.load %arg7[%c0_48, %c0_49] : memref<320x128xf32, #tpu.memory_space<vmem>>, vector<36x128xf32>
    tpu.vector_store %arg7[%c0_48, %c0_49], %59 {strides = array<i32>} : memref<320x128xf32, #tpu.memory_space<vmem>>, vector<36x128xf32>,
    %c36 = arith.constant 36 : index
    %c0_50 = arith.constant 0 : index
    %61 = vector.load %arg7[%c36, %c0_50] : memref<320x128xf32, #tpu.memory_space<vmem>>, vector<4x128xf32>
    tpu.vector_store %arg7[%c36, %c0_50], %0 {strides = array<i32>} : memref<320x128xf32, #tpu.memory_space<vmem>>, vector<4x128xf32>,
    %c0_51 = arith.constant 0 : index
    %c0_52 = arith.constant 0 : index
    %c0_53 = arith.constant 0 : index
    %c0_54 = arith.constant 0 : index
    %62 = vector.load %arg1[%c0_51, %c0_52, %c0_53, %c0_54] : memref<4x9x36x128xf32, #tpu.memory_space<vmem>>, vector<4x1x36x128xf32>
    %63 = vector.shape_cast %62 : vector<4x1x36x128xf32> to vector<4x36x128xf32>
    %c0_55 = arith.constant 0 : index
    %c1_56 = arith.constant 1 : index
    %64 = memref.load %arg2[%c0_55, %c1_56] : memref<9x8xf32, #tpu.memory_space<smem>>
    %65 = vector.broadcast %64 : f32 to vector<4x36x128xf32>
    %66 = arith.mulf %63, %65 : vector<4x36x128xf32>
    %c0_57 = arith.constant 0 : index
    %c1_58 = arith.constant 1 : index
    %c0_59 = arith.constant 0 : index
    %c0_60 = arith.constant 0 : index
    %67 = vector.load %arg1[%c0_57, %c1_58, %c0_59, %c0_60] : memref<4x9x36x128xf32, #tpu.memory_space<vmem>>, vector<4x1x36x128xf32>
    %68 = vector.shape_cast %67 : vector<4x1x36x128xf32> to vector<4x36x128xf32>
    %c1_61 = arith.constant 1 : index
    %c1_62 = arith.constant 1 : index
    %69 = memref.load %arg2[%c1_61, %c1_62] : memref<9x8xf32, #tpu.memory_space<smem>>
    %70 = vector.broadcast %69 : f32 to vector<4x36x128xf32>
    %71 = arith.mulf %68, %70 : vector<4x36x128xf32>
    %72 = arith.addf %66, %71 : vector<4x36x128xf32>
    %c0_63 = arith.constant 0 : index
    %c2_64 = arith.constant 2 : index
    %c0_65 = arith.constant 0 : index
    %c0_66 = arith.constant 0 : index
    %73 = vector.load %arg1[%c0_63, %c2_64, %c0_65, %c0_66] : memref<4x9x36x128xf32, #tpu.memory_space<vmem>>, vector<4x1x36x128xf32>
    %74 = vector.shape_cast %73 : vector<4x1x36x128xf32> to vector<4x36x128xf32>
    %c2_67 = arith.constant 2 : index
    %c1_68 = arith.constant 1 : index
    %75 = memref.load %arg2[%c2_67, %c1_68] : memref<9x8xf32, #tpu.memory_space<smem>>
    %76 = vector.broadcast %75 : f32 to vector<4x36x128xf32>
    %77 = arith.mulf %74, %76 : vector<4x36x128xf32>
    %78 = arith.addf %72, %77 : vector<4x36x128xf32>
    %c0_69 = arith.constant 0 : index
    %c3_70 = arith.constant 3 : index
    %c0_71 = arith.constant 0 : index
    %c0_72 = arith.constant 0 : index
    %79 = vector.load %arg1[%c0_69, %c3_70, %c0_71, %c0_72] : memref<4x9x36x128xf32, #tpu.memory_space<vmem>>, vector<4x1x36x128xf32>
    %80 = vector.shape_cast %79 : vector<4x1x36x128xf32> to vector<4x36x128xf32>
    %c3_73 = arith.constant 3 : index
    %c1_74 = arith.constant 1 : index
    %81 = memref.load %arg2[%c3_73, %c1_74] : memref<9x8xf32, #tpu.memory_space<smem>>
    %82 = vector.broadcast %81 : f32 to vector<4x36x128xf32>
    %83 = arith.mulf %80, %82 : vector<4x36x128xf32>
    %84 = arith.addf %78, %83 : vector<4x36x128xf32>
    %c0_75 = arith.constant 0 : index
    %c4_76 = arith.constant 4 : index
    %c0_77 = arith.constant 0 : index
    %c0_78 = arith.constant 0 : index
    %85 = vector.load %arg1[%c0_75, %c4_76, %c0_77, %c0_78] : memref<4x9x36x128xf32, #tpu.memory_space<vmem>>, vector<4x1x36x128xf32>
    %86 = vector.shape_cast %85 : vector<4x1x36x128xf32> to vector<4x36x128xf32>
    %c4_79 = arith.constant 4 : index
    %c1_80 = arith.constant 1 : index
    %87 = memref.load %arg2[%c4_79, %c1_80] : memref<9x8xf32, #tpu.memory_space<smem>>
    %88 = vector.broadcast %87 : f32 to vector<4x36x128xf32>
    %89 = arith.mulf %86, %88 : vector<4x36x128xf32>
    %90 = arith.addf %84, %89 : vector<4x36x128xf32>
    %c0_81 = arith.constant 0 : index
    %c5_82 = arith.constant 5 : index
    %c0_83 = arith.constant 0 : index
    %c0_84 = arith.constant 0 : index
    %91 = vector.load %arg1[%c0_81, %c5_82, %c0_83, %c0_84] : memref<4x9x36x128xf32, #tpu.memory_space<vmem>>, vector<4x1x36x128xf32>
    %92 = vector.shape_cast %91 : vector<4x1x36x128xf32> to vector<4x36x128xf32>
    %c5_85 = arith.constant 5 : index
    %c1_86 = arith.constant 1 : index
    %93 = memref.load %arg2[%c5_85, %c1_86] : memref<9x8xf32, #tpu.memory_space<smem>>
    %94 = vector.broadcast %93 : f32 to vector<4x36x128xf32>
    %95 = arith.mulf %92, %94 : vector<4x36x128xf32>
    %96 = arith.addf %90, %95 : vector<4x36x128xf32>
    %c0_87 = arith.constant 0 : index
    %c6_88 = arith.constant 6 : index
    %c0_89 = arith.constant 0 : index
    %c0_90 = arith.constant 0 : index
    %97 = vector.load %arg1[%c0_87, %c6_88, %c0_89, %c0_90] : memref<4x9x36x128xf32, #tpu.memory_space<vmem>>, vector<4x1x36x128xf32>
    %98 = vector.shape_cast %97 : vector<4x1x36x128xf32> to vector<4x36x128xf32>
    %c6_91 = arith.constant 6 : index
    %c1_92 = arith.constant 1 : index
    %99 = memref.load %arg2[%c6_91, %c1_92] : memref<9x8xf32, #tpu.memory_space<smem>>
    %100 = vector.broadcast %99 : f32 to vector<4x36x128xf32>
    %101 = arith.mulf %98, %100 : vector<4x36x128xf32>
    %102 = arith.addf %96, %101 : vector<4x36x128xf32>
    %c0_93 = arith.constant 0 : index
    %c7_94 = arith.constant 7 : index
    %c0_95 = arith.constant 0 : index
    %c0_96 = arith.constant 0 : index
    %103 = vector.load %arg1[%c0_93, %c7_94, %c0_95, %c0_96] : memref<4x9x36x128xf32, #tpu.memory_space<vmem>>, vector<4x1x36x128xf32>
    %104 = vector.shape_cast %103 : vector<4x1x36x128xf32> to vector<4x36x128xf32>
    %c7_97 = arith.constant 7 : index
    %c1_98 = arith.constant 1 : index
    %105 = memref.load %arg2[%c7_97, %c1_98] : memref<9x8xf32, #tpu.memory_space<smem>>
    %106 = vector.broadcast %105 : f32 to vector<4x36x128xf32>
    %107 = arith.mulf %104, %106 : vector<4x36x128xf32>
    %108 = arith.addf %102, %107 : vector<4x36x128xf32>
    %c0_99 = arith.constant 0 : index
    %c8_100 = arith.constant 8 : index
    %c0_101 = arith.constant 0 : index
    %c0_102 = arith.constant 0 : index
    %109 = vector.load %arg1[%c0_99, %c8_100, %c0_101, %c0_102] : memref<4x9x36x128xf32, #tpu.memory_space<vmem>>, vector<4x1x36x128xf32>
    %110 = vector.shape_cast %109 : vector<4x1x36x128xf32> to vector<4x36x128xf32>
    %c8_103 = arith.constant 8 : index
    %c1_104 = arith.constant 1 : index
    %111 = memref.load %arg2[%c8_103, %c1_104] : memref<9x8xf32, #tpu.memory_space<smem>>
    %112 = vector.broadcast %111 : f32 to vector<4x36x128xf32>
    %113 = arith.mulf %110, %112 : vector<4x36x128xf32>
    %114 = arith.addf %108, %113 : vector<4x36x128xf32>
    %c1_105 = arith.constant 1 : index
    %115 = memref.load %arg3[%c1_105] : memref<8xf32, #tpu.memory_space<smem>>
    %116 = vector.broadcast %115 : f32 to vector<4x36x128xf32>
    %117 = arith.addf %114, %116 : vector<4x36x128xf32>
    %cst_106 = arith.constant 0.000000e+00 : f32
    %118 = vector.broadcast %cst_106 : f32 to vector<4x36x128xf32>
    %119 = arith.maximumf %117, %118 : vector<4x36x128xf32>
    %cst_107 = arith.constant dense<0xFF800000> : vector<36x128xf32>
    %120 = vector.multi_reduction <maximumf>, %119, %cst_107 [0] : vector<4x36x128xf32> to vector<36x128xf32>
    %c40 = arith.constant 40 : index
    %c0_108 = arith.constant 0 : index
    %121 = vector.load %arg7[%c40, %c0_108] : memref<320x128xf32, #tpu.memory_space<vmem>>, vector<36x128xf32>
    tpu.vector_store %arg7[%c40, %c0_108], %120 {strides = array<i32>} : memref<320x128xf32, #tpu.memory_space<vmem>>, vector<36x128xf32>,
    %c76 = arith.constant 76 : index
    %c0_109 = arith.constant 0 : index
    %122 = vector.load %arg7[%c76, %c0_109] : memref<320x128xf32, #tpu.memory_space<vmem>>, vector<4x128xf32>
    tpu.vector_store %arg7[%c76, %c0_109], %0 {strides = array<i32>} : memref<320x128xf32, #tpu.memory_space<vmem>>, vector<4x128xf32>,
    %c0_110 = arith.constant 0 : index
    %c0_111 = arith.constant 0 : index
    %c0_112 = arith.constant 0 : index
    %c0_113 = arith.constant 0 : index
    %123 = vector.load %arg1[%c0_110, %c0_111, %c0_112, %c0_113] : memref<4x9x36x128xf32, #tpu.memory_space<vmem>>, vector<4x1x36x128xf32>
    %124 = vector.shape_cast %123 : vector<4x1x36x128xf32> to vector<4x36x128xf32>
    %c0_114 = arith.constant 0 : index
    %c2_115 = arith.constant 2 : index
    %125 = memref.load %arg2[%c0_114, %c2_115] : memref<9x8xf32, #tpu.memory_space<smem>>
    %126 = vector.broadcast %125 : f32 to vector<4x36x128xf32>
    %127 = arith.mulf %124, %126 : vector<4x36x128xf32>
    %c0_116 = arith.constant 0 : index
    %c1_117 = arith.constant 1 : index
    %c0_118 = arith.constant 0 : index
    %c0_119 = arith.constant 0 : index
    %128 = vector.load %arg1[%c0_116, %c1_117, %c0_118, %c0_119] : memref<4x9x36x128xf32, #tpu.memory_space<vmem>>, vector<4x1x36x128xf32>
    %129 = vector.shape_cast %128 : vector<4x1x36x128xf32> to vector<4x36x128xf32>
    %c1_120 = arith.constant 1 : index
    %c2_121 = arith.constant 2 : index
    %130 = memref.load %arg2[%c1_120, %c2_121] : memref<9x8xf32, #tpu.memory_space<smem>>
    %131 = vector.broadcast %130 : f32 to vector<4x36x128xf32>
    %132 = arith.mulf %129, %131 : vector<4x36x128xf32>
    %133 = arith.addf %127, %132 : vector<4x36x128xf32>
    %c0_122 = arith.constant 0 : index
    %c2_123 = arith.constant 2 : index
    %c0_124 = arith.constant 0 : index
    %c0_125 = arith.constant 0 : index
    %134 = vector.load %arg1[%c0_122, %c2_123, %c0_124, %c0_125] : memref<4x9x36x128xf32, #tpu.memory_space<vmem>>, vector<4x1x36x128xf32>
    %135 = vector.shape_cast %134 : vector<4x1x36x128xf32> to vector<4x36x128xf32>
    %c2_126 = arith.constant 2 : index
    %c2_127 = arith.constant 2 : index
    %136 = memref.load %arg2[%c2_126, %c2_127] : memref<9x8xf32, #tpu.memory_space<smem>>
    %137 = vector.broadcast %136 : f32 to vector<4x36x128xf32>
    %138 = arith.mulf %135, %137 : vector<4x36x128xf32>
    %139 = arith.addf %133, %138 : vector<4x36x128xf32>
    %c0_128 = arith.constant 0 : index
    %c3_129 = arith.constant 3 : index
    %c0_130 = arith.constant 0 : index
    %c0_131 = arith.constant 0 : index
    %140 = vector.load %arg1[%c0_128, %c3_129, %c0_130, %c0_131] : memref<4x9x36x128xf32, #tpu.memory_space<vmem>>, vector<4x1x36x128xf32>
    %141 = vector.shape_cast %140 : vector<4x1x36x128xf32> to vector<4x36x128xf32>
    %c3_132 = arith.constant 3 : index
    %c2_133 = arith.constant 2 : index
    %142 = memref.load %arg2[%c3_132, %c2_133] : memref<9x8xf32, #tpu.memory_space<smem>>
    %143 = vector.broadcast %142 : f32 to vector<4x36x128xf32>
    %144 = arith.mulf %141, %143 : vector<4x36x128xf32>
    %145 = arith.addf %139, %144 : vector<4x36x128xf32>
    %c0_134 = arith.constant 0 : index
    %c4_135 = arith.constant 4 : index
    %c0_136 = arith.constant 0 : index
    %c0_137 = arith.constant 0 : index
    %146 = vector.load %arg1[%c0_134, %c4_135, %c0_136, %c0_137] : memref<4x9x36x128xf32, #tpu.memory_space<vmem>>, vector<4x1x36x128xf32>
    %147 = vector.shape_cast %146 : vector<4x1x36x128xf32> to vector<4x36x128xf32>
    %c4_138 = arith.constant 4 : index
    %c2_139 = arith.constant 2 : index
    %148 = memref.load %arg2[%c4_138, %c2_139] : memref<9x8xf32, #tpu.memory_space<smem>>
    %149 = vector.broadcast %148 : f32 to vector<4x36x128xf32>
    %150 = arith.mulf %147, %149 : vector<4x36x128xf32>
    %151 = arith.addf %145, %150 : vector<4x36x128xf32>
    %c0_140 = arith.constant 0 : index
    %c5_141 = arith.constant 5 : index
    %c0_142 = arith.constant 0 : index
    %c0_143 = arith.constant 0 : index
    %152 = vector.load %arg1[%c0_140, %c5_141, %c0_142, %c0_143] : memref<4x9x36x128xf32, #tpu.memory_space<vmem>>, vector<4x1x36x128xf32>
    %153 = vector.shape_cast %152 : vector<4x1x36x128xf32> to vector<4x36x128xf32>
    %c5_144 = arith.constant 5 : index
    %c2_145 = arith.constant 2 : index
    %154 = memref.load %arg2[%c5_144, %c2_145] : memref<9x8xf32, #tpu.memory_space<smem>>
    %155 = vector.broadcast %154 : f32 to vector<4x36x128xf32>
    %156 = arith.mulf %153, %155 : vector<4x36x128xf32>
    %157 = arith.addf %151, %156 : vector<4x36x128xf32>
    %c0_146 = arith.constant 0 : index
    %c6_147 = arith.constant 6 : index
    %c0_148 = arith.constant 0 : index
    %c0_149 = arith.constant 0 : index
    %158 = vector.load %arg1[%c0_146, %c6_147, %c0_148, %c0_149] : memref<4x9x36x128xf32, #tpu.memory_space<vmem>>, vector<4x1x36x128xf32>
    %159 = vector.shape_cast %158 : vector<4x1x36x128xf32> to vector<4x36x128xf32>
    %c6_150 = arith.constant 6 : index
    %c2_151 = arith.constant 2 : index
    %160 = memref.load %arg2[%c6_150, %c2_151] : memref<9x8xf32, #tpu.memory_space<smem>>
    %161 = vector.broadcast %160 : f32 to vector<4x36x128xf32>
    %162 = arith.mulf %159, %161 : vector<4x36x128xf32>
    %163 = arith.addf %157, %162 : vector<4x36x128xf32>
    %c0_152 = arith.constant 0 : index
    %c7_153 = arith.constant 7 : index
    %c0_154 = arith.constant 0 : index
    %c0_155 = arith.constant 0 : index
    %164 = vector.load %arg1[%c0_152, %c7_153, %c0_154, %c0_155] : memref<4x9x36x128xf32, #tpu.memory_space<vmem>>, vector<4x1x36x128xf32>
    %165 = vector.shape_cast %164 : vector<4x1x36x128xf32> to vector<4x36x128xf32>
    %c7_156 = arith.constant 7 : index
    %c2_157 = arith.constant 2 : index
    %166 = memref.load %arg2[%c7_156, %c2_157] : memref<9x8xf32, #tpu.memory_space<smem>>
    %167 = vector.broadcast %166 : f32 to vector<4x36x128xf32>
    %168 = arith.mulf %165, %167 : vector<4x36x128xf32>
    %169 = arith.addf %163, %168 : vector<4x36x128xf32>
    %c0_158 = arith.constant 0 : index
    %c8_159 = arith.constant 8 : index
    %c0_160 = arith.constant 0 : index
    %c0_161 = arith.constant 0 : index
    %170 = vector.load %arg1[%c0_158, %c8_159, %c0_160, %c0_161] : memref<4x9x36x128xf32, #tpu.memory_space<vmem>>, vector<4x1x36x128xf32>
    %171 = vector.shape_cast %170 : vector<4x1x36x128xf32> to vector<4x36x128xf32>
    %c8_162 = arith.constant 8 : index
    %c2_163 = arith.constant 2 : index
    %172 = memref.load %arg2[%c8_162, %c2_163] : memref<9x8xf32, #tpu.memory_space<smem>>
    %173 = vector.broadcast %172 : f32 to vector<4x36x128xf32>
    %174 = arith.mulf %171, %173 : vector<4x36x128xf32>
    %175 = arith.addf %169, %174 : vector<4x36x128xf32>
    %c2_164 = arith.constant 2 : index
    %176 = memref.load %arg3[%c2_164] : memref<8xf32, #tpu.memory_space<smem>>
    %177 = vector.broadcast %176 : f32 to vector<4x36x128xf32>
    %178 = arith.addf %175, %177 : vector<4x36x128xf32>
    %cst_165 = arith.constant 0.000000e+00 : f32
    %179 = vector.broadcast %cst_165 : f32 to vector<4x36x128xf32>
    %180 = arith.maximumf %178, %179 : vector<4x36x128xf32>
    %cst_166 = arith.constant dense<0xFF800000> : vector<36x128xf32>
    %181 = vector.multi_reduction <maximumf>, %180, %cst_166 [0] : vector<4x36x128xf32> to vector<36x128xf32>
    %c80 = arith.constant 80 : index
    %c0_167 = arith.constant 0 : index
    %182 = vector.load %arg7[%c80, %c0_167] : memref<320x128xf32, #tpu.memory_space<vmem>>, vector<36x128xf32>
    tpu.vector_store %arg7[%c80, %c0_167], %181 {strides = array<i32>} : memref<320x128xf32, #tpu.memory_space<vmem>>, vector<36x128xf32>,
    %c116 = arith.constant 116 : index
    %c0_168 = arith.constant 0 : index
    %183 = vector.load %arg7[%c116, %c0_168] : memref<320x128xf32, #tpu.memory_space<vmem>>, vector<4x128xf32>
    tpu.vector_store %arg7[%c116, %c0_168], %0 {strides = array<i32>} : memref<320x128xf32, #tpu.memory_space<vmem>>, vector<4x128xf32>,
    %c0_169 = arith.constant 0 : index
    %c0_170 = arith.constant 0 : index
    %c0_171 = arith.constant 0 : index
    %c0_172 = arith.constant 0 : index
    %184 = vector.load %arg1[%c0_169, %c0_170, %c0_171, %c0_172] : memref<4x9x36x128xf32, #tpu.memory_space<vmem>>, vector<4x1x36x128xf32>
    %185 = vector.shape_cast %184 : vector<4x1x36x128xf32> to vector<4x36x128xf32>
    %c0_173 = arith.constant 0 : index
    %c3_174 = arith.constant 3 : index
    %186 = memref.load %arg2[%c0_173, %c3_174] : memref<9x8xf32, #tpu.memory_space<smem>>
    %187 = vector.broadcast %186 : f32 to vector<4x36x128xf32>
    %188 = arith.mulf %185, %187 : vector<4x36x128xf32>
    %c0_175 = arith.constant 0 : index
    %c1_176 = arith.constant 1 : index
    %c0_177 = arith.constant 0 : index
    %c0_178 = arith.constant 0 : index
    %189 = vector.load %arg1[%c0_175, %c1_176, %c0_177, %c0_178] : memref<4x9x36x128xf32, #tpu.memory_space<vmem>>, vector<4x1x36x128xf32>
    %190 = vector.shape_cast %189 : vector<4x1x36x128xf32> to vector<4x36x128xf32>
    %c1_179 = arith.constant 1 : index
    %c3_180 = arith.constant 3 : index
    %191 = memref.load %arg2[%c1_179, %c3_180] : memref<9x8xf32, #tpu.memory_space<smem>>
    %192 = vector.broadcast %191 : f32 to vector<4x36x128xf32>
    %193 = arith.mulf %190, %192 : vector<4x36x128xf32>
    %194 = arith.addf %188, %193 : vector<4x36x128xf32>
    %c0_181 = arith.constant 0 : index
    %c2_182 = arith.constant 2 : index
    %c0_183 = arith.constant 0 : index
    %c0_184 = arith.constant 0 : index
    %195 = vector.load %arg1[%c0_181, %c2_182, %c0_183, %c0_184] : memref<4x9x36x128xf32, #tpu.memory_space<vmem>>, vector<4x1x36x128xf32>
    %196 = vector.shape_cast %195 : vector<4x1x36x128xf32> to vector<4x36x128xf32>
    %c2_185 = arith.constant 2 : index
    %c3_186 = arith.constant 3 : index
    %197 = memref.load %arg2[%c2_185, %c3_186] : memref<9x8xf32, #tpu.memory_space<smem>>
    %198 = vector.broadcast %197 : f32 to vector<4x36x128xf32>
    %199 = arith.mulf %196, %198 : vector<4x36x128xf32>
    %200 = arith.addf %194, %199 : vector<4x36x128xf32>
    %c0_187 = arith.constant 0 : index
    %c3_188 = arith.constant 3 : index
    %c0_189 = arith.constant 0 : index
    %c0_190 = arith.constant 0 : index
    %201 = vector.load %arg1[%c0_187, %c3_188, %c0_189, %c0_190] : memref<4x9x36x128xf32, #tpu.memory_space<vmem>>, vector<4x1x36x128xf32>
    %202 = vector.shape_cast %201 : vector<4x1x36x128xf32> to vector<4x36x128xf32>
    %c3_191 = arith.constant 3 : index
    %c3_192 = arith.constant 3 : index
    %203 = memref.load %arg2[%c3_191, %c3_192] : memref<9x8xf32, #tpu.memory_space<smem>>
    %204 = vector.broadcast %203 : f32 to vector<4x36x128xf32>
    %205 = arith.mulf %202, %204 : vector<4x36x128xf32>
    %206 = arith.addf %200, %205 : vector<4x36x128xf32>
    %c0_193 = arith.constant 0 : index
    %c4_194 = arith.constant 4 : index
    %c0_195 = arith.constant 0 : index
    %c0_196 = arith.constant 0 : index
    %207 = vector.load %arg1[%c0_193, %c4_194, %c0_195, %c0_196] : memref<4x9x36x128xf32, #tpu.memory_space<vmem>>, vector<4x1x36x128xf32>
    %208 = vector.shape_cast %207 : vector<4x1x36x128xf32> to vector<4x36x128xf32>
    %c4_197 = arith.constant 4 : index
    %c3_198 = arith.constant 3 : index
    %209 = memref.load %arg2[%c4_197, %c3_198] : memref<9x8xf32, #tpu.memory_space<smem>>
    %210 = vector.broadcast %209 : f32 to vector<4x36x128xf32>
    %211 = arith.mulf %208, %210 : vector<4x36x128xf32>
    %212 = arith.addf %206, %211 : vector<4x36x128xf32>
    %c0_199 = arith.constant 0 : index
    %c5_200 = arith.constant 5 : index
    %c0_201 = arith.constant 0 : index
    %c0_202 = arith.constant 0 : index
    %213 = vector.load %arg1[%c0_199, %c5_200, %c0_201, %c0_202] : memref<4x9x36x128xf32, #tpu.memory_space<vmem>>, vector<4x1x36x128xf32>
    %214 = vector.shape_cast %213 : vector<4x1x36x128xf32> to vector<4x36x128xf32>
    %c5_203 = arith.constant 5 : index
    %c3_204 = arith.constant 3 : index
    %215 = memref.load %arg2[%c5_203, %c3_204] : memref<9x8xf32, #tpu.memory_space<smem>>
    %216 = vector.broadcast %215 : f32 to vector<4x36x128xf32>
    %217 = arith.mulf %214, %216 : vector<4x36x128xf32>
    %218 = arith.addf %212, %217 : vector<4x36x128xf32>
    %c0_205 = arith.constant 0 : index
    %c6_206 = arith.constant 6 : index
    %c0_207 = arith.constant 0 : index
    %c0_208 = arith.constant 0 : index
    %219 = vector.load %arg1[%c0_205, %c6_206, %c0_207, %c0_208] : memref<4x9x36x128xf32, #tpu.memory_space<vmem>>, vector<4x1x36x128xf32>
    %220 = vector.shape_cast %219 : vector<4x1x36x128xf32> to vector<4x36x128xf32>
    %c6_209 = arith.constant 6 : index
    %c3_210 = arith.constant 3 : index
    %221 = memref.load %arg2[%c6_209, %c3_210] : memref<9x8xf32, #tpu.memory_space<smem>>
    %222 = vector.broadcast %221 : f32 to vector<4x36x128xf32>
    %223 = arith.mulf %220, %222 : vector<4x36x128xf32>
    %224 = arith.addf %218, %223 : vector<4x36x128xf32>
    %c0_211 = arith.constant 0 : index
    %c7_212 = arith.constant 7 : index
    %c0_213 = arith.constant 0 : index
    %c0_214 = arith.constant 0 : index
    %225 = vector.load %arg1[%c0_211, %c7_212, %c0_213, %c0_214] : memref<4x9x36x128xf32, #tpu.memory_space<vmem>>, vector<4x1x36x128xf32>
    %226 = vector.shape_cast %225 : vector<4x1x36x128xf32> to vector<4x36x128xf32>
    %c7_215 = arith.constant 7 : index
    %c3_216 = arith.constant 3 : index
    %227 = memref.load %arg2[%c7_215, %c3_216] : memref<9x8xf32, #tpu.memory_space<smem>>
    %228 = vector.broadcast %227 : f32 to vector<4x36x128xf32>
    %229 = arith.mulf %226, %228 : vector<4x36x128xf32>
    %230 = arith.addf %224, %229 : vector<4x36x128xf32>
    %c0_217 = arith.constant 0 : index
    %c8_218 = arith.constant 8 : index
    %c0_219 = arith.constant 0 : index
    %c0_220 = arith.constant 0 : index
    %231 = vector.load %arg1[%c0_217, %c8_218, %c0_219, %c0_220] : memref<4x9x36x128xf32, #tpu.memory_space<vmem>>, vector<4x1x36x128xf32>
    %232 = vector.shape_cast %231 : vector<4x1x36x128xf32> to vector<4x36x128xf32>
    %c8_221 = arith.constant 8 : index
    %c3_222 = arith.constant 3 : index
    %233 = memref.load %arg2[%c8_221, %c3_222] : memref<9x8xf32, #tpu.memory_space<smem>>
    %234 = vector.broadcast %233 : f32 to vector<4x36x128xf32>
    %235 = arith.mulf %232, %234 : vector<4x36x128xf32>
    %236 = arith.addf %230, %235 : vector<4x36x128xf32>
    %c3_223 = arith.constant 3 : index
    %237 = memref.load %arg3[%c3_223] : memref<8xf32, #tpu.memory_space<smem>>
    %238 = vector.broadcast %237 : f32 to vector<4x36x128xf32>
    %239 = arith.addf %236, %238 : vector<4x36x128xf32>
    %cst_224 = arith.constant 0.000000e+00 : f32
    %240 = vector.broadcast %cst_224 : f32 to vector<4x36x128xf32>
    %241 = arith.maximumf %239, %240 : vector<4x36x128xf32>
    %cst_225 = arith.constant dense<0xFF800000> : vector<36x128xf32>
    %242 = vector.multi_reduction <maximumf>, %241, %cst_225 [0] : vector<4x36x128xf32> to vector<36x128xf32>
    %c120 = arith.constant 120 : index
    %c0_226 = arith.constant 0 : index
    %243 = vector.load %arg7[%c120, %c0_226] : memref<320x128xf32, #tpu.memory_space<vmem>>, vector<36x128xf32>
    tpu.vector_store %arg7[%c120, %c0_226], %242 {strides = array<i32>} : memref<320x128xf32, #tpu.memory_space<vmem>>, vector<36x128xf32>,
    %c156 = arith.constant 156 : index
    %c0_227 = arith.constant 0 : index
    %244 = vector.load %arg7[%c156, %c0_227] : memref<320x128xf32, #tpu.memory_space<vmem>>, vector<4x128xf32>
    tpu.vector_store %arg7[%c156, %c0_227], %0 {strides = array<i32>} : memref<320x128xf32, #tpu.memory_space<vmem>>, vector<4x128xf32>,
    %c0_228 = arith.constant 0 : index
    %c0_229 = arith.constant 0 : index
    %c0_230 = arith.constant 0 : index
    %c0_231 = arith.constant 0 : index
    %245 = vector.load %arg1[%c0_228, %c0_229, %c0_230, %c0_231] : memref<4x9x36x128xf32, #tpu.memory_space<vmem>>, vector<4x1x36x128xf32>
    %246 = vector.shape_cast %245 : vector<4x1x36x128xf32> to vector<4x36x128xf32>
    %c0_232 = arith.constant 0 : index
    %c4_233 = arith.constant 4 : index
    %247 = memref.load %arg2[%c0_232, %c4_233] : memref<9x8xf32, #tpu.memory_space<smem>>
    %248 = vector.broadcast %247 : f32 to vector<4x36x128xf32>
    %249 = arith.mulf %246, %248 : vector<4x36x128xf32>
    %c0_234 = arith.constant 0 : index
    %c1_235 = arith.constant 1 : index
    %c0_236 = arith.constant 0 : index
    %c0_237 = arith.constant 0 : index
    %250 = vector.load %arg1[%c0_234, %c1_235, %c0_236, %c0_237] : memref<4x9x36x128xf32, #tpu.memory_space<vmem>>, vector<4x1x36x128xf32>
    %251 = vector.shape_cast %250 : vector<4x1x36x128xf32> to vector<4x36x128xf32>
    %c1_238 = arith.constant 1 : index
    %c4_239 = arith.constant 4 : index
    %252 = memref.load %arg2[%c1_238, %c4_239] : memref<9x8xf32, #tpu.memory_space<smem>>
    %253 = vector.broadcast %252 : f32 to vector<4x36x128xf32>
    %254 = arith.mulf %251, %253 : vector<4x36x128xf32>
    %255 = arith.addf %249, %254 : vector<4x36x128xf32>
    %c0_240 = arith.constant 0 : index
    %c2_241 = arith.constant 2 : index
    %c0_242 = arith.constant 0 : index
    %c0_243 = arith.constant 0 : index
    %256 = vector.load %arg1[%c0_240, %c2_241, %c0_242, %c0_243] : memref<4x9x36x128xf32, #tpu.memory_space<vmem>>, vector<4x1x36x128xf32>
    %257 = vector.shape_cast %256 : vector<4x1x36x128xf32> to vector<4x36x128xf32>
    %c2_244 = arith.constant 2 : index
    %c4_245 = arith.constant 4 : index
    %258 = memref.load %arg2[%c2_244, %c4_245] : memref<9x8xf32, #tpu.memory_space<smem>>
    %259 = vector.broadcast %258 : f32 to vector<4x36x128xf32>
    %260 = arith.mulf %257, %259 : vector<4x36x128xf32>
    %261 = arith.addf %255, %260 : vector<4x36x128xf32>
    %c0_246 = arith.constant 0 : index
    %c3_247 = arith.constant 3 : index
    %c0_248 = arith.constant 0 : index
    %c0_249 = arith.constant 0 : index
    %262 = vector.load %arg1[%c0_246, %c3_247, %c0_248, %c0_249] : memref<4x9x36x128xf32, #tpu.memory_space<vmem>>, vector<4x1x36x128xf32>
    %263 = vector.shape_cast %262 : vector<4x1x36x128xf32> to vector<4x36x128xf32>
    %c3_250 = arith.constant 3 : index
    %c4_251 = arith.constant 4 : index
    %264 = memref.load %arg2[%c3_250, %c4_251] : memref<9x8xf32, #tpu.memory_space<smem>>
    %265 = vector.broadcast %264 : f32 to vector<4x36x128xf32>
    %266 = arith.mulf %263, %265 : vector<4x36x128xf32>
    %267 = arith.addf %261, %266 : vector<4x36x128xf32>
    %c0_252 = arith.constant 0 : index
    %c4_253 = arith.constant 4 : index
    %c0_254 = arith.constant 0 : index
    %c0_255 = arith.constant 0 : index
    %268 = vector.load %arg1[%c0_252, %c4_253, %c0_254, %c0_255] : memref<4x9x36x128xf32, #tpu.memory_space<vmem>>, vector<4x1x36x128xf32>
    %269 = vector.shape_cast %268 : vector<4x1x36x128xf32> to vector<4x36x128xf32>
    %c4_256 = arith.constant 4 : index
    %c4_257 = arith.constant 4 : index
    %270 = memref.load %arg2[%c4_256, %c4_257] : memref<9x8xf32, #tpu.memory_space<smem>>
    %271 = vector.broadcast %270 : f32 to vector<4x36x128xf32>
    %272 = arith.mulf %269, %271 : vector<4x36x128xf32>
    %273 = arith.addf %267, %272 : vector<4x36x128xf32>
    %c0_258 = arith.constant 0 : index
    %c5_259 = arith.constant 5 : index
    %c0_260 = arith.constant 0 : index
    %c0_261 = arith.constant 0 : index
    %274 = vector.load %arg1[%c0_258, %c5_259, %c0_260, %c0_261] : memref<4x9x36x128xf32, #tpu.memory_space<vmem>>, vector<4x1x36x128xf32>
    %275 = vector.shape_cast %274 : vector<4x1x36x128xf32> to vector<4x36x128xf32>
    %c5_262 = arith.constant 5 : index
    %c4_263 = arith.constant 4 : index
    %276 = memref.load %arg2[%c5_262, %c4_263] : memref<9x8xf32, #tpu.memory_space<smem>>
    %277 = vector.broadcast %276 : f32 to vector<4x36x128xf32>
    %278 = arith.mulf %275, %277 : vector<4x36x128xf32>
    %279 = arith.addf %273, %278 : vector<4x36x128xf32>
    %c0_264 = arith.constant 0 : index
    %c6_265 = arith.constant 6 : index
    %c0_266 = arith.constant 0 : index
    %c0_267 = arith.constant 0 : index
    %280 = vector.load %arg1[%c0_264, %c6_265, %c0_266, %c0_267] : memref<4x9x36x128xf32, #tpu.memory_space<vmem>>, vector<4x1x36x128xf32>
    %281 = vector.shape_cast %280 : vector<4x1x36x128xf32> to vector<4x36x128xf32>
    %c6_268 = arith.constant 6 : index
    %c4_269 = arith.constant 4 : index
    %282 = memref.load %arg2[%c6_268, %c4_269] : memref<9x8xf32, #tpu.memory_space<smem>>
    %283 = vector.broadcast %282 : f32 to vector<4x36x128xf32>
    %284 = arith.mulf %281, %283 : vector<4x36x128xf32>
    %285 = arith.addf %279, %284 : vector<4x36x128xf32>
    %c0_270 = arith.constant 0 : index
    %c7_271 = arith.constant 7 : index
    %c0_272 = arith.constant 0 : index
    %c0_273 = arith.constant 0 : index
    %286 = vector.load %arg1[%c0_270, %c7_271, %c0_272, %c0_273] : memref<4x9x36x128xf32, #tpu.memory_space<vmem>>, vector<4x1x36x128xf32>
    %287 = vector.shape_cast %286 : vector<4x1x36x128xf32> to vector<4x36x128xf32>
    %c7_274 = arith.constant 7 : index
    %c4_275 = arith.constant 4 : index
    %288 = memref.load %arg2[%c7_274, %c4_275] : memref<9x8xf32, #tpu.memory_space<smem>>
    %289 = vector.broadcast %288 : f32 to vector<4x36x128xf32>
    %290 = arith.mulf %287, %289 : vector<4x36x128xf32>
    %291 = arith.addf %285, %290 : vector<4x36x128xf32>
    %c0_276 = arith.constant 0 : index
    %c8_277 = arith.constant 8 : index
    %c0_278 = arith.constant 0 : index
    %c0_279 = arith.constant 0 : index
    %292 = vector.load %arg1[%c0_276, %c8_277, %c0_278, %c0_279] : memref<4x9x36x128xf32, #tpu.memory_space<vmem>>, vector<4x1x36x128xf32>
    %293 = vector.shape_cast %292 : vector<4x1x36x128xf32> to vector<4x36x128xf32>
    %c8_280 = arith.constant 8 : index
    %c4_281 = arith.constant 4 : index
    %294 = memref.load %arg2[%c8_280, %c4_281] : memref<9x8xf32, #tpu.memory_space<smem>>
    %295 = vector.broadcast %294 : f32 to vector<4x36x128xf32>
    %296 = arith.mulf %293, %295 : vector<4x36x128xf32>
    %297 = arith.addf %291, %296 : vector<4x36x128xf32>
    %c4_282 = arith.constant 4 : index
    %298 = memref.load %arg3[%c4_282] : memref<8xf32, #tpu.memory_space<smem>>
    %299 = vector.broadcast %298 : f32 to vector<4x36x128xf32>
    %300 = arith.addf %297, %299 : vector<4x36x128xf32>
    %cst_283 = arith.constant 0.000000e+00 : f32
    %301 = vector.broadcast %cst_283 : f32 to vector<4x36x128xf32>
    %302 = arith.maximumf %300, %301 : vector<4x36x128xf32>
    %cst_284 = arith.constant dense<0xFF800000> : vector<36x128xf32>
    %303 = vector.multi_reduction <maximumf>, %302, %cst_284 [0] : vector<4x36x128xf32> to vector<36x128xf32>
    %c160 = arith.constant 160 : index
    %c0_285 = arith.constant 0 : index
    %304 = vector.load %arg7[%c160, %c0_285] : memref<320x128xf32, #tpu.memory_space<vmem>>, vector<36x128xf32>
    tpu.vector_store %arg7[%c160, %c0_285], %303 {strides = array<i32>} : memref<320x128xf32, #tpu.memory_space<vmem>>, vector<36x128xf32>,
    %c196 = arith.constant 196 : index
    %c0_286 = arith.constant 0 : index
    %305 = vector.load %arg7[%c196, %c0_286] : memref<320x128xf32, #tpu.memory_space<vmem>>, vector<4x128xf32>
    tpu.vector_store %arg7[%c196, %c0_286], %0 {strides = array<i32>} : memref<320x128xf32, #tpu.memory_space<vmem>>, vector<4x128xf32>,
    %c0_287 = arith.constant 0 : index
    %c0_288 = arith.constant 0 : index
    %c0_289 = arith.constant 0 : index
    %c0_290 = arith.constant 0 : index
    %306 = vector.load %arg1[%c0_287, %c0_288, %c0_289, %c0_290] : memref<4x9x36x128xf32, #tpu.memory_space<vmem>>, vector<4x1x36x128xf32>
    %307 = vector.shape_cast %306 : vector<4x1x36x128xf32> to vector<4x36x128xf32>
    %c0_291 = arith.constant 0 : index
    %c5_292 = arith.constant 5 : index
    %308 = memref.load %arg2[%c0_291, %c5_292] : memref<9x8xf32, #tpu.memory_space<smem>>
    %309 = vector.broadcast %308 : f32 to vector<4x36x128xf32>
    %310 = arith.mulf %307, %309 : vector<4x36x128xf32>
    %c0_293 = arith.constant 0 : index
    %c1_294 = arith.constant 1 : index
    %c0_295 = arith.constant 0 : index
    %c0_296 = arith.constant 0 : index
    %311 = vector.load %arg1[%c0_293, %c1_294, %c0_295, %c0_296] : memref<4x9x36x128xf32, #tpu.memory_space<vmem>>, vector<4x1x36x128xf32>
    %312 = vector.shape_cast %311 : vector<4x1x36x128xf32> to vector<4x36x128xf32>
    %c1_297 = arith.constant 1 : index
    %c5_298 = arith.constant 5 : index
    %313 = memref.load %arg2[%c1_297, %c5_298] : memref<9x8xf32, #tpu.memory_space<smem>>
    %314 = vector.broadcast %313 : f32 to vector<4x36x128xf32>
    %315 = arith.mulf %312, %314 : vector<4x36x128xf32>
    %316 = arith.addf %310, %315 : vector<4x36x128xf32>
    %c0_299 = arith.constant 0 : index
    %c2_300 = arith.constant 2 : index
    %c0_301 = arith.constant 0 : index
    %c0_302 = arith.constant 0 : index
    %317 = vector.load %arg1[%c0_299, %c2_300, %c0_301, %c0_302] : memref<4x9x36x128xf32, #tpu.memory_space<vmem>>, vector<4x1x36x128xf32>
    %318 = vector.shape_cast %317 : vector<4x1x36x128xf32> to vector<4x36x128xf32>
    %c2_303 = arith.constant 2 : index
    %c5_304 = arith.constant 5 : index
    %319 = memref.load %arg2[%c2_303, %c5_304] : memref<9x8xf32, #tpu.memory_space<smem>>
    %320 = vector.broadcast %319 : f32 to vector<4x36x128xf32>
    %321 = arith.mulf %318, %320 : vector<4x36x128xf32>
    %322 = arith.addf %316, %321 : vector<4x36x128xf32>
    %c0_305 = arith.constant 0 : index
    %c3_306 = arith.constant 3 : index
    %c0_307 = arith.constant 0 : index
    %c0_308 = arith.constant 0 : index
    %323 = vector.load %arg1[%c0_305, %c3_306, %c0_307, %c0_308] : memref<4x9x36x128xf32, #tpu.memory_space<vmem>>, vector<4x1x36x128xf32>
    %324 = vector.shape_cast %323 : vector<4x1x36x128xf32> to vector<4x36x128xf32>
    %c3_309 = arith.constant 3 : index
    %c5_310 = arith.constant 5 : index
    %325 = memref.load %arg2[%c3_309, %c5_310] : memref<9x8xf32, #tpu.memory_space<smem>>
    %326 = vector.broadcast %325 : f32 to vector<4x36x128xf32>
    %327 = arith.mulf %324, %326 : vector<4x36x128xf32>
    %328 = arith.addf %322, %327 : vector<4x36x128xf32>
    %c0_311 = arith.constant 0 : index
    %c4_312 = arith.constant 4 : index
    %c0_313 = arith.constant 0 : index
    %c0_314 = arith.constant 0 : index
    %329 = vector.load %arg1[%c0_311, %c4_312, %c0_313, %c0_314] : memref<4x9x36x128xf32, #tpu.memory_space<vmem>>, vector<4x1x36x128xf32>
    %330 = vector.shape_cast %329 : vector<4x1x36x128xf32> to vector<4x36x128xf32>
    %c4_315 = arith.constant 4 : index
    %c5_316 = arith.constant 5 : index
    %331 = memref.load %arg2[%c4_315, %c5_316] : memref<9x8xf32, #tpu.memory_space<smem>>
    %332 = vector.broadcast %331 : f32 to vector<4x36x128xf32>
    %333 = arith.mulf %330, %332 : vector<4x36x128xf32>
    %334 = arith.addf %328, %333 : vector<4x36x128xf32>
    %c0_317 = arith.constant 0 : index
    %c5_318 = arith.constant 5 : index
    %c0_319 = arith.constant 0 : index
    %c0_320 = arith.constant 0 : index
    %335 = vector.load %arg1[%c0_317, %c5_318, %c0_319, %c0_320] : memref<4x9x36x128xf32, #tpu.memory_space<vmem>>, vector<4x1x36x128xf32>
    %336 = vector.shape_cast %335 : vector<4x1x36x128xf32> to vector<4x36x128xf32>
    %c5_321 = arith.constant 5 : index
    %c5_322 = arith.constant 5 : index
    %337 = memref.load %arg2[%c5_321, %c5_322] : memref<9x8xf32, #tpu.memory_space<smem>>
    %338 = vector.broadcast %337 : f32 to vector<4x36x128xf32>
    %339 = arith.mulf %336, %338 : vector<4x36x128xf32>
    %340 = arith.addf %334, %339 : vector<4x36x128xf32>
    %c0_323 = arith.constant 0 : index
    %c6_324 = arith.constant 6 : index
    %c0_325 = arith.constant 0 : index
    %c0_326 = arith.constant 0 : index
    %341 = vector.load %arg1[%c0_323, %c6_324, %c0_325, %c0_326] : memref<4x9x36x128xf32, #tpu.memory_space<vmem>>, vector<4x1x36x128xf32>
    %342 = vector.shape_cast %341 : vector<4x1x36x128xf32> to vector<4x36x128xf32>
    %c6_327 = arith.constant 6 : index
    %c5_328 = arith.constant 5 : index
    %343 = memref.load %arg2[%c6_327, %c5_328] : memref<9x8xf32, #tpu.memory_space<smem>>
    %344 = vector.broadcast %343 : f32 to vector<4x36x128xf32>
    %345 = arith.mulf %342, %344 : vector<4x36x128xf32>
    %346 = arith.addf %340, %345 : vector<4x36x128xf32>
    %c0_329 = arith.constant 0 : index
    %c7_330 = arith.constant 7 : index
    %c0_331 = arith.constant 0 : index
    %c0_332 = arith.constant 0 : index
    %347 = vector.load %arg1[%c0_329, %c7_330, %c0_331, %c0_332] : memref<4x9x36x128xf32, #tpu.memory_space<vmem>>, vector<4x1x36x128xf32>
    %348 = vector.shape_cast %347 : vector<4x1x36x128xf32> to vector<4x36x128xf32>
    %c7_333 = arith.constant 7 : index
    %c5_334 = arith.constant 5 : index
    %349 = memref.load %arg2[%c7_333, %c5_334] : memref<9x8xf32, #tpu.memory_space<smem>>
    %350 = vector.broadcast %349 : f32 to vector<4x36x128xf32>
    %351 = arith.mulf %348, %350 : vector<4x36x128xf32>
    %352 = arith.addf %346, %351 : vector<4x36x128xf32>
    %c0_335 = arith.constant 0 : index
    %c8_336 = arith.constant 8 : index
    %c0_337 = arith.constant 0 : index
    %c0_338 = arith.constant 0 : index
    %353 = vector.load %arg1[%c0_335, %c8_336, %c0_337, %c0_338] : memref<4x9x36x128xf32, #tpu.memory_space<vmem>>, vector<4x1x36x128xf32>
    %354 = vector.shape_cast %353 : vector<4x1x36x128xf32> to vector<4x36x128xf32>
    %c8_339 = arith.constant 8 : index
    %c5_340 = arith.constant 5 : index
    %355 = memref.load %arg2[%c8_339, %c5_340] : memref<9x8xf32, #tpu.memory_space<smem>>
    %356 = vector.broadcast %355 : f32 to vector<4x36x128xf32>
    %357 = arith.mulf %354, %356 : vector<4x36x128xf32>
    %358 = arith.addf %352, %357 : vector<4x36x128xf32>
    %c5_341 = arith.constant 5 : index
    %359 = memref.load %arg3[%c5_341] : memref<8xf32, #tpu.memory_space<smem>>
    %360 = vector.broadcast %359 : f32 to vector<4x36x128xf32>
    %361 = arith.addf %358, %360 : vector<4x36x128xf32>
    %cst_342 = arith.constant 0.000000e+00 : f32
    %362 = vector.broadcast %cst_342 : f32 to vector<4x36x128xf32>
    %363 = arith.maximumf %361, %362 : vector<4x36x128xf32>
    %cst_343 = arith.constant dense<0xFF800000> : vector<36x128xf32>
    %364 = vector.multi_reduction <maximumf>, %363, %cst_343 [0] : vector<4x36x128xf32> to vector<36x128xf32>
    %c200 = arith.constant 200 : index
    %c0_344 = arith.constant 0 : index
    %365 = vector.load %arg7[%c200, %c0_344] : memref<320x128xf32, #tpu.memory_space<vmem>>, vector<36x128xf32>
    tpu.vector_store %arg7[%c200, %c0_344], %364 {strides = array<i32>} : memref<320x128xf32, #tpu.memory_space<vmem>>, vector<36x128xf32>,
    %c236 = arith.constant 236 : index
    %c0_345 = arith.constant 0 : index
    %366 = vector.load %arg7[%c236, %c0_345] : memref<320x128xf32, #tpu.memory_space<vmem>>, vector<4x128xf32>
    tpu.vector_store %arg7[%c236, %c0_345], %0 {strides = array<i32>} : memref<320x128xf32, #tpu.memory_space<vmem>>, vector<4x128xf32>,
    %c0_346 = arith.constant 0 : index
    %c0_347 = arith.constant 0 : index
    %c0_348 = arith.constant 0 : index
    %c0_349 = arith.constant 0 : index
    %367 = vector.load %arg1[%c0_346, %c0_347, %c0_348, %c0_349] : memref<4x9x36x128xf32, #tpu.memory_space<vmem>>, vector<4x1x36x128xf32>
    %368 = vector.shape_cast %367 : vector<4x1x36x128xf32> to vector<4x36x128xf32>
    %c0_350 = arith.constant 0 : index
    %c6_351 = arith.constant 6 : index
    %369 = memref.load %arg2[%c0_350, %c6_351] : memref<9x8xf32, #tpu.memory_space<smem>>
    %370 = vector.broadcast %369 : f32 to vector<4x36x128xf32>
    %371 = arith.mulf %368, %370 : vector<4x36x128xf32>
    %c0_352 = arith.constant 0 : index
    %c1_353 = arith.constant 1 : index
    %c0_354 = arith.constant 0 : index
    %c0_355 = arith.constant 0 : index
    %372 = vector.load %arg1[%c0_352, %c1_353, %c0_354, %c0_355] : memref<4x9x36x128xf32, #tpu.memory_space<vmem>>, vector<4x1x36x128xf32>
    %373 = vector.shape_cast %372 : vector<4x1x36x128xf32> to vector<4x36x128xf32>
    %c1_356 = arith.constant 1 : index
    %c6_357 = arith.constant 6 : index
    %374 = memref.load %arg2[%c1_356, %c6_357] : memref<9x8xf32, #tpu.memory_space<smem>>
    %375 = vector.broadcast %374 : f32 to vector<4x36x128xf32>
    %376 = arith.mulf %373, %375 : vector<4x36x128xf32>
    %377 = arith.addf %371, %376 : vector<4x36x128xf32>
    %c0_358 = arith.constant 0 : index
    %c2_359 = arith.constant 2 : index
    %c0_360 = arith.constant 0 : index
    %c0_361 = arith.constant 0 : index
    %378 = vector.load %arg1[%c0_358, %c2_359, %c0_360, %c0_361] : memref<4x9x36x128xf32, #tpu.memory_space<vmem>>, vector<4x1x36x128xf32>
    %379 = vector.shape_cast %378 : vector<4x1x36x128xf32> to vector<4x36x128xf32>
    %c2_362 = arith.constant 2 : index
    %c6_363 = arith.constant 6 : index
    %380 = memref.load %arg2[%c2_362, %c6_363] : memref<9x8xf32, #tpu.memory_space<smem>>
    %381 = vector.broadcast %380 : f32 to vector<4x36x128xf32>
    %382 = arith.mulf %379, %381 : vector<4x36x128xf32>
    %383 = arith.addf %377, %382 : vector<4x36x128xf32>
    %c0_364 = arith.constant 0 : index
    %c3_365 = arith.constant 3 : index
    %c0_366 = arith.constant 0 : index
    %c0_367 = arith.constant 0 : index
    %384 = vector.load %arg1[%c0_364, %c3_365, %c0_366, %c0_367] : memref<4x9x36x128xf32, #tpu.memory_space<vmem>>, vector<4x1x36x128xf32>
    %385 = vector.shape_cast %384 : vector<4x1x36x128xf32> to vector<4x36x128xf32>
    %c3_368 = arith.constant 3 : index
    %c6_369 = arith.constant 6 : index
    %386 = memref.load %arg2[%c3_368, %c6_369] : memref<9x8xf32, #tpu.memory_space<smem>>
    %387 = vector.broadcast %386 : f32 to vector<4x36x128xf32>
    %388 = arith.mulf %385, %387 : vector<4x36x128xf32>
    %389 = arith.addf %383, %388 : vector<4x36x128xf32>
    %c0_370 = arith.constant 0 : index
    %c4_371 = arith.constant 4 : index
    %c0_372 = arith.constant 0 : index
    %c0_373 = arith.constant 0 : index
    %390 = vector.load %arg1[%c0_370, %c4_371, %c0_372, %c0_373] : memref<4x9x36x128xf32, #tpu.memory_space<vmem>>, vector<4x1x36x128xf32>
    %391 = vector.shape_cast %390 : vector<4x1x36x128xf32> to vector<4x36x128xf32>
    %c4_374 = arith.constant 4 : index
    %c6_375 = arith.constant 6 : index
    %392 = memref.load %arg2[%c4_374, %c6_375] : memref<9x8xf32, #tpu.memory_space<smem>>
    %393 = vector.broadcast %392 : f32 to vector<4x36x128xf32>
    %394 = arith.mulf %391, %393 : vector<4x36x128xf32>
    %395 = arith.addf %389, %394 : vector<4x36x128xf32>
    %c0_376 = arith.constant 0 : index
    %c5_377 = arith.constant 5 : index
    %c0_378 = arith.constant 0 : index
    %c0_379 = arith.constant 0 : index
    %396 = vector.load %arg1[%c0_376, %c5_377, %c0_378, %c0_379] : memref<4x9x36x128xf32, #tpu.memory_space<vmem>>, vector<4x1x36x128xf32>
    %397 = vector.shape_cast %396 : vector<4x1x36x128xf32> to vector<4x36x128xf32>
    %c5_380 = arith.constant 5 : index
    %c6_381 = arith.constant 6 : index
    %398 = memref.load %arg2[%c5_380, %c6_381] : memref<9x8xf32, #tpu.memory_space<smem>>
    %399 = vector.broadcast %398 : f32 to vector<4x36x128xf32>
    %400 = arith.mulf %397, %399 : vector<4x36x128xf32>
    %401 = arith.addf %395, %400 : vector<4x36x128xf32>
    %c0_382 = arith.constant 0 : index
    %c6_383 = arith.constant 6 : index
    %c0_384 = arith.constant 0 : index
    %c0_385 = arith.constant 0 : index
    %402 = vector.load %arg1[%c0_382, %c6_383, %c0_384, %c0_385] : memref<4x9x36x128xf32, #tpu.memory_space<vmem>>, vector<4x1x36x128xf32>
    %403 = vector.shape_cast %402 : vector<4x1x36x128xf32> to vector<4x36x128xf32>
    %c6_386 = arith.constant 6 : index
    %c6_387 = arith.constant 6 : index
    %404 = memref.load %arg2[%c6_386, %c6_387] : memref<9x8xf32, #tpu.memory_space<smem>>
    %405 = vector.broadcast %404 : f32 to vector<4x36x128xf32>
    %406 = arith.mulf %403, %405 : vector<4x36x128xf32>
    %407 = arith.addf %401, %406 : vector<4x36x128xf32>
    %c0_388 = arith.constant 0 : index
    %c7_389 = arith.constant 7 : index
    %c0_390 = arith.constant 0 : index
    %c0_391 = arith.constant 0 : index
    %408 = vector.load %arg1[%c0_388, %c7_389, %c0_390, %c0_391] : memref<4x9x36x128xf32, #tpu.memory_space<vmem>>, vector<4x1x36x128xf32>
    %409 = vector.shape_cast %408 : vector<4x1x36x128xf32> to vector<4x36x128xf32>
    %c7_392 = arith.constant 7 : index
    %c6_393 = arith.constant 6 : index
    %410 = memref.load %arg2[%c7_392, %c6_393] : memref<9x8xf32, #tpu.memory_space<smem>>
    %411 = vector.broadcast %410 : f32 to vector<4x36x128xf32>
    %412 = arith.mulf %409, %411 : vector<4x36x128xf32>
    %413 = arith.addf %407, %412 : vector<4x36x128xf32>
    %c0_394 = arith.constant 0 : index
    %c8_395 = arith.constant 8 : index
    %c0_396 = arith.constant 0 : index
    %c0_397 = arith.constant 0 : index
    %414 = vector.load %arg1[%c0_394, %c8_395, %c0_396, %c0_397] : memref<4x9x36x128xf32, #tpu.memory_space<vmem>>, vector<4x1x36x128xf32>
    %415 = vector.shape_cast %414 : vector<4x1x36x128xf32> to vector<4x36x128xf32>
    %c8_398 = arith.constant 8 : index
    %c6_399 = arith.constant 6 : index
    %416 = memref.load %arg2[%c8_398, %c6_399] : memref<9x8xf32, #tpu.memory_space<smem>>
    %417 = vector.broadcast %416 : f32 to vector<4x36x128xf32>
    %418 = arith.mulf %415, %417 : vector<4x36x128xf32>
    %419 = arith.addf %413, %418 : vector<4x36x128xf32>
    %c6_400 = arith.constant 6 : index
    %420 = memref.load %arg3[%c6_400] : memref<8xf32, #tpu.memory_space<smem>>
    %421 = vector.broadcast %420 : f32 to vector<4x36x128xf32>
    %422 = arith.addf %419, %421 : vector<4x36x128xf32>
    %cst_401 = arith.constant 0.000000e+00 : f32
    %423 = vector.broadcast %cst_401 : f32 to vector<4x36x128xf32>
    %424 = arith.maximumf %422, %423 : vector<4x36x128xf32>
    %cst_402 = arith.constant dense<0xFF800000> : vector<36x128xf32>
    %425 = vector.multi_reduction <maximumf>, %424, %cst_402 [0] : vector<4x36x128xf32> to vector<36x128xf32>
    %c240 = arith.constant 240 : index
    %c0_403 = arith.constant 0 : index
    %426 = vector.load %arg7[%c240, %c0_403] : memref<320x128xf32, #tpu.memory_space<vmem>>, vector<36x128xf32>
    tpu.vector_store %arg7[%c240, %c0_403], %425 {strides = array<i32>} : memref<320x128xf32, #tpu.memory_space<vmem>>, vector<36x128xf32>,
    %c276 = arith.constant 276 : index
    %c0_404 = arith.constant 0 : index
    %427 = vector.load %arg7[%c276, %c0_404] : memref<320x128xf32, #tpu.memory_space<vmem>>, vector<4x128xf32>
    tpu.vector_store %arg7[%c276, %c0_404], %0 {strides = array<i32>} : memref<320x128xf32, #tpu.memory_space<vmem>>, vector<4x128xf32>,
    %c0_405 = arith.constant 0 : index
    %c0_406 = arith.constant 0 : index
    %c0_407 = arith.constant 0 : index
    %c0_408 = arith.constant 0 : index
    %428 = vector.load %arg1[%c0_405, %c0_406, %c0_407, %c0_408] : memref<4x9x36x128xf32, #tpu.memory_space<vmem>>, vector<4x1x36x128xf32>
    %429 = vector.shape_cast %428 : vector<4x1x36x128xf32> to vector<4x36x128xf32>
    %c0_409 = arith.constant 0 : index
    %c7_410 = arith.constant 7 : index
    %430 = memref.load %arg2[%c0_409, %c7_410] : memref<9x8xf32, #tpu.memory_space<smem>>
    %431 = vector.broadcast %430 : f32 to vector<4x36x128xf32>
    %432 = arith.mulf %429, %431 : vector<4x36x128xf32>
    %c0_411 = arith.constant 0 : index
    %c1_412 = arith.constant 1 : index
    %c0_413 = arith.constant 0 : index
    %c0_414 = arith.constant 0 : index
    %433 = vector.load %arg1[%c0_411, %c1_412, %c0_413, %c0_414] : memref<4x9x36x128xf32, #tpu.memory_space<vmem>>, vector<4x1x36x128xf32>
    %434 = vector.shape_cast %433 : vector<4x1x36x128xf32> to vector<4x36x128xf32>
    %c1_415 = arith.constant 1 : index
    %c7_416 = arith.constant 7 : index
    %435 = memref.load %arg2[%c1_415, %c7_416] : memref<9x8xf32, #tpu.memory_space<smem>>
    %436 = vector.broadcast %435 : f32 to vector<4x36x128xf32>
    %437 = arith.mulf %434, %436 : vector<4x36x128xf32>
    %438 = arith.addf %432, %437 : vector<4x36x128xf32>
    %c0_417 = arith.constant 0 : index
    %c2_418 = arith.constant 2 : index
    %c0_419 = arith.constant 0 : index
    %c0_420 = arith.constant 0 : index
    %439 = vector.load %arg1[%c0_417, %c2_418, %c0_419, %c0_420] : memref<4x9x36x128xf32, #tpu.memory_space<vmem>>, vector<4x1x36x128xf32>
    %440 = vector.shape_cast %439 : vector<4x1x36x128xf32> to vector<4x36x128xf32>
    %c2_421 = arith.constant 2 : index
    %c7_422 = arith.constant 7 : index
    %441 = memref.load %arg2[%c2_421, %c7_422] : memref<9x8xf32, #tpu.memory_space<smem>>
    %442 = vector.broadcast %441 : f32 to vector<4x36x128xf32>
    %443 = arith.mulf %440, %442 : vector<4x36x128xf32>
    %444 = arith.addf %438, %443 : vector<4x36x128xf32>
    %c0_423 = arith.constant 0 : index
    %c3_424 = arith.constant 3 : index
    %c0_425 = arith.constant 0 : index
    %c0_426 = arith.constant 0 : index
    %445 = vector.load %arg1[%c0_423, %c3_424, %c0_425, %c0_426] : memref<4x9x36x128xf32, #tpu.memory_space<vmem>>, vector<4x1x36x128xf32>
    %446 = vector.shape_cast %445 : vector<4x1x36x128xf32> to vector<4x36x128xf32>
    %c3_427 = arith.constant 3 : index
    %c7_428 = arith.constant 7 : index
    %447 = memref.load %arg2[%c3_427, %c7_428] : memref<9x8xf32, #tpu.memory_space<smem>>
    %448 = vector.broadcast %447 : f32 to vector<4x36x128xf32>
    %449 = arith.mulf %446, %448 : vector<4x36x128xf32>
    %450 = arith.addf %444, %449 : vector<4x36x128xf32>
    %c0_429 = arith.constant 0 : index
    %c4_430 = arith.constant 4 : index
    %c0_431 = arith.constant 0 : index
    %c0_432 = arith.constant 0 : index
    %451 = vector.load %arg1[%c0_429, %c4_430, %c0_431, %c0_432] : memref<4x9x36x128xf32, #tpu.memory_space<vmem>>, vector<4x1x36x128xf32>
    %452 = vector.shape_cast %451 : vector<4x1x36x128xf32> to vector<4x36x128xf32>
    %c4_433 = arith.constant 4 : index
    %c7_434 = arith.constant 7 : index
    %453 = memref.load %arg2[%c4_433, %c7_434] : memref<9x8xf32, #tpu.memory_space<smem>>
    %454 = vector.broadcast %453 : f32 to vector<4x36x128xf32>
    %455 = arith.mulf %452, %454 : vector<4x36x128xf32>
    %456 = arith.addf %450, %455 : vector<4x36x128xf32>
    %c0_435 = arith.constant 0 : index
    %c5_436 = arith.constant 5 : index
    %c0_437 = arith.constant 0 : index
    %c0_438 = arith.constant 0 : index
    %457 = vector.load %arg1[%c0_435, %c5_436, %c0_437, %c0_438] : memref<4x9x36x128xf32, #tpu.memory_space<vmem>>, vector<4x1x36x128xf32>
    %458 = vector.shape_cast %457 : vector<4x1x36x128xf32> to vector<4x36x128xf32>
    %c5_439 = arith.constant 5 : index
    %c7_440 = arith.constant 7 : index
    %459 = memref.load %arg2[%c5_439, %c7_440] : memref<9x8xf32, #tpu.memory_space<smem>>
    %460 = vector.broadcast %459 : f32 to vector<4x36x128xf32>
    %461 = arith.mulf %458, %460 : vector<4x36x128xf32>
    %462 = arith.addf %456, %461 : vector<4x36x128xf32>
    %c0_441 = arith.constant 0 : index
    %c6_442 = arith.constant 6 : index
    %c0_443 = arith.constant 0 : index
    %c0_444 = arith.constant 0 : index
    %463 = vector.load %arg1[%c0_441, %c6_442, %c0_443, %c0_444] : memref<4x9x36x128xf32, #tpu.memory_space<vmem>>, vector<4x1x36x128xf32>
    %464 = vector.shape_cast %463 : vector<4x1x36x128xf32> to vector<4x36x128xf32>
    %c6_445 = arith.constant 6 : index
    %c7_446 = arith.constant 7 : index
    %465 = memref.load %arg2[%c6_445, %c7_446] : memref<9x8xf32, #tpu.memory_space<smem>>
    %466 = vector.broadcast %465 : f32 to vector<4x36x128xf32>
    %467 = arith.mulf %464, %466 : vector<4x36x128xf32>
    %468 = arith.addf %462, %467 : vector<4x36x128xf32>
    %c0_447 = arith.constant 0 : index
    %c7_448 = arith.constant 7 : index
    %c0_449 = arith.constant 0 : index
    %c0_450 = arith.constant 0 : index
    %469 = vector.load %arg1[%c0_447, %c7_448, %c0_449, %c0_450] : memref<4x9x36x128xf32, #tpu.memory_space<vmem>>, vector<4x1x36x128xf32>
    %470 = vector.shape_cast %469 : vector<4x1x36x128xf32> to vector<4x36x128xf32>
    %c7_451 = arith.constant 7 : index
    %c7_452 = arith.constant 7 : index
    %471 = memref.load %arg2[%c7_451, %c7_452] : memref<9x8xf32, #tpu.memory_space<smem>>
    %472 = vector.broadcast %471 : f32 to vector<4x36x128xf32>
    %473 = arith.mulf %470, %472 : vector<4x36x128xf32>
    %474 = arith.addf %468, %473 : vector<4x36x128xf32>
    %c0_453 = arith.constant 0 : index
    %c8_454 = arith.constant 8 : index
    %c0_455 = arith.constant 0 : index
    %c0_456 = arith.constant 0 : index
    %475 = vector.load %arg1[%c0_453, %c8_454, %c0_455, %c0_456] : memref<4x9x36x128xf32, #tpu.memory_space<vmem>>, vector<4x1x36x128xf32>
    %476 = vector.shape_cast %475 : vector<4x1x36x128xf32> to vector<4x36x128xf32>
    %c8_457 = arith.constant 8 : index
    %c7_458 = arith.constant 7 : index
    %477 = memref.load %arg2[%c8_457, %c7_458] : memref<9x8xf32, #tpu.memory_space<smem>>
    %478 = vector.broadcast %477 : f32 to vector<4x36x128xf32>
    %479 = arith.mulf %476, %478 : vector<4x36x128xf32>
    %480 = arith.addf %474, %479 : vector<4x36x128xf32>
    %c7_459 = arith.constant 7 : index
    %481 = memref.load %arg3[%c7_459] : memref<8xf32, #tpu.memory_space<smem>>
    %482 = vector.broadcast %481 : f32 to vector<4x36x128xf32>
    %483 = arith.addf %480, %482 : vector<4x36x128xf32>
    %cst_460 = arith.constant 0.000000e+00 : f32
    %484 = vector.broadcast %cst_460 : f32 to vector<4x36x128xf32>
    %485 = arith.maximumf %483, %484 : vector<4x36x128xf32>
    %cst_461 = arith.constant dense<0xFF800000> : vector<36x128xf32>
    %486 = vector.multi_reduction <maximumf>, %485, %cst_461 [0] : vector<4x36x128xf32> to vector<36x128xf32>
    %c280 = arith.constant 280 : index
    %c0_462 = arith.constant 0 : index
    %487 = vector.load %arg7[%c280, %c0_462] : memref<320x128xf32, #tpu.memory_space<vmem>>, vector<36x128xf32>
    tpu.vector_store %arg7[%c280, %c0_462], %486 {strides = array<i32>} : memref<320x128xf32, #tpu.memory_space<vmem>>, vector<36x128xf32>,
    %c316 = arith.constant 316 : index
    %c0_463 = arith.constant 0 : index
    %488 = vector.load %arg7[%c316, %c0_463] : memref<320x128xf32, #tpu.memory_space<vmem>>, vector<4x128xf32>
    tpu.vector_store %arg7[%c316, %c0_463], %0 {strides = array<i32>} : memref<320x128xf32, #tpu.memory_space<vmem>>, vector<4x128xf32>,
    %c0_464 = arith.constant 0 : index
    %c0_465 = arith.constant 0 : index
    %489 = vector.load %arg4[%c0_464, %c0_465] : memref<10x320xf32, #tpu.memory_space<vmem>>, vector<10x320xf32>
    %c0_466 = arith.constant 0 : index
    %c0_467 = arith.constant 0 : index
    %490 = vector.load %arg7[%c0_466, %c0_467] : memref<320x128xf32, #tpu.memory_space<vmem>>, vector<320x128xf32>
    %cst_468 = arith.constant dense<0.000000e+00> : vector<10x128xf32>
    %491 = tpu.matmul %489, %490, %cst_468 {dimension_numbers = #tpu.dot_dimension_numbers<[1], [0], [0], [1], [0, 0, 1, 1], [], []>} : vector<10x320xf32>, vector<320x128xf32>, vector<10x128xf32> -> vector<10x128xf32>
    %c0_469 = arith.constant 0 : index
    %c0_470 = arith.constant 0 : index
    %492 = vector.load %arg5[%c0_469, %c0_470] : memref<10x1xf32, #tpu.memory_space<vmem>>, vector<10x1xf32>
    %493 = vector.broadcast %492 : vector<10x1xf32> to vector<10x128xf32>
    %494 = arith.addf %491, %493 : vector<10x128xf32>
    %cst_471 = arith.constant dense<0xFF800000> : vector<128xf32>
    %495 = vector.multi_reduction <maximumf>, %494, %cst_471 [0] : vector<10x128xf32> to vector<128xf32>
    %496 = vector.shape_cast %495 : vector<128xf32> to vector<1x128xf32>
    %497 = vector.broadcast %496 : vector<1x128xf32> to vector<10x128xf32>
    %498 = arith.subf %494, %497 : vector<10x128xf32>
    %499 = math.exp %498 : vector<10x128xf32>
    %cst_472 = arith.constant dense<0.000000e+00> : vector<128xf32>
    %500 = vector.multi_reduction <add>, %499, %cst_472 [0] : vector<10x128xf32> to vector<128xf32>
    %501 = vector.shape_cast %500 : vector<128xf32> to vector<1x128xf32>
    %502 = math.log %501 : vector<1x128xf32>
    %503 = vector.broadcast %502 : vector<1x128xf32> to vector<10x128xf32>
    %504 = arith.subf %498, %503 : vector<10x128xf32>
    %c0_473 = arith.constant 0 : index
    %c0_474 = arith.constant 0 : index
    %505 = vector.load %arg6[%c0_473, %c0_474] : memref<10x128xf32, #tpu.memory_space<vmem>>, vector<10x128xf32>
    tpu.vector_store %arg6[%c0_473, %c0_474], %504 {strides = array<i32>} : memref<10x128xf32, #tpu.memory_space<vmem>>, vector<10x128xf32>,
    return
  }
  func.func @transform_0(%arg0: i32) -> (i32, i32, i32, i32) {
    %c0_i32 = arith.constant 0 : i32
    %c0_i32_0 = arith.constant 0 : i32
    %c0_i32_1 = arith.constant 0 : i32
    %c0_i32_2 = arith.constant 0 : i32
    return %c0_i32, %c0_i32_0, %c0_i32_1, %arg0 : i32, i32, i32, i32
  }
  func.func @transform_1(%arg0: i32) -> (i32, i32) {
    %c0_i32 = arith.constant 0 : i32
    %c0_i32_0 = arith.constant 0 : i32
    %c0_i32_1 = arith.constant 0 : i32
    return %c0_i32, %c0_i32_0 : i32, i32
  }
  func.func @transform_2(%arg0: i32) -> i32 {
    %c0_i32 = arith.constant 0 : i32
    %c0_i32_0 = arith.constant 0 : i32
    return %c0_i32 : i32
  }
  func.func @transform_3(%arg0: i32) -> (i32, i32) {
    %c0_i32 = arith.constant 0 : i32
    %c0_i32_0 = arith.constant 0 : i32
    %c0_i32_1 = arith.constant 0 : i32
    return %c0_i32, %c0_i32_0 : i32, i32
  }
  func.func @transform_4(%arg0: i32) -> (i32, i32) {
    %c0_i32 = arith.constant 0 : i32
    %c0_i32_0 = arith.constant 0 : i32
    %c0_i32_1 = arith.constant 0 : i32
    return %c0_i32, %c0_i32_0 : i32, i32
  }
  func.func @transform_5(%arg0: i32) -> (i32, i32) {
    %c0_i32 = arith.constant 0 : i32
    %c0_i32_0 = arith.constant 0 : i32
    return %c0_i32, %arg0 : i32, i32
  }
}

</mosaic_0001>

<bundles_post_ra>
// kernel: tpu_custom_call.1
= control target key start
LH: loop header
LB: loop body
LE: loop exit
PB: predicated region body
PF: predicated region fallthrough
CT: control target
= control target key end

     0   :  { %10 = vsyncpa [#allocation5], 0  ;;  %s14207_s0 = inlined_call_operand.vmem [shape: f32[4,9,36,128], index: 0, kind: input, shape index: {}]   ;;  %s14208_s1 = inlined_call_operand.vmem [shape: f32[9,8], index: 1, kind: input, shape index: {}]   ;;  %s14209_s2 = inlined_call_operand.vmem [shape: f32[8], index: 2, kind: input, shape index: {}]   ;;  %s14210_s3 = inlined_call_operand.vmem [shape: f32[10,320], index: 3, kind: input, shape index: {}]   ;;  %s14211_s4 = inlined_call_operand.vmem [shape: f32[10,1], index: 4, kind: input, shape index: {}]   ;;  %s14212_s5 = inlined_call_operand.hbm [shape: f32[10,128], index: 5, kind: output, shape index: {}]  }
   0x1   :  { %11 = vsyncpa [#allocation7], 0 }
   0x2   :  { %12 = vsyncpa [#allocation4], 0  ;;  %s20_s20 = sshll.u32 %s14208_s1, 4  ;;  %s33_s23 = sshll.u32 %s14209_s2, 4  ;;  %s21_s20 = int_to_ptr.vmem [resolvable:$true] %s20_s20  ;;  %s34_s23 = int_to_ptr.vmem [resolvable:$true] %s33_s23 }
   0x3   :  { %s6648_s24 = scalar_lea.vmem %s21_s20, 256  ;;  %p6653_p1 = scmp.lt.s32.totalorder %s21_s20, %s21_s20 }
   0x4   :  { %p6649_p0 = scmp.ne.s32.totalorder %s21_s20, %s6648_s24  ;;  %p6654_p2 = scmp.lt.s32.totalorder %s6648_s24, %s6648_s24 }
   0x6   :  { %p6655_p3 = por %p6654_p2, %p6653_p1 }
   0x8   :  { %p6656_p4 = pnand %p6655_p3, %p6649_p0 }
   0xa   :  { %6659 = shalt.err (!%p6656_p4)
}
   0xb   :  { %s6700_s25 = smov [#allocation3]   ;;  %s6701_s26 = smov 128  }
   0xc   :  { %s6702_s27 = smov 8   ;;  %s6660_s1 = scalar_lea.vmem %s34_s23, 16 }
   0xd   :  { %26 = dma.vmem_to_smem %s21_s20, 256, %s6700_s25, [#allocation5], %s6701_s26, %s6701_s26, %s6702_s27  }
   0xe   :  { %p6661_p5 = scmp.ne.s32.totalorder %s34_s23, %s6660_s1  ;;  %p6665_p6 = scmp.lt.s32.totalorder %s34_s23, %s34_s23 }
   0xf   :  { %p6666_p7 = scmp.lt.s32.totalorder %s6660_s1, %s6660_s1 }
  0x11   :  { %p6667_p8 = por %p6666_p7, %p6665_p6 }
  0x13   :  { %p6668_p9 = pnand %p6667_p8, %p6661_p5 }
  0x15   :  { %6671 = shalt.err (!%p6668_p9)
}
  0x16   :  { %s6703_s2 = smov [#allocation6]  }
  0x17   :  { %36 = dma.vmem_to_smem %s34_s23, 16, %s6703_s2, [#allocation7]  }
  0x18   :  { %6694 = dma.done.wait [#allocation5], 256  }
  0x19   :  { %6695 = vsyncadd [#allocation5], 4294967040 }
  0x1a   :  { %6696 = dma.done.wait [#allocation7], 16  }
  0x1b   :  { %6697 = vsyncadd [#allocation7], 4294967280 }
  0x1c   :  { %47 = sfence }
  0x1d   :  { %s68_s28 = sld [smem:[#allocation3]]  ;;  %v6704_v0 = vmov 0.0   ;;  %v48_v1 = vld [vmem:[%s14207_s0] sm:$0xff]  ;;  %v49_v2 = vld [vmem:[%s14207_s0 + $0x8] sm:$0xff]  ;;  %v50_v3 = vld [vmem:[%s14207_s0 + $0x10] sm:$0xff]  ;;  %s7497_s16 = sld [smem:[#allocation3 + $0x1]] }
  0x1e   :  { %661 = vst [vmem:[#allocation2 + $0x24] sm:$0xf] %v6704_v0  ;;  %1266 = vst [vmem:[#allocation2 + $0x4c] sm:$0xf] %v6704_v0  ;;  %s6755_s10 = sld [smem:[#allocation3 + $0x80]]  ;;  %v51_v4 = vld [vmem:[%s14207_s0 + $0x18] sm:$0xff] }
  0x1f   :  { %1871 = vst [vmem:[#allocation2 + $0x74] sm:$0xf] %v6704_v0  ;;  %2476 = vst [vmem:[#allocation2 + $0x9c] sm:$0xf] %v6704_v0  ;;  %v52_v5 = vld [vmem:[%s14207_s0 + $0x20] sm:$0xf] }
  0x20   :  { %3081 = vst [vmem:[#allocation2 + $0xc4] sm:$0xf] %v6704_v0  ;;  %3686 = vst [vmem:[#allocation2 + $0xec] sm:$0xf] %v6704_v0  ;;  %v53_v6 = vld [vmem:[%s14207_s0 + $0x168] sm:$0xff]  ;;  %v54_v7 = vld [vmem:[%s14207_s0 + $0x170] sm:$0xff] }
  0x21   :  { %4291 = vst [vmem:[#allocation2 + $0x114] sm:$0xf] %v6704_v0  ;;  %4896 = vst [vmem:[#allocation2 + $0x13c] sm:$0xf] %v6704_v0  ;;  %v55_v8 = vld [vmem:[%s14207_s0 + $0x178] sm:$0xff]  ;;  %v56_v9 = vld [vmem:[%s14207_s0 + $0x180] sm:$0xff] }
  0x22   :  { %v57_v10 = vld [vmem:[%s14207_s0 + $0x188] sm:$0xf]  ;;  %v58_v11 = vld [vmem:[%s14207_s0 + $0x2d0] sm:$0xff]  ;;  %v59_v13 = vld [vmem:[%s14207_s0 + $0x2d8] sm:$0xff]  ;;  %s6869_s8 = sld [smem:[#allocation3 + $0x100]]  ;;  %vm648_vm0 = vcmask 1043456  }
  0x23   :  { %v69_v12 = vstv %s68_s28  ;;  %v60_v14 = vld [vmem:[%s14207_s0 + $0x2e0] sm:$0xff]  ;;  %v61_v15 = vld [vmem:[%s14207_s0 + $0x2e8] sm:$0xff]  ;;  %v62_v16 = vld [vmem:[%s14207_s0 + $0x2f0] sm:$0xf]  ;;  %s6957_s2 = sld [smem:[#allocation3 + $0x180]]  ;;  %s7812_s13 = sld [smem:[#allocation3 + $0x101]] }
  0x24   :  { %v63_v17 = vld [vmem:[%s14207_s0 + $0x438] sm:$0xff]  ;;  %v64_v18 = vld [vmem:[%s14207_s0 + $0x440] sm:$0xff]  ;;  %v65_v19 = vld [vmem:[%s14207_s0 + $0x448] sm:$0xff]  ;;  %v70_v22 = vmul.f32 %v69_v12, %v48_v1  ;;  %v71_v23 = vmul.f32 %v69_v12, %v49_v2  ;;  %v72_v24 = vmul.f32 %v69_v12, %v50_v3  ;;  %v73_v25 = vmul.f32 %v69_v12, %v51_v4  ;;  %s6959_s29 = sld [smem:[#allocation3 + $0x200]]  ;;  %s7940_s24 = sld [smem:[#allocation3 + $0x281]] }
  0x25   :  { %v66_v20 = vld [vmem:[%s14207_s0 + $0x450] sm:$0xff]  ;;  %v67_v21 = vld [vmem:[%s14207_s0 + $0x458] sm:$0xf]  ;;  %v74_v26 = vmul.f32 %v69_v12, %v52_v5  ;;  %v75_v27 = vmul.f32 %v69_v12, %v53_v6  ;;  %v6808_v28 = vmul.f32 %v69_v12, %v54_v7  ;;  %v5159_v29 = vld [vmem:[%s14207_s0 + $0x28] sm:$0xff]  ;;  %v77_v32 = vmul.f32 %v69_v12, %v55_v8  ;;  %s7156_s12 = sld [smem:[#allocation3 + $0x280]]  ;;  %s7942_s25 = sld [smem:[#allocation3 + $0x301]] }
  0x26   :  { %v5160_v30 = vld [vmem:[%s14207_s0 + $0x30] sm:$0xff]  ;;  %v5161_v31 = vld [vmem:[%s14207_s0 + $0x38] sm:$0xff]  ;;  %v78_v33 = vmul.f32 %v69_v12, %v56_v9  ;;  %v79_v34 = vmul.f32 %v69_v12, %v57_v10  ;;  %v6819_v35 = vmul.f32 %v69_v12, %v58_v11  ;;  %v5162_v36 = vld [vmem:[%s14207_s0 + $0x40] sm:$0xff]  ;;  %v81_v39 = vmul.f32 %v69_v12, %v59_v13  ;;  %s7165_s14 = sld [smem:[#allocation3 + $0x300]]  ;;  %s8341_s19 = sld [smem:[#allocation3 + $0x381]] }
  0x27   :  { %v5163_v37 = vld [vmem:[%s14207_s0 + $0x48] sm:$0xf]  ;;  %v5164_v38 = vld [vmem:[%s14207_s0 + $0x190] sm:$0xff]  ;;  %v82_v40 = vmul.f32 %v69_v12, %v60_v14  ;;  %v83_v41 = vmul.f32 %v69_v12, %v61_v15  ;;  %v5165_v42 = vld [vmem:[%s14207_s0 + $0x198] sm:$0xff]  ;;  %v112_v45 = vstv %s6755_s10  ;;  %v84_v46 = vmul.f32 %v69_v12, %v62_v16  ;;  %s7167_s15 = sld [smem:[#allocation3 + $0x380]]  ;;  %s8364_s22 = sld [smem:[#allocation3 + $0x2]] }
  0x28   :  { %v5166_v43 = vld [vmem:[%s14207_s0 + $0x1a0] sm:$0xff]  ;;  %v5167_v44 = vld [vmem:[%s14207_s0 + $0x1a8] sm:$0xff]  ;;  %v85_v47 = vmul.f32 %v69_v12, %v63_v17  ;;  %v86_v48 = vmul.f32 %v69_v12, %v64_v18  ;;  %v6840_v49 = vmul.f32 %v69_v12, %v65_v19  ;;  %v5168_v50 = vld [vmem:[%s14207_s0 + $0x1b0] sm:$0xf]  ;;  %v88_v53 = vmul.f32 %v69_v12, %v66_v20  ;;  %s7476_s1 = sld [smem:[#allocation3 + $0x400]]  ;;  %s8638_s10 = sld [smem:[#allocation3 + $0x82]] }
  0x29   :  { %v5169_v51 = vld [vmem:[%s14207_s0 + $0x2f8] sm:$0xff]  ;;  %v5170_v52 = vld [vmem:[%s14207_s0 + $0x300] sm:$0xff]  ;;  %v89_v54 = vmul.f32 %v69_v12, %v67_v21  ;;  %v5171_v55 = vld [vmem:[%s14207_s0 + $0x308] sm:$0xff]  ;;  %v113_v58 = vmul.f32 %v5159_v29, %v112_v45  ;;  %v114_v59 = vmul.f32 %v5160_v30, %v112_v45  ;;  %v115_v63 = vmul.f32 %v5161_v31, %v112_v45  ;;  %s7491_s28 = sld [smem:[#allocation6]]  ;;  %s8798_s11 = sld [smem:[#allocation3 + $0x102]] }
  0x2a   :  { %v5172_v56 = vld [vmem:[%s14207_s0 + $0x310] sm:$0xff]  ;;  %v5173_v57 = vld [vmem:[%s14207_s0 + $0x318] sm:$0xf]  ;;  %v5174_v60 = vld [vmem:[%s14207_s0 + $0x460] sm:$0xff]  ;;  %v116_v0 = vmul.f32 %v5162_v36, %v112_v45  ;;  %v117_v1 = vmul.f32 %v5163_v37, %v112_v45  ;;  %v118_v2 = vmul.f32 %v5164_v38, %v112_v45  ;;  %v119_v5 = vmul.f32 %v5165_v42, %v112_v45  ;;  %s8809_s18 = sld [smem:[#allocation3 + $0x182]]  ;;  %s9573_s9 = sld [smem:[#allocation3 + $0x83]] }
  0x2b   :  { %v5175_v61 = vld [vmem:[%s14207_s0 + $0x468] sm:$0xff]  ;;  %v5176_v62 = vld [vmem:[%s14207_s0 + $0x470] sm:$0xff]  ;;  %v5177_v3 = vld [vmem:[%s14207_s0 + $0x478] sm:$0xff]  ;;  %v120_v6 = vmul.f32 %v5166_v43, %v112_v45  ;;  %v121_v7 = vmul.f32 %v5167_v44, %v112_v45  ;;  %v122_v8 = vmul.f32 %v5168_v50, %v112_v45  ;;  %v123_v9 = vmul.f32 %v5169_v51, %v112_v45  ;;  %s8813_s20 = sld [smem:[#allocation3 + $0x282]]  ;;  %s9575_s17 = sld [smem:[#allocation3 + $0x103]] }
  0x2c   :  { %v5178_v4 = vld [vmem:[%s14207_s0 + $0x480] sm:$0xf]  ;;  %v124_v10 = vmul.f32 %v5170_v52, %v112_v45  ;;  %v125_v11 = vmul.f32 %v5171_v55, %v112_v45  ;;  %v126_v12 = vmul.f32 %v5172_v56, %v112_v45  ;;  %v127_v13 = vmul.f32 %v5173_v57, %v112_v45  ;;  %v5180_v36 = vld [vmem:[%s14207_s0 + $0x50] sm:$0xff]  ;;  %v5181_v37 = vld [vmem:[%s14207_s0 + $0x58] sm:$0xff]  ;;  %s9235_s7 = sld [smem:[#allocation6 + $0x2]]  ;;  %s10012_s23 = sld [smem:[#allocation3 + $0x383]] }
  0x2d   :  { %v128_v14 = vmul.f32 %v5174_v60, %v112_v45  ;;  %v129_v15 = vmul.f32 %v5175_v61, %v112_v45  ;;  %v130_v16 = vmul.f32 %v5176_v62, %v112_v45  ;;  %v131_v17 = vmul.f32 %v5177_v3, %v112_v45  ;;  %v5186_v43 = vld [vmem:[%s14207_s0 + $0x1c0] sm:$0xff]  ;;  %v5187_v44 = vld [vmem:[%s14207_s0 + $0x1c8] sm:$0xff]  ;;  %v5197_v62 = vld [vmem:[%s14207_s0 + $0x498] sm:$0xff]  ;;  %s10420_s6 = sld [smem:[#allocation3 + $0x104]]  ;;  %s13319_s21 = sld [smem:[#allocation3 + $0x7]] }
  0x2e   :  { %v132_v18 = vmul.f32 %v5178_v4, %v112_v45  ;;  %v6877_v19 = vadd.f32 %v113_v58, %v70_v22  ;;  %v6879_v20 = vadd.f32 %v114_v59, %v71_v23  ;;  %v6881_v21 = vadd.f32 %v115_v63, %v72_v24  ;;  %v5194_v58 = vld [vmem:[%s14207_s0 + $0x340] sm:$0xf] }
  0x2f   :  { %v6883_v29 = vadd.f32 %v116_v0, %v73_v25  ;;  %v6885_v30 = vadd.f32 %v117_v1, %v74_v26  ;;  %v6887_v31 = vadd.f32 %v118_v2, %v75_v27  ;;  %v139_v22 = vadd.f32 %v119_v5, %v6808_v28  ;;  %v5182_v25 = vld [vmem:[%s14207_s0 + $0x60] sm:$0xff]  ;;  %v5183_v26 = vld [vmem:[%s14207_s0 + $0x68] sm:$0xff]  ;;  %v5184_v27 = vld [vmem:[%s14207_s0 + $0x70] sm:$0xf] }
  0x30   :  { %v140_v23 = vadd.f32 %v120_v6, %v77_v32  ;;  %v141_v38 = vadd.f32 %v121_v7, %v78_v33  ;;  %v6896_v24 = vadd.f32 %v122_v8, %v79_v34  ;;  %v143_v42 = vadd.f32 %v123_v9, %v6819_v35  ;;  %v5185_v34 = vld [vmem:[%s14207_s0 + $0x1b8] sm:$0xff]  ;;  %v5188_v35 = vld [vmem:[%s14207_s0 + $0x1d0] sm:$0xff]  ;;  %v5198_v63 = vld [vmem:[%s14207_s0 + $0x4a0] sm:$0xff] }
  0x31   :  { %v144_v28 = vadd.f32 %v124_v10, %v81_v39  ;;  %v145_v32 = vadd.f32 %v125_v11, %v82_v40  ;;  %v6908_v33 = vadd.f32 %v126_v12, %v83_v41  ;;  %v147_v45 = vadd.f32 %v127_v13, %v84_v46  ;;  %v5189_v39 = vld [vmem:[%s14207_s0 + $0x1d8] sm:$0xf]  ;;  %v5190_v40 = vld [vmem:[%s14207_s0 + $0x320] sm:$0xff]  ;;  %v5191_v46 = vld [vmem:[%s14207_s0 + $0x328] sm:$0xff] }
  0x32   :  { %v148_v50 = vadd.f32 %v128_v14, %v85_v47  ;;  %v149_v51 = vadd.f32 %v129_v15, %v86_v48  ;;  %v175_v41 = vstv %s6869_s8  ;;  %v150_v52 = vadd.f32 %v130_v16, %v6840_v49  ;;  %v5192_v47 = vld [vmem:[%s14207_s0 + $0x330] sm:$0xff]  ;;  %v5193_v48 = vld [vmem:[%s14207_s0 + $0x338] sm:$0xff]  ;;  %v5195_v49 = vld [vmem:[%s14207_s0 + $0x488] sm:$0xff]  ;;  %s8811_s8 = sld [smem:[#allocation3 + $0x202]] }
  0x33   :  { %v151_v55 = vadd.f32 %v131_v17, %v88_v53  ;;  %v152_v56 = vadd.f32 %v132_v18, %v89_v54  ;;  %v176_v57 = vmul.f32 %v5180_v36, %v175_v41  ;;  %v5196_v53 = vld [vmem:[%s14207_s0 + $0x490] sm:$0xff]  ;;  %v177_v54 = vmul.f32 %v5181_v37, %v175_v41  ;;  %v5199_v0 = vld [vmem:[%s14207_s0 + $0x4a8] sm:$0xf] }
  0x34   :  { %v178_v59 = vmul.f32 %v5182_v25, %v175_v41  ;;  %v179_v60 = vmul.f32 %v5183_v26, %v175_v41  ;;  %v180_v61 = vmul.f32 %v5184_v27, %v175_v41  ;;  %v181_v1 = vmul.f32 %v5185_v34, %v175_v41  ;;  %v5201_v25 = vld [vmem:[%s14207_s0 + $0x78] sm:$0xff] }
  0x35   :  { %v182_v2 = vmul.f32 %v5186_v43, %v175_v41  ;;  %v183_v3 = vmul.f32 %v5187_v44, %v175_v41  ;;  %v184_v4 = vmul.f32 %v5188_v35, %v175_v41  ;;  %v185_v5 = vmul.f32 %v5189_v39, %v175_v41  ;;  %v5206_v43 = vld [vmem:[%s14207_s0 + $0x1e0] sm:$0xff]  ;;  %v5207_v44 = vld [vmem:[%s14207_s0 + $0x1e8] sm:$0xff]  ;;  %v5208_v35 = vld [vmem:[%s14207_s0 + $0x1f0] sm:$0xff] }
  0x36   :  { %v186_v6 = vmul.f32 %v5190_v40, %v175_v41  ;;  %v187_v7 = vmul.f32 %v5191_v46, %v175_v41  ;;  %v188_v8 = vmul.f32 %v5192_v47, %v175_v41  ;;  %v189_v9 = vmul.f32 %v5193_v48, %v175_v41  ;;  %v5209_v39 = vld [vmem:[%s14207_s0 + $0x1f8] sm:$0xff]  ;;  %v5210_v40 = vld [vmem:[%s14207_s0 + $0x200] sm:$0xf] }
  0x37   :  { %v190_v10 = vmul.f32 %v5194_v58, %v175_v41  ;;  %v191_v11 = vmul.f32 %v5195_v49, %v175_v41  ;;  %v192_v12 = vmul.f32 %v5196_v53, %v175_v41  ;;  %v193_v13 = vmul.f32 %v5197_v62, %v175_v41  ;;  %v5213_v46 = vld [vmem:[%s14207_s0 + $0x358] sm:$0xff] }
  0x38   :  { %v194_v14 = vmul.f32 %v5198_v63, %v175_v41  ;;  %v195_v15 = vmul.f32 %v5199_v0, %v175_v41  ;;  %v196_v16 = vadd.f32 %v176_v57, %v6877_v19  ;;  %v197_v17 = vadd.f32 %v177_v54, %v6879_v20  ;;  %v5202_v20 = vld [vmem:[%s14207_s0 + $0x80] sm:$0xff]  ;;  %v5217_v53 = vld [vmem:[%s14207_s0 + $0x4b8] sm:$0xff]  ;;  %v5220_v0 = vld [vmem:[%s14207_s0 + $0x4d0] sm:$0xf] }
  0x39   :  { %v198_v18 = vadd.f32 %v178_v59, %v6881_v21  ;;  %v6965_v36 = vadd.f32 %v179_v60, %v6883_v29  ;;  %v6968_v37 = vadd.f32 %v180_v61, %v6885_v30  ;;  %v201_v26 = vadd.f32 %v181_v1, %v6887_v31  ;;  %v5203_v21 = vld [vmem:[%s14207_s0 + $0x88] sm:$0xff]  ;;  %v5204_v29 = vld [vmem:[%s14207_s0 + $0x90] sm:$0xff]  ;;  %v5218_v54 = vld [vmem:[%s14207_s0 + $0x4c0] sm:$0xff] }
  0x3a   :  { %v202_v27 = vadd.f32 %v182_v2, %v139_v22  ;;  %v6974_v34 = vadd.f32 %v183_v3, %v140_v23  ;;  %v6976_v19 = vadd.f32 %v184_v4, %v141_v38  ;;  %v205_v30 = vadd.f32 %v185_v5, %v6896_v24  ;;  %v5205_v38 = vld [vmem:[%s14207_s0 + $0x98] sm:$0xf]  ;;  %v5219_v59 = vld [vmem:[%s14207_s0 + $0x4c8] sm:$0xff] }
  0x3b   :  { %v206_v31 = vadd.f32 %v186_v6, %v143_v42  ;;  %v6988_v22 = vadd.f32 %v187_v7, %v144_v28  ;;  %v6990_v23 = vadd.f32 %v188_v8, %v145_v32  ;;  %v209_v24 = vadd.f32 %v189_v9, %v6908_v33 }
  0x3c   :  { %v210_v42 = vadd.f32 %v190_v10, %v147_v45  ;;  %v7002_v28 = vadd.f32 %v191_v11, %v148_v50  ;;  %v7004_v32 = vadd.f32 %v192_v12, %v149_v51  ;;  %v213_v41 = vadd.f32 %v193_v13, %v150_v52  ;;  %v5211_v50 = vld [vmem:[%s14207_s0 + $0x348] sm:$0xff]  ;;  %v5212_v51 = vld [vmem:[%s14207_s0 + $0x350] sm:$0xff]  ;;  %v5214_v52 = vld [vmem:[%s14207_s0 + $0x360] sm:$0xff] }
  0x3d   :  { %v214_v33 = vadd.f32 %v194_v14, %v151_v55  ;;  %v7015_v45 = vadd.f32 %v195_v15, %v152_v56  ;;  %v238_v47 = vstv %s6957_s2  ;;  %v5215_v55 = vld [vmem:[%s14207_s0 + $0x368] sm:$0xf]  ;;  %v5216_v56 = vld [vmem:[%s14207_s0 + $0x4b0] sm:$0xff]  ;;  %v7037_v49 = vstv %s6959_s29  ;;  %s7499_s2 = sld [smem:[#allocation3 + $0x81]]  ;;  %s11236_s29 = sld [smem:[#allocation3 + $0x85]] }
  0x3e   :  { %v239_v48 = vmul.f32 %v5201_v25, %v238_v47  ;;  %v240_v57 = vmul.f32 %v5202_v20, %v238_v47  ;;  %v241_v58 = vmul.f32 %v5203_v21, %v238_v47  ;;  %v242_v60 = vmul.f32 %v5204_v29, %v238_v47  ;;  %v5222_v20 = vld [vmem:[%s14207_s0 + $0xa0] sm:$0xff] }
  0x3f   :  { %v243_v61 = vmul.f32 %v5205_v38, %v238_v47  ;;  %v244_v62 = vmul.f32 %v5206_v43, %v238_v47  ;;  %v245_v63 = vmul.f32 %v5207_v44, %v238_v47  ;;  %v246_v1 = vmul.f32 %v5208_v35, %v238_v47  ;;  %v5223_v44 = vld [vmem:[%s14207_s0 + $0xa8] sm:$0xff] }
  0x40   :  { %v247_v2 = vmul.f32 %v5209_v39, %v238_v47  ;;  %v248_v3 = vmul.f32 %v5210_v40, %v238_v47  ;;  %v249_v4 = vmul.f32 %v5211_v50, %v238_v47  ;;  %v250_v5 = vmul.f32 %v5212_v51, %v238_v47  ;;  %v5227_v35 = vld [vmem:[%s14207_s0 + $0x208] sm:$0xff]  ;;  %v5229_v40 = vld [vmem:[%s14207_s0 + $0x218] sm:$0xff]  ;;  %v5230_v50 = vld [vmem:[%s14207_s0 + $0x220] sm:$0xff] }
  0x41   :  { %v251_v6 = vmul.f32 %v5213_v46, %v238_v47  ;;  %v252_v7 = vmul.f32 %v5214_v52, %v238_v47  ;;  %v253_v8 = vmul.f32 %v5215_v55, %v238_v47  ;;  %v254_v9 = vmul.f32 %v5216_v56, %v238_v47  ;;  %v5232_v46 = vld [vmem:[%s14207_s0 + $0x370] sm:$0xff] }
  0x42   :  { %v255_v10 = vmul.f32 %v5217_v53, %v238_v47  ;;  %v256_v11 = vmul.f32 %v5218_v54, %v238_v47  ;;  %v257_v12 = vmul.f32 %v5219_v59, %v238_v47  ;;  %v258_v13 = vmul.f32 %v5220_v0, %v238_v47  ;;  %v5233_v47 = vld [vmem:[%s14207_s0 + $0x378] sm:$0xff] }
  0x43   :  { %v7051_v14 = vadd.f32 %v239_v48, %v196_v16  ;;  %v7053_v15 = vadd.f32 %v240_v57, %v197_v17  ;;  %v7055_v25 = vadd.f32 %v241_v58, %v198_v18  ;;  %v262_v21 = vadd.f32 %v242_v60, %v6965_v36  ;;  %v5224_v16 = vld [vmem:[%s14207_s0 + $0xb0] sm:$0xff]  ;;  %v5225_v17 = vld [vmem:[%s14207_s0 + $0xb8] sm:$0xff]  ;;  %v5239_v57 = vld [vmem:[%s14207_s0 + $0x4e8] sm:$0xff] }
  0x44   :  { %v263_v29 = vadd.f32 %v243_v61, %v6968_v37  ;;  %v264_v38 = vadd.f32 %v244_v62, %v201_v26  ;;  %v265_v43 = vadd.f32 %v245_v63, %v202_v27  ;;  %v7072_v18 = vadd.f32 %v246_v1, %v6974_v34  ;;  %v5226_v27 = vld [vmem:[%s14207_s0 + $0xc0] sm:$0xf]  ;;  %v5228_v34 = vld [vmem:[%s14207_s0 + $0x210] sm:$0xff]  ;;  %v5241_v61 = vld [vmem:[%s14207_s0 + $0x4f8] sm:$0xf] }
  0x45   :  { %v7075_v36 = vadd.f32 %v247_v2, %v6976_v19  ;;  %v7077_v37 = vadd.f32 %v248_v3, %v205_v30  ;;  %v7079_v26 = vadd.f32 %v249_v4, %v206_v31  ;;  %v7091_v39 = vadd.f32 %v250_v5, %v6988_v22  ;;  %v5231_v22 = vld [vmem:[%s14207_s0 + $0x228] sm:$0xf]  ;;  %v5240_v58 = vld [vmem:[%s14207_s0 + $0x4f0] sm:$0xff] }
  0x46   :  { %v7094_v19 = vadd.f32 %v251_v6, %v6990_v23  ;;  %v7096_v30 = vadd.f32 %v252_v7, %v209_v24  ;;  %v7098_v31 = vadd.f32 %v253_v8, %v210_v42  ;;  %v7110_v51 = vadd.f32 %v254_v9, %v7002_v28  ;;  %v5234_v28 = vld [vmem:[%s14207_s0 + $0x380] sm:$0xff] }
  0x47   :  { %v7113_v23 = vadd.f32 %v255_v10, %v7004_v32  ;;  %v7115_v24 = vadd.f32 %v256_v11, %v213_v41  ;;  %v7117_v42 = vadd.f32 %v257_v12, %v214_v33  ;;  %v7129_v52 = vadd.f32 %v258_v13, %v7015_v45  ;;  %v5235_v32 = vld [vmem:[%s14207_s0 + $0x388] sm:$0xff]  ;;  %v5236_v41 = vld [vmem:[%s14207_s0 + $0x390] sm:$0xf]  ;;  %v5237_v33 = vld [vmem:[%s14207_s0 + $0x4d8] sm:$0xff] }
  0x48   :  { %v302_v55 = vmul.f32 %v5222_v20, %v7037_v49  ;;  %v303_v56 = vmul.f32 %v5223_v44, %v7037_v49  ;;  %v304_v48 = vmul.f32 %v5224_v16, %v7037_v49  ;;  %v5238_v45 = vld [vmem:[%s14207_s0 + $0x4e0] sm:$0xff]  ;;  %v305_v53 = vmul.f32 %v5225_v17, %v7037_v49 }
  0x49   :  { %v306_v54 = vmul.f32 %v5226_v27, %v7037_v49  ;;  %v307_v59 = vmul.f32 %v5227_v35, %v7037_v49  ;;  %v308_v60 = vmul.f32 %v5228_v34, %v7037_v49  ;;  %v309_v62 = vmul.f32 %v5229_v40, %v7037_v49  ;;  %v5247_v27 = vld [vmem:[%s14207_s0 + $0xe8] sm:$0xf]  ;;  %v5248_v35 = vld [vmem:[%s14207_s0 + $0x230] sm:$0xff]  ;;  %v5250_v40 = vld [vmem:[%s14207_s0 + $0x240] sm:$0xff] }
  0x4a   :  { %v310_v63 = vmul.f32 %v5230_v50, %v7037_v49  ;;  %v311_v0 = vmul.f32 %v5231_v22, %v7037_v49  ;;  %v312_v1 = vmul.f32 %v5232_v46, %v7037_v49  ;;  %v313_v2 = vmul.f32 %v5233_v47, %v7037_v49  ;;  %v5253_v46 = vld [vmem:[%s14207_s0 + $0x398] sm:$0xff]  ;;  %v5254_v47 = vld [vmem:[%s14207_s0 + $0x3a0] sm:$0xff] }
  0x4b   :  { %v314_v3 = vmul.f32 %v5234_v28, %v7037_v49  ;;  %v315_v4 = vmul.f32 %v5235_v32, %v7037_v49  ;;  %v316_v5 = vmul.f32 %v5236_v41, %v7037_v49  ;;  %v317_v6 = vmul.f32 %v5237_v33, %v7037_v49  ;;  %v5257_v41 = vld [vmem:[%s14207_s0 + $0x3b8] sm:$0xf]  ;;  %v5258_v33 = vld [vmem:[%s14207_s0 + $0x500] sm:$0xff] }
  0x4c   :  { %v318_v7 = vmul.f32 %v5238_v45, %v7037_v49  ;;  %v319_v8 = vmul.f32 %v5239_v57, %v7037_v49  ;;  %v320_v9 = vmul.f32 %v5240_v58, %v7037_v49  ;;  %v321_v10 = vmul.f32 %v5241_v61, %v7037_v49  ;;  %v5243_v49 = vld [vmem:[%s14207_s0 + $0xc8] sm:$0xff]  ;;  %v5260_v57 = vld [vmem:[%s14207_s0 + $0x510] sm:$0xff]  ;;  %v5261_v58 = vld [vmem:[%s14207_s0 + $0x518] sm:$0xff] }
  0x4d   :  { %v7179_v11 = vadd.f32 %v302_v55, %v7051_v14  ;;  %v7182_v12 = vadd.f32 %v303_v56, %v7053_v15  ;;  %v7185_v13 = vadd.f32 %v304_v48, %v7055_v25  ;;  %v7187_v20 = vadd.f32 %v305_v53, %v262_v21  ;;  %v5244_v14 = vld [vmem:[%s14207_s0 + $0xd0] sm:$0xff]  ;;  %v5245_v15 = vld [vmem:[%s14207_s0 + $0xd8] sm:$0xff]  ;;  %v5246_v25 = vld [vmem:[%s14207_s0 + $0xe0] sm:$0xff] }
  0x4e   :  { %v7189_v44 = vadd.f32 %v306_v54, %v263_v29  ;;  %v7191_v16 = vadd.f32 %v307_v59, %v264_v38  ;;  %v7193_v17 = vadd.f32 %v308_v60, %v265_v43  ;;  %v329_v21 = vadd.f32 %v309_v62, %v7072_v18  ;;  %v5249_v18 = vld [vmem:[%s14207_s0 + $0x238] sm:$0xff]  ;;  %v5262_v53 = vld [vmem:[%s14207_s0 + $0x520] sm:$0xf] }
  0x4f   :  { %v7209_v29 = vadd.f32 %v310_v63, %v7075_v36  ;;  %v7212_v38 = vadd.f32 %v311_v0, %v7077_v37  ;;  %v7215_v43 = vadd.f32 %v312_v1, %v7079_v26  ;;  %v333_v36 = vadd.f32 %v313_v2, %v7091_v39  ;;  %v5251_v39 = vld [vmem:[%s14207_s0 + $0x248] sm:$0xff] }
  0x50   :  { %v7228_v37 = vadd.f32 %v314_v3, %v7094_v19  ;;  %v7231_v26 = vadd.f32 %v315_v4, %v7096_v30  ;;  %v7234_v34 = vadd.f32 %v316_v5, %v7098_v31  ;;  %v5252_v19 = vld [vmem:[%s14207_s0 + $0x250] sm:$0xf]  ;;  %v337_v50 = vadd.f32 %v317_v6, %v7110_v51  ;;  %v5255_v51 = vld [vmem:[%s14207_s0 + $0x3a8] sm:$0xff] }
  0x51   :  { %v7247_v30 = vadd.f32 %v318_v7, %v7113_v23  ;;  %v7250_v31 = vadd.f32 %v319_v8, %v7115_v24  ;;  %v7253_v22 = vadd.f32 %v320_v9, %v7117_v42  ;;  %v341_v23 = vadd.f32 %v321_v10, %v7129_v52  ;;  %v5256_v24 = vld [vmem:[%s14207_s0 + $0x3b0] sm:$0xff]  ;;  %v5259_v52 = vld [vmem:[%s14207_s0 + $0x508] sm:$0xff] }
  0x52   :  { %v364_v42 = vstv %s7156_s12  ;;  %v7270_v28 = vstv %s7165_s14  ;;  %v7273_v32 = vstv %s7167_s15  ;;  %s7927_s12 = sld [smem:[#allocation3 + $0x181]]  ;;  %s9800_s15 = sld [smem:[#allocation3 + $0x183]]  ;;  %vm4955_vm1 = vcmask 523264  }
  0x53   :  { %v365_v55 = vmul.f32 %v5243_v49, %v364_v42  ;;  %v366_v56 = vmul.f32 %v5244_v14, %v364_v42  ;;  %v367_v48 = vmul.f32 %v5245_v15, %v364_v42  ;;  %v368_v45 = vmul.f32 %v5246_v25, %v364_v42  ;;  %v5264_v25 = vld [vmem:[%s14207_s0 + $0xf0] sm:$0xff]  ;;  %s10014_s14 = sld [smem:[#allocation3 + $0x403]] }
  0x54   :  { %v369_v54 = vmul.f32 %v5247_v27, %v364_v42  ;;  %v370_v59 = vmul.f32 %v5248_v35, %v364_v42  ;;  %v371_v60 = vmul.f32 %v5249_v18, %v364_v42  ;;  %v372_v61 = vmul.f32 %v5250_v40, %v364_v42  ;;  %v5265_v27 = vld [vmem:[%s14207_s0 + $0xf8] sm:$0xff] }
  0x55   :  { %v373_v62 = vmul.f32 %v5251_v39, %v364_v42  ;;  %v374_v63 = vmul.f32 %v5252_v19, %v364_v42  ;;  %v375_v0 = vmul.f32 %v5253_v46, %v364_v42  ;;  %v376_v1 = vmul.f32 %v5254_v47, %v364_v42  ;;  %v5270_v19 = vld [vmem:[%s14207_s0 + $0x260] sm:$0xff]  ;;  %v5271_v46 = vld [vmem:[%s14207_s0 + $0x268] sm:$0xff] }
  0x56   :  { %v377_v2 = vmul.f32 %v5255_v51, %v364_v42  ;;  %v378_v3 = vmul.f32 %v5256_v24, %v364_v42  ;;  %v379_v4 = vmul.f32 %v5257_v41, %v364_v42  ;;  %v380_v5 = vmul.f32 %v5258_v33, %v364_v42  ;;  %v5273_v51 = vld [vmem:[%s14207_s0 + $0x278] sm:$0xf]  ;;  %v5274_v24 = vld [vmem:[%s14207_s0 + $0x3c0] sm:$0xff]  ;;  %v5276_v41 = vld [vmem:[%s14207_s0 + $0x3d0] sm:$0xff] }
  0x57   :  { %v381_v6 = vmul.f32 %v5259_v52, %v364_v42  ;;  %v382_v7 = vmul.f32 %v5260_v57, %v364_v42  ;;  %v383_v8 = vmul.f32 %v5261_v58, %v364_v42  ;;  %v384_v9 = vmul.f32 %v5262_v53, %v364_v42  ;;  %v5277_v33 = vld [vmem:[%s14207_s0 + $0x3d8] sm:$0xff]  ;;  %v5283_v57 = vld [vmem:[%s14207_s0 + $0x548] sm:$0xf] }
  0x58   :  { %v385_v10 = vadd.f32 %v365_v55, %v7179_v11  ;;  %v386_v49 = vadd.f32 %v366_v56, %v7182_v12  ;;  %v387_v14 = vadd.f32 %v367_v48, %v7185_v13  ;;  %v388_v15 = vadd.f32 %v368_v45, %v7187_v20  ;;  %v5266_v12 = vld [vmem:[%s14207_s0 + $0x100] sm:$0xff]  ;;  %v5267_v13 = vld [vmem:[%s14207_s0 + $0x108] sm:$0xff]  ;;  %v5268_v20 = vld [vmem:[%s14207_s0 + $0x110] sm:$0xf] }
  0x59   :  { %v389_v35 = vadd.f32 %v369_v54, %v7189_v44  ;;  %v390_v18 = vadd.f32 %v370_v59, %v7191_v16  ;;  %v391_v11 = vadd.f32 %v371_v60, %v7193_v17  ;;  %v392_v40 = vadd.f32 %v372_v61, %v329_v21  ;;  %v5269_v21 = vld [vmem:[%s14207_s0 + $0x258] sm:$0xff]  ;;  %v5282_v45 = vld [vmem:[%s14207_s0 + $0x540] sm:$0xff] }
  0x5a   :  { %v393_v39 = vadd.f32 %v373_v62, %v7209_v29  ;;  %v394_v44 = vadd.f32 %v374_v63, %v7212_v38  ;;  %v395_v16 = vadd.f32 %v375_v0, %v7215_v43  ;;  %v396_v17 = vadd.f32 %v376_v1, %v333_v36  ;;  %v5272_v36 = vld [vmem:[%s14207_s0 + $0x270] sm:$0xff]  ;;  %v5281_v48 = vld [vmem:[%s14207_s0 + $0x538] sm:$0xff] }
  0x5b   :  { %v397_v47 = vadd.f32 %v377_v2, %v7228_v37  ;;  %v398_v29 = vadd.f32 %v378_v3, %v7231_v26  ;;  %v399_v38 = vadd.f32 %v379_v4, %v7234_v34  ;;  %v400_v43 = vadd.f32 %v380_v5, %v337_v50  ;;  %v5275_v50 = vld [vmem:[%s14207_s0 + $0x3c8] sm:$0xff] }
  0x5c   :  { %v401_v42 = vadd.f32 %v381_v6, %v7247_v30  ;;  %v402_v37 = vadd.f32 %v382_v7, %v7250_v31  ;;  %v403_v26 = vadd.f32 %v383_v8, %v7253_v22  ;;  %v404_v34 = vadd.f32 %v384_v9, %v341_v23  ;;  %v5278_v30 = vld [vmem:[%s14207_s0 + $0x3e0] sm:$0xf]  ;;  %v5279_v31 = vld [vmem:[%s14207_s0 + $0x528] sm:$0xff]  ;;  %v5280_v22 = vld [vmem:[%s14207_s0 + $0x530] sm:$0xff] }
  0x5d   :  { %v428_v23 = vmul.f32 %v5264_v25, %v7270_v28  ;;  %v429_v52 = vmul.f32 %v5265_v27, %v7270_v28  ;;  %v430_v55 = vmul.f32 %v5266_v12, %v7270_v28  ;;  %v431_v56 = vmul.f32 %v5267_v13, %v7270_v28  ;;  %v5285_v12 = vld [vmem:[%s14207_s0 + $0x118] sm:$0xff]  ;;  %v5286_v13 = vld [vmem:[%s14207_s0 + $0x120] sm:$0xff] }
  0x5e   :  { %v432_v58 = vmul.f32 %v5268_v20, %v7270_v28  ;;  %v433_v53 = vmul.f32 %v5269_v21, %v7270_v28  ;;  %v434_v54 = vmul.f32 %v5270_v19, %v7270_v28  ;;  %v435_v59 = vmul.f32 %v5271_v46, %v7270_v28 }
  0x5f   :  { %v436_v60 = vmul.f32 %v5272_v36, %v7270_v28  ;;  %v437_v61 = vmul.f32 %v5273_v51, %v7270_v28  ;;  %v438_v62 = vmul.f32 %v5274_v24, %v7270_v28  ;;  %v439_v63 = vmul.f32 %v5275_v50, %v7270_v28  ;;  %v5292_v36 = vld [vmem:[%s14207_s0 + $0x290] sm:$0xff]  ;;  %v5293_v51 = vld [vmem:[%s14207_s0 + $0x298] sm:$0xff]  ;;  %v5294_v24 = vld [vmem:[%s14207_s0 + $0x2a0] sm:$0xf] }
  0x60   :  { %v440_v0 = vmul.f32 %v5276_v41, %v7270_v28  ;;  %v441_v1 = vmul.f32 %v5277_v33, %v7270_v28  ;;  %v442_v2 = vmul.f32 %v5278_v30, %v7270_v28  ;;  %v443_v3 = vmul.f32 %v5279_v31, %v7270_v28  ;;  %v5295_v50 = vld [vmem:[%s14207_s0 + $0x3e8] sm:$0xff]  ;;  %v5296_v41 = vld [vmem:[%s14207_s0 + $0x3f0] sm:$0xff]  ;;  %v5297_v33 = vld [vmem:[%s14207_s0 + $0x3f8] sm:$0xff] }
  0x61   :  { %v444_v4 = vmul.f32 %v5280_v22, %v7270_v28  ;;  %v445_v5 = vmul.f32 %v5281_v48, %v7270_v28  ;;  %v446_v6 = vmul.f32 %v5282_v45, %v7270_v28  ;;  %v447_v7 = vmul.f32 %v5283_v57, %v7270_v28  ;;  %v5298_v30 = vld [vmem:[%s14207_s0 + $0x400] sm:$0xff] }
  0x62   :  { %v7389_v8 = vadd.f32 %v428_v23, %v385_v10  ;;  %v7391_v9 = vadd.f32 %v429_v52, %v386_v49  ;;  %v7393_v25 = vadd.f32 %v430_v55, %v387_v14  ;;  %v7395_v27 = vadd.f32 %v431_v56, %v388_v15  ;;  %v5287_v10 = vld [vmem:[%s14207_s0 + $0x128] sm:$0xff]  ;;  %v5288_v49 = vld [vmem:[%s14207_s0 + $0x130] sm:$0xff]  ;;  %v5289_v14 = vld [vmem:[%s14207_s0 + $0x138] sm:$0xf] }
  0x63   :  { %v452_v20 = vadd.f32 %v432_v58, %v389_v35  ;;  %v453_v21 = vadd.f32 %v433_v53, %v390_v18  ;;  %v454_v19 = vadd.f32 %v434_v54, %v391_v11  ;;  %v455_v28 = vadd.f32 %v435_v59, %v392_v40  ;;  %v5290_v11 = vld [vmem:[%s14207_s0 + $0x280] sm:$0xff]  ;;  %v5291_v40 = vld [vmem:[%s14207_s0 + $0x288] sm:$0xff]  ;;  %v5304_v56 = vld [vmem:[%s14207_s0 + $0x570] sm:$0xf] }
  0x64   :  { %v7412_v15 = vadd.f32 %v436_v60, %v393_v39  ;;  %v7414_v46 = vadd.f32 %v437_v61, %v394_v44  ;;  %v7416_v35 = vadd.f32 %v438_v62, %v395_v16  ;;  %v7418_v18 = vadd.f32 %v439_v63, %v396_v17  ;;  %v5302_v52 = vld [vmem:[%s14207_s0 + $0x560] sm:$0xff]  ;;  %v5303_v55 = vld [vmem:[%s14207_s0 + $0x568] sm:$0xff] }
  0x65   :  { %v7429_v39 = vadd.f32 %v440_v0, %v397_v47  ;;  %v7431_v44 = vadd.f32 %v441_v1, %v398_v29  ;;  %v7433_v16 = vadd.f32 %v442_v2, %v399_v38  ;;  %v7435_v17 = vadd.f32 %v443_v3, %v400_v43 }
  0x66   :  { %v7446_v47 = vadd.f32 %v444_v4, %v401_v42  ;;  %v7448_v29 = vadd.f32 %v445_v5, %v402_v37  ;;  %v7450_v38 = vadd.f32 %v446_v6, %v403_v26  ;;  %v7452_v43 = vadd.f32 %v447_v7, %v404_v34  ;;  %v5299_v42 = vld [vmem:[%s14207_s0 + $0x408] sm:$0xf]  ;;  %v5300_v37 = vld [vmem:[%s14207_s0 + $0x550] sm:$0xff]  ;;  %v5301_v26 = vld [vmem:[%s14207_s0 + $0x558] sm:$0xff] }
  0x67   :  { %v491_v34 = vmul.f32 %v5285_v12, %v7273_v32  ;;  %v492_v31 = vmul.f32 %v5286_v13, %v7273_v32  ;;  %v493_v22 = vmul.f32 %v5287_v10, %v7273_v32  ;;  %v494_v23 = vmul.f32 %v5288_v49, %v7273_v32 }
  0x68   :  { %v495_v48 = vmul.f32 %v5289_v14, %v7273_v32  ;;  %v496_v45 = vmul.f32 %v5290_v11, %v7273_v32  ;;  %v497_v57 = vmul.f32 %v5291_v40, %v7273_v32  ;;  %v498_v58 = vmul.f32 %v5292_v36, %v7273_v32  ;;  %v5311_v11 = vld [vmem:[%s14207_s0 + $0x2a8] sm:$0xff]  ;;  %v5312_v40 = vld [vmem:[%s14207_s0 + $0x2b0] sm:$0xff] }
  0x69   :  { %v499_v53 = vmul.f32 %v5293_v51, %v7273_v32  ;;  %v500_v54 = vmul.f32 %v5294_v24, %v7273_v32  ;;  %v501_v59 = vmul.f32 %v5295_v50, %v7273_v32  ;;  %v502_v60 = vmul.f32 %v5296_v41, %v7273_v32  ;;  %v5314_v51 = vld [vmem:[%s14207_s0 + $0x2c0] sm:$0xff]  ;;  %v5315_v24 = vld [vmem:[%s14207_s0 + $0x2c8] sm:$0xf]  ;;  %v5317_v41 = vld [vmem:[%s14207_s0 + $0x418] sm:$0xff] }
  0x6a   :  { %v503_v61 = vmul.f32 %v5297_v33, %v7273_v32  ;;  %v504_v62 = vmul.f32 %v5298_v30, %v7273_v32  ;;  %v505_v63 = vmul.f32 %v5299_v42, %v7273_v32  ;;  %v506_v0 = vmul.f32 %v5300_v37, %v7273_v32  ;;  %v5318_v33 = vld [vmem:[%s14207_s0 + $0x420] sm:$0xff]  ;;  %v5319_v30 = vld [vmem:[%s14207_s0 + $0x428] sm:$0xff]  ;;  %v5321_v37 = vld [vmem:[%s14207_s0 + $0x578] sm:$0xff] }
  0x6b   :  { %v507_v1 = vmul.f32 %v5301_v26, %v7273_v32  ;;  %v508_v2 = vmul.f32 %v5302_v52, %v7273_v32  ;;  %v509_v3 = vmul.f32 %v5303_v55, %v7273_v32  ;;  %v510_v4 = vmul.f32 %v5304_v56, %v7273_v32  ;;  %v5306_v32 = vld [vmem:[%s14207_s0 + $0x140] sm:$0xff]  ;;  %v5323_v52 = vld [vmem:[%s14207_s0 + $0x588] sm:$0xff]  ;;  %v5324_v55 = vld [vmem:[%s14207_s0 + $0x590] sm:$0xff] }
  0x6c   :  { %v7510_v5 = vadd.f32 %v491_v34, %v7389_v8  ;;  %v7513_v6 = vadd.f32 %v492_v31, %v7391_v9  ;;  %v7516_v7 = vadd.f32 %v493_v22, %v7393_v25  ;;  %v7519_v12 = vadd.f32 %v494_v23, %v7395_v27  ;;  %v5307_v8 = vld [vmem:[%s14207_s0 + $0x148] sm:$0xff]  ;;  %v5308_v9 = vld [vmem:[%s14207_s0 + $0x150] sm:$0xff]  ;;  %v5309_v25 = vld [vmem:[%s14207_s0 + $0x158] sm:$0xff] }
  0x6d   :  { %v7521_v13 = vadd.f32 %v495_v48, %v452_v20  ;;  %v7523_v10 = vadd.f32 %v496_v45, %v453_v21  ;;  %v7525_v49 = vadd.f32 %v497_v57, %v454_v19  ;;  %v7527_v14 = vadd.f32 %v498_v58, %v455_v28  ;;  %v5310_v28 = vld [vmem:[%s14207_s0 + $0x160] sm:$0xf]  ;;  %v5325_v56 = vld [vmem:[%s14207_s0 + $0x598] sm:$0xf] }
  0x6e   :  { %v519_v27 = vadd.f32 %v499_v53, %v7412_v15  ;;  %v520_v20 = vadd.f32 %v500_v54, %v7414_v46  ;;  %v521_v21 = vadd.f32 %v501_v59, %v7416_v35  ;;  %v522_v19 = vadd.f32 %v502_v60, %v7418_v18  ;;  %v5313_v15 = vld [vmem:[%s14207_s0 + $0x2b8] sm:$0xff]  ;;  %v5322_v26 = vld [vmem:[%s14207_s0 + $0x580] sm:$0xff] }
  0x6f   :  { %v523_v46 = vadd.f32 %v503_v61, %v7429_v39  ;;  %v524_v35 = vadd.f32 %v504_v62, %v7431_v44  ;;  %v525_v18 = vadd.f32 %v505_v63, %v7433_v16  ;;  %v526_v36 = vadd.f32 %v506_v0, %v7435_v17  ;;  %v5316_v39 = vld [vmem:[%s14207_s0 + $0x410] sm:$0xff] }
  0x70   :  { %v527_v50 = vadd.f32 %v507_v1, %v7446_v47  ;;  %v528_v44 = vadd.f32 %v508_v2, %v7448_v29  ;;  %v529_v16 = vadd.f32 %v509_v3, %v7450_v38  ;;  %v530_v17 = vadd.f32 %v510_v4, %v7452_v43  ;;  %v5320_v43 = vld [vmem:[%s14207_s0 + $0x430] sm:$0xf] }
  0x71   :  { %v553_v42 = vstv %s7476_s1  ;;  %v7585_v47 = vstv %s7491_s28  ;;  %v7588_v29 = vstv %s7497_s16  ;;  %v7591_v38 = vstv %s7499_s2  ;;  %s7938_s2 = sld [smem:[#allocation3 + $0x201]]  ;;  %s9212_s1 = sld [smem:[#allocation3 + $0x302]] }
  0x72   :  { %v554_v34 = vmul.f32 %v5306_v32, %v553_v42  ;;  %v555_v31 = vmul.f32 %v5307_v8, %v553_v42  ;;  %v556_v22 = vmul.f32 %v5308_v9, %v553_v42  ;;  %v557_v23 = vmul.f32 %v5309_v25, %v553_v42  ;;  %s11660_s16 = sld [smem:[#allocation3 + $0x185]]  ;;  %s13764_s28 = sld [smem:[#allocation3 + $0x407]] }
  0x73   :  { %v558_v48 = vmul.f32 %v5310_v28, %v553_v42  ;;  %v559_v45 = vmul.f32 %v5311_v11, %v553_v42  ;;  %v560_v57 = vmul.f32 %v5312_v40, %v553_v42  ;;  %v561_v58 = vmul.f32 %v5313_v15, %v553_v42 }
  0x74   :  { %v562_v53 = vmul.f32 %v5314_v51, %v553_v42  ;;  %v563_v54 = vmul.f32 %v5315_v24, %v553_v42  ;;  %v564_v59 = vmul.f32 %v5316_v39, %v553_v42  ;;  %v565_v60 = vmul.f32 %v5317_v41, %v553_v42 }
  0x75   :  { %v566_v61 = vmul.f32 %v5318_v33, %v553_v42  ;;  %v567_v62 = vmul.f32 %v5319_v30, %v553_v42  ;;  %v568_v63 = vmul.f32 %v5320_v43, %v553_v42  ;;  %v569_v0 = vmul.f32 %v5321_v37, %v553_v42 }
  0x76   :  { %v570_v1 = vmul.f32 %v5322_v26, %v553_v42  ;;  %v571_v2 = vmul.f32 %v5323_v52, %v553_v42  ;;  %v572_v3 = vmul.f32 %v5324_v55, %v553_v42  ;;  %v573_v4 = vmul.f32 %v5325_v56, %v553_v42 }
  0x77   :  { %v574_v32 = vadd.f32 %v554_v34, %v7510_v5  ;;  %v575_v8 = vadd.f32 %v555_v31, %v7513_v6  ;;  %v576_v9 = vadd.f32 %v556_v22, %v7516_v7  ;;  %v577_v25 = vadd.f32 %v557_v23, %v7519_v12 }
  0x78   :  { %v578_v28 = vadd.f32 %v558_v48, %v7521_v13  ;;  %v579_v11 = vadd.f32 %v559_v45, %v7523_v10  ;;  %v580_v40 = vadd.f32 %v560_v57, %v7525_v49  ;;  %v581_v15 = vadd.f32 %v561_v58, %v7527_v14 }
  0x79   :  { %v582_v51 = vadd.f32 %v562_v53, %v519_v27  ;;  %v583_v24 = vadd.f32 %v563_v54, %v520_v20  ;;  %v584_v39 = vadd.f32 %v564_v59, %v521_v21  ;;  %v585_v41 = vadd.f32 %v565_v60, %v522_v19 }
  0x7a   :  { %v586_v33 = vadd.f32 %v566_v61, %v523_v46  ;;  %v587_v5 = vadd.f32 %v567_v62, %v524_v35  ;;  %v588_v30 = vadd.f32 %v568_v63, %v525_v18  ;;  %v589_v6 = vadd.f32 %v569_v0, %v526_v36 }
  0x7b   :  { %v590_v42 = vadd.f32 %v570_v1, %v527_v50  ;;  %v591_v7 = vadd.f32 %v571_v2, %v528_v44  ;;  %v592_v43 = vadd.f32 %v572_v3, %v529_v16  ;;  %v593_v12 = vadd.f32 %v573_v4, %v530_v17  ;;  %v663_v4 = vld [vmem:[%s14207_s0 + $0x8] sm:$0xff] }
  0x7c   :  { %v596_v13 = vadd.f32 %v7585_v47, %v574_v32  ;;  %v597_v10 = vadd.f32 %v7585_v47, %v575_v8  ;;  %v598_v49 = vadd.f32 %v7585_v47, %v576_v9  ;;  %v599_v14 = vadd.f32 %v7585_v47, %v577_v25  ;;  %v664_v32 = vld [vmem:[%s14207_s0 + $0x10] sm:$0xff] }
  0x7d   :  { %v600_v27 = vadd.f32 %v7585_v47, %v578_v28  ;;  %v601_v20 = vadd.f32 %v7585_v47, %v579_v11  ;;  %v602_v21 = vadd.f32 %v7585_v47, %v580_v40  ;;  %v603_v19 = vadd.f32 %v7585_v47, %v581_v15  ;;  %v665_v11 = vld [vmem:[%s14207_s0 + $0x18] sm:$0xff]  ;;  %v666_v40 = vld [vmem:[%s14207_s0 + $0x20] sm:$0xf]  ;;  %v667_v15 = vld [vmem:[%s14207_s0 + $0x168] sm:$0xff] }
  0x7e   :  { %v604_v46 = vadd.f32 %v7585_v47, %v582_v51  ;;  %v605_v35 = vadd.f32 %v7585_v47, %v583_v24  ;;  %v606_v18 = vadd.f32 %v7585_v47, %v584_v39  ;;  %v607_v36 = vadd.f32 %v7585_v47, %v585_v41 }
  0x7f   :  { %v608_v50 = vadd.f32 %v7585_v47, %v586_v33  ;;  %v609_v44 = vadd.f32 %v7585_v47, %v587_v5  ;;  %v610_v16 = vadd.f32 %v7585_v47, %v588_v30  ;;  %v611_v17 = vadd.f32 %v7585_v47, %v589_v6  ;;  %v668_v33 = vld [vmem:[%s14207_s0 + $0x170] sm:$0xff]  ;;  %v669_v5 = vld [vmem:[%s14207_s0 + $0x178] sm:$0xff]  ;;  %v670_v30 = vld [vmem:[%s14207_s0 + $0x180] sm:$0xff] }
  0x80   :  { %v612_v37 = vadd.f32 %v7585_v47, %v590_v42  ;;  %v613_v26 = vadd.f32 %v7585_v47, %v591_v7  ;;  %v614_v34 = vadd.f32 %v7585_v47, %v592_v43  ;;  %v615_v31 = vadd.f32 %v7585_v47, %v593_v12  ;;  %v662_v47 = vld [vmem:[%s14207_s0] sm:$0xff]  ;;  %v671_v6 = vld [vmem:[%s14207_s0 + $0x188] sm:$0xf] }
  0x81   :  { %v616_v22 = vmax.f32 %v596_v13, 0.0  ;;  %v617_v23 = vmax.f32 %v597_v10, 0.0  ;;  %v618_v52 = vmax.f32 %v598_v49, 0.0  ;;  %v619_v55 = vmax.f32 %v599_v14, 0.0  ;;  %v672_v13 = vld [vmem:[%s14207_s0 + $0x2d0] sm:$0xff]  ;;  %v673_v10 = vld [vmem:[%s14207_s0 + $0x2d8] sm:$0xff] }
  0x82   :  { %v620_v56 = vmax.f32 %v600_v27, 0.0  ;;  %v621_v48 = vmax.f32 %v601_v20, 0.0  ;;  %v622_v45 = vmax.f32 %v602_v21, 0.0  ;;  %v623_v57 = vmax.f32 %v603_v19, 0.0  ;;  %v674_v49 = vld [vmem:[%s14207_s0 + $0x2e0] sm:$0xff]  ;;  %v675_v27 = vld [vmem:[%s14207_s0 + $0x2e8] sm:$0xff] }
  0x83   :  { %v624_v58 = vmax.f32 %v604_v46, 0.0  ;;  %v625_v53 = vmax.f32 %v605_v35, 0.0  ;;  %v626_v54 = vmax.f32 %v606_v18, 0.0  ;;  %v627_v59 = vmax.f32 %v607_v36, 0.0  ;;  %v676_v20 = vld [vmem:[%s14207_s0 + $0x2f0] sm:$0xf] }
  0x84   :  { %v628_v60 = vmax.f32 %v608_v50, 0.0  ;;  %v629_v61 = vmax.f32 %v609_v44, 0.0  ;;  %v630_v62 = vmax.f32 %v610_v16, 0.0  ;;  %v631_v63 = vmax.f32 %v611_v17, 0.0  ;;  %v677_v21 = vld [vmem:[%s14207_s0 + $0x438] sm:$0xff]  ;;  %v678_v16 = vld [vmem:[%s14207_s0 + $0x440] sm:$0xff] }
  0x85   :  { %v632_v0 = vmax.f32 %v612_v37, 0.0  ;;  %v633_v1 = vmax.f32 %v613_v26, 0.0  ;;  %v634_v2 = vmax.f32 %v614_v34, 0.0  ;;  %v635_v3 = vmax.f32 %v615_v31, 0.0  ;;  %v679_v17 = vld [vmem:[%s14207_s0 + $0x448] sm:$0xff]  ;;  %v680_v37 = vld [vmem:[%s14207_s0 + $0x450] sm:$0xff] }
  0x86   :  { %v636_v8 = vmax.f32 %v616_v22, %v621_v48  ;;  %v639_v9 = vmax.f32 %v617_v23, %v622_v45  ;;  %v642_v25 = vmax.f32 %v618_v52, %v623_v57  ;;  %v645_v28 = vmax.f32 %v619_v55, %v624_v58  ;;  %v681_v34 = vld [vmem:[%s14207_s0 + $0x458] sm:$0xf]  ;;  %v5328_v52 = vld [vmem:[%s14207_s0 + $0x28] sm:$0xff]  ;;  %v5329_v55 = vld [vmem:[%s14207_s0 + $0x30] sm:$0xff] }
  0x87   :  { %v649_v51 = vsel %vm648_vm0, %v620_v56, -inf  ;;  %v650_v24 = vsel %vm648_vm0, %v625_v53, -inf  ;;  %v652_v39 = vsel %vm648_vm0, %v630_v62, -inf  ;;  %v654_v41 = vsel %vm648_vm0, %v635_v3, -inf  ;;  %v5330_v58 = vld [vmem:[%s14207_s0 + $0x38] sm:$0xff]  ;;  %v5331_v53 = vld [vmem:[%s14207_s0 + $0x40] sm:$0xff] }
  0x88   :  { %v637_v42 = vmax.f32 %v636_v8, %v626_v54  ;;  %v640_v7 = vmax.f32 %v639_v9, %v627_v59  ;;  %v643_v43 = vmax.f32 %v642_v25, %v628_v60  ;;  %v646_v12 = vmax.f32 %v645_v28, %v629_v61  ;;  %v5332_v54 = vld [vmem:[%s14207_s0 + $0x48] sm:$0xf]  ;;  %v5337_v8 = vld [vmem:[%s14207_s0 + $0x1b0] sm:$0xf]  ;;  %v5338_v9 = vld [vmem:[%s14207_s0 + $0x2f8] sm:$0xff] }
  0x89   :  { %v651_v14 = vmax.f32 %v649_v51, %v650_v24  ;;  %v7692_v19 = vmul.f32 %v7588_v29, %v662_v47  ;;  %v7695_v46 = vmul.f32 %v7588_v29, %v663_v4  ;;  %v7698_v35 = vmul.f32 %v7588_v29, %v664_v32  ;;  %v5334_v47 = vld [vmem:[%s14207_s0 + $0x198] sm:$0xff]  ;;  %v5336_v32 = vld [vmem:[%s14207_s0 + $0x1a8] sm:$0xff]  ;;  %v5341_v51 = vld [vmem:[%s14207_s0 + $0x310] sm:$0xff] }
  0x8a   :  { %v638_v18 = vmax.f32 %v637_v42, %v631_v63  ;;  %v641_v36 = vmax.f32 %v640_v7, %v632_v0  ;;  %v644_v50 = vmax.f32 %v643_v43, %v633_v1  ;;  %v647_v44 = vmax.f32 %v646_v12, %v634_v2  ;;  %v5333_v63 = vld [vmem:[%s14207_s0 + $0x190] sm:$0xff]  ;;  %v5335_v0 = vld [vmem:[%s14207_s0 + $0x1a0] sm:$0xff]  ;;  %v5346_v7 = vld [vmem:[%s14207_s0 + $0x478] sm:$0xff] }
  0x8b   :  { %v653_v26 = vmax.f32 %v651_v14, %v652_v39  ;;  %v7713_v31 = vmul.f32 %v7588_v29, %v665_v11  ;;  %v7716_v22 = vmul.f32 %v7588_v29, %v666_v40  ;;  %v7719_v23 = vmul.f32 %v7588_v29, %v667_v15  ;;  %v5339_v40 = vld [vmem:[%s14207_s0 + $0x300] sm:$0xff]  ;;  %v5340_v15 = vld [vmem:[%s14207_s0 + $0x308] sm:$0xff]  ;;  %v5342_v39 = vld [vmem:[%s14207_s0 + $0x318] sm:$0xf] }
  0x8c   :  { %656 = vst [vmem:[#allocation2] sm:$0xff] %v638_v18  ;;  %657 = vst [vmem:[#allocation2 + $0x8] sm:$0xff] %v641_v36  ;;  %v7728_v56 = vmul.f32 %v7588_v29, %v668_v33  ;;  %v7731_v48 = vmul.f32 %v7588_v29, %v669_v5  ;;  %v7734_v45 = vmul.f32 %v7588_v29, %v670_v30  ;;  %v5345_v42 = vld [vmem:[%s14207_s0 + $0x470] sm:$0xff]  ;;  %v5347_v43 = vld [vmem:[%s14207_s0 + $0x480] sm:$0xf]  ;;  %vm5112_vm2 = vcmask 1041408  }
  0x8d   :  { %658 = vst [vmem:[#allocation2 + $0x10] sm:$0xff] %v644_v50  ;;  %659 = vst [vmem:[#allocation2 + $0x18] sm:$0xff] %v647_v44  ;;  %v7737_v57 = vmul.f32 %v7588_v29, %v671_v6  ;;  %v655_v59 = vmax.f32 %v653_v26, %v654_v41  ;;  %v694_v60 = vmul.f32 %v7588_v29, %v672_v13  ;;  %v5344_v41 = vld [vmem:[%s14207_s0 + $0x468] sm:$0xff] }
  0x8e   :  { %v695_v61 = vmul.f32 %v7588_v29, %v673_v10  ;;  %v696_v62 = vmul.f32 %v7588_v29, %v674_v49  ;;  %v697_v1 = vmul.f32 %v7588_v29, %v675_v27  ;;  %v698_v2 = vmul.f32 %v7588_v29, %v676_v20 }
  0x8f   :  { %v699_v3 = vmul.f32 %v7588_v29, %v677_v21  ;;  %v700_v4 = vmul.f32 %v7588_v29, %v678_v16  ;;  %660 = vst [vmem:[#allocation2 + $0x20] sm:$0xf] %v655_v59  ;;  %v701_v25 = vmul.f32 %v7588_v29, %v679_v17  ;;  %v702_v28 = vmul.f32 %v7588_v29, %v680_v37 }
  0x90   :  { %v703_v11 = vmul.f32 %v7588_v29, %v681_v34  ;;  %v726_v24 = vmul.f32 %v5328_v52, %v7591_v38  ;;  %v5343_v29 = vld [vmem:[%s14207_s0 + $0x460] sm:$0xff]  ;;  %v727_v33 = vmul.f32 %v5329_v55, %v7591_v38  ;;  %v728_v5 = vmul.f32 %v5330_v58, %v7591_v38 }
  0x91   :  { %v729_v30 = vmul.f32 %v5331_v53, %v7591_v38  ;;  %v730_v6 = vmul.f32 %v5332_v54, %v7591_v38  ;;  %v731_v12 = vmul.f32 %v5333_v63, %v7591_v38  ;;  %v732_v13 = vmul.f32 %v5334_v47, %v7591_v38  ;;  %v5349_v53 = vld [vmem:[%s14207_s0 + $0x50] sm:$0xff]  ;;  %v5352_v54 = vld [vmem:[%s14207_s0 + $0x68] sm:$0xff]  ;;  %v5354_v63 = vld [vmem:[%s14207_s0 + $0x1b8] sm:$0xff] }
  0x92   :  { %v733_v10 = vmul.f32 %v5335_v0, %v7591_v38  ;;  %v734_v49 = vmul.f32 %v5336_v32, %v7591_v38  ;;  %v735_v14 = vmul.f32 %v5337_v8, %v7591_v38  ;;  %v736_v27 = vmul.f32 %v5338_v9, %v7591_v38  ;;  %v5355_v47 = vld [vmem:[%s14207_s0 + $0x1c0] sm:$0xff]  ;;  %v5357_v32 = vld [vmem:[%s14207_s0 + $0x1d0] sm:$0xff]  ;;  %v5358_v8 = vld [vmem:[%s14207_s0 + $0x1d8] sm:$0xf] }
  0x93   :  { %v737_v20 = vmul.f32 %v5339_v40, %v7591_v38  ;;  %v738_v21 = vmul.f32 %v5340_v15, %v7591_v38  ;;  %v739_v18 = vmul.f32 %v5341_v51, %v7591_v38  ;;  %v740_v36 = vmul.f32 %v5342_v39, %v7591_v38  ;;  %v5359_v9 = vld [vmem:[%s14207_s0 + $0x320] sm:$0xff]  ;;  %v5361_v40 = vld [vmem:[%s14207_s0 + $0x330] sm:$0xff]  ;;  %v5362_v15 = vld [vmem:[%s14207_s0 + $0x338] sm:$0xff] }
  0x94   :  { %v741_v50 = vmul.f32 %v5343_v29, %v7591_v38  ;;  %v742_v44 = vmul.f32 %v5344_v41, %v7591_v38  ;;  %v743_v16 = vmul.f32 %v5345_v42, %v7591_v38  ;;  %v744_v17 = vmul.f32 %v5346_v7, %v7591_v38 }
  0x95   :  { %v745_v37 = vmul.f32 %v5347_v43, %v7591_v38  ;;  %v7826_v26 = vadd.f32 %v726_v24, %v7692_v19  ;;  %v7829_v34 = vadd.f32 %v727_v33, %v7695_v46  ;;  %v7832_v52 = vadd.f32 %v728_v5, %v7698_v35  ;;  %v5350_v38 = vld [vmem:[%s14207_s0 + $0x58] sm:$0xff]  ;;  %v5367_v5 = vld [vmem:[%s14207_s0 + $0x4a0] sm:$0xff] }
  0x96   :  { %v7835_v55 = vadd.f32 %v729_v30, %v7713_v31  ;;  %v7838_v58 = vadd.f32 %v730_v6, %v7716_v22  ;;  %v7847_v19 = vadd.f32 %v731_v12, %v7719_v23  ;;  %v7850_v46 = vadd.f32 %v732_v13, %v7728_v56  ;;  %v5351_v22 = vld [vmem:[%s14207_s0 + $0x60] sm:$0xff]  ;;  %v5353_v23 = vld [vmem:[%s14207_s0 + $0x70] sm:$0xf]  ;;  %v5366_v33 = vld [vmem:[%s14207_s0 + $0x498] sm:$0xff] }
  0x97   :  { %v7853_v35 = vadd.f32 %v733_v10, %v7731_v48  ;;  %v7856_v31 = vadd.f32 %v734_v49, %v7734_v45  ;;  %v7868_v56 = vadd.f32 %v735_v14, %v7737_v57  ;;  %v7870_v48 = vadd.f32 %v736_v27, %v694_v60  ;;  %v5356_v57 = vld [vmem:[%s14207_s0 + $0x1c8] sm:$0xff] }
  0x98   :  { %v7872_v59 = vadd.f32 %v737_v20, %v695_v61  ;;  %v7874_v45 = vadd.f32 %v738_v21, %v696_v62  ;;  %v7885_v0 = vadd.f32 %v739_v18, %v697_v1  ;;  %v7887_v60 = vadd.f32 %v740_v36, %v698_v2  ;;  %v5368_v30 = vld [vmem:[%s14207_s0 + $0x4a8] sm:$0xf] }
  0x99   :  { %v7889_v61 = vadd.f32 %v741_v50, %v699_v3  ;;  %v7891_v62 = vadd.f32 %v742_v44, %v700_v4  ;;  %v7902_v1 = vadd.f32 %v743_v16, %v701_v25  ;;  %v7904_v2 = vadd.f32 %v744_v17, %v702_v28  ;;  %v5360_v4 = vld [vmem:[%s14207_s0 + $0x328] sm:$0xff]  ;;  %v5363_v25 = vld [vmem:[%s14207_s0 + $0x340] sm:$0xf] }
  0x9a   :  { %v7906_v3 = vadd.f32 %v745_v37, %v703_v11  ;;  %v787_v51 = vstv %s7812_s13  ;;  %v5364_v28 = vld [vmem:[%s14207_s0 + $0x488] sm:$0xff]  ;;  %v5365_v11 = vld [vmem:[%s14207_s0 + $0x490] sm:$0xff]  ;;  %s12105_s13 = sld [smem:[#allocation3 + $0x6]] }
  0x9b   :  { %v788_v24 = vmul.f32 %v5349_v53, %v787_v51  ;;  %v789_v39 = vmul.f32 %v5350_v38, %v787_v51  ;;  %v790_v29 = vmul.f32 %v5351_v22, %v787_v51  ;;  %v791_v41 = vmul.f32 %v5352_v54, %v787_v51 }
  0x9c   :  { %v792_v6 = vmul.f32 %v5353_v23, %v787_v51  ;;  %v793_v42 = vmul.f32 %v5354_v63, %v787_v51  ;;  %v794_v7 = vmul.f32 %v5355_v47, %v787_v51  ;;  %v795_v43 = vmul.f32 %v5356_v57, %v787_v51  ;;  %v5374_v63 = vld [vmem:[%s14207_s0 + $0x98] sm:$0xf]  ;;  %v5375_v47 = vld [vmem:[%s14207_s0 + $0x1e0] sm:$0xff] }
  0x9d   :  { %v796_v12 = vmul.f32 %v5357_v32, %v787_v51  ;;  %v797_v13 = vmul.f32 %v5358_v8, %v787_v51  ;;  %v798_v10 = vmul.f32 %v5359_v9, %v787_v51  ;;  %v799_v49 = vmul.f32 %v5360_v4, %v787_v51  ;;  %v5378_v8 = vld [vmem:[%s14207_s0 + $0x1f8] sm:$0xff] }
  0x9e   :  { %v800_v14 = vmul.f32 %v5361_v40, %v787_v51  ;;  %v801_v27 = vmul.f32 %v5362_v15, %v787_v51  ;;  %v802_v20 = vmul.f32 %v5363_v25, %v787_v51  ;;  %v803_v21 = vmul.f32 %v5364_v28, %v787_v51  ;;  %v5381_v40 = vld [vmem:[%s14207_s0 + $0x350] sm:$0xff]  ;;  %v5382_v15 = vld [vmem:[%s14207_s0 + $0x358] sm:$0xff] }
  0x9f   :  { %v804_v18 = vmul.f32 %v5365_v11, %v787_v51  ;;  %v805_v36 = vmul.f32 %v5366_v33, %v787_v51  ;;  %v806_v50 = vmul.f32 %v5367_v5, %v787_v51  ;;  %v807_v44 = vmul.f32 %v5368_v30, %v787_v51  ;;  %v5385_v28 = vld [vmem:[%s14207_s0 + $0x4b0] sm:$0xff]  ;;  %v5386_v11 = vld [vmem:[%s14207_s0 + $0x4b8] sm:$0xff]  ;;  %v5387_v33 = vld [vmem:[%s14207_s0 + $0x4c0] sm:$0xff] }
  0xa0   :  { %v7945_v16 = vadd.f32 %v788_v24, %v7826_v26  ;;  %v7948_v17 = vadd.f32 %v789_v39, %v7829_v34  ;;  %v7951_v37 = vadd.f32 %v790_v29, %v7832_v52  ;;  %v7954_v53 = vadd.f32 %v791_v41, %v7835_v55  ;;  %v5370_v34 = vld [vmem:[%s14207_s0 + $0x78] sm:$0xff]  ;;  %v5371_v52 = vld [vmem:[%s14207_s0 + $0x80] sm:$0xff]  ;;  %v5372_v55 = vld [vmem:[%s14207_s0 + $0x88] sm:$0xff] }
  0xa1   :  { %v7957_v38 = vadd.f32 %v792_v6, %v7838_v58  ;;  %v7960_v22 = vadd.f32 %v793_v42, %v7847_v19  ;;  %v7963_v54 = vadd.f32 %v794_v7, %v7850_v46  ;;  %v7966_v26 = vadd.f32 %v795_v43, %v7853_v35  ;;  %v5373_v58 = vld [vmem:[%s14207_s0 + $0x90] sm:$0xff]  ;;  %v5388_v5 = vld [vmem:[%s14207_s0 + $0x4c8] sm:$0xff] }
  0xa2   :  { %v7981_v19 = vadd.f32 %v796_v12, %v7856_v31  ;;  %v7984_v46 = vadd.f32 %v797_v13, %v7868_v56  ;;  %v7987_v35 = vadd.f32 %v798_v10, %v7870_v48  ;;  %v7990_v23 = vadd.f32 %v799_v49, %v7872_v59  ;;  %v5376_v31 = vld [vmem:[%s14207_s0 + $0x1e8] sm:$0xff]  ;;  %v5377_v56 = vld [vmem:[%s14207_s0 + $0x1f0] sm:$0xff] }
  0xa3   :  { %v8005_v48 = vadd.f32 %v800_v14, %v7874_v45  ;;  %v8008_v59 = vadd.f32 %v801_v27, %v7885_v0  ;;  %v8011_v57 = vadd.f32 %v802_v20, %v7887_v60  ;;  %v8014_v32 = vadd.f32 %v803_v21, %v7889_v61  ;;  %v5379_v45 = vld [vmem:[%s14207_s0 + $0x200] sm:$0xf]  ;;  %v5380_v0 = vld [vmem:[%s14207_s0 + $0x348] sm:$0xff]  ;;  %v5389_v30 = vld [vmem:[%s14207_s0 + $0x4d0] sm:$0xf] }
  0xa4   :  { %v8026_v9 = vadd.f32 %v804_v18, %v7891_v62  ;;  %v8029_v60 = vadd.f32 %v805_v36, %v7902_v1  ;;  %v8032_v61 = vadd.f32 %v806_v50, %v7904_v2  ;;  %v8035_v4 = vadd.f32 %v807_v44, %v7906_v3  ;;  %v5383_v62 = vld [vmem:[%s14207_s0 + $0x360] sm:$0xff]  ;;  %v5384_v3 = vld [vmem:[%s14207_s0 + $0x368] sm:$0xf] }
  0xa5   :  { %v849_v1 = vstv %s7927_s12  ;;  %v8048_v51 = vstv %s7938_s2  ;;  %v8051_v2 = vstv %s7940_s24  ;;  %v8054_v25 = vstv %s7942_s25  ;;  %s8356_s24 = sld [smem:[#allocation3 + $0x401]]  ;;  %s10006_s2 = sld [smem:[#allocation3 + $0x303]] }
  0xa6   :  { %v850_v24 = vmul.f32 %v5370_v34, %v849_v1  ;;  %v851_v39 = vmul.f32 %v5371_v52, %v849_v1  ;;  %v852_v29 = vmul.f32 %v5372_v55, %v849_v1  ;;  %v853_v41 = vmul.f32 %v5373_v58, %v849_v1  ;;  %s8362_s25 = sld [smem:[#allocation6 + $0x1]]  ;;  %s10807_s12 = sld [smem:[#allocation3 + $0x204]] }
  0xa7   :  { %v854_v6 = vmul.f32 %v5374_v63, %v849_v1  ;;  %v855_v42 = vmul.f32 %v5375_v47, %v849_v1  ;;  %v856_v7 = vmul.f32 %v5376_v31, %v849_v1  ;;  %v857_v43 = vmul.f32 %v5377_v56, %v849_v1  ;;  %v5391_v63 = vld [vmem:[%s14207_s0 + $0xa0] sm:$0xff]  ;;  %v5392_v47 = vld [vmem:[%s14207_s0 + $0xa8] sm:$0xff] }
  0xa8   :  { %v858_v12 = vmul.f32 %v5378_v8, %v849_v1  ;;  %v859_v13 = vmul.f32 %v5379_v45, %v849_v1  ;;  %v860_v10 = vmul.f32 %v5380_v0, %v849_v1  ;;  %v861_v49 = vmul.f32 %v5381_v40, %v849_v1  ;;  %v5395_v8 = vld [vmem:[%s14207_s0 + $0xc0] sm:$0xf]  ;;  %v5396_v45 = vld [vmem:[%s14207_s0 + $0x208] sm:$0xff]  ;;  %v5397_v0 = vld [vmem:[%s14207_s0 + $0x210] sm:$0xff] }
  0xa9   :  { %v862_v14 = vmul.f32 %v5382_v15, %v849_v1  ;;  %v863_v27 = vmul.f32 %v5383_v62, %v849_v1  ;;  %v864_v20 = vmul.f32 %v5384_v3, %v849_v1  ;;  %v865_v21 = vmul.f32 %v5385_v28, %v849_v1  ;;  %v5398_v40 = vld [vmem:[%s14207_s0 + $0x218] sm:$0xff]  ;;  %v5399_v15 = vld [vmem:[%s14207_s0 + $0x220] sm:$0xff]  ;;  %v5400_v62 = vld [vmem:[%s14207_s0 + $0x228] sm:$0xf] }
  0xaa   :  { %v866_v18 = vmul.f32 %v5386_v11, %v849_v1  ;;  %v867_v36 = vmul.f32 %v5387_v33, %v849_v1  ;;  %v868_v50 = vmul.f32 %v5388_v5, %v849_v1  ;;  %v869_v44 = vmul.f32 %v5389_v30, %v849_v1  ;;  %v5401_v1 = vld [vmem:[%s14207_s0 + $0x370] sm:$0xff]  ;;  %v5402_v3 = vld [vmem:[%s14207_s0 + $0x378] sm:$0xff]  ;;  %v5403_v28 = vld [vmem:[%s14207_s0 + $0x380] sm:$0xff] }
  0xab   :  { %v870_v34 = vadd.f32 %v850_v24, %v7945_v16  ;;  %v871_v52 = vadd.f32 %v851_v39, %v7948_v17  ;;  %v872_v55 = vadd.f32 %v852_v29, %v7951_v37  ;;  %v873_v58 = vadd.f32 %v853_v41, %v7954_v53  ;;  %v5393_v37 = vld [vmem:[%s14207_s0 + $0xb0] sm:$0xff]  ;;  %v5394_v53 = vld [vmem:[%s14207_s0 + $0xb8] sm:$0xff]  ;;  %v5404_v11 = vld [vmem:[%s14207_s0 + $0x388] sm:$0xff] }
  0xac   :  { %v874_v31 = vadd.f32 %v854_v6, %v7957_v38  ;;  %v875_v56 = vadd.f32 %v855_v42, %v7960_v22  ;;  %v876_v16 = vadd.f32 %v856_v7, %v7963_v54  ;;  %v877_v17 = vadd.f32 %v857_v43, %v7966_v26  ;;  %v5408_v41 = vld [vmem:[%s14207_s0 + $0x4e8] sm:$0xff]  ;;  %v5409_v33 = vld [vmem:[%s14207_s0 + $0x4f0] sm:$0xff]  ;;  %v5410_v5 = vld [vmem:[%s14207_s0 + $0x4f8] sm:$0xf] }
  0xad   :  { %v878_v38 = vadd.f32 %v858_v12, %v7981_v19  ;;  %v879_v22 = vadd.f32 %v859_v13, %v7984_v46  ;;  %v880_v54 = vadd.f32 %v860_v10, %v7987_v35  ;;  %v881_v26 = vadd.f32 %v861_v49, %v7990_v23 }
  0xae   :  { %v882_v19 = vadd.f32 %v862_v14, %v8005_v48  ;;  %v883_v46 = vadd.f32 %v863_v27, %v8008_v59  ;;  %v884_v35 = vadd.f32 %v864_v20, %v8011_v57  ;;  %v885_v23 = vadd.f32 %v865_v21, %v8014_v32 }
  0xaf   :  { %v886_v48 = vadd.f32 %v866_v18, %v8026_v9  ;;  %v887_v59 = vadd.f32 %v867_v36, %v8029_v60  ;;  %v888_v57 = vadd.f32 %v868_v50, %v8032_v61  ;;  %v889_v32 = vadd.f32 %v869_v44, %v8035_v4  ;;  %v5405_v9 = vld [vmem:[%s14207_s0 + $0x390] sm:$0xf]  ;;  %v5406_v60 = vld [vmem:[%s14207_s0 + $0x4d8] sm:$0xff]  ;;  %v5407_v61 = vld [vmem:[%s14207_s0 + $0x4e0] sm:$0xff] }
  0xb0   :  { %v912_v4 = vmul.f32 %v5391_v63, %v8048_v51  ;;  %v913_v24 = vmul.f32 %v5392_v47, %v8048_v51  ;;  %v914_v39 = vmul.f32 %v5393_v37, %v8048_v51  ;;  %v915_v29 = vmul.f32 %v5394_v53, %v8048_v51  ;;  %v5412_v53 = vld [vmem:[%s14207_s0 + $0xc8] sm:$0xff] }
  0xb1   :  { %v916_v30 = vmul.f32 %v5395_v8, %v8048_v51  ;;  %v917_v6 = vmul.f32 %v5396_v45, %v8048_v51  ;;  %v918_v42 = vmul.f32 %v5397_v0, %v8048_v51  ;;  %v919_v7 = vmul.f32 %v5398_v40, %v8048_v51  ;;  %v5413_v8 = vld [vmem:[%s14207_s0 + $0xd0] sm:$0xff] }
  0xb2   :  { %v920_v43 = vmul.f32 %v5399_v15, %v8048_v51  ;;  %v921_v12 = vmul.f32 %v5400_v62, %v8048_v51  ;;  %v922_v13 = vmul.f32 %v5401_v1, %v8048_v51  ;;  %v923_v10 = vmul.f32 %v5402_v3, %v8048_v51 }
  0xb3   :  { %v924_v49 = vmul.f32 %v5403_v28, %v8048_v51  ;;  %v925_v14 = vmul.f32 %v5404_v11, %v8048_v51  ;;  %v926_v27 = vmul.f32 %v5405_v9, %v8048_v51  ;;  %v927_v20 = vmul.f32 %v5406_v60, %v8048_v51 }
  0xb4   :  { %v928_v21 = vmul.f32 %v5407_v61, %v8048_v51  ;;  %v929_v18 = vmul.f32 %v5408_v41, %v8048_v51  ;;  %v930_v36 = vmul.f32 %v5409_v33, %v8048_v51  ;;  %v931_v50 = vmul.f32 %v5410_v5, %v8048_v51  ;;  %v5414_v51 = vld [vmem:[%s14207_s0 + $0xd8] sm:$0xff]  ;;  %v5431_v41 = vld [vmem:[%s14207_s0 + $0x520] sm:$0xf] }
  0xb5   :  { %v932_v44 = vadd.f32 %v912_v4, %v870_v34  ;;  %v933_v63 = vadd.f32 %v913_v24, %v871_v52  ;;  %v934_v47 = vadd.f32 %v914_v39, %v872_v55  ;;  %v935_v37 = vadd.f32 %v915_v29, %v873_v58  ;;  %v5415_v34 = vld [vmem:[%s14207_s0 + $0xe0] sm:$0xff]  ;;  %v5416_v52 = vld [vmem:[%s14207_s0 + $0xe8] sm:$0xf]  ;;  %v5429_v39 = vld [vmem:[%s14207_s0 + $0x510] sm:$0xff] }
  0xb6   :  { %v936_v45 = vadd.f32 %v916_v30, %v874_v31  ;;  %v937_v0 = vadd.f32 %v917_v6, %v875_v56  ;;  %v938_v40 = vadd.f32 %v918_v42, %v876_v16  ;;  %v939_v15 = vadd.f32 %v919_v7, %v877_v17  ;;  %v5417_v31 = vld [vmem:[%s14207_s0 + $0x230] sm:$0xff]  ;;  %v5418_v56 = vld [vmem:[%s14207_s0 + $0x238] sm:$0xff]  ;;  %v5419_v16 = vld [vmem:[%s14207_s0 + $0x240] sm:$0xff] }
  0xb7   :  { %v940_v55 = vadd.f32 %v920_v43, %v878_v38  ;;  %v941_v58 = vadd.f32 %v921_v12, %v879_v22  ;;  %v942_v62 = vadd.f32 %v922_v13, %v880_v54  ;;  %v943_v1 = vadd.f32 %v923_v10, %v881_v26  ;;  %v5420_v38 = vld [vmem:[%s14207_s0 + $0x248] sm:$0xff]  ;;  %v5421_v22 = vld [vmem:[%s14207_s0 + $0x250] sm:$0xf]  ;;  %v5422_v54 = vld [vmem:[%s14207_s0 + $0x398] sm:$0xff] }
  0xb8   :  { %v944_v17 = vadd.f32 %v924_v49, %v882_v19  ;;  %v945_v3 = vadd.f32 %v925_v14, %v883_v46  ;;  %v946_v28 = vadd.f32 %v926_v27, %v884_v35  ;;  %v947_v11 = vadd.f32 %v927_v20, %v885_v23  ;;  %v5423_v19 = vld [vmem:[%s14207_s0 + $0x3a0] sm:$0xff]  ;;  %v5424_v46 = vld [vmem:[%s14207_s0 + $0x3a8] sm:$0xff]  ;;  %v5425_v35 = vld [vmem:[%s14207_s0 + $0x3b0] sm:$0xff] }
  0xb9   :  { %v948_v26 = vadd.f32 %v928_v21, %v886_v48  ;;  %v949_v9 = vadd.f32 %v929_v18, %v887_v59  ;;  %v950_v60 = vadd.f32 %v930_v36, %v888_v57  ;;  %v951_v61 = vadd.f32 %v931_v50, %v889_v32  ;;  %v5426_v23 = vld [vmem:[%s14207_s0 + $0x3b8] sm:$0xf]  ;;  %v5427_v48 = vld [vmem:[%s14207_s0 + $0x500] sm:$0xff]  ;;  %v5428_v59 = vld [vmem:[%s14207_s0 + $0x508] sm:$0xff] }
  0xba   :  { %v974_v57 = vmul.f32 %v5412_v53, %v8051_v2  ;;  %v975_v32 = vmul.f32 %v5413_v8, %v8051_v2  ;;  %v976_v4 = vmul.f32 %v5414_v51, %v8051_v2  ;;  %v977_v24 = vmul.f32 %v5415_v34, %v8051_v2  ;;  %v5430_v29 = vld [vmem:[%s14207_s0 + $0x518] sm:$0xff]  ;;  %v5433_v51 = vld [vmem:[%s14207_s0 + $0xf0] sm:$0xff] }
  0xbb   :  { %v978_v33 = vmul.f32 %v5416_v52, %v8051_v2  ;;  %v979_v5 = vmul.f32 %v5417_v31, %v8051_v2  ;;  %v980_v30 = vmul.f32 %v5418_v56, %v8051_v2  ;;  %v981_v6 = vmul.f32 %v5419_v16, %v8051_v2  ;;  %v5434_v34 = vld [vmem:[%s14207_s0 + $0xf8] sm:$0xff] }
  0xbc   :  { %v982_v42 = vmul.f32 %v5420_v38, %v8051_v2  ;;  %v983_v7 = vmul.f32 %v5421_v22, %v8051_v2  ;;  %v984_v43 = vmul.f32 %v5422_v54, %v8051_v2  ;;  %v985_v12 = vmul.f32 %v5423_v19, %v8051_v2  ;;  %v5440_v38 = vld [vmem:[%s14207_s0 + $0x268] sm:$0xff]  ;;  %v5441_v22 = vld [vmem:[%s14207_s0 + $0x270] sm:$0xff]  ;;  %v5442_v54 = vld [vmem:[%s14207_s0 + $0x278] sm:$0xf] }
  0xbd   :  { %v986_v13 = vmul.f32 %v5424_v46, %v8051_v2  ;;  %v987_v10 = vmul.f32 %v5425_v35, %v8051_v2  ;;  %v988_v49 = vmul.f32 %v5426_v23, %v8051_v2  ;;  %v989_v14 = vmul.f32 %v5427_v48, %v8051_v2  ;;  %v5443_v19 = vld [vmem:[%s14207_s0 + $0x3c0] sm:$0xff]  ;;  %v5444_v46 = vld [vmem:[%s14207_s0 + $0x3c8] sm:$0xff]  ;;  %v5445_v35 = vld [vmem:[%s14207_s0 + $0x3d0] sm:$0xff] }
  0xbe   :  { %v990_v27 = vmul.f32 %v5428_v59, %v8051_v2  ;;  %v991_v20 = vmul.f32 %v5429_v39, %v8051_v2  ;;  %v992_v21 = vmul.f32 %v5430_v29, %v8051_v2  ;;  %v993_v18 = vmul.f32 %v5431_v41, %v8051_v2  ;;  %v5446_v23 = vld [vmem:[%s14207_s0 + $0x3d8] sm:$0xff] }
  0xbf   :  { %v8254_v36 = vadd.f32 %v974_v57, %v932_v44  ;;  %v8256_v50 = vadd.f32 %v975_v32, %v933_v63  ;;  %v8258_v53 = vadd.f32 %v976_v4, %v934_v47  ;;  %v8260_v8 = vadd.f32 %v977_v24, %v935_v37  ;;  %v5435_v44 = vld [vmem:[%s14207_s0 + $0x100] sm:$0xff]  ;;  %v5436_v63 = vld [vmem:[%s14207_s0 + $0x108] sm:$0xff]  ;;  %v5437_v47 = vld [vmem:[%s14207_s0 + $0x110] sm:$0xf] }
  0xc0   :  { %v998_v52 = vadd.f32 %v978_v33, %v936_v45  ;;  %v999_v31 = vadd.f32 %v979_v5, %v937_v0  ;;  %v1000_v56 = vadd.f32 %v980_v30, %v938_v40  ;;  %v1001_v2 = vadd.f32 %v981_v6, %v939_v15  ;;  %v5438_v40 = vld [vmem:[%s14207_s0 + $0x258] sm:$0xff]  ;;  %v5439_v15 = vld [vmem:[%s14207_s0 + $0x260] sm:$0xff]  ;;  %v5452_v24 = vld [vmem:[%s14207_s0 + $0x548] sm:$0xf] }
  0xc1   :  { %v8277_v37 = vadd.f32 %v982_v42, %v940_v55  ;;  %v8279_v16 = vadd.f32 %v983_v7, %v941_v58  ;;  %v8281_v45 = vadd.f32 %v984_v43, %v942_v62  ;;  %v8283_v0 = vadd.f32 %v985_v12, %v943_v1  ;;  %v5450_v32 = vld [vmem:[%s14207_s0 + $0x538] sm:$0xff]  ;;  %v5451_v4 = vld [vmem:[%s14207_s0 + $0x540] sm:$0xff] }
  0xc2   :  { %v8294_v55 = vadd.f32 %v986_v13, %v944_v17  ;;  %v8296_v58 = vadd.f32 %v987_v10, %v945_v3  ;;  %v8298_v62 = vadd.f32 %v988_v49, %v946_v28  ;;  %v8300_v1 = vadd.f32 %v989_v14, %v947_v11 }
  0xc3   :  { %v8311_v17 = vadd.f32 %v990_v27, %v948_v26  ;;  %v8313_v3 = vadd.f32 %v991_v20, %v949_v9  ;;  %v8315_v28 = vadd.f32 %v992_v21, %v950_v60  ;;  %v8317_v11 = vadd.f32 %v993_v18, %v951_v61  ;;  %v5447_v26 = vld [vmem:[%s14207_s0 + $0x3e0] sm:$0xf]  ;;  %v5448_v9 = vld [vmem:[%s14207_s0 + $0x528] sm:$0xff]  ;;  %v5449_v60 = vld [vmem:[%s14207_s0 + $0x530] sm:$0xff] }
  0xc4   :  { %v1036_v61 = vmul.f32 %v5433_v51, %v8054_v25  ;;  %v1037_v48 = vmul.f32 %v5434_v34, %v8054_v25  ;;  %v1038_v59 = vmul.f32 %v5435_v44, %v8054_v25  ;;  %v1039_v57 = vmul.f32 %v5436_v63, %v8054_v25 }
  0xc5   :  { %v1040_v39 = vmul.f32 %v5437_v47, %v8054_v25  ;;  %v1041_v29 = vmul.f32 %v5438_v40, %v8054_v25  ;;  %v1042_v41 = vmul.f32 %v5439_v15, %v8054_v25  ;;  %v1043_v33 = vmul.f32 %v5440_v38, %v8054_v25  ;;  %v5459_v40 = vld [vmem:[%s14207_s0 + $0x280] sm:$0xff] }
  0xc6   :  { %v1044_v5 = vmul.f32 %v5441_v22, %v8054_v25  ;;  %v1045_v30 = vmul.f32 %v5442_v54, %v8054_v25  ;;  %v1046_v6 = vmul.f32 %v5443_v19, %v8054_v25  ;;  %v1047_v42 = vmul.f32 %v5444_v46, %v8054_v25  ;;  %v5462_v22 = vld [vmem:[%s14207_s0 + $0x298] sm:$0xff]  ;;  %v5465_v46 = vld [vmem:[%s14207_s0 + $0x3f0] sm:$0xff] }
  0xc7   :  { %v1048_v7 = vmul.f32 %v5445_v35, %v8054_v25  ;;  %v1049_v43 = vmul.f32 %v5446_v23, %v8054_v25  ;;  %v1050_v12 = vmul.f32 %v5447_v26, %v8054_v25  ;;  %v1051_v13 = vmul.f32 %v5448_v9, %v8054_v25  ;;  %v5466_v35 = vld [vmem:[%s14207_s0 + $0x3f8] sm:$0xff]  ;;  %v5469_v9 = vld [vmem:[%s14207_s0 + $0x550] sm:$0xff] }
  0xc8   :  { %v1052_v10 = vmul.f32 %v5449_v60, %v8054_v25  ;;  %v1053_v49 = vmul.f32 %v5450_v32, %v8054_v25  ;;  %v1054_v14 = vmul.f32 %v5451_v4, %v8054_v25  ;;  %v1055_v27 = vmul.f32 %v5452_v24, %v8054_v25  ;;  %v5454_v25 = vld [vmem:[%s14207_s0 + $0x118] sm:$0xff]  ;;  %v5471_v32 = vld [vmem:[%s14207_s0 + $0x560] sm:$0xff]  ;;  %v5472_v4 = vld [vmem:[%s14207_s0 + $0x568] sm:$0xff] }
  0xc9   :  { %v8375_v20 = vadd.f32 %v1036_v61, %v8254_v36  ;;  %v8378_v21 = vadd.f32 %v1037_v48, %v8256_v50  ;;  %v8381_v18 = vadd.f32 %v1038_v59, %v8258_v53  ;;  %v8384_v51 = vadd.f32 %v1039_v57, %v8260_v8  ;;  %v5455_v36 = vld [vmem:[%s14207_s0 + $0x120] sm:$0xff]  ;;  %v5456_v50 = vld [vmem:[%s14207_s0 + $0x128] sm:$0xff]  ;;  %v5457_v53 = vld [vmem:[%s14207_s0 + $0x130] sm:$0xff] }
  0xca   :  { %v8386_v34 = vadd.f32 %v1040_v39, %v998_v52  ;;  %v8388_v44 = vadd.f32 %v1041_v29, %v999_v31  ;;  %v8390_v63 = vadd.f32 %v1042_v41, %v1000_v56  ;;  %v8392_v47 = vadd.f32 %v1043_v33, %v1001_v2  ;;  %v5458_v2 = vld [vmem:[%s14207_s0 + $0x138] sm:$0xf]  ;;  %v5473_v24 = vld [vmem:[%s14207_s0 + $0x570] sm:$0xf] }
  0xcb   :  { %v8407_v8 = vadd.f32 %v1044_v5, %v8277_v37  ;;  %v8410_v52 = vadd.f32 %v1045_v30, %v8279_v16  ;;  %v8413_v31 = vadd.f32 %v1046_v6, %v8281_v45  ;;  %v8416_v56 = vadd.f32 %v1047_v42, %v8283_v0  ;;  %v5460_v37 = vld [vmem:[%s14207_s0 + $0x288] sm:$0xff]  ;;  %v5461_v16 = vld [vmem:[%s14207_s0 + $0x290] sm:$0xff]  ;;  %v5470_v60 = vld [vmem:[%s14207_s0 + $0x558] sm:$0xff] }
  0xcc   :  { %v8431_v45 = vadd.f32 %v1048_v7, %v8294_v55  ;;  %v8434_v0 = vadd.f32 %v1049_v43, %v8296_v58  ;;  %v8437_v15 = vadd.f32 %v1050_v12, %v8298_v62  ;;  %v8440_v38 = vadd.f32 %v1051_v13, %v8300_v1  ;;  %v5463_v55 = vld [vmem:[%s14207_s0 + $0x2a0] sm:$0xf]  ;;  %v5464_v58 = vld [vmem:[%s14207_s0 + $0x3e8] sm:$0xff] }
  0xcd   :  { %v8452_v54 = vadd.f32 %v1052_v10, %v8311_v17  ;;  %v8455_v62 = vadd.f32 %v1053_v49, %v8313_v3  ;;  %v8458_v1 = vadd.f32 %v1054_v14, %v8315_v28  ;;  %v8461_v19 = vadd.f32 %v1055_v27, %v8317_v11  ;;  %v5467_v17 = vld [vmem:[%s14207_s0 + $0x400] sm:$0xff]  ;;  %v5468_v11 = vld [vmem:[%s14207_s0 + $0x408] sm:$0xf] }
  0xce   :  { %v1097_v3 = vstv %s8341_s19  ;;  %v8474_v23 = vstv %s8356_s24  ;;  %v8477_v28 = vstv %s8362_s25  ;;  %v8480_v26 = vstv %s8364_s22  ;;  %s9991_s19 = sld [smem:[#allocation3 + $0x283]]  ;;  %s12980_s25 = sld [smem:[#allocation6 + $0x6]] }
  0xcf   :  { %v1098_v61 = vmul.f32 %v5454_v25, %v1097_v3  ;;  %v1099_v48 = vmul.f32 %v5455_v36, %v1097_v3  ;;  %v1100_v59 = vmul.f32 %v5456_v50, %v1097_v3  ;;  %v1101_v57 = vmul.f32 %v5457_v53, %v1097_v3  ;;  %s13560_s22 = sld [smem:[#allocation3 + $0x207]] }
  0xd0   :  { %v1102_v39 = vmul.f32 %v5458_v2, %v1097_v3  ;;  %v1103_v29 = vmul.f32 %v5459_v40, %v1097_v3  ;;  %v1104_v41 = vmul.f32 %v5460_v37, %v1097_v3  ;;  %v1105_v33 = vmul.f32 %v5461_v16, %v1097_v3  ;;  %v5475_v2 = vld [vmem:[%s14207_s0 + $0x140] sm:$0xff]  ;;  %v5476_v40 = vld [vmem:[%s14207_s0 + $0x148] sm:$0xff] }
  0xd1   :  { %v1106_v5 = vmul.f32 %v5462_v22, %v1097_v3  ;;  %v1107_v30 = vmul.f32 %v5463_v55, %v1097_v3  ;;  %v1108_v6 = vmul.f32 %v5464_v58, %v1097_v3  ;;  %v1109_v42 = vmul.f32 %v5465_v46, %v1097_v3  ;;  %v5479_v22 = vld [vmem:[%s14207_s0 + $0x160] sm:$0xf]  ;;  %v5480_v55 = vld [vmem:[%s14207_s0 + $0x2a8] sm:$0xff]  ;;  %v5481_v58 = vld [vmem:[%s14207_s0 + $0x2b0] sm:$0xff] }
  0xd2   :  { %v1110_v7 = vmul.f32 %v5466_v35, %v1097_v3  ;;  %v1111_v43 = vmul.f32 %v5467_v17, %v1097_v3  ;;  %v1112_v12 = vmul.f32 %v5468_v11, %v1097_v3  ;;  %v1113_v13 = vmul.f32 %v5469_v9, %v1097_v3  ;;  %v5482_v46 = vld [vmem:[%s14207_s0 + $0x2b8] sm:$0xff]  ;;  %v5483_v35 = vld [vmem:[%s14207_s0 + $0x2c0] sm:$0xff]  ;;  %v5484_v17 = vld [vmem:[%s14207_s0 + $0x2c8] sm:$0xf] }
  0xd3   :  { %v1114_v10 = vmul.f32 %v5470_v60, %v1097_v3  ;;  %v1115_v49 = vmul.f32 %v5471_v32, %v1097_v3  ;;  %v1116_v14 = vmul.f32 %v5472_v4, %v1097_v3  ;;  %v1117_v27 = vmul.f32 %v5473_v24, %v1097_v3  ;;  %v5485_v3 = vld [vmem:[%s14207_s0 + $0x410] sm:$0xff]  ;;  %v5486_v11 = vld [vmem:[%s14207_s0 + $0x418] sm:$0xff]  ;;  %v5487_v9 = vld [vmem:[%s14207_s0 + $0x420] sm:$0xff] }
  0xd4   :  { %v1118_v25 = vadd.f32 %v1098_v61, %v8375_v20  ;;  %v1119_v36 = vadd.f32 %v1099_v48, %v8378_v21  ;;  %v1120_v50 = vadd.f32 %v1100_v59, %v8381_v18  ;;  %v1121_v53 = vadd.f32 %v1101_v57, %v8384_v51  ;;  %v5477_v18 = vld [vmem:[%s14207_s0 + $0x150] sm:$0xff]  ;;  %v5478_v51 = vld [vmem:[%s14207_s0 + $0x158] sm:$0xff]  ;;  %v5488_v60 = vld [vmem:[%s14207_s0 + $0x428] sm:$0xff] }
  0xd5   :  { %v1122_v37 = vadd.f32 %v1102_v39, %v8386_v34  ;;  %v1123_v16 = vadd.f32 %v1103_v29, %v8388_v44  ;;  %v1124_v20 = vadd.f32 %v1104_v41, %v8390_v63  ;;  %v1125_v21 = vadd.f32 %v1105_v33, %v8392_v47  ;;  %v5492_v57 = vld [vmem:[%s14207_s0 + $0x588] sm:$0xff]  ;;  %v5493_v32 = vld [vmem:[%s14207_s0 + $0x590] sm:$0xff]  ;;  %v5494_v4 = vld [vmem:[%s14207_s0 + $0x598] sm:$0xf] }
  0xd6   :  { %v1126_v34 = vadd.f32 %v1106_v5, %v8407_v8  ;;  %v1127_v44 = vadd.f32 %v1107_v30, %v8410_v52  ;;  %v1128_v63 = vadd.f32 %v1108_v6, %v8413_v31  ;;  %v1129_v47 = vadd.f32 %v1109_v42, %v8416_v56 }
  0xd7   :  { %v1130_v8 = vadd.f32 %v1110_v7, %v8431_v45  ;;  %v1131_v52 = vadd.f32 %v1111_v43, %v8434_v0  ;;  %v1132_v31 = vadd.f32 %v1112_v12, %v8437_v15  ;;  %v1133_v56 = vadd.f32 %v1113_v13, %v8440_v38 }
  0xd8   :  { %v1134_v45 = vadd.f32 %v1114_v10, %v8452_v54  ;;  %v1135_v0 = vadd.f32 %v1115_v49, %v8455_v62  ;;  %v1136_v15 = vadd.f32 %v1116_v14, %v8458_v1  ;;  %v1137_v38 = vadd.f32 %v1117_v27, %v8461_v19  ;;  %v5489_v54 = vld [vmem:[%s14207_s0 + $0x430] sm:$0xf]  ;;  %v5490_v62 = vld [vmem:[%s14207_s0 + $0x578] sm:$0xff]  ;;  %v5491_v1 = vld [vmem:[%s14207_s0 + $0x580] sm:$0xff] }
  0xd9   :  { %v1160_v19 = vmul.f32 %v5475_v2, %v8474_v23  ;;  %v1161_v61 = vmul.f32 %v5476_v40, %v8474_v23  ;;  %v1162_v48 = vmul.f32 %v5477_v18, %v8474_v23  ;;  %v1163_v59 = vmul.f32 %v5478_v51, %v8474_v23 }
  0xda   :  { %v1164_v24 = vmul.f32 %v5479_v22, %v8474_v23  ;;  %v1165_v39 = vmul.f32 %v5480_v55, %v8474_v23  ;;  %v1166_v29 = vmul.f32 %v5481_v58, %v8474_v23  ;;  %v1167_v41 = vmul.f32 %v5482_v46, %v8474_v23 }
  0xdb   :  { %v1168_v33 = vmul.f32 %v5483_v35, %v8474_v23  ;;  %v1169_v5 = vmul.f32 %v5484_v17, %v8474_v23  ;;  %v1170_v30 = vmul.f32 %v5485_v3, %v8474_v23  ;;  %v1171_v6 = vmul.f32 %v5486_v11, %v8474_v23 }
  0xdc   :  { %v1172_v42 = vmul.f32 %v5487_v9, %v8474_v23  ;;  %v1173_v7 = vmul.f32 %v5488_v60, %v8474_v23  ;;  %v1174_v43 = vmul.f32 %v5489_v54, %v8474_v23  ;;  %v1175_v12 = vmul.f32 %v5490_v62, %v8474_v23 }
  0xdd   :  { %v1176_v13 = vmul.f32 %v5491_v1, %v8474_v23  ;;  %v1177_v10 = vmul.f32 %v5492_v57, %v8474_v23  ;;  %v1178_v49 = vmul.f32 %v5493_v32, %v8474_v23  ;;  %v1179_v14 = vmul.f32 %v5494_v4, %v8474_v23 }
  0xde   :  { %v1180_v27 = vadd.f32 %v1160_v19, %v1118_v25  ;;  %v1181_v2 = vadd.f32 %v1161_v61, %v1119_v36  ;;  %v1182_v40 = vadd.f32 %v1162_v48, %v1120_v50  ;;  %v1183_v18 = vadd.f32 %v1163_v59, %v1121_v53 }
  0xdf   :  { %v1184_v51 = vadd.f32 %v1164_v24, %v1122_v37  ;;  %v1185_v22 = vadd.f32 %v1165_v39, %v1123_v16  ;;  %v1186_v55 = vadd.f32 %v1166_v29, %v1124_v20  ;;  %v1187_v58 = vadd.f32 %v1167_v41, %v1125_v21 }
  0xe0   :  { %v1188_v46 = vadd.f32 %v1168_v33, %v1126_v34  ;;  %v1189_v35 = vadd.f32 %v1169_v5, %v1127_v44  ;;  %v1190_v17 = vadd.f32 %v1170_v30, %v1128_v63  ;;  %v1191_v3 = vadd.f32 %v1171_v6, %v1129_v47 }
  0xe1   :  { %v1192_v11 = vadd.f32 %v1172_v42, %v1130_v8  ;;  %v1193_v9 = vadd.f32 %v1173_v7, %v1131_v52  ;;  %v1194_v60 = vadd.f32 %v1174_v43, %v1132_v31  ;;  %v1195_v54 = vadd.f32 %v1175_v12, %v1133_v56 }
  0xe2   :  { %v1196_v62 = vadd.f32 %v1176_v13, %v1134_v45  ;;  %v1197_v1 = vadd.f32 %v1177_v10, %v1135_v0  ;;  %v1198_v57 = vadd.f32 %v1178_v49, %v1136_v15  ;;  %v1199_v23 = vadd.f32 %v1179_v14, %v1137_v38  ;;  %v1268_v49 = vld [vmem:[%s14207_s0 + $0x8] sm:$0xff]  ;;  %v1269_v14 = vld [vmem:[%s14207_s0 + $0x10] sm:$0xff] }
  0xe3   :  { %v1202_v25 = vadd.f32 %v8477_v28, %v1180_v27  ;;  %v1203_v36 = vadd.f32 %v8477_v28, %v1181_v2  ;;  %v1204_v50 = vadd.f32 %v8477_v28, %v1182_v40  ;;  %v1205_v53 = vadd.f32 %v8477_v28, %v1183_v18 }
  0xe4   :  { %v1206_v37 = vadd.f32 %v8477_v28, %v1184_v51  ;;  %v1207_v16 = vadd.f32 %v8477_v28, %v1185_v22  ;;  %v1208_v20 = vadd.f32 %v8477_v28, %v1186_v55  ;;  %v1209_v21 = vadd.f32 %v8477_v28, %v1187_v58  ;;  %v1270_v51 = vld [vmem:[%s14207_s0 + $0x18] sm:$0xff]  ;;  %v1271_v22 = vld [vmem:[%s14207_s0 + $0x20] sm:$0xf]  ;;  %v1272_v55 = vld [vmem:[%s14207_s0 + $0x168] sm:$0xff] }
  0xe5   :  { %v1210_v34 = vadd.f32 %v8477_v28, %v1188_v46  ;;  %v1211_v44 = vadd.f32 %v8477_v28, %v1189_v35  ;;  %v1212_v63 = vadd.f32 %v8477_v28, %v1190_v17  ;;  %v1213_v47 = vadd.f32 %v8477_v28, %v1191_v3  ;;  %v1273_v3 = vld [vmem:[%s14207_s0 + $0x170] sm:$0xff] }
  0xe6   :  { %v1214_v8 = vadd.f32 %v8477_v28, %v1192_v11  ;;  %v1215_v52 = vadd.f32 %v8477_v28, %v1193_v9  ;;  %v1216_v31 = vadd.f32 %v8477_v28, %v1194_v60  ;;  %v1217_v56 = vadd.f32 %v8477_v28, %v1195_v54  ;;  %v1274_v11 = vld [vmem:[%s14207_s0 + $0x178] sm:$0xff]  ;;  %v1275_v9 = vld [vmem:[%s14207_s0 + $0x180] sm:$0xff]  ;;  %v1276_v60 = vld [vmem:[%s14207_s0 + $0x188] sm:$0xf] }
  0xe7   :  { %v1218_v45 = vadd.f32 %v8477_v28, %v1196_v62  ;;  %v1219_v0 = vadd.f32 %v8477_v28, %v1197_v1  ;;  %v1220_v15 = vadd.f32 %v8477_v28, %v1198_v57  ;;  %v1221_v38 = vadd.f32 %v8477_v28, %v1199_v23  ;;  %v1267_v28 = vld [vmem:[%s14207_s0] sm:$0xff]  ;;  %v1277_v23 = vld [vmem:[%s14207_s0 + $0x2d0] sm:$0xff] }
  0xe8   :  { %v1222_v19 = vmax.f32 %v1202_v25, 0.0  ;;  %v1223_v61 = vmax.f32 %v1203_v36, 0.0  ;;  %v1224_v48 = vmax.f32 %v1204_v50, 0.0  ;;  %v1225_v59 = vmax.f32 %v1205_v53, 0.0  ;;  %v1278_v25 = vld [vmem:[%s14207_s0 + $0x2d8] sm:$0xff]  ;;  %v1279_v36 = vld [vmem:[%s14207_s0 + $0x2e0] sm:$0xff] }
  0xe9   :  { %v1226_v32 = vmax.f32 %v1206_v37, 0.0  ;;  %v1227_v4 = vmax.f32 %v1207_v16, 0.0  ;;  %v1228_v24 = vmax.f32 %v1208_v20, 0.0  ;;  %v1229_v39 = vmax.f32 %v1209_v21, 0.0  ;;  %v1280_v53 = vld [vmem:[%s14207_s0 + $0x2e8] sm:$0xff]  ;;  %v1282_v16 = vld [vmem:[%s14207_s0 + $0x438] sm:$0xff] }
  0xea   :  { %v1230_v29 = vmax.f32 %v1210_v34, 0.0  ;;  %v1231_v41 = vmax.f32 %v1211_v44, 0.0  ;;  %v1232_v33 = vmax.f32 %v1212_v63, 0.0  ;;  %v1233_v5 = vmax.f32 %v1213_v47, 0.0  ;;  %v1281_v37 = vld [vmem:[%s14207_s0 + $0x2f0] sm:$0xf] }
  0xeb   :  { %v1234_v30 = vmax.f32 %v1214_v8, 0.0  ;;  %v1235_v6 = vmax.f32 %v1215_v52, 0.0  ;;  %v1236_v42 = vmax.f32 %v1216_v31, 0.0  ;;  %v1237_v7 = vmax.f32 %v1217_v56, 0.0  ;;  %v1283_v52 = vld [vmem:[%s14207_s0 + $0x440] sm:$0xff]  ;;  %v1284_v31 = vld [vmem:[%s14207_s0 + $0x448] sm:$0xff] }
  0xec   :  { %v1238_v43 = vmax.f32 %v1218_v45, 0.0  ;;  %v1239_v12 = vmax.f32 %v1219_v0, 0.0  ;;  %v1240_v13 = vmax.f32 %v1220_v15, 0.0  ;;  %v1241_v10 = vmax.f32 %v1221_v38, 0.0  ;;  %v1285_v56 = vld [vmem:[%s14207_s0 + $0x450] sm:$0xff] }
  0xed   :  { %v1242_v27 = vmax.f32 %v1222_v19, %v1227_v4  ;;  %v1245_v2 = vmax.f32 %v1223_v61, %v1228_v24  ;;  %v1248_v40 = vmax.f32 %v1224_v48, %v1229_v39  ;;  %v1251_v18 = vmax.f32 %v1225_v59, %v1230_v29  ;;  %v1286_v0 = vld [vmem:[%s14207_s0 + $0x458] sm:$0xf]  ;;  %v5498_v61 = vld [vmem:[%s14207_s0 + $0x28] sm:$0xff]  ;;  %v5499_v48 = vld [vmem:[%s14207_s0 + $0x30] sm:$0xff] }
  0xee   :  { %v1254_v58 = vsel %vm648_vm0, %v1226_v32, -inf  ;;  %v1255_v46 = vsel %vm648_vm0, %v1231_v41, -inf  ;;  %v1257_v35 = vsel %vm648_vm0, %v1236_v42, -inf  ;;  %v1259_v17 = vsel %vm648_vm0, %v1241_v10, -inf  ;;  %v5500_v39 = vld [vmem:[%s14207_s0 + $0x38] sm:$0xff]  ;;  %v5501_v29 = vld [vmem:[%s14207_s0 + $0x40] sm:$0xff] }
  0xef   :  { %v1243_v54 = vmax.f32 %v1242_v27, %v1232_v33  ;;  %v1246_v62 = vmax.f32 %v1245_v2, %v1233_v5  ;;  %v1249_v1 = vmax.f32 %v1248_v40, %v1234_v30  ;;  %v1252_v57 = vmax.f32 %v1251_v18, %v1235_v6  ;;  %v5502_v41 = vld [vmem:[%s14207_s0 + $0x48] sm:$0xf]  ;;  %v5503_v42 = vld [vmem:[%s14207_s0 + $0x190] sm:$0xff]  ;;  %v5508_v27 = vld [vmem:[%s14207_s0 + $0x2f8] sm:$0xff] }
  0xf0   :  { %v1256_v50 = vmax.f32 %v1254_v58, %v1255_v46  ;;  %v8675_v20 = vmul.f32 %v8480_v26, %v1267_v28  ;;  %v8678_v21 = vmul.f32 %v8480_v26, %v1268_v49  ;;  %v8681_v34 = vmul.f32 %v8480_v26, %v1269_v14  ;;  %v5505_v28 = vld [vmem:[%s14207_s0 + $0x1a0] sm:$0xff]  ;;  %v5506_v49 = vld [vmem:[%s14207_s0 + $0x1a8] sm:$0xff]  ;;  %v5507_v14 = vld [vmem:[%s14207_s0 + $0x1b0] sm:$0xf] }
  0xf1   :  { %v1244_v44 = vmax.f32 %v1243_v54, %v1237_v7  ;;  %v1247_v63 = vmax.f32 %v1246_v62, %v1238_v43  ;;  %v1250_v47 = vmax.f32 %v1249_v1, %v1239_v12  ;;  %v1253_v8 = vmax.f32 %v1252_v57, %v1240_v13  ;;  %v5504_v7 = vld [vmem:[%s14207_s0 + $0x198] sm:$0xff]  ;;  %v5517_v62 = vld [vmem:[%s14207_s0 + $0x480] sm:$0xf] }
  0xf2   :  { %v1258_v45 = vmax.f32 %v1256_v50, %v1257_v35  ;;  %v8696_v15 = vmul.f32 %v8480_v26, %v1270_v51  ;;  %v8699_v38 = vmul.f32 %v8480_v26, %v1271_v22  ;;  %v8702_v19 = vmul.f32 %v8480_v26, %v1272_v55  ;;  %v5509_v51 = vld [vmem:[%s14207_s0 + $0x300] sm:$0xff]  ;;  %v5510_v22 = vld [vmem:[%s14207_s0 + $0x308] sm:$0xff]  ;;  %v5511_v55 = vld [vmem:[%s14207_s0 + $0x310] sm:$0xff] }
  0xf3   :  { %1261 = vst [vmem:[#allocation2 + $0x28] sm:$0xff] %v1244_v44  ;;  %1262 = vst [vmem:[#allocation2 + $0x30] sm:$0xff] %v1247_v63  ;;  %v8711_v59 = vmul.f32 %v8480_v26, %v1273_v3  ;;  %v8714_v32 = vmul.f32 %v8480_v26, %v1274_v11  ;;  %v8717_v4 = vmul.f32 %v8480_v26, %v1275_v9  ;;  %v1330_v58 = vstv %s8638_s10  ;;  %v5512_v46 = vld [vmem:[%s14207_s0 + $0x318] sm:$0xf]  ;;  %v5514_v35 = vld [vmem:[%s14207_s0 + $0x468] sm:$0xff] }
  0xf4   :  { %1263 = vst [vmem:[#allocation2 + $0x38] sm:$0xff] %v1250_v47  ;;  %1264 = vst [vmem:[#allocation2 + $0x40] sm:$0xff] %v1253_v8  ;;  %v8720_v24 = vmul.f32 %v8480_v26, %v1276_v60  ;;  %v1260_v33 = vmax.f32 %v1258_v45, %v1259_v17  ;;  %v8732_v5 = vmul.f32 %v8480_v26, %v1277_v23  ;;  %v5515_v60 = vld [vmem:[%s14207_s0 + $0x470] sm:$0xff]  ;;  %v5516_v54 = vld [vmem:[%s14207_s0 + $0x478] sm:$0xff] }
  0xf5   :  { %v8735_v30 = vmul.f32 %v8480_v26, %v1278_v25  ;;  %v8738_v6 = vmul.f32 %v8480_v26, %v1279_v36  ;;  %v8750_v43 = vmul.f32 %v8480_v26, %v1280_v53  ;;  %v8753_v12 = vmul.f32 %v8480_v26, %v1281_v37 }
  0xf6   :  { %v8756_v13 = vmul.f32 %v8480_v26, %v1282_v16  ;;  %v8759_v10 = vmul.f32 %v8480_v26, %v1283_v52  ;;  %1265 = vst [vmem:[#allocation2 + $0x48] sm:$0xf] %v1260_v33  ;;  %v8771_v2 = vmul.f32 %v8480_v26, %v1284_v31  ;;  %v8774_v40 = vmul.f32 %v8480_v26, %v1285_v56 }
  0xf7   :  { %v8777_v18 = vmul.f32 %v8480_v26, %v1286_v0  ;;  %v5513_v26 = vld [vmem:[%s14207_s0 + $0x460] sm:$0xff]  ;;  %v1331_v17 = vmul.f32 %v5498_v61, %v1330_v58  ;;  %v1332_v3 = vmul.f32 %v5499_v48, %v1330_v58  ;;  %v1333_v11 = vmul.f32 %v5500_v39, %v1330_v58 }
  0xf8   :  { %v1334_v9 = vmul.f32 %v5501_v29, %v1330_v58  ;;  %v1335_v1 = vmul.f32 %v5502_v41, %v1330_v58  ;;  %v1336_v57 = vmul.f32 %v5503_v42, %v1330_v58  ;;  %v1337_v23 = vmul.f32 %v5504_v7, %v1330_v58  ;;  %v5523_v42 = vld [vmem:[%s14207_s0 + $0x70] sm:$0xf]  ;;  %v5524_v7 = vld [vmem:[%s14207_s0 + $0x1b8] sm:$0xff] }
  0xf9   :  { %v1338_v25 = vmul.f32 %v5505_v28, %v1330_v58  ;;  %v1339_v36 = vmul.f32 %v5506_v49, %v1330_v58  ;;  %v1340_v50 = vmul.f32 %v5507_v14, %v1330_v58  ;;  %v1341_v53 = vmul.f32 %v5508_v27, %v1330_v58  ;;  %v5527_v14 = vld [vmem:[%s14207_s0 + $0x1d0] sm:$0xff] }
  0xfa   :  { %v1342_v37 = vmul.f32 %v5509_v51, %v1330_v58  ;;  %v1343_v16 = vmul.f32 %v5510_v22, %v1330_v58  ;;  %v1344_v44 = vmul.f32 %v5511_v55, %v1330_v58  ;;  %v1345_v63 = vmul.f32 %v5512_v46, %v1330_v58  ;;  %v5530_v22 = vld [vmem:[%s14207_s0 + $0x328] sm:$0xff]  ;;  %v5531_v55 = vld [vmem:[%s14207_s0 + $0x330] sm:$0xff] }
  0xfb   :  { %v1346_v47 = vmul.f32 %v5513_v26, %v1330_v58  ;;  %v1347_v8 = vmul.f32 %v5514_v35, %v1330_v58  ;;  %v1348_v52 = vmul.f32 %v5515_v60, %v1330_v58  ;;  %v1349_v31 = vmul.f32 %v5516_v54, %v1330_v58  ;;  %v5534_v26 = vld [vmem:[%s14207_s0 + $0x488] sm:$0xff]  ;;  %v5535_v35 = vld [vmem:[%s14207_s0 + $0x490] sm:$0xff]  ;;  %v5536_v60 = vld [vmem:[%s14207_s0 + $0x498] sm:$0xff] }
  0xfc   :  { %v1350_v56 = vmul.f32 %v5517_v62, %v1330_v58  ;;  %v8816_v45 = vadd.f32 %v1331_v17, %v8675_v20  ;;  %v8819_v0 = vadd.f32 %v1332_v3, %v8678_v21  ;;  %v8822_v61 = vadd.f32 %v1333_v11, %v8681_v34  ;;  %v5519_v21 = vld [vmem:[%s14207_s0 + $0x50] sm:$0xff]  ;;  %v5520_v34 = vld [vmem:[%s14207_s0 + $0x58] sm:$0xff]  ;;  %v5537_v54 = vld [vmem:[%s14207_s0 + $0x4a0] sm:$0xff] }
  0xfd   :  { %v8825_v48 = vadd.f32 %v1334_v9, %v8696_v15  ;;  %v8828_v39 = vadd.f32 %v1335_v1, %v8699_v38  ;;  %v8831_v29 = vadd.f32 %v1336_v57, %v8702_v19  ;;  %v8834_v41 = vadd.f32 %v1337_v23, %v8711_v59  ;;  %v5521_v15 = vld [vmem:[%s14207_s0 + $0x60] sm:$0xff]  ;;  %v5522_v38 = vld [vmem:[%s14207_s0 + $0x68] sm:$0xff] }
  0xfe   :  { %v8837_v20 = vadd.f32 %v1338_v25, %v8714_v32  ;;  %v8852_v19 = vadd.f32 %v1339_v36, %v8717_v4  ;;  %v8855_v59 = vadd.f32 %v1340_v50, %v8720_v24  ;;  %v8858_v32 = vadd.f32 %v1341_v53, %v8732_v5  ;;  %v5525_v4 = vld [vmem:[%s14207_s0 + $0x1c0] sm:$0xff]  ;;  %v5526_v24 = vld [vmem:[%s14207_s0 + $0x1c8] sm:$0xff] }
  0xff   :  { %v8861_v33 = vadd.f32 %v1342_v37, %v8735_v30  ;;  %v8876_v5 = vadd.f32 %v1343_v16, %v8738_v6  ;;  %v8879_v30 = vadd.f32 %v1344_v44, %v8750_v43  ;;  %v8882_v28 = vadd.f32 %v1345_v63, %v8753_v12  ;;  %v5528_v6 = vld [vmem:[%s14207_s0 + $0x1d8] sm:$0xf]  ;;  %v5529_v43 = vld [vmem:[%s14207_s0 + $0x320] sm:$0xff]  ;;  %v5538_v62 = vld [vmem:[%s14207_s0 + $0x4a8] sm:$0xf] }
 0x100   :  { %v8885_v49 = vadd.f32 %v1346_v47, %v8756_v13  ;;  %v8897_v27 = vadd.f32 %v1347_v8, %v8759_v10  ;;  %v8900_v12 = vadd.f32 %v1348_v52, %v8771_v2  ;;  %v8903_v13 = vadd.f32 %v1349_v31, %v8774_v40  ;;  %v5532_v10 = vld [vmem:[%s14207_s0 + $0x338] sm:$0xff] }
 0x101   :  { %v8906_v51 = vadd.f32 %v1350_v56, %v8777_v18  ;;  %v1392_v2 = vstv %s8798_s11  ;;  %v8919_v58 = vstv %s8809_s18  ;;  %v8922_v40 = vstv %s8811_s8  ;;  %v5533_v18 = vld [vmem:[%s14207_s0 + $0x340] sm:$0xf]  ;;  %s9227_s8 = sld [smem:[#allocation3 + $0x382]]  ;;  %s9571_s18 = sld [smem:[#allocation3 + $0x3]] }
 0x102   :  { %v8925_v46 = vstv %s8813_s20  ;;  %v1393_v17 = vmul.f32 %v5519_v21, %v1392_v2  ;;  %v1394_v3 = vmul.f32 %v5520_v34, %v1392_v2  ;;  %v1395_v11 = vmul.f32 %v5521_v15, %v1392_v2  ;;  %s9233_s20 = sld [smem:[#allocation3 + $0x402]]  ;;  %s9812_s11 = sld [smem:[#allocation3 + $0x203]] }
 0x103   :  { %v1396_v9 = vmul.f32 %v5522_v38, %v1392_v2  ;;  %v1397_v1 = vmul.f32 %v5523_v42, %v1392_v2  ;;  %v1398_v57 = vmul.f32 %v5524_v7, %v1392_v2  ;;  %v1399_v23 = vmul.f32 %v5525_v4, %v1392_v2  ;;  %v5540_v42 = vld [vmem:[%s14207_s0 + $0x78] sm:$0xff]  ;;  %v5541_v7 = vld [vmem:[%s14207_s0 + $0x80] sm:$0xff] }
 0x104   :  { %v1400_v25 = vmul.f32 %v5526_v24, %v1392_v2  ;;  %v1401_v36 = vmul.f32 %v5527_v14, %v1392_v2  ;;  %v1402_v50 = vmul.f32 %v5528_v6, %v1392_v2  ;;  %v1403_v53 = vmul.f32 %v5529_v43, %v1392_v2  ;;  %v5544_v14 = vld [vmem:[%s14207_s0 + $0x98] sm:$0xf]  ;;  %v5545_v6 = vld [vmem:[%s14207_s0 + $0x1e0] sm:$0xff]  ;;  %v5546_v43 = vld [vmem:[%s14207_s0 + $0x1e8] sm:$0xff] }
 0x105   :  { %v1404_v37 = vmul.f32 %v5530_v22, %v1392_v2  ;;  %v1405_v16 = vmul.f32 %v5531_v55, %v1392_v2  ;;  %v1406_v44 = vmul.f32 %v5532_v10, %v1392_v2  ;;  %v1407_v63 = vmul.f32 %v5533_v18, %v1392_v2  ;;  %v5547_v22 = vld [vmem:[%s14207_s0 + $0x1f0] sm:$0xff]  ;;  %v5548_v55 = vld [vmem:[%s14207_s0 + $0x1f8] sm:$0xff]  ;;  %v5549_v10 = vld [vmem:[%s14207_s0 + $0x200] sm:$0xf] }
 0x106   :  { %v1408_v47 = vmul.f32 %v5534_v26, %v1392_v2  ;;  %v1409_v8 = vmul.f32 %v5535_v35, %v1392_v2  ;;  %v1410_v52 = vmul.f32 %v5536_v60, %v1392_v2  ;;  %v1411_v31 = vmul.f32 %v5537_v54, %v1392_v2  ;;  %v5551_v18 = vld [vmem:[%s14207_s0 + $0x350] sm:$0xff]  ;;  %v5552_v26 = vld [vmem:[%s14207_s0 + $0x358] sm:$0xff]  ;;  %v5553_v35 = vld [vmem:[%s14207_s0 + $0x360] sm:$0xff] }
 0x107   :  { %v1412_v56 = vmul.f32 %v5538_v62, %v1392_v2  ;;  %v1413_v21 = vadd.f32 %v1393_v17, %v8816_v45  ;;  %v1414_v34 = vadd.f32 %v1394_v3, %v8819_v0  ;;  %v1415_v15 = vadd.f32 %v1395_v11, %v8822_v61  ;;  %v5542_v61 = vld [vmem:[%s14207_s0 + $0x88] sm:$0xff]  ;;  %v5559_v54 = vld [vmem:[%s14207_s0 + $0x4d0] sm:$0xf] }
 0x108   :  { %v1416_v38 = vadd.f32 %v1396_v9, %v8825_v48  ;;  %v1417_v4 = vadd.f32 %v1397_v1, %v8828_v39  ;;  %v1418_v24 = vadd.f32 %v1398_v57, %v8831_v29  ;;  %v1419_v45 = vadd.f32 %v1399_v23, %v8834_v41  ;;  %v5543_v48 = vld [vmem:[%s14207_s0 + $0x90] sm:$0xff]  ;;  %v5550_v2 = vld [vmem:[%s14207_s0 + $0x348] sm:$0xff]  ;;  %v5557_v9 = vld [vmem:[%s14207_s0 + $0x4c0] sm:$0xff] }
 0x109   :  { %v1420_v0 = vadd.f32 %v1400_v25, %v8837_v20  ;;  %v1421_v39 = vadd.f32 %v1401_v36, %v8852_v19  ;;  %v1422_v29 = vadd.f32 %v1402_v50, %v8855_v59  ;;  %v1423_v41 = vadd.f32 %v1403_v53, %v8858_v32  ;;  %v5558_v60 = vld [vmem:[%s14207_s0 + $0x4c8] sm:$0xff] }
 0x10a   :  { %v1424_v20 = vadd.f32 %v1404_v37, %v8861_v33  ;;  %v1425_v19 = vadd.f32 %v1405_v16, %v8876_v5  ;;  %v1426_v59 = vadd.f32 %v1406_v44, %v8879_v30  ;;  %v1427_v32 = vadd.f32 %v1407_v63, %v8882_v28 }
 0x10b   :  { %v1428_v33 = vadd.f32 %v1408_v47, %v8885_v49  ;;  %v1429_v5 = vadd.f32 %v1409_v8, %v8897_v27  ;;  %v1430_v30 = vadd.f32 %v1410_v52, %v8900_v12  ;;  %v1431_v28 = vadd.f32 %v1411_v31, %v8903_v13  ;;  %v5554_v27 = vld [vmem:[%s14207_s0 + $0x368] sm:$0xf]  ;;  %v5555_v12 = vld [vmem:[%s14207_s0 + $0x4b0] sm:$0xff]  ;;  %v5556_v13 = vld [vmem:[%s14207_s0 + $0x4b8] sm:$0xff] }
 0x10c   :  { %v1432_v49 = vadd.f32 %v1412_v56, %v8906_v51  ;;  %v1455_v51 = vmul.f32 %v5540_v42, %v8919_v58  ;;  %v1456_v17 = vmul.f32 %v5541_v7, %v8919_v58  ;;  %v1457_v3 = vmul.f32 %v5542_v61, %v8919_v58 }
 0x10d   :  { %v1458_v11 = vmul.f32 %v5543_v48, %v8919_v58  ;;  %v1459_v62 = vmul.f32 %v5544_v14, %v8919_v58  ;;  %v1460_v1 = vmul.f32 %v5545_v6, %v8919_v58  ;;  %v1461_v57 = vmul.f32 %v5546_v43, %v8919_v58  ;;  %v5561_v48 = vld [vmem:[%s14207_s0 + $0xa0] sm:$0xff]  ;;  %v5562_v14 = vld [vmem:[%s14207_s0 + $0xa8] sm:$0xff] }
 0x10e   :  { %v1462_v23 = vmul.f32 %v5547_v22, %v8919_v58  ;;  %v1463_v25 = vmul.f32 %v5548_v55, %v8919_v58  ;;  %v1464_v36 = vmul.f32 %v5549_v10, %v8919_v58  ;;  %v1465_v50 = vmul.f32 %v5550_v2, %v8919_v58 }
 0x10f   :  { %v1466_v53 = vmul.f32 %v5551_v18, %v8919_v58  ;;  %v1467_v37 = vmul.f32 %v5552_v26, %v8919_v58  ;;  %v1468_v16 = vmul.f32 %v5553_v35, %v8919_v58  ;;  %v1469_v44 = vmul.f32 %v5554_v27, %v8919_v58 }
 0x110   :  { %v1470_v63 = vmul.f32 %v5555_v12, %v8919_v58  ;;  %v1471_v47 = vmul.f32 %v5556_v13, %v8919_v58  ;;  %v1472_v8 = vmul.f32 %v5557_v9, %v8919_v58  ;;  %v1473_v52 = vmul.f32 %v5558_v60, %v8919_v58  ;;  %v5580_v9 = vld [vmem:[%s14207_s0 + $0x4f8] sm:$0xf] }
 0x111   :  { %v1474_v31 = vmul.f32 %v5559_v54, %v8919_v58  ;;  %v1475_v56 = vadd.f32 %v1455_v51, %v1413_v21  ;;  %v1476_v42 = vadd.f32 %v1456_v17, %v1414_v34  ;;  %v1477_v7 = vadd.f32 %v1457_v3, %v1415_v15  ;;  %v5563_v58 = vld [vmem:[%s14207_s0 + $0xb0] sm:$0xff]  ;;  %v5564_v21 = vld [vmem:[%s14207_s0 + $0xb8] sm:$0xff]  ;;  %v5565_v34 = vld [vmem:[%s14207_s0 + $0xc0] sm:$0xf] }
 0x112   :  { %v1478_v61 = vadd.f32 %v1458_v11, %v1416_v38  ;;  %v1479_v6 = vadd.f32 %v1459_v62, %v1417_v4  ;;  %v1480_v43 = vadd.f32 %v1460_v1, %v1418_v24  ;;  %v1481_v22 = vadd.f32 %v1461_v57, %v1419_v45  ;;  %v5566_v4 = vld [vmem:[%s14207_s0 + $0x208] sm:$0xff]  ;;  %v5567_v24 = vld [vmem:[%s14207_s0 + $0x210] sm:$0xff]  ;;  %v5568_v45 = vld [vmem:[%s14207_s0 + $0x218] sm:$0xff] }
 0x113   :  { %v1482_v55 = vadd.f32 %v1462_v23, %v1420_v0  ;;  %v1483_v15 = vadd.f32 %v1463_v25, %v1421_v39  ;;  %v1484_v38 = vadd.f32 %v1464_v36, %v1422_v29  ;;  %v1485_v10 = vadd.f32 %v1465_v50, %v1423_v41  ;;  %v5569_v39 = vld [vmem:[%s14207_s0 + $0x220] sm:$0xff]  ;;  %v5570_v29 = vld [vmem:[%s14207_s0 + $0x228] sm:$0xf]  ;;  %v5571_v41 = vld [vmem:[%s14207_s0 + $0x370] sm:$0xff] }
 0x114   :  { %v1486_v2 = vadd.f32 %v1466_v53, %v1424_v20  ;;  %v1487_v0 = vadd.f32 %v1467_v37, %v1425_v19  ;;  %v1488_v18 = vadd.f32 %v1468_v16, %v1426_v59  ;;  %v1489_v26 = vadd.f32 %v1469_v44, %v1427_v32  ;;  %v5572_v19 = vld [vmem:[%s14207_s0 + $0x378] sm:$0xff]  ;;  %v5573_v59 = vld [vmem:[%s14207_s0 + $0x380] sm:$0xff]  ;;  %v5574_v32 = vld [vmem:[%s14207_s0 + $0x388] sm:$0xff] }
 0x115   :  { %v1490_v35 = vadd.f32 %v1470_v63, %v1428_v33  ;;  %v1491_v20 = vadd.f32 %v1471_v47, %v1429_v5  ;;  %v1492_v27 = vadd.f32 %v1472_v8, %v1430_v30  ;;  %v1493_v12 = vadd.f32 %v1473_v52, %v1431_v28  ;;  %v5575_v33 = vld [vmem:[%s14207_s0 + $0x390] sm:$0xf]  ;;  %v5576_v5 = vld [vmem:[%s14207_s0 + $0x4d8] sm:$0xff]  ;;  %v5577_v30 = vld [vmem:[%s14207_s0 + $0x4e0] sm:$0xff] }
 0x116   :  { %v1494_v13 = vadd.f32 %v1474_v31, %v1432_v49  ;;  %v1517_v28 = vmul.f32 %v5561_v48, %v8922_v40  ;;  %v1518_v49 = vmul.f32 %v5562_v14, %v8922_v40  ;;  %v1519_v51 = vmul.f32 %v5563_v58, %v8922_v40  ;;  %v5578_v3 = vld [vmem:[%s14207_s0 + $0x4e8] sm:$0xff]  ;;  %v5579_v11 = vld [vmem:[%s14207_s0 + $0x4f0] sm:$0xff] }
 0x117   :  { %v1520_v17 = vmul.f32 %v5564_v21, %v8922_v40  ;;  %v1521_v60 = vmul.f32 %v5565_v34, %v8922_v40  ;;  %v1522_v54 = vmul.f32 %v5566_v4, %v8922_v40  ;;  %v1523_v62 = vmul.f32 %v5567_v24, %v8922_v40  ;;  %v5582_v58 = vld [vmem:[%s14207_s0 + $0xc8] sm:$0xff]  ;;  %v5583_v21 = vld [vmem:[%s14207_s0 + $0xd0] sm:$0xff] }
 0x118   :  { %v1524_v1 = vmul.f32 %v5568_v45, %v8922_v40  ;;  %v1525_v57 = vmul.f32 %v5569_v39, %v8922_v40  ;;  %v1526_v23 = vmul.f32 %v5570_v29, %v8922_v40  ;;  %v1527_v25 = vmul.f32 %v5571_v41, %v8922_v40  ;;  %v5589_v39 = vld [vmem:[%s14207_s0 + $0x240] sm:$0xff]  ;;  %v5590_v29 = vld [vmem:[%s14207_s0 + $0x248] sm:$0xff]  ;;  %v5591_v41 = vld [vmem:[%s14207_s0 + $0x250] sm:$0xf] }
 0x119   :  { %v1528_v36 = vmul.f32 %v5572_v19, %v8922_v40  ;;  %v1529_v50 = vmul.f32 %v5573_v59, %v8922_v40  ;;  %v1530_v53 = vmul.f32 %v5574_v32, %v8922_v40  ;;  %v1531_v37 = vmul.f32 %v5575_v33, %v8922_v40  ;;  %v5592_v19 = vld [vmem:[%s14207_s0 + $0x398] sm:$0xff]  ;;  %v5593_v59 = vld [vmem:[%s14207_s0 + $0x3a0] sm:$0xff]  ;;  %v5594_v32 = vld [vmem:[%s14207_s0 + $0x3a8] sm:$0xff] }
 0x11a   :  { %v1532_v16 = vmul.f32 %v5576_v5, %v8922_v40  ;;  %v1533_v44 = vmul.f32 %v5577_v30, %v8922_v40  ;;  %v1534_v63 = vmul.f32 %v5578_v3, %v8922_v40  ;;  %v1535_v47 = vmul.f32 %v5579_v11, %v8922_v40  ;;  %v5595_v33 = vld [vmem:[%s14207_s0 + $0x3b0] sm:$0xff] }
 0x11b   :  { %v1536_v8 = vmul.f32 %v5580_v9, %v8922_v40  ;;  %v9125_v52 = vadd.f32 %v1517_v28, %v1475_v56  ;;  %v9127_v31 = vadd.f32 %v1518_v49, %v1476_v42  ;;  %v9129_v48 = vadd.f32 %v1519_v51, %v1477_v7  ;;  %v5584_v56 = vld [vmem:[%s14207_s0 + $0xd8] sm:$0xff]  ;;  %v5585_v42 = vld [vmem:[%s14207_s0 + $0xe0] sm:$0xff]  ;;  %v5586_v7 = vld [vmem:[%s14207_s0 + $0xe8] sm:$0xf] }
 0x11c   :  { %v9131_v14 = vadd.f32 %v1520_v17, %v1478_v61  ;;  %v1541_v34 = vadd.f32 %v1521_v60, %v1479_v6  ;;  %v1542_v4 = vadd.f32 %v1522_v54, %v1480_v43  ;;  %v1543_v24 = vadd.f32 %v1523_v62, %v1481_v22  ;;  %v5587_v22 = vld [vmem:[%s14207_s0 + $0x230] sm:$0xff]  ;;  %v5600_v51 = vld [vmem:[%s14207_s0 + $0x518] sm:$0xff]  ;;  %v5601_v17 = vld [vmem:[%s14207_s0 + $0x520] sm:$0xf] }
 0x11d   :  { %v1544_v40 = vadd.f32 %v1524_v1, %v1482_v55  ;;  %v9148_v61 = vadd.f32 %v1525_v57, %v1483_v15  ;;  %v9150_v45 = vadd.f32 %v1526_v23, %v1484_v38  ;;  %v9152_v6 = vadd.f32 %v1527_v25, %v1485_v10  ;;  %v5588_v55 = vld [vmem:[%s14207_s0 + $0x238] sm:$0xff]  ;;  %v5599_v49 = vld [vmem:[%s14207_s0 + $0x510] sm:$0xff] }
 0x11e   :  { %v9154_v43 = vadd.f32 %v1528_v36, %v1486_v2  ;;  %v9165_v15 = vadd.f32 %v1529_v50, %v1487_v0  ;;  %v9167_v38 = vadd.f32 %v1530_v53, %v1488_v18  ;;  %v9169_v10 = vadd.f32 %v1531_v37, %v1489_v26 }
 0x11f   :  { %v9171_v2 = vadd.f32 %v1532_v16, %v1490_v35  ;;  %v9182_v0 = vadd.f32 %v1533_v44, %v1491_v20  ;;  %v9184_v18 = vadd.f32 %v1534_v63, %v1492_v27  ;;  %v9186_v26 = vadd.f32 %v1535_v47, %v1493_v12  ;;  %v5596_v20 = vld [vmem:[%s14207_s0 + $0x3b8] sm:$0xf]  ;;  %v5597_v27 = vld [vmem:[%s14207_s0 + $0x500] sm:$0xff]  ;;  %v5598_v12 = vld [vmem:[%s14207_s0 + $0x508] sm:$0xff] }
 0x120   :  { %v9188_v35 = vadd.f32 %v1536_v8, %v1494_v13  ;;  %v1579_v13 = vmul.f32 %v5582_v58, %v8925_v46  ;;  %v1580_v5 = vmul.f32 %v5583_v21, %v8925_v46  ;;  %v1581_v30 = vmul.f32 %v5584_v56, %v8925_v46 }
 0x121   :  { %v1582_v28 = vmul.f32 %v5585_v42, %v8925_v46  ;;  %v1583_v3 = vmul.f32 %v5586_v7, %v8925_v46  ;;  %v1584_v11 = vmul.f32 %v5587_v22, %v8925_v46  ;;  %v1585_v9 = vmul.f32 %v5588_v55, %v8925_v46  ;;  %v5608_v22 = vld [vmem:[%s14207_s0 + $0x258] sm:$0xff] }
 0x122   :  { %v1586_v60 = vmul.f32 %v5589_v39, %v8925_v46  ;;  %v1587_v54 = vmul.f32 %v5590_v29, %v8925_v46  ;;  %v1588_v62 = vmul.f32 %v5591_v41, %v8925_v46  ;;  %v1589_v1 = vmul.f32 %v5592_v19, %v8925_v46  ;;  %v5611_v29 = vld [vmem:[%s14207_s0 + $0x270] sm:$0xff] }
 0x123   :  { %v1590_v57 = vmul.f32 %v5593_v59, %v8925_v46  ;;  %v1591_v23 = vmul.f32 %v5594_v32, %v8925_v46  ;;  %v1592_v25 = vmul.f32 %v5595_v33, %v8925_v46  ;;  %v1593_v36 = vmul.f32 %v5596_v20, %v8925_v46  ;;  %v5614_v59 = vld [vmem:[%s14207_s0 + $0x3c8] sm:$0xff]  ;;  %v5615_v32 = vld [vmem:[%s14207_s0 + $0x3d0] sm:$0xff] }
 0x124   :  { %v1594_v50 = vmul.f32 %v5597_v27, %v8925_v46  ;;  %v1595_v53 = vmul.f32 %v5598_v12, %v8925_v46  ;;  %v1596_v37 = vmul.f32 %v5599_v49, %v8925_v46  ;;  %v1597_v16 = vmul.f32 %v5600_v51, %v8925_v46  ;;  %v5618_v27 = vld [vmem:[%s14207_s0 + $0x528] sm:$0xff]  ;;  %v5619_v12 = vld [vmem:[%s14207_s0 + $0x530] sm:$0xff]  ;;  %v5620_v49 = vld [vmem:[%s14207_s0 + $0x538] sm:$0xff] }
 0x125   :  { %v1598_v44 = vmul.f32 %v5601_v17, %v8925_v46  ;;  %v9246_v63 = vadd.f32 %v1579_v13, %v9125_v52  ;;  %v9249_v47 = vadd.f32 %v1580_v5, %v9127_v31  ;;  %v9252_v8 = vadd.f32 %v1581_v30, %v9129_v48  ;;  %v5603_v46 = vld [vmem:[%s14207_s0 + $0xf0] sm:$0xff]  ;;  %v5604_v52 = vld [vmem:[%s14207_s0 + $0xf8] sm:$0xff]  ;;  %v5605_v31 = vld [vmem:[%s14207_s0 + $0x100] sm:$0xff] }
 0x126   :  { %v9255_v58 = vadd.f32 %v1582_v28, %v9131_v14  ;;  %v9257_v21 = vadd.f32 %v1583_v3, %v1541_v34  ;;  %v9259_v56 = vadd.f32 %v1584_v11, %v1542_v4  ;;  %v9261_v42 = vadd.f32 %v1585_v9, %v1543_v24  ;;  %v5606_v48 = vld [vmem:[%s14207_s0 + $0x108] sm:$0xff]  ;;  %v5621_v51 = vld [vmem:[%s14207_s0 + $0x540] sm:$0xff] }
 0x127   :  { %v9263_v7 = vadd.f32 %v1586_v60, %v1544_v40  ;;  %v9278_v14 = vadd.f32 %v1587_v54, %v9148_v61  ;;  %v9281_v34 = vadd.f32 %v1588_v62, %v9150_v45  ;;  %v9284_v4 = vadd.f32 %v1589_v1, %v9152_v6  ;;  %v5607_v40 = vld [vmem:[%s14207_s0 + $0x110] sm:$0xf]  ;;  %v5609_v61 = vld [vmem:[%s14207_s0 + $0x260] sm:$0xff]  ;;  %v5610_v45 = vld [vmem:[%s14207_s0 + $0x268] sm:$0xff] }
 0x128   :  { %v9287_v24 = vadd.f32 %v1590_v57, %v9154_v43  ;;  %v9302_v6 = vadd.f32 %v1591_v23, %v9165_v15  ;;  %v9305_v43 = vadd.f32 %v1592_v25, %v9167_v38  ;;  %v9308_v55 = vadd.f32 %v1593_v36, %v9169_v10  ;;  %v5612_v15 = vld [vmem:[%s14207_s0 + $0x278] sm:$0xf]  ;;  %v5613_v38 = vld [vmem:[%s14207_s0 + $0x3c0] sm:$0xff]  ;;  %v5622_v17 = vld [vmem:[%s14207_s0 + $0x548] sm:$0xf] }
 0x129   :  { %v9311_v39 = vadd.f32 %v1594_v50, %v9171_v2  ;;  %v9323_v41 = vadd.f32 %v1595_v53, %v9182_v0  ;;  %v9326_v10 = vadd.f32 %v1596_v37, %v9184_v18  ;;  %v9329_v2 = vadd.f32 %v1597_v16, %v9186_v26  ;;  %v5616_v0 = vld [vmem:[%s14207_s0 + $0x3d8] sm:$0xff] }
 0x12a   :  { %v9332_v19 = vadd.f32 %v1598_v44, %v9188_v35  ;;  %v1640_v18 = vstv %s9212_s1  ;;  %v9345_v33 = vstv %s9227_s8  ;;  %v9348_v26 = vstv %s9233_s20  ;;  %v5617_v35 = vld [vmem:[%s14207_s0 + $0x3e0] sm:$0xf]  ;;  %s10820_s8 = sld [smem:[#allocation3 + $0x304]]  ;;  %s12554_s1 = sld [smem:[#allocation3 + $0x186]] }
 0x12b   :  { %v9351_v20 = vstv %s9235_s7  ;;  %v1641_v13 = vmul.f32 %v5603_v46, %v1640_v18  ;;  %v1642_v5 = vmul.f32 %v5604_v52, %v1640_v18  ;;  %v1643_v30 = vmul.f32 %v5605_v31, %v1640_v18  ;;  %s10397_s7 = sld [smem:[#allocation3 + $0x4]] }
 0x12c   :  { %v1644_v28 = vmul.f32 %v5606_v48, %v1640_v18  ;;  %v1645_v3 = vmul.f32 %v5607_v40, %v1640_v18  ;;  %v1646_v11 = vmul.f32 %v5608_v22, %v1640_v18  ;;  %v1647_v9 = vmul.f32 %v5609_v61, %v1640_v18  ;;  %v5624_v40 = vld [vmem:[%s14207_s0 + $0x118] sm:$0xff]  ;;  %v5625_v22 = vld [vmem:[%s14207_s0 + $0x120] sm:$0xff]  ;;  %s10822_s20 = sld [smem:[#allocation3 + $0x384]] }
 0x12d   :  { %v1648_v60 = vmul.f32 %v5610_v45, %v1640_v18  ;;  %v1649_v54 = vmul.f32 %v5611_v29, %v1640_v18  ;;  %v1650_v62 = vmul.f32 %v5612_v15, %v1640_v18  ;;  %v1651_v1 = vmul.f32 %v5613_v38, %v1640_v18  ;;  %v5628_v29 = vld [vmem:[%s14207_s0 + $0x138] sm:$0xf]  ;;  %v5629_v15 = vld [vmem:[%s14207_s0 + $0x280] sm:$0xff]  ;;  %v5630_v38 = vld [vmem:[%s14207_s0 + $0x288] sm:$0xff] }
 0x12e   :  { %v1652_v57 = vmul.f32 %v5614_v59, %v1640_v18  ;;  %v1653_v23 = vmul.f32 %v5615_v32, %v1640_v18  ;;  %v1654_v25 = vmul.f32 %v5616_v0, %v1640_v18  ;;  %v1655_v36 = vmul.f32 %v5617_v35, %v1640_v18  ;;  %v5631_v59 = vld [vmem:[%s14207_s0 + $0x290] sm:$0xff]  ;;  %v5632_v32 = vld [vmem:[%s14207_s0 + $0x298] sm:$0xff]  ;;  %v5633_v0 = vld [vmem:[%s14207_s0 + $0x2a0] sm:$0xf] }
 0x12f   :  { %v1656_v50 = vmul.f32 %v5618_v27, %v1640_v18  ;;  %v1657_v53 = vmul.f32 %v5619_v12, %v1640_v18  ;;  %v1658_v37 = vmul.f32 %v5620_v49, %v1640_v18  ;;  %v1659_v16 = vmul.f32 %v5621_v51, %v1640_v18  ;;  %v5635_v35 = vld [vmem:[%s14207_s0 + $0x3f0] sm:$0xff]  ;;  %v5636_v27 = vld [vmem:[%s14207_s0 + $0x3f8] sm:$0xff]  ;;  %v5637_v12 = vld [vmem:[%s14207_s0 + $0x400] sm:$0xff] }
 0x130   :  { %v1660_v44 = vmul.f32 %v5622_v17, %v1640_v18  ;;  %v1661_v46 = vadd.f32 %v1641_v13, %v9246_v63  ;;  %v1662_v52 = vadd.f32 %v1642_v5, %v9249_v47  ;;  %v1663_v31 = vadd.f32 %v1643_v30, %v9252_v8  ;;  %v5626_v8 = vld [vmem:[%s14207_s0 + $0x128] sm:$0xff]  ;;  %v5643_v51 = vld [vmem:[%s14207_s0 + $0x570] sm:$0xf] }
 0x131   :  { %v1664_v48 = vadd.f32 %v1644_v28, %v9255_v58  ;;  %v1665_v61 = vadd.f32 %v1645_v3, %v9257_v21  ;;  %v1666_v45 = vadd.f32 %v1646_v11, %v9259_v56  ;;  %v1667_v63 = vadd.f32 %v1647_v9, %v9261_v42  ;;  %v5627_v58 = vld [vmem:[%s14207_s0 + $0x130] sm:$0xff]  ;;  %v5634_v18 = vld [vmem:[%s14207_s0 + $0x3e8] sm:$0xff]  ;;  %v5641_v28 = vld [vmem:[%s14207_s0 + $0x560] sm:$0xff] }
 0x132   :  { %v1668_v47 = vadd.f32 %v1648_v60, %v9263_v7  ;;  %v1669_v21 = vadd.f32 %v1649_v54, %v9278_v14  ;;  %v1670_v56 = vadd.f32 %v1650_v62, %v9281_v34  ;;  %v1671_v42 = vadd.f32 %v1651_v1, %v9284_v4  ;;  %v5642_v49 = vld [vmem:[%s14207_s0 + $0x568] sm:$0xff] }
 0x133   :  { %v1672_v7 = vadd.f32 %v1652_v57, %v9287_v24  ;;  %v1673_v14 = vadd.f32 %v1653_v23, %v9302_v6  ;;  %v1674_v34 = vadd.f32 %v1654_v25, %v9305_v43  ;;  %v1675_v4 = vadd.f32 %v1655_v36, %v9308_v55 }
 0x134   :  { %v1676_v24 = vadd.f32 %v1656_v50, %v9311_v39  ;;  %v1677_v6 = vadd.f32 %v1657_v53, %v9323_v41  ;;  %v1678_v43 = vadd.f32 %v1658_v37, %v9326_v10  ;;  %v1679_v55 = vadd.f32 %v1659_v16, %v9329_v2  ;;  %v5638_v41 = vld [vmem:[%s14207_s0 + $0x408] sm:$0xf]  ;;  %v5639_v10 = vld [vmem:[%s14207_s0 + $0x550] sm:$0xff]  ;;  %v5640_v2 = vld [vmem:[%s14207_s0 + $0x558] sm:$0xff] }
 0x135   :  { %v1680_v39 = vadd.f32 %v1660_v44, %v9332_v19  ;;  %v1703_v19 = vmul.f32 %v5624_v40, %v9345_v33  ;;  %v1704_v13 = vmul.f32 %v5625_v22, %v9345_v33  ;;  %v1705_v5 = vmul.f32 %v5626_v8, %v9345_v33 }
 0x136   :  { %v1706_v30 = vmul.f32 %v5627_v58, %v9345_v33  ;;  %v1707_v17 = vmul.f32 %v5628_v29, %v9345_v33  ;;  %v1708_v3 = vmul.f32 %v5629_v15, %v9345_v33  ;;  %v1709_v11 = vmul.f32 %v5630_v38, %v9345_v33  ;;  %v5645_v58 = vld [vmem:[%s14207_s0 + $0x140] sm:$0xff]  ;;  %v5646_v29 = vld [vmem:[%s14207_s0 + $0x148] sm:$0xff] }
 0x137   :  { %v1710_v9 = vmul.f32 %v5631_v59, %v9345_v33  ;;  %v1711_v60 = vmul.f32 %v5632_v32, %v9345_v33  ;;  %v1712_v54 = vmul.f32 %v5633_v0, %v9345_v33  ;;  %v1713_v62 = vmul.f32 %v5634_v18, %v9345_v33 }
 0x138   :  { %v1714_v1 = vmul.f32 %v5635_v35, %v9345_v33  ;;  %v1715_v57 = vmul.f32 %v5636_v27, %v9345_v33  ;;  %v1716_v23 = vmul.f32 %v5637_v12, %v9345_v33  ;;  %v1717_v25 = vmul.f32 %v5638_v41, %v9345_v33 }
 0x139   :  { %v1718_v36 = vmul.f32 %v5639_v10, %v9345_v33  ;;  %v1719_v50 = vmul.f32 %v5640_v2, %v9345_v33  ;;  %v1720_v53 = vmul.f32 %v5641_v28, %v9345_v33  ;;  %v1721_v37 = vmul.f32 %v5642_v49, %v9345_v33  ;;  %v5664_v28 = vld [vmem:[%s14207_s0 + $0x598] sm:$0xf] }
 0x13a   :  { %v1722_v16 = vmul.f32 %v5643_v51, %v9345_v33  ;;  %v1723_v44 = vadd.f32 %v1703_v19, %v1661_v46  ;;  %v1724_v40 = vadd.f32 %v1704_v13, %v1662_v52  ;;  %v1725_v22 = vadd.f32 %v1705_v5, %v1663_v31  ;;  %v5647_v33 = vld [vmem:[%s14207_s0 + $0x150] sm:$0xff]  ;;  %v5648_v46 = vld [vmem:[%s14207_s0 + $0x158] sm:$0xff]  ;;  %v5649_v52 = vld [vmem:[%s14207_s0 + $0x160] sm:$0xf] }
 0x13b   :  { %v1726_v8 = vadd.f32 %v1706_v30, %v1664_v48  ;;  %v1727_v15 = vadd.f32 %v1707_v17, %v1665_v61  ;;  %v1728_v38 = vadd.f32 %v1708_v3, %v1666_v45  ;;  %v1729_v59 = vadd.f32 %v1709_v11, %v1667_v63  ;;  %v5650_v61 = vld [vmem:[%s14207_s0 + $0x2a8] sm:$0xff]  ;;  %v5651_v45 = vld [vmem:[%s14207_s0 + $0x2b0] sm:$0xff]  ;;  %v5652_v63 = vld [vmem:[%s14207_s0 + $0x2b8] sm:$0xff] }
 0x13c   :  { %v1730_v32 = vadd.f32 %v1710_v9, %v1668_v47  ;;  %v1731_v31 = vadd.f32 %v1711_v60, %v1669_v21  ;;  %v1732_v48 = vadd.f32 %v1712_v54, %v1670_v56  ;;  %v1733_v0 = vadd.f32 %v1713_v62, %v1671_v42  ;;  %v5653_v21 = vld [vmem:[%s14207_s0 + $0x2c0] sm:$0xff]  ;;  %v5654_v56 = vld [vmem:[%s14207_s0 + $0x2c8] sm:$0xf]  ;;  %v5655_v42 = vld [vmem:[%s14207_s0 + $0x410] sm:$0xff] }
 0x13d   :  { %v1734_v18 = vadd.f32 %v1714_v1, %v1672_v7  ;;  %v1735_v47 = vadd.f32 %v1715_v57, %v1673_v14  ;;  %v1736_v35 = vadd.f32 %v1716_v23, %v1674_v34  ;;  %v1737_v27 = vadd.f32 %v1717_v25, %v1675_v4  ;;  %v5656_v14 = vld [vmem:[%s14207_s0 + $0x418] sm:$0xff]  ;;  %v5657_v34 = vld [vmem:[%s14207_s0 + $0x420] sm:$0xff]  ;;  %v5658_v4 = vld [vmem:[%s14207_s0 + $0x428] sm:$0xff] }
 0x13e   :  { %v1738_v12 = vadd.f32 %v1718_v36, %v1676_v24  ;;  %v1739_v7 = vadd.f32 %v1719_v50, %v1677_v6  ;;  %v1740_v41 = vadd.f32 %v1720_v53, %v1678_v43  ;;  %v1741_v10 = vadd.f32 %v1721_v37, %v1679_v55  ;;  %v5659_v24 = vld [vmem:[%s14207_s0 + $0x430] sm:$0xf]  ;;  %v5660_v6 = vld [vmem:[%s14207_s0 + $0x578] sm:$0xff]  ;;  %v5661_v43 = vld [vmem:[%s14207_s0 + $0x580] sm:$0xff] }
 0x13f   :  { %v1742_v2 = vadd.f32 %v1722_v16, %v1680_v39  ;;  %v1765_v55 = vmul.f32 %v5645_v58, %v9348_v26  ;;  %v1766_v39 = vmul.f32 %v5646_v29, %v9348_v26  ;;  %v1767_v19 = vmul.f32 %v5647_v33, %v9348_v26  ;;  %v5662_v5 = vld [vmem:[%s14207_s0 + $0x588] sm:$0xff]  ;;  %v5663_v30 = vld [vmem:[%s14207_s0 + $0x590] sm:$0xff] }
 0x140   :  { %v1768_v13 = vmul.f32 %v5648_v46, %v9348_v26  ;;  %v1769_v49 = vmul.f32 %v5649_v52, %v9348_v26  ;;  %v1770_v51 = vmul.f32 %v5650_v61, %v9348_v26  ;;  %v1771_v17 = vmul.f32 %v5651_v45, %v9348_v26 }
 0x141   :  { %v1772_v3 = vmul.f32 %v5652_v63, %v9348_v26  ;;  %v1773_v11 = vmul.f32 %v5653_v21, %v9348_v26  ;;  %v1774_v9 = vmul.f32 %v5654_v56, %v9348_v26  ;;  %v1775_v60 = vmul.f32 %v5655_v42, %v9348_v26 }
 0x142   :  { %v1776_v54 = vmul.f32 %v5656_v14, %v9348_v26  ;;  %v1777_v62 = vmul.f32 %v5657_v34, %v9348_v26  ;;  %v1778_v1 = vmul.f32 %v5658_v4, %v9348_v26  ;;  %v1779_v57 = vmul.f32 %v5659_v24, %v9348_v26 }
 0x143   :  { %v1780_v23 = vmul.f32 %v5660_v6, %v9348_v26  ;;  %v1781_v25 = vmul.f32 %v5661_v43, %v9348_v26  ;;  %v1782_v36 = vmul.f32 %v5662_v5, %v9348_v26  ;;  %v1783_v50 = vmul.f32 %v5663_v30, %v9348_v26 }
 0x144   :  { %v1784_v53 = vmul.f32 %v5664_v28, %v9348_v26  ;;  %v1785_v37 = vadd.f32 %v1765_v55, %v1723_v44  ;;  %v1786_v16 = vadd.f32 %v1766_v39, %v1724_v40  ;;  %v1787_v58 = vadd.f32 %v1767_v19, %v1725_v22 }
 0x145   :  { %v1788_v29 = vadd.f32 %v1768_v13, %v1726_v8  ;;  %v1789_v33 = vadd.f32 %v1769_v49, %v1727_v15  ;;  %v1790_v46 = vadd.f32 %v1770_v51, %v1728_v38  ;;  %v1791_v52 = vadd.f32 %v1771_v17, %v1729_v59 }
 0x146   :  { %v1792_v61 = vadd.f32 %v1772_v3, %v1730_v32  ;;  %v1793_v45 = vadd.f32 %v1773_v11, %v1731_v31  ;;  %v1794_v63 = vadd.f32 %v1774_v9, %v1732_v48  ;;  %v1795_v21 = vadd.f32 %v1775_v60, %v1733_v0 }
 0x147   :  { %v1796_v56 = vadd.f32 %v1776_v54, %v1734_v18  ;;  %v1797_v42 = vadd.f32 %v1777_v62, %v1735_v47  ;;  %v1798_v14 = vadd.f32 %v1778_v1, %v1736_v35  ;;  %v1799_v34 = vadd.f32 %v1779_v57, %v1737_v27 }
 0x148   :  { %v1800_v4 = vadd.f32 %v1780_v23, %v1738_v12  ;;  %v1801_v24 = vadd.f32 %v1781_v25, %v1739_v7  ;;  %v1802_v6 = vadd.f32 %v1782_v36, %v1740_v41  ;;  %v1803_v43 = vadd.f32 %v1783_v50, %v1741_v10 }
 0x149   :  { %v1804_v26 = vadd.f32 %v1784_v53, %v1742_v2  ;;  %v1807_v44 = vadd.f32 %v9351_v20, %v1785_v37  ;;  %v1808_v40 = vadd.f32 %v9351_v20, %v1786_v16  ;;  %v1809_v22 = vadd.f32 %v9351_v20, %v1787_v58  ;;  %v1872_v37 = vld [vmem:[%s14207_s0] sm:$0xff]  ;;  %v1873_v16 = vld [vmem:[%s14207_s0 + $0x8] sm:$0xff]  ;;  %v1874_v58 = vld [vmem:[%s14207_s0 + $0x10] sm:$0xff] }
 0x14a   :  { %v1810_v8 = vadd.f32 %v9351_v20, %v1788_v29  ;;  %v1811_v15 = vadd.f32 %v9351_v20, %v1789_v33  ;;  %v1812_v38 = vadd.f32 %v9351_v20, %v1790_v46  ;;  %v1813_v59 = vadd.f32 %v9351_v20, %v1791_v52 }
 0x14b   :  { %v1814_v32 = vadd.f32 %v9351_v20, %v1792_v61  ;;  %v1815_v31 = vadd.f32 %v9351_v20, %v1793_v45  ;;  %v1816_v48 = vadd.f32 %v9351_v20, %v1794_v63  ;;  %v1817_v0 = vadd.f32 %v9351_v20, %v1795_v21  ;;  %v1875_v61 = vld [vmem:[%s14207_s0 + $0x18] sm:$0xff]  ;;  %v1876_v45 = vld [vmem:[%s14207_s0 + $0x20] sm:$0xf]  ;;  %v1877_v63 = vld [vmem:[%s14207_s0 + $0x168] sm:$0xff] }
 0x14c   :  { %v1818_v18 = vadd.f32 %v9351_v20, %v1796_v56  ;;  %v1819_v47 = vadd.f32 %v9351_v20, %v1797_v42  ;;  %v1820_v35 = vadd.f32 %v9351_v20, %v1798_v14  ;;  %v1821_v27 = vadd.f32 %v9351_v20, %v1799_v34  ;;  %v1878_v21 = vld [vmem:[%s14207_s0 + $0x170] sm:$0xff] }
 0x14d   :  { %v1822_v12 = vadd.f32 %v9351_v20, %v1800_v4  ;;  %v1823_v7 = vadd.f32 %v9351_v20, %v1801_v24  ;;  %v1824_v41 = vadd.f32 %v9351_v20, %v1802_v6  ;;  %v1825_v10 = vadd.f32 %v9351_v20, %v1803_v43  ;;  %v1879_v4 = vld [vmem:[%s14207_s0 + $0x178] sm:$0xff]  ;;  %v1880_v24 = vld [vmem:[%s14207_s0 + $0x180] sm:$0xff]  ;;  %v1881_v6 = vld [vmem:[%s14207_s0 + $0x188] sm:$0xf] }
 0x14e   :  { %v1826_v2 = vadd.f32 %v9351_v20, %v1804_v26  ;;  %v1827_v55 = vmax.f32 %v1807_v44, 0.0  ;;  %v1828_v39 = vmax.f32 %v1808_v40, 0.0  ;;  %v1829_v19 = vmax.f32 %v1809_v22, 0.0  ;;  %v1882_v26 = vld [vmem:[%s14207_s0 + $0x2d0] sm:$0xff]  ;;  %v1883_v44 = vld [vmem:[%s14207_s0 + $0x2d8] sm:$0xff]  ;;  %v1884_v40 = vld [vmem:[%s14207_s0 + $0x2e0] sm:$0xff] }
 0x14f   :  { %v1830_v13 = vmax.f32 %v1810_v8, 0.0  ;;  %v1831_v5 = vmax.f32 %v1811_v15, 0.0  ;;  %v1832_v30 = vmax.f32 %v1812_v38, 0.0  ;;  %v1833_v28 = vmax.f32 %v1813_v59, 0.0  ;;  %v1885_v22 = vld [vmem:[%s14207_s0 + $0x2e8] sm:$0xff] }
 0x150   :  { %v1834_v49 = vmax.f32 %v1814_v32, 0.0  ;;  %v1835_v51 = vmax.f32 %v1815_v31, 0.0  ;;  %v1836_v17 = vmax.f32 %v1816_v48, 0.0  ;;  %v1837_v3 = vmax.f32 %v1817_v0, 0.0  ;;  %v1886_v0 = vld [vmem:[%s14207_s0 + $0x2f0] sm:$0xf] }
 0x151   :  { %v1838_v11 = vmax.f32 %v1818_v18, 0.0  ;;  %v1839_v9 = vmax.f32 %v1819_v47, 0.0  ;;  %v1840_v20 = vmax.f32 %v1820_v35, 0.0  ;;  %v1841_v60 = vmax.f32 %v1821_v27, 0.0  ;;  %v1887_v18 = vld [vmem:[%s14207_s0 + $0x438] sm:$0xff]  ;;  %v1888_v47 = vld [vmem:[%s14207_s0 + $0x440] sm:$0xff] }
 0x152   :  { %v1842_v54 = vmax.f32 %v1822_v12, 0.0  ;;  %v1843_v62 = vmax.f32 %v1823_v7, 0.0  ;;  %v1844_v1 = vmax.f32 %v1824_v41, 0.0  ;;  %v1845_v57 = vmax.f32 %v1825_v10, 0.0  ;;  %v1889_v27 = vld [vmem:[%s14207_s0 + $0x448] sm:$0xff]  ;;  %v1890_v12 = vld [vmem:[%s14207_s0 + $0x450] sm:$0xff] }
 0x153   :  { %v1846_v23 = vmax.f32 %v1826_v2, 0.0  ;;  %v1847_v25 = vmax.f32 %v1827_v55, %v1832_v30  ;;  %v1850_v36 = vmax.f32 %v1828_v39, %v1833_v28  ;;  %v1853_v50 = vmax.f32 %v1829_v19, %v1834_v49  ;;  %v1891_v7 = vld [vmem:[%s14207_s0 + $0x458] sm:$0xf]  ;;  %v5669_v30 = vld [vmem:[%s14207_s0 + $0x30] sm:$0xff] }
 0x154   :  { %v1856_v53 = vmax.f32 %v1830_v13, %v1835_v51  ;;  %v1859_v29 = vsel %vm648_vm0, %v1831_v5, -inf  ;;  %v1860_v33 = vsel %vm648_vm0, %v1836_v17, -inf  ;;  %v1862_v46 = vsel %vm648_vm0, %v1841_v60, -inf  ;;  %v5668_v5 = vld [vmem:[%s14207_s0 + $0x28] sm:$0xff]  ;;  %v5670_v28 = vld [vmem:[%s14207_s0 + $0x38] sm:$0xff] }
 0x155   :  { %v1864_v52 = vsel %vm648_vm0, %v1846_v23, -inf  ;;  %v1848_v56 = vmax.f32 %v1847_v25, %v1837_v3  ;;  %v1851_v42 = vmax.f32 %v1850_v36, %v1838_v11  ;;  %v1854_v14 = vmax.f32 %v1853_v50, %v1839_v9  ;;  %v5671_v11 = vld [vmem:[%s14207_s0 + $0x40] sm:$0xff]  ;;  %v5672_v9 = vld [vmem:[%s14207_s0 + $0x48] sm:$0xf] }
 0x156   :  { %v1857_v34 = vmax.f32 %v1856_v53, %v1840_v20  ;;  %v1861_v43 = vmax.f32 %v1859_v29, %v1860_v33  ;;  %v1893_v8 = vstv %s9571_s18  ;;  %v9625_v15 = vstv %s9573_s9  ;;  %v5673_v20 = vld [vmem:[%s14207_s0 + $0x190] sm:$0xff]  ;;  %v5675_v23 = vld [vmem:[%s14207_s0 + $0x1a0] sm:$0xff] }
 0x157   :  { %v9628_v38 = vstv %s9575_s17  ;;  %v1849_v59 = vmax.f32 %v1848_v56, %v1842_v54  ;;  %v1852_v32 = vmax.f32 %v1851_v42, %v1843_v62  ;;  %v1855_v31 = vmax.f32 %v1854_v14, %v1844_v1  ;;  %v5676_v25 = vld [vmem:[%s14207_s0 + $0x1a8] sm:$0xff]  ;;  %v5679_v29 = vld [vmem:[%s14207_s0 + $0x300] sm:$0xff]  ;;  %v5685_v14 = vld [vmem:[%s14207_s0 + $0x470] sm:$0xff]  ;;  %s10818_s17 = sld [smem:[#allocation3 + $0x284]] }
 0x158   :  { %v1858_v48 = vmax.f32 %v1857_v34, %v1845_v57  ;;  %v1863_v35 = vmax.f32 %v1861_v43, %v1862_v46  ;;  %v9648_v41 = vmul.f32 %v1893_v8, %v1872_v37  ;;  %v9650_v10 = vmul.f32 %v1893_v8, %v1873_v16  ;;  %v5674_v57 = vld [vmem:[%s14207_s0 + $0x198] sm:$0xff]  ;;  %v5677_v16 = vld [vmem:[%s14207_s0 + $0x1b0] sm:$0xf]  ;;  %v5683_v56 = vld [vmem:[%s14207_s0 + $0x460] sm:$0xff] }
 0x159   :  { %v9652_v2 = vmul.f32 %v1893_v8, %v1874_v58  ;;  %1866 = vst [vmem:[#allocation2 + $0x50] sm:$0xff] %v1849_v59  ;;  %1867 = vst [vmem:[#allocation2 + $0x58] sm:$0xff] %v1852_v32  ;;  %v1897_v55 = vmul.f32 %v1893_v8, %v1875_v61  ;;  %v1898_v39 = vmul.f32 %v1893_v8, %v1876_v45  ;;  %v5678_v58 = vld [vmem:[%s14207_s0 + $0x2f8] sm:$0xff]  ;;  %v5681_v61 = vld [vmem:[%s14207_s0 + $0x310] sm:$0xff] }
 0x15a   :  { %1868 = vst [vmem:[#allocation2 + $0x60] sm:$0xff] %v1855_v31  ;;  %1869 = vst [vmem:[#allocation2 + $0x68] sm:$0xff] %v1858_v48  ;;  %v1899_v19 = vmul.f32 %v1893_v8, %v1877_v63  ;;  %v9654_v13 = vmul.f32 %v1893_v8, %v1878_v21  ;;  %v1865_v49 = vmax.f32 %v1863_v35, %v1864_v52  ;;  %v5680_v52 = vld [vmem:[%s14207_s0 + $0x308] sm:$0xff]  ;;  %v5682_v45 = vld [vmem:[%s14207_s0 + $0x318] sm:$0xf] }
 0x15b   :  { %v1901_v51 = vmul.f32 %v1893_v8, %v1879_v4  ;;  %v1902_v17 = vmul.f32 %v1893_v8, %v1880_v24  ;;  %v1903_v3 = vmul.f32 %v1893_v8, %v1881_v6  ;;  %v1904_v60 = vmul.f32 %v1893_v8, %v1882_v26  ;;  %v5684_v42 = vld [vmem:[%s14207_s0 + $0x468] sm:$0xff]  ;;  %v5686_v43 = vld [vmem:[%s14207_s0 + $0x478] sm:$0xff]  ;;  %v5687_v26 = vld [vmem:[%s14207_s0 + $0x480] sm:$0xf] }
 0x15c   :  { %v1905_v54 = vmul.f32 %v1893_v8, %v1883_v44  ;;  %v1906_v62 = vmul.f32 %v1893_v8, %v1884_v40  ;;  %v1907_v1 = vmul.f32 %v1893_v8, %v1885_v22  ;;  %1870 = vst [vmem:[#allocation2 + $0x70] sm:$0xf] %v1865_v49  ;;  %v1908_v36 = vmul.f32 %v1893_v8, %v1886_v0 }
 0x15d   :  { %v1909_v50 = vmul.f32 %v1893_v8, %v1887_v18  ;;  %v1910_v53 = vmul.f32 %v1893_v8, %v1888_v47  ;;  %v1911_v37 = vmul.f32 %v1893_v8, %v1889_v27  ;;  %v1912_v33 = vmul.f32 %v1893_v8, %v1890_v12 }
 0x15e   :  { %v1913_v46 = vmul.f32 %v1893_v8, %v1891_v7  ;;  %v1936_v63 = vmul.f32 %v5668_v5, %v9625_v15  ;;  %v1937_v21 = vmul.f32 %v5669_v30, %v9625_v15  ;;  %v1938_v34 = vmul.f32 %v5670_v28, %v9625_v15 }
 0x15f   :  { %v1939_v4 = vmul.f32 %v5671_v11, %v9625_v15  ;;  %v1940_v24 = vmul.f32 %v5672_v9, %v9625_v15  ;;  %v1941_v6 = vmul.f32 %v5673_v20, %v9625_v15  ;;  %v1942_v44 = vmul.f32 %v5674_v57, %v9625_v15  ;;  %v5690_v9 = vld [vmem:[%s14207_s0 + $0x58] sm:$0xff]  ;;  %v5691_v20 = vld [vmem:[%s14207_s0 + $0x60] sm:$0xff] }
 0x160   :  { %v1943_v40 = vmul.f32 %v5675_v23, %v9625_v15  ;;  %v1944_v22 = vmul.f32 %v5676_v25, %v9625_v15  ;;  %v1945_v8 = vmul.f32 %v5677_v16, %v9625_v15  ;;  %v1946_v59 = vmul.f32 %v5678_v58, %v9625_v15  ;;  %v5697_v58 = vld [vmem:[%s14207_s0 + $0x1d0] sm:$0xff] }
 0x161   :  { %v1947_v32 = vmul.f32 %v5679_v29, %v9625_v15  ;;  %v1948_v31 = vmul.f32 %v5680_v52, %v9625_v15  ;;  %v1949_v48 = vmul.f32 %v5681_v61, %v9625_v15  ;;  %v1950_v0 = vmul.f32 %v5682_v45, %v9625_v15  ;;  %v5698_v29 = vld [vmem:[%s14207_s0 + $0x1d8] sm:$0xf]  ;;  %v5701_v52 = vld [vmem:[%s14207_s0 + $0x330] sm:$0xff] }
 0x162   :  { %v1951_v18 = vmul.f32 %v5683_v56, %v9625_v15  ;;  %v1952_v47 = vmul.f32 %v5684_v42, %v9625_v15  ;;  %v1953_v35 = vmul.f32 %v5685_v14, %v9625_v15  ;;  %v1954_v27 = vmul.f32 %v5686_v43, %v9625_v15 }
 0x163   :  { %v1955_v12 = vmul.f32 %v5687_v26, %v9625_v15  ;;  %v1956_v7 = vadd.f32 %v1936_v63, %v9648_v41  ;;  %v1957_v5 = vadd.f32 %v1937_v21, %v9650_v10  ;;  %v1958_v30 = vadd.f32 %v1938_v34, %v9652_v2  ;;  %v5689_v10 = vld [vmem:[%s14207_s0 + $0x50] sm:$0xff]  ;;  %v5695_v2 = vld [vmem:[%s14207_s0 + $0x1c0] sm:$0xff]  ;;  %v5706_v21 = vld [vmem:[%s14207_s0 + $0x498] sm:$0xff] }
 0x164   :  { %v1959_v28 = vadd.f32 %v1939_v4, %v1897_v55  ;;  %v1960_v49 = vadd.f32 %v1940_v24, %v1898_v39  ;;  %v1961_v11 = vadd.f32 %v1941_v6, %v1899_v19  ;;  %v1962_v57 = vadd.f32 %v1942_v44, %v9654_v13  ;;  %v5696_v55 = vld [vmem:[%s14207_s0 + $0x1c8] sm:$0xff]  ;;  %v5707_v4 = vld [vmem:[%s14207_s0 + $0x4a0] sm:$0xff] }
 0x165   :  { %v1963_v15 = vadd.f32 %v1943_v40, %v1901_v51  ;;  %v1964_v23 = vadd.f32 %v1944_v22, %v1902_v17  ;;  %v1965_v41 = vadd.f32 %v1945_v8, %v1903_v3  ;;  %v1966_v39 = vadd.f32 %v1946_v59, %v1904_v60  ;;  %v5692_v13 = vld [vmem:[%s14207_s0 + $0x68] sm:$0xff]  ;;  %v5693_v51 = vld [vmem:[%s14207_s0 + $0x70] sm:$0xf]  ;;  %v5694_v17 = vld [vmem:[%s14207_s0 + $0x1b8] sm:$0xff] }
 0x166   :  { %v1967_v19 = vadd.f32 %v1947_v32, %v1905_v54  ;;  %v1968_v25 = vadd.f32 %v1948_v31, %v1906_v62  ;;  %v1969_v16 = vadd.f32 %v1949_v48, %v1907_v1  ;;  %v5700_v3 = vld [vmem:[%s14207_s0 + $0x328] sm:$0xff]  ;;  %v1970_v60 = vadd.f32 %v1950_v0, %v1908_v36  ;;  %v5699_v36 = vld [vmem:[%s14207_s0 + $0x320] sm:$0xff] }
 0x167   :  { %v1971_v54 = vadd.f32 %v1951_v18, %v1909_v50  ;;  %v1972_v62 = vadd.f32 %v1952_v47, %v1910_v53  ;;  %v1973_v1 = vadd.f32 %v1953_v35, %v1911_v37  ;;  %v1974_v61 = vadd.f32 %v1954_v27, %v1912_v33  ;;  %v5702_v50 = vld [vmem:[%s14207_s0 + $0x338] sm:$0xff]  ;;  %v5704_v53 = vld [vmem:[%s14207_s0 + $0x488] sm:$0xff]  ;;  %v5703_v33 = vld [vmem:[%s14207_s0 + $0x340] sm:$0xf] }
 0x168   :  { %v1975_v45 = vadd.f32 %v1955_v12, %v1913_v46  ;;  %v1998_v37 = vmul.f32 %v5689_v10, %v9628_v38  ;;  %v1999_v63 = vmul.f32 %v5690_v9, %v9628_v38  ;;  %v5705_v46 = vld [vmem:[%s14207_s0 + $0x490] sm:$0xff]  ;;  %v2000_v56 = vmul.f32 %v5691_v20, %v9628_v38  ;;  %v5708_v24 = vld [vmem:[%s14207_s0 + $0x4a8] sm:$0xf] }
 0x169   :  { %v2001_v42 = vmul.f32 %v5692_v13, %v9628_v38  ;;  %v2002_v14 = vmul.f32 %v5693_v51, %v9628_v38  ;;  %v2003_v34 = vmul.f32 %v5694_v17, %v9628_v38  ;;  %v2004_v6 = vmul.f32 %v5695_v2, %v9628_v38  ;;  %v5711_v2 = vld [vmem:[%s14207_s0 + $0x80] sm:$0xff] }
 0x16a   :  { %v2005_v43 = vmul.f32 %v5696_v55, %v9628_v38  ;;  %v2006_v26 = vmul.f32 %v5697_v58, %v9628_v38  ;;  %v2007_v44 = vmul.f32 %v5698_v29, %v9628_v38  ;;  %v2008_v40 = vmul.f32 %v5699_v36, %v9628_v38  ;;  %v5718_v58 = vld [vmem:[%s14207_s0 + $0x1f8] sm:$0xff]  ;;  %v5719_v29 = vld [vmem:[%s14207_s0 + $0x200] sm:$0xf] }
 0x16b   :  { %v2009_v22 = vmul.f32 %v5700_v3, %v9628_v38  ;;  %v2010_v8 = vmul.f32 %v5701_v52, %v9628_v38  ;;  %v2011_v59 = vmul.f32 %v5702_v50, %v9628_v38  ;;  %v2012_v32 = vmul.f32 %v5703_v33, %v9628_v38  ;;  %v5715_v3 = vld [vmem:[%s14207_s0 + $0x1e0] sm:$0xff] }
 0x16c   :  { %v2013_v31 = vmul.f32 %v5704_v53, %v9628_v38  ;;  %v2014_v48 = vmul.f32 %v5705_v46, %v9628_v38  ;;  %v2015_v0 = vmul.f32 %v5706_v21, %v9628_v38  ;;  %v2016_v18 = vmul.f32 %v5707_v4, %v9628_v38  ;;  %v5723_v52 = vld [vmem:[%s14207_s0 + $0x360] sm:$0xff]  ;;  %v5724_v53 = vld [vmem:[%s14207_s0 + $0x368] sm:$0xf] }
 0x16d   :  { %v2017_v47 = vmul.f32 %v5708_v24, %v9628_v38  ;;  %v2018_v35 = vadd.f32 %v1998_v37, %v1956_v7  ;;  %v2019_v27 = vadd.f32 %v1999_v63, %v1957_v5  ;;  %v2020_v12 = vadd.f32 %v2000_v56, %v1958_v30  ;;  %v5712_v38 = vld [vmem:[%s14207_s0 + $0x88] sm:$0xff]  ;;  %v5717_v5 = vld [vmem:[%s14207_s0 + $0x1f0] sm:$0xff]  ;;  %v5727_v21 = vld [vmem:[%s14207_s0 + $0x4c0] sm:$0xff] }
 0x16e   :  { %v2021_v9 = vadd.f32 %v2001_v42, %v1959_v28  ;;  %v9824_v20 = vadd.f32 %v2002_v14, %v1960_v49  ;;  %v9826_v10 = vadd.f32 %v2003_v34, %v1961_v11  ;;  %v2024_v55 = vadd.f32 %v2004_v6, %v1962_v57  ;;  %v5716_v7 = vld [vmem:[%s14207_s0 + $0x1e8] sm:$0xff]  ;;  %v5710_v57 = vld [vmem:[%s14207_s0 + $0x78] sm:$0xff]  ;;  %v5729_v42 = vld [vmem:[%s14207_s0 + $0x4d0] sm:$0xf] }
 0x16f   :  { %v2025_v13 = vadd.f32 %v2005_v43, %v1963_v15  ;;  %v9831_v51 = vadd.f32 %v2006_v26, %v1964_v23  ;;  %v9833_v17 = vadd.f32 %v2007_v44, %v1965_v41  ;;  %v2028_v30 = vadd.f32 %v2008_v40, %v1966_v39  ;;  %v5713_v15 = vld [vmem:[%s14207_s0 + $0x90] sm:$0xff]  ;;  %v5714_v23 = vld [vmem:[%s14207_s0 + $0x98] sm:$0xf]  ;;  %v5728_v56 = vld [vmem:[%s14207_s0 + $0x4c8] sm:$0xff] }
 0x170   :  { %v2029_v28 = vadd.f32 %v2009_v22, %v1967_v19  ;;  %v9844_v49 = vadd.f32 %v2010_v8, %v1968_v25  ;;  %v9846_v11 = vadd.f32 %v2011_v59, %v1969_v16  ;;  %v5721_v41 = vld [vmem:[%s14207_s0 + $0x350] sm:$0xff]  ;;  %v2032_v39 = vadd.f32 %v2012_v32, %v1970_v60  ;;  %v5722_v60 = vld [vmem:[%s14207_s0 + $0x358] sm:$0xff] }
 0x171   :  { %v2033_v19 = vadd.f32 %v2013_v31, %v1971_v54  ;;  %v9860_v25 = vadd.f32 %v2014_v48, %v1972_v62  ;;  %v9862_v16 = vadd.f32 %v2015_v0, %v1973_v1  ;;  %v2036_v54 = vadd.f32 %v2016_v18, %v1974_v61  ;;  %v5720_v1 = vld [vmem:[%s14207_s0 + $0x348] sm:$0xff]  ;;  %v5725_v61 = vld [vmem:[%s14207_s0 + $0x4b0] sm:$0xff] }
 0x172   :  { %v2037_v62 = vadd.f32 %v2017_v47, %v1975_v45  ;;  %v2059_v36 = vstv %s9800_s15  ;;  %v9884_v50 = vstv %s9812_s11  ;;  %v5726_v45 = vld [vmem:[%s14207_s0 + $0x4b8] sm:$0xff]  ;;  %s12082_s15 = sld [smem:[#allocation3 + $0x385]]  ;;  %s12558_s11 = sld [smem:[#allocation3 + $0x286]] }
 0x173   :  { %v2060_v37 = vmul.f32 %v5710_v57, %v2059_v36  ;;  %v2061_v63 = vmul.f32 %v5711_v2, %v2059_v36  ;;  %v2062_v33 = vmul.f32 %v5712_v38, %v2059_v36  ;;  %v2063_v46 = vmul.f32 %v5713_v15, %v2059_v36 }
 0x174   :  { %v2064_v14 = vmul.f32 %v5714_v23, %v2059_v36  ;;  %v2065_v34 = vmul.f32 %v5715_v3, %v2059_v36  ;;  %v2066_v4 = vmul.f32 %v5716_v7, %v2059_v36  ;;  %v2067_v24 = vmul.f32 %v5717_v5, %v2059_v36  ;;  %v5732_v7 = vld [vmem:[%s14207_s0 + $0xa8] sm:$0xff]  ;;  %v5742_v3 = vld [vmem:[%s14207_s0 + $0x378] sm:$0xff] }
 0x175   :  { %v2068_v6 = vmul.f32 %v5718_v58, %v2059_v36  ;;  %v2069_v43 = vmul.f32 %v5719_v29, %v2059_v36  ;;  %v2070_v26 = vmul.f32 %v5720_v1, %v2059_v36  ;;  %v2071_v44 = vmul.f32 %v5721_v41, %v2059_v36  ;;  %v5734_v41 = vld [vmem:[%s14207_s0 + $0xb8] sm:$0xff] }
 0x176   :  { %v2072_v40 = vmul.f32 %v5722_v60, %v2059_v36  ;;  %v2073_v22 = vmul.f32 %v5723_v52, %v2059_v36  ;;  %v2074_v8 = vmul.f32 %v5724_v53, %v2059_v36  ;;  %v2075_v59 = vmul.f32 %v5725_v61, %v2059_v36  ;;  %v5740_v60 = vld [vmem:[%s14207_s0 + $0x228] sm:$0xf]  ;;  %v5739_v52 = vld [vmem:[%s14207_s0 + $0x220] sm:$0xff] }
 0x177   :  { %v2076_v32 = vmul.f32 %v5726_v45, %v2059_v36  ;;  %v2077_v31 = vmul.f32 %v5727_v21, %v2059_v36  ;;  %v2078_v48 = vmul.f32 %v5728_v56, %v2059_v36  ;;  %v2079_v0 = vmul.f32 %v5729_v42, %v2059_v36  ;;  %v5741_v36 = vld [vmem:[%s14207_s0 + $0x370] sm:$0xff] }
 0x178   :  { %v9904_v18 = vadd.f32 %v2060_v37, %v2018_v35  ;;  %v9906_v47 = vadd.f32 %v2061_v63, %v2019_v27  ;;  %v9908_v2 = vadd.f32 %v2062_v33, %v2020_v12  ;;  %v9910_v38 = vadd.f32 %v2063_v46, %v2021_v9  ;;  %v5733_v27 = vld [vmem:[%s14207_s0 + $0xb0] sm:$0xff]  ;;  %v5738_v9 = vld [vmem:[%s14207_s0 + $0x218] sm:$0xff]  ;;  %v5748_v63 = vld [vmem:[%s14207_s0 + $0x4e8] sm:$0xff] }
 0x179   :  { %v9916_v5 = vadd.f32 %v2064_v14, %v9824_v20  ;;  %v9919_v57 = vadd.f32 %v2065_v34, %v9826_v10  ;;  %v9921_v15 = vadd.f32 %v2066_v4, %v2024_v55  ;;  %v9923_v35 = vadd.f32 %v2067_v24, %v2025_v13  ;;  %v5737_v12 = vld [vmem:[%s14207_s0 + $0x210] sm:$0xff]  ;;  %v5731_v13 = vld [vmem:[%s14207_s0 + $0xa0] sm:$0xff]  ;;  %v5750_v46 = vld [vmem:[%s14207_s0 + $0x4f8] sm:$0xf] }
 0x17a   :  { %v2088_v20 = vadd.f32 %v2068_v6, %v9831_v51  ;;  %v2089_v10 = vadd.f32 %v2069_v43, %v9833_v17  ;;  %v2090_v55 = vadd.f32 %v2070_v26, %v2028_v30  ;;  %v2091_v23 = vadd.f32 %v2071_v44, %v2029_v28  ;;  %v5735_v30 = vld [vmem:[%s14207_s0 + $0xc0] sm:$0xf]  ;;  %v5736_v28 = vld [vmem:[%s14207_s0 + $0x208] sm:$0xff]  ;;  %v5749_v33 = vld [vmem:[%s14207_s0 + $0x4f0] sm:$0xff] }
 0x17b   :  { %v2092_v58 = vadd.f32 %v2072_v40, %v9844_v49  ;;  %v2093_v51 = vadd.f32 %v2073_v22, %v9846_v11  ;;  %v2094_v29 = vadd.f32 %v2074_v8, %v2032_v39  ;;  %v2095_v17 = vadd.f32 %v2075_v59, %v2033_v19  ;;  %v5743_v49 = vld [vmem:[%s14207_s0 + $0x380] sm:$0xff] }
 0x17c   :  { %v9960_v11 = vadd.f32 %v2076_v32, %v9860_v25  ;;  %v9963_v39 = vadd.f32 %v2077_v31, %v9862_v16  ;;  %v9965_v19 = vadd.f32 %v2078_v48, %v2036_v54  ;;  %v9967_v1 = vadd.f32 %v2079_v0, %v2037_v62  ;;  %v5744_v25 = vld [vmem:[%s14207_s0 + $0x388] sm:$0xff]  ;;  %v5745_v16 = vld [vmem:[%s14207_s0 + $0x390] sm:$0xf]  ;;  %v5746_v54 = vld [vmem:[%s14207_s0 + $0x4d8] sm:$0xff] }
 0x17d   :  { %v5747_v62 = vld [vmem:[%s14207_s0 + $0x4e0] sm:$0xff]  ;;  %v2122_v53 = vmul.f32 %v5731_v13, %v9884_v50  ;;  %v2123_v61 = vmul.f32 %v5732_v7, %v9884_v50  ;;  %v2124_v45 = vmul.f32 %v5733_v27, %v9884_v50  ;;  %v2125_v37 = vmul.f32 %v5734_v41, %v9884_v50  ;;  %v5752_v41 = vld [vmem:[%s14207_s0 + $0xc8] sm:$0xff] }
 0x17e   :  { %v2126_v21 = vmul.f32 %v5735_v30, %v9884_v50  ;;  %v2127_v56 = vmul.f32 %v5736_v28, %v9884_v50  ;;  %v2128_v42 = vmul.f32 %v5737_v12, %v9884_v50  ;;  %v2129_v14 = vmul.f32 %v5738_v9, %v9884_v50  ;;  %v5759_v13 = vld [vmem:[%s14207_s0 + $0x240] sm:$0xff] }
 0x17f   :  { %v2130_v34 = vmul.f32 %v5739_v52, %v9884_v50  ;;  %v2131_v4 = vmul.f32 %v5740_v60, %v9884_v50  ;;  %v2132_v24 = vmul.f32 %v5741_v36, %v9884_v50  ;;  %v2133_v6 = vmul.f32 %v5742_v3, %v9884_v50  ;;  %v5755_v3 = vld [vmem:[%s14207_s0 + $0xe0] sm:$0xff]  ;;  %v5762_v52 = vld [vmem:[%s14207_s0 + $0x398] sm:$0xff] }
 0x180   :  { %v2134_v43 = vmul.f32 %v5743_v49, %v9884_v50  ;;  %v2135_v26 = vmul.f32 %v5744_v25, %v9884_v50  ;;  %v2136_v44 = vmul.f32 %v5745_v16, %v9884_v50  ;;  %v2137_v40 = vmul.f32 %v5746_v54, %v9884_v50  ;;  %v5760_v49 = vld [vmem:[%s14207_s0 + $0x248] sm:$0xff]  ;;  %v5766_v16 = vld [vmem:[%s14207_s0 + $0x3b8] sm:$0xf]  ;;  %v5767_v54 = vld [vmem:[%s14207_s0 + $0x500] sm:$0xff] }
 0x181   :  { %v2138_v22 = vmul.f32 %v5747_v62, %v9884_v50  ;;  %v2139_v8 = vmul.f32 %v5748_v63, %v9884_v50  ;;  %v2140_v59 = vmul.f32 %v5749_v33, %v9884_v50  ;;  %v2141_v32 = vmul.f32 %v5750_v46, %v9884_v50  ;;  %v5768_v62 = vld [vmem:[%s14207_s0 + $0x508] sm:$0xff]  ;;  %v5769_v63 = vld [vmem:[%s14207_s0 + $0x510] sm:$0xff]  ;;  %v5770_v33 = vld [vmem:[%s14207_s0 + $0x518] sm:$0xff] }
 0x182   :  { %v10025_v31 = vadd.f32 %v2122_v53, %v9904_v18  ;;  %v10028_v48 = vadd.f32 %v2123_v61, %v9906_v47  ;;  %v10031_v0 = vadd.f32 %v2124_v45, %v9908_v2  ;;  %v10034_v7 = vadd.f32 %v2125_v37, %v9910_v38  ;;  %v5753_v47 = vld [vmem:[%s14207_s0 + $0xd0] sm:$0xff]  ;;  %v5754_v2 = vld [vmem:[%s14207_s0 + $0xd8] sm:$0xff]  ;;  %v5771_v46 = vld [vmem:[%s14207_s0 + $0x520] sm:$0xf] }
 0x183   :  { %v10037_v27 = vadd.f32 %v2126_v21, %v9916_v5  ;;  %v10040_v12 = vadd.f32 %v2127_v56, %v9919_v57  ;;  %v10043_v50 = vadd.f32 %v2128_v42, %v9921_v15  ;;  %v10046_v18 = vadd.f32 %v2129_v14, %v9923_v35  ;;  %v5756_v15 = vld [vmem:[%s14207_s0 + $0xe8] sm:$0xf]  ;;  %v5758_v35 = vld [vmem:[%s14207_s0 + $0x238] sm:$0xff] }
 0x184   :  { %v10054_v38 = vadd.f32 %v2130_v34, %v2088_v20  ;;  %v10056_v5 = vadd.f32 %v2131_v4, %v2089_v10  ;;  %v10058_v57 = vadd.f32 %v2132_v24, %v2090_v55  ;;  %v10060_v9 = vadd.f32 %v2133_v6, %v2091_v23 }
 0x185   :  { %v10071_v20 = vadd.f32 %v2134_v43, %v2092_v58  ;;  %v10073_v10 = vadd.f32 %v2135_v26, %v2093_v51  ;;  %v10075_v55 = vadd.f32 %v2136_v44, %v2094_v29  ;;  %v10077_v23 = vadd.f32 %v2137_v40, %v2095_v17  ;;  %v5757_v58 = vld [vmem:[%s14207_s0 + $0x230] sm:$0xff]  ;;  %v5763_v29 = vld [vmem:[%s14207_s0 + $0x3a0] sm:$0xff] }
 0x186   :  { %v5761_v51 = vld [vmem:[%s14207_s0 + $0x250] sm:$0xf]  ;;  %v10095_v17 = vadd.f32 %v2138_v22, %v9960_v11  ;;  %v10098_v30 = vadd.f32 %v2139_v8, %v9963_v39  ;;  %v10101_v28 = vadd.f32 %v2140_v59, %v9965_v19  ;;  %v10104_v60 = vadd.f32 %v2141_v32, %v9967_v1  ;;  %v5764_v11 = vld [vmem:[%s14207_s0 + $0x3a8] sm:$0xff] }
 0x187   :  { %v5765_v39 = vld [vmem:[%s14207_s0 + $0x3b0] sm:$0xff]  ;;  %v2183_v19 = vstv %s9991_s19  ;;  %v10120_v36 = vstv %s10006_s2  ;;  %v10123_v1 = vstv %s10012_s23  ;;  %s10412_s23 = sld [smem:[#allocation6 + $0x3]]  ;;  %s10702_s19 = sld [smem:[#allocation3 + $0x184]] }
 0x188   :  { %v10126_v25 = vstv %s10014_s14  ;;  %v2184_v53 = vmul.f32 %v5752_v41, %v2183_v19  ;;  %v2185_v61 = vmul.f32 %v5753_v47, %v2183_v19  ;;  %v2186_v45 = vmul.f32 %v5754_v2, %v2183_v19  ;;  %s10418_s14 = sld [smem:[#allocation3 + $0x84]] }
 0x189   :  { %v2187_v37 = vmul.f32 %v5755_v3, %v2183_v19  ;;  %v2188_v21 = vmul.f32 %v5756_v15, %v2183_v19  ;;  %v2189_v56 = vmul.f32 %v5757_v58, %v2183_v19  ;;  %v2190_v42 = vmul.f32 %v5758_v35, %v2183_v19 }
 0x18a   :  { %v2191_v14 = vmul.f32 %v5759_v13, %v2183_v19  ;;  %v2192_v34 = vmul.f32 %v5760_v49, %v2183_v19  ;;  %v2193_v4 = vmul.f32 %v5761_v51, %v2183_v19  ;;  %v2194_v24 = vmul.f32 %v5762_v52, %v2183_v19  ;;  %v5774_v13 = vld [vmem:[%s14207_s0 + $0xf8] sm:$0xff]  ;;  %v5784_v49 = vld [vmem:[%s14207_s0 + $0x3c8] sm:$0xff]  ;;  %v5777_v52 = vld [vmem:[%s14207_s0 + $0x110] sm:$0xf] }
 0x18b   :  { %v2195_v6 = vmul.f32 %v5763_v29, %v2183_v19  ;;  %v2196_v43 = vmul.f32 %v5764_v11, %v2183_v19  ;;  %v2197_v26 = vmul.f32 %v5765_v39, %v2183_v19  ;;  %v2198_v44 = vmul.f32 %v5766_v16, %v2183_v19  ;;  %v5776_v29 = vld [vmem:[%s14207_s0 + $0x108] sm:$0xff]  ;;  %v5778_v11 = vld [vmem:[%s14207_s0 + $0x258] sm:$0xff]  ;;  %v5781_v16 = vld [vmem:[%s14207_s0 + $0x270] sm:$0xff] }
 0x18c   :  { %v2199_v40 = vmul.f32 %v5767_v54, %v2183_v19  ;;  %v2200_v22 = vmul.f32 %v5768_v62, %v2183_v19  ;;  %v2201_v8 = vmul.f32 %v5769_v63, %v2183_v19  ;;  %v2202_v59 = vmul.f32 %v5770_v33, %v2183_v19  ;;  %v5782_v39 = vld [vmem:[%s14207_s0 + $0x278] sm:$0xf]  ;;  %v5783_v54 = vld [vmem:[%s14207_s0 + $0x3c0] sm:$0xff]  ;;  %v5792_v33 = vld [vmem:[%s14207_s0 + $0x548] sm:$0xf] }
 0x18d   :  { %v2203_v32 = vmul.f32 %v5771_v46, %v2183_v19  ;;  %v2204_v47 = vadd.f32 %v2184_v53, %v10025_v31  ;;  %v2205_v2 = vadd.f32 %v2185_v61, %v10028_v48  ;;  %v2206_v15 = vadd.f32 %v2186_v45, %v10031_v0  ;;  %v5775_v31 = vld [vmem:[%s14207_s0 + $0x100] sm:$0xff]  ;;  %v5780_v0 = vld [vmem:[%s14207_s0 + $0x268] sm:$0xff]  ;;  %v5786_v62 = vld [vmem:[%s14207_s0 + $0x3d8] sm:$0xff] }
 0x18e   :  { %v2207_v35 = vadd.f32 %v2187_v37, %v10034_v7  ;;  %v2208_v41 = vadd.f32 %v2188_v21, %v10037_v27  ;;  %v2209_v3 = vadd.f32 %v2189_v56, %v10040_v12  ;;  %v2210_v58 = vadd.f32 %v2190_v42, %v10043_v50  ;;  %v5779_v48 = vld [vmem:[%s14207_s0 + $0x260] sm:$0xff]  ;;  %v5790_v37 = vld [vmem:[%s14207_s0 + $0x538] sm:$0xff] }
 0x18f   :  { %v2211_v51 = vadd.f32 %v2191_v14, %v10046_v18  ;;  %v2212_v7 = vadd.f32 %v2192_v34, %v10054_v38  ;;  %v2213_v27 = vadd.f32 %v2193_v4, %v10056_v5  ;;  %v2214_v12 = vadd.f32 %v2194_v24, %v10058_v57  ;;  %v5773_v18 = vld [vmem:[%s14207_s0 + $0xf0] sm:$0xff]  ;;  %v5791_v63 = vld [vmem:[%s14207_s0 + $0x540] sm:$0xff] }
 0x190   :  { %v2215_v50 = vadd.f32 %v2195_v6, %v10060_v9  ;;  %v2216_v38 = vadd.f32 %v2196_v43, %v10071_v20  ;;  %v2217_v5 = vadd.f32 %v2197_v26, %v10073_v10  ;;  %v2218_v57 = vadd.f32 %v2198_v44, %v10075_v55  ;;  %v5785_v20 = vld [vmem:[%s14207_s0 + $0x3d0] sm:$0xff] }
 0x191   :  { %v2219_v9 = vadd.f32 %v2199_v40, %v10077_v23  ;;  %v2220_v10 = vadd.f32 %v2200_v22, %v10095_v17  ;;  %v2221_v55 = vadd.f32 %v2201_v8, %v10098_v30  ;;  %v2222_v23 = vadd.f32 %v2202_v59, %v10101_v28  ;;  %v5787_v17 = vld [vmem:[%s14207_s0 + $0x3e0] sm:$0xf]  ;;  %v5788_v30 = vld [vmem:[%s14207_s0 + $0x528] sm:$0xff]  ;;  %v5789_v28 = vld [vmem:[%s14207_s0 + $0x530] sm:$0xff] }
 0x192   :  { %v2223_v19 = vadd.f32 %v2203_v32, %v10104_v60  ;;  %v2246_v60 = vmul.f32 %v5773_v18, %v10120_v36  ;;  %v2247_v53 = vmul.f32 %v5774_v13, %v10120_v36  ;;  %v2248_v61 = vmul.f32 %v5775_v31, %v10120_v36 }
 0x193   :  { %v2249_v45 = vmul.f32 %v5776_v29, %v10120_v36  ;;  %v2250_v46 = vmul.f32 %v5777_v52, %v10120_v36  ;;  %v2251_v21 = vmul.f32 %v5778_v11, %v10120_v36  ;;  %v2252_v56 = vmul.f32 %v5779_v48, %v10120_v36  ;;  %v5796_v11 = vld [vmem:[%s14207_s0 + $0x128] sm:$0xff] }
 0x194   :  { %v2253_v42 = vmul.f32 %v5780_v0, %v10120_v36  ;;  %v2254_v14 = vmul.f32 %v5781_v16, %v10120_v36  ;;  %v2255_v34 = vmul.f32 %v5782_v39, %v10120_v36  ;;  %v2256_v4 = vmul.f32 %v5783_v54, %v10120_v36  ;;  %v5795_v0 = vld [vmem:[%s14207_s0 + $0x120] sm:$0xff] }
 0x195   :  { %v2257_v24 = vmul.f32 %v5784_v49, %v10120_v36  ;;  %v2258_v6 = vmul.f32 %v5785_v20, %v10120_v36  ;;  %v2259_v43 = vmul.f32 %v5786_v62, %v10120_v36  ;;  %v2260_v26 = vmul.f32 %v5787_v17, %v10120_v36  ;;  %v5802_v62 = vld [vmem:[%s14207_s0 + $0x298] sm:$0xff]  ;;  %v5804_v17 = vld [vmem:[%s14207_s0 + $0x3e8] sm:$0xff] }
 0x196   :  { %v2261_v44 = vmul.f32 %v5788_v30, %v10120_v36  ;;  %v2262_v40 = vmul.f32 %v5789_v28, %v10120_v36  ;;  %v2263_v22 = vmul.f32 %v5790_v37, %v10120_v36  ;;  %v2264_v8 = vmul.f32 %v5791_v63, %v10120_v36  ;;  %v5807_v30 = vld [vmem:[%s14207_s0 + $0x400] sm:$0xff]  ;;  %v5808_v28 = vld [vmem:[%s14207_s0 + $0x408] sm:$0xf]  ;;  %v5813_v37 = vld [vmem:[%s14207_s0 + $0x570] sm:$0xf] }
 0x197   :  { %v2265_v59 = vmul.f32 %v5792_v33, %v10120_v36  ;;  %v2266_v32 = vadd.f32 %v2246_v60, %v2204_v47  ;;  %v2267_v13 = vadd.f32 %v2247_v53, %v2205_v2  ;;  %v2268_v31 = vadd.f32 %v2248_v61, %v2206_v15  ;;  %v5800_v36 = vld [vmem:[%s14207_s0 + $0x288] sm:$0xff]  ;;  %v5801_v47 = vld [vmem:[%s14207_s0 + $0x290] sm:$0xff]  ;;  %v5811_v61 = vld [vmem:[%s14207_s0 + $0x560] sm:$0xff] }
 0x198   :  { %v2269_v48 = vadd.f32 %v2249_v45, %v2207_v35  ;;  %v2270_v18 = vadd.f32 %v2250_v46, %v2208_v41  ;;  %v2271_v29 = vadd.f32 %v2251_v21, %v2209_v3  ;;  %v2272_v49 = vadd.f32 %v2252_v56, %v2210_v58  ;;  %v5794_v41 = vld [vmem:[%s14207_s0 + $0x118] sm:$0xff]  ;;  %v5797_v3 = vld [vmem:[%s14207_s0 + $0x130] sm:$0xff]  ;;  %v5812_v45 = vld [vmem:[%s14207_s0 + $0x568] sm:$0xff] }
 0x199   :  { %v2273_v52 = vadd.f32 %v2253_v42, %v2211_v51  ;;  %v2274_v2 = vadd.f32 %v2254_v14, %v2212_v7  ;;  %v2275_v15 = vadd.f32 %v2255_v34, %v2213_v27  ;;  %v2276_v35 = vadd.f32 %v2256_v4, %v2214_v12  ;;  %v5805_v58 = vld [vmem:[%s14207_s0 + $0x3f0] sm:$0xff]  ;;  %v5798_v7 = vld [vmem:[%s14207_s0 + $0x138] sm:$0xf]  ;;  %v5799_v27 = vld [vmem:[%s14207_s0 + $0x280] sm:$0xff] }
 0x19a   :  { %v2277_v39 = vadd.f32 %v2257_v24, %v2215_v50  ;;  %v2278_v51 = vadd.f32 %v2258_v6, %v2216_v38  ;;  %v2279_v20 = vadd.f32 %v2259_v43, %v2217_v5  ;;  %v2280_v16 = vadd.f32 %v2260_v26, %v2218_v57  ;;  %v5803_v12 = vld [vmem:[%s14207_s0 + $0x2a0] sm:$0xf]  ;;  %v5806_v50 = vld [vmem:[%s14207_s0 + $0x3f8] sm:$0xff] }
 0x19b   :  { %v2281_v54 = vadd.f32 %v2261_v44, %v2219_v9  ;;  %v2282_v38 = vadd.f32 %v2262_v40, %v2220_v10  ;;  %v2283_v5 = vadd.f32 %v2263_v22, %v2221_v55  ;;  %v2284_v57 = vadd.f32 %v2264_v8, %v2222_v23  ;;  %v5809_v10 = vld [vmem:[%s14207_s0 + $0x550] sm:$0xff]  ;;  %v5810_v55 = vld [vmem:[%s14207_s0 + $0x558] sm:$0xff] }
 0x19c   :  { %v2285_v9 = vadd.f32 %v2265_v59, %v2223_v19  ;;  %v2308_v23 = vmul.f32 %v5794_v41, %v10123_v1  ;;  %v2309_v19 = vmul.f32 %v5795_v0, %v10123_v1  ;;  %v2310_v60 = vmul.f32 %v5796_v11, %v10123_v1 }
 0x19d   :  { %v2311_v53 = vmul.f32 %v5797_v3, %v10123_v1  ;;  %v2312_v63 = vmul.f32 %v5798_v7, %v10123_v1  ;;  %v2313_v33 = vmul.f32 %v5799_v27, %v10123_v1  ;;  %v2314_v46 = vmul.f32 %v5800_v36, %v10123_v1  ;;  %v5816_v36 = vld [vmem:[%s14207_s0 + $0x148] sm:$0xff]  ;;  %v5826_v7 = vld [vmem:[%s14207_s0 + $0x418] sm:$0xff] }
 0x19e   :  { %v2315_v21 = vmul.f32 %v5801_v47, %v10123_v1  ;;  %v2316_v56 = vmul.f32 %v5802_v62, %v10123_v1  ;;  %v2317_v42 = vmul.f32 %v5803_v12, %v10123_v1  ;;  %v2318_v14 = vmul.f32 %v5804_v17, %v10123_v1  ;;  %v5823_v17 = vld [vmem:[%s14207_s0 + $0x2c0] sm:$0xff] }
 0x19f   :  { %v2319_v34 = vmul.f32 %v5805_v58, %v10123_v1  ;;  %v2320_v4 = vmul.f32 %v5806_v50, %v10123_v1  ;;  %v2321_v24 = vmul.f32 %v5807_v30, %v10123_v1  ;;  %v2322_v6 = vmul.f32 %v5808_v28, %v10123_v1  ;;  %v5825_v30 = vld [vmem:[%s14207_s0 + $0x410] sm:$0xff]  ;;  %v5828_v28 = vld [vmem:[%s14207_s0 + $0x428] sm:$0xff] }
 0x1a0   :  { %v2323_v43 = vmul.f32 %v5809_v10, %v10123_v1  ;;  %v2324_v26 = vmul.f32 %v5810_v55, %v10123_v1  ;;  %v2325_v44 = vmul.f32 %v5811_v61, %v10123_v1  ;;  %v2326_v40 = vmul.f32 %v5812_v45, %v10123_v1  ;;  %v5829_v10 = vld [vmem:[%s14207_s0 + $0x430] sm:$0xf] }
 0x1a1   :  { %v2327_v22 = vmul.f32 %v5813_v37, %v10123_v1  ;;  %v10326_v8 = vadd.f32 %v2308_v23, %v2266_v32  ;;  %v10328_v59 = vadd.f32 %v2309_v19, %v2267_v13  ;;  %v10330_v0 = vadd.f32 %v2310_v60, %v2268_v31  ;;  %v5817_v1 = vld [vmem:[%s14207_s0 + $0x150] sm:$0xff]  ;;  %v5822_v13 = vld [vmem:[%s14207_s0 + $0x2b8] sm:$0xff]  ;;  %v5832_v19 = vld [vmem:[%s14207_s0 + $0x588] sm:$0xff] }
 0x1a2   :  { %v10332_v11 = vadd.f32 %v2311_v53, %v2269_v48  ;;  %v10337_v47 = vadd.f32 %v2312_v63, %v2270_v18  ;;  %v10339_v41 = vadd.f32 %v2313_v33, %v2271_v29  ;;  %v10341_v3 = vadd.f32 %v2314_v46, %v2272_v49  ;;  %v5821_v32 = vld [vmem:[%s14207_s0 + $0x2b0] sm:$0xff]  ;;  %v5815_v49 = vld [vmem:[%s14207_s0 + $0x140] sm:$0xff]  ;;  %v5834_v53 = vld [vmem:[%s14207_s0 + $0x598] sm:$0xf] }
 0x1a3   :  { %v10343_v58 = vadd.f32 %v2315_v21, %v2273_v52  ;;  %v2336_v31 = vadd.f32 %v2316_v56, %v2274_v2  ;;  %v2337_v48 = vadd.f32 %v2317_v42, %v2275_v15  ;;  %v2338_v18 = vadd.f32 %v2318_v14, %v2276_v35  ;;  %v5818_v52 = vld [vmem:[%s14207_s0 + $0x158] sm:$0xff]  ;;  %v5819_v2 = vld [vmem:[%s14207_s0 + $0x160] sm:$0xf]  ;;  %v5820_v15 = vld [vmem:[%s14207_s0 + $0x2a8] sm:$0xff] }
 0x1a4   :  { %v2339_v29 = vadd.f32 %v2319_v34, %v2277_v39  ;;  %v2340_v27 = vadd.f32 %v2320_v4, %v2278_v51  ;;  %v2341_v12 = vadd.f32 %v2321_v24, %v2279_v20  ;;  %v2342_v50 = vadd.f32 %v2322_v6, %v2280_v16  ;;  %v5824_v35 = vld [vmem:[%s14207_s0 + $0x2c8] sm:$0xf]  ;;  %v5827_v39 = vld [vmem:[%s14207_s0 + $0x420] sm:$0xff]  ;;  %v5833_v60 = vld [vmem:[%s14207_s0 + $0x590] sm:$0xff] }
 0x1a5   :  { %v2343_v62 = vadd.f32 %v2323_v43, %v2281_v54  ;;  %v2344_v51 = vadd.f32 %v2324_v26, %v2282_v38  ;;  %v2345_v20 = vadd.f32 %v2325_v44, %v2283_v5  ;;  %v2346_v16 = vadd.f32 %v2326_v40, %v2284_v57  ;;  %v5830_v38 = vld [vmem:[%s14207_s0 + $0x578] sm:$0xff]  ;;  %v5831_v5 = vld [vmem:[%s14207_s0 + $0x580] sm:$0xff] }
 0x1a6   :  { %v2347_v54 = vadd.f32 %v2327_v22, %v2285_v9  ;;  %v2370_v57 = vmul.f32 %v5815_v49, %v10126_v25  ;;  %v2371_v9 = vmul.f32 %v5816_v36, %v10126_v25  ;;  %v2372_v55 = vmul.f32 %v5817_v1, %v10126_v25 }
 0x1a7   :  { %v2373_v23 = vmul.f32 %v5818_v52, %v10126_v25  ;;  %v2374_v61 = vmul.f32 %v5819_v2, %v10126_v25  ;;  %v2375_v45 = vmul.f32 %v5820_v15, %v10126_v25  ;;  %v2376_v37 = vmul.f32 %v5821_v32, %v10126_v25 }
 0x1a8   :  { %v2377_v63 = vmul.f32 %v5822_v13, %v10126_v25  ;;  %v2378_v33 = vmul.f32 %v5823_v17, %v10126_v25  ;;  %v2379_v46 = vmul.f32 %v5824_v35, %v10126_v25  ;;  %v2380_v21 = vmul.f32 %v5825_v30, %v10126_v25 }
 0x1a9   :  { %v2381_v56 = vmul.f32 %v5826_v7, %v10126_v25  ;;  %v2382_v42 = vmul.f32 %v5827_v39, %v10126_v25  ;;  %v2383_v14 = vmul.f32 %v5828_v28, %v10126_v25  ;;  %v2384_v34 = vmul.f32 %v5829_v10, %v10126_v25 }
 0x1aa   :  { %v2385_v4 = vmul.f32 %v5830_v38, %v10126_v25  ;;  %v2386_v24 = vmul.f32 %v5831_v5, %v10126_v25  ;;  %v2387_v6 = vmul.f32 %v5832_v19, %v10126_v25  ;;  %v2388_v43 = vmul.f32 %v5833_v60, %v10126_v25 }
 0x1ab   :  { %v2389_v26 = vmul.f32 %v5834_v53, %v10126_v25  ;;  %v2390_v44 = vadd.f32 %v2370_v57, %v10326_v8  ;;  %v2391_v40 = vadd.f32 %v2371_v9, %v10328_v59  ;;  %v2392_v22 = vadd.f32 %v2372_v55, %v10330_v0 }
 0x1ac   :  { %v2393_v36 = vadd.f32 %v2373_v23, %v10332_v11  ;;  %v2394_v1 = vadd.f32 %v2374_v61, %v10337_v47  ;;  %v2395_v32 = vadd.f32 %v2375_v45, %v10339_v41  ;;  %v2396_v13 = vadd.f32 %v2376_v37, %v10341_v3 }
 0x1ad   :  { %v2397_v49 = vadd.f32 %v2377_v63, %v10343_v58  ;;  %v2398_v25 = vadd.f32 %v2378_v33, %v2336_v31  ;;  %v2399_v8 = vadd.f32 %v2379_v46, %v2337_v48  ;;  %v2400_v52 = vadd.f32 %v2380_v21, %v2338_v18 }
 0x1ae   :  { %v2401_v59 = vadd.f32 %v2381_v56, %v2339_v29  ;;  %v2402_v7 = vadd.f32 %v2382_v42, %v2340_v27  ;;  %v2403_v0 = vadd.f32 %v2383_v14, %v2341_v12  ;;  %v2404_v2 = vadd.f32 %v2384_v34, %v2342_v50 }
 0x1af   :  { %v2405_v11 = vadd.f32 %v2385_v4, %v2343_v62  ;;  %v2406_v15 = vadd.f32 %v2386_v24, %v2344_v51  ;;  %v2407_v47 = vadd.f32 %v2387_v6, %v2345_v20  ;;  %v2408_v35 = vadd.f32 %v2388_v43, %v2346_v16 }
 0x1b0   :  { %v2409_v39 = vadd.f32 %v2389_v26, %v2347_v54  ;;  %v2411_v41 = vstv %s10412_s23  ;;  %v10440_v17 = vstv %s10397_s7  ;;  %v10443_v3 = vstv %s10418_s14  ;;  %s11673_s23 = sld [smem:[#allocation3 + $0x285]]  ;;  %s13756_s7 = sld [smem:[#allocation3 + $0x307]] }
 0x1b1   :  { %v10446_v30 = vstv %s10420_s6  ;;  %v2412_v58 = vadd.f32 %v2411_v41, %v2390_v44  ;;  %v2413_v31 = vadd.f32 %v2411_v41, %v2391_v40  ;;  %v2414_v48 = vadd.f32 %v2411_v41, %v2392_v22  ;;  %v2477_v44 = vld [vmem:[%s14207_s0] sm:$0xff]  ;;  %s11213_s6 = sld [smem:[#allocation3 + $0x404]]  ;;  %s11675_s14 = sld [smem:[#allocation3 + $0x305]] }
 0x1b2   :  { %v2415_v18 = vadd.f32 %v2411_v41, %v2393_v36  ;;  %v2416_v29 = vadd.f32 %v2411_v41, %v2394_v1  ;;  %v2417_v27 = vadd.f32 %v2411_v41, %v2395_v32  ;;  %v2418_v12 = vadd.f32 %v2411_v41, %v2396_v13  ;;  %v2478_v32 = vld [vmem:[%s14207_s0 + $0x8] sm:$0xff]  ;;  %v2479_v13 = vld [vmem:[%s14207_s0 + $0x10] sm:$0xff] }
 0x1b3   :  { %v2419_v50 = vadd.f32 %v2411_v41, %v2397_v49  ;;  %v2420_v62 = vadd.f32 %v2411_v41, %v2398_v25  ;;  %v2421_v51 = vadd.f32 %v2411_v41, %v2399_v8  ;;  %v2422_v20 = vadd.f32 %v2411_v41, %v2400_v52  ;;  %v2482_v49 = vld [vmem:[%s14207_s0 + $0x168] sm:$0xff] }
 0x1b4   :  { %v2423_v16 = vadd.f32 %v2411_v41, %v2401_v59  ;;  %v2424_v54 = vadd.f32 %v2411_v41, %v2402_v7  ;;  %v2425_v28 = vadd.f32 %v2411_v41, %v2403_v0  ;;  %v2426_v10 = vadd.f32 %v2411_v41, %v2404_v2  ;;  %v2480_v7 = vld [vmem:[%s14207_s0 + $0x18] sm:$0xff]  ;;  %v2483_v0 = vld [vmem:[%s14207_s0 + $0x170] sm:$0xff] }
 0x1b5   :  { %v2427_v38 = vadd.f32 %v2411_v41, %v2405_v11  ;;  %v2428_v5 = vadd.f32 %v2411_v41, %v2406_v15  ;;  %v2429_v57 = vadd.f32 %v2411_v41, %v2407_v47  ;;  %v2430_v9 = vadd.f32 %v2411_v41, %v2408_v35  ;;  %v2481_v35 = vld [vmem:[%s14207_s0 + $0x20] sm:$0xf] }
 0x1b6   :  { %v2431_v55 = vadd.f32 %v2411_v41, %v2409_v39  ;;  %v2432_v23 = vmax.f32 %v2412_v58, 0.0  ;;  %v2433_v19 = vmax.f32 %v2413_v31, 0.0  ;;  %v2434_v60 = vmax.f32 %v2414_v48, 0.0  ;;  %v2484_v39 = vld [vmem:[%s14207_s0 + $0x178] sm:$0xff]  ;;  %v2485_v41 = vld [vmem:[%s14207_s0 + $0x180] sm:$0xff]  ;;  %v2487_v58 = vld [vmem:[%s14207_s0 + $0x2d0] sm:$0xff] }
 0x1b7   :  { %v2435_v53 = vmax.f32 %v2415_v18, 0.0  ;;  %v2436_v61 = vmax.f32 %v2416_v29, 0.0  ;;  %v2437_v45 = vmax.f32 %v2417_v27, 0.0  ;;  %v2438_v37 = vmax.f32 %v2418_v12, 0.0  ;;  %v2488_v31 = vld [vmem:[%s14207_s0 + $0x2d8] sm:$0xff]  ;;  %v2489_v29 = vld [vmem:[%s14207_s0 + $0x2e0] sm:$0xff] }
 0x1b8   :  { %v2439_v63 = vmax.f32 %v2419_v50, 0.0  ;;  %v2440_v33 = vmax.f32 %v2420_v62, 0.0  ;;  %v2441_v46 = vmax.f32 %v2421_v51, 0.0  ;;  %v2442_v21 = vmax.f32 %v2422_v20, 0.0  ;;  %v2486_v18 = vld [vmem:[%s14207_s0 + $0x188] sm:$0xf] }
 0x1b9   :  { %v2443_v56 = vmax.f32 %v2423_v16, 0.0  ;;  %v2444_v42 = vmax.f32 %v2424_v54, 0.0  ;;  %v2445_v14 = vmax.f32 %v2425_v28, 0.0  ;;  %v2446_v34 = vmax.f32 %v2426_v10, 0.0  ;;  %v2492_v27 = vld [vmem:[%s14207_s0 + $0x438] sm:$0xff]  ;;  %v2493_v12 = vld [vmem:[%s14207_s0 + $0x440] sm:$0xff] }
 0x1ba   :  { %v2447_v4 = vmax.f32 %v2427_v38, 0.0  ;;  %v2448_v24 = vmax.f32 %v2428_v5, 0.0  ;;  %v2449_v6 = vmax.f32 %v2429_v57, 0.0  ;;  %v2450_v43 = vmax.f32 %v2430_v9, 0.0  ;;  %v2490_v10 = vld [vmem:[%s14207_s0 + $0x2e8] sm:$0xff]  ;;  %v2495_v5 = vld [vmem:[%s14207_s0 + $0x450] sm:$0xff] }
 0x1bb   :  { %v2451_v26 = vmax.f32 %v2431_v55, 0.0  ;;  %v2452_v40 = vmax.f32 %v2432_v23, %v2437_v45  ;;  %v2455_v22 = vmax.f32 %v2433_v19, %v2438_v37  ;;  %v2458_v36 = vmax.f32 %v2434_v60, %v2439_v63  ;;  %v2494_v38 = vld [vmem:[%s14207_s0 + $0x448] sm:$0xff]  ;;  %v2491_v9 = vld [vmem:[%s14207_s0 + $0x2f0] sm:$0xf]  ;;  %v2496_v55 = vld [vmem:[%s14207_s0 + $0x458] sm:$0xf] }
 0x1bc   :  { %v2461_v1 = vmax.f32 %v2435_v53, %v2440_v33  ;;  %v2464_v25 = vsel %vm648_vm0, %v2436_v61, -inf  ;;  %v2465_v8 = vsel %vm648_vm0, %v2441_v46, -inf  ;;  %v2467_v52 = vsel %vm648_vm0, %v2446_v34, -inf  ;;  %v5838_v53 = vld [vmem:[%s14207_s0 + $0x28] sm:$0xff]  ;;  %v5839_v33 = vld [vmem:[%s14207_s0 + $0x30] sm:$0xff] }
 0x1bd   :  { %v2469_v59 = vsel %vm648_vm0, %v2451_v26, -inf  ;;  %v2453_v2 = vmax.f32 %v2452_v40, %v2442_v21  ;;  %v2456_v11 = vmax.f32 %v2455_v22, %v2443_v56  ;;  %v2459_v15 = vmax.f32 %v2458_v36, %v2444_v42  ;;  %v5843_v46 = vld [vmem:[%s14207_s0 + $0x190] sm:$0xff]  ;;  %v5844_v21 = vld [vmem:[%s14207_s0 + $0x198] sm:$0xff]  ;;  %v5845_v36 = vld [vmem:[%s14207_s0 + $0x1a0] sm:$0xff] }
 0x1be   :  { %v2462_v47 = vmax.f32 %v2461_v1, %v2445_v14  ;;  %v2466_v48 = vmax.f32 %v2464_v25, %v2465_v8  ;;  %v10498_v50 = vmul.f32 %v10440_v17, %v2477_v44  ;;  %v10501_v62 = vmul.f32 %v10440_v17, %v2478_v32  ;;  %v5846_v1 = vld [vmem:[%s14207_s0 + $0x1a8] sm:$0xff]  ;;  %v5849_v32 = vld [vmem:[%s14207_s0 + $0x300] sm:$0xff]  ;;  %v5847_v8 = vld [vmem:[%s14207_s0 + $0x1b0] sm:$0xf] }
 0x1bf   :  { %v10504_v51 = vmul.f32 %v10440_v17, %v2479_v13  ;;  %v2454_v20 = vmax.f32 %v2453_v2, %v2447_v4  ;;  %v2457_v16 = vmax.f32 %v2456_v11, %v2448_v24  ;;  %v2460_v54 = vmax.f32 %v2459_v15, %v2449_v6  ;;  %v5840_v4 = vld [vmem:[%s14207_s0 + $0x38] sm:$0xff]  ;;  %v5841_v24 = vld [vmem:[%s14207_s0 + $0x40] sm:$0xff]  ;;  %v5842_v6 = vld [vmem:[%s14207_s0 + $0x48] sm:$0xf] }
 0x1c0   :  { %v2463_v28 = vmax.f32 %v2462_v47, %v2450_v43  ;;  %v2468_v57 = vmax.f32 %v2466_v48, %v2467_v52  ;;  %v10522_v23 = vmul.f32 %v10440_v17, %v2480_v7  ;;  %v10525_v19 = vmul.f32 %v10440_v17, %v2481_v35  ;;  %v5848_v43 = vld [vmem:[%s14207_s0 + $0x2f8] sm:$0xff]  ;;  %v5850_v52 = vld [vmem:[%s14207_s0 + $0x308] sm:$0xff] }
 0x1c1   :  { %v10528_v60 = vmul.f32 %v10440_v17, %v2482_v49  ;;  %2471 = vst [vmem:[#allocation2 + $0x78] sm:$0xff] %v2454_v20  ;;  %2472 = vst [vmem:[#allocation2 + $0x80] sm:$0xff] %v2457_v16  ;;  %v2505_v61 = vmul.f32 %v10440_v17, %v2483_v0  ;;  %v2506_v45 = vmul.f32 %v10440_v17, %v2484_v39  ;;  %v5852_v0 = vld [vmem:[%s14207_s0 + $0x318] sm:$0xf]  ;;  %v5854_v2 = vld [vmem:[%s14207_s0 + $0x468] sm:$0xff] }
 0x1c2   :  { %2473 = vst [vmem:[#allocation2 + $0x88] sm:$0xff] %v2460_v54  ;;  %2474 = vst [vmem:[#allocation2 + $0x90] sm:$0xff] %v2463_v28  ;;  %v2507_v37 = vmul.f32 %v10440_v17, %v2485_v41  ;;  %v10537_v63 = vmul.f32 %v10440_v17, %v2486_v18  ;;  %v2470_v56 = vmax.f32 %v2468_v57, %v2469_v59  ;;  %v5851_v59 = vld [vmem:[%s14207_s0 + $0x310] sm:$0xff]  ;;  %v5856_v41 = vld [vmem:[%s14207_s0 + $0x478] sm:$0xff] }
 0x1c3   :  { %v2509_v42 = vmul.f32 %v10440_v17, %v2487_v58  ;;  %v2510_v14 = vmul.f32 %v10440_v17, %v2488_v31  ;;  %v2511_v34 = vmul.f32 %v10440_v17, %v2489_v29  ;;  %v2512_v26 = vmul.f32 %v10440_v17, %v2490_v10  ;;  %v5855_v39 = vld [vmem:[%s14207_s0 + $0x470] sm:$0xff]  ;;  %v5857_v58 = vld [vmem:[%s14207_s0 + $0x480] sm:$0xf] }
 0x1c4   :  { %v2513_v44 = vmul.f32 %v10440_v17, %v2491_v9  ;;  %v2514_v40 = vmul.f32 %v10440_v17, %v2492_v27  ;;  %v2515_v22 = vmul.f32 %v10440_v17, %v2493_v12  ;;  %2475 = vst [vmem:[#allocation2 + $0x98] sm:$0xf] %v2470_v56  ;;  %v2516_v13 = vmul.f32 %v10440_v17, %v2494_v38  ;;  %v5859_v56 = vld [vmem:[%s14207_s0 + $0x50] sm:$0xff] }
 0x1c5   :  { %v2517_v49 = vmul.f32 %v10440_v17, %v2495_v5  ;;  %v2518_v25 = vmul.f32 %v10440_v17, %v2496_v55  ;;  %v2541_v7 = vmul.f32 %v5838_v53, %v10443_v3  ;;  %v5853_v17 = vld [vmem:[%s14207_s0 + $0x460] sm:$0xff]  ;;  %v2542_v11 = vmul.f32 %v5839_v33, %v10443_v3 }
 0x1c6   :  { %v2543_v15 = vmul.f32 %v5840_v4, %v10443_v3  ;;  %v2544_v47 = vmul.f32 %v5841_v24, %v10443_v3  ;;  %v2545_v35 = vmul.f32 %v5842_v6, %v10443_v3  ;;  %v2546_v31 = vmul.f32 %v5843_v46, %v10443_v3 }
 0x1c7   :  { %v2547_v48 = vmul.f32 %v5844_v21, %v10443_v3  ;;  %v2548_v18 = vmul.f32 %v5845_v36, %v10443_v3  ;;  %v2549_v29 = vmul.f32 %v5846_v1, %v10443_v3  ;;  %v2550_v27 = vmul.f32 %v5847_v8, %v10443_v3  ;;  %v5869_v36 = vld [vmem:[%s14207_s0 + $0x320] sm:$0xff]  ;;  %v5866_v1 = vld [vmem:[%s14207_s0 + $0x1c8] sm:$0xff] }
 0x1c8   :  { %v2551_v12 = vmul.f32 %v5848_v43, %v10443_v3  ;;  %v2552_v20 = vmul.f32 %v5849_v32, %v10443_v3  ;;  %v2553_v16 = vmul.f32 %v5850_v52, %v10443_v3  ;;  %v2554_v54 = vmul.f32 %v5851_v59, %v10443_v3  ;;  %v5867_v32 = vld [vmem:[%s14207_s0 + $0x1d0] sm:$0xff]  ;;  %v5870_v8 = vld [vmem:[%s14207_s0 + $0x328] sm:$0xff] }
 0x1c9   :  { %v2555_v28 = vmul.f32 %v5852_v0, %v10443_v3  ;;  %v2556_v10 = vmul.f32 %v5853_v17, %v10443_v3  ;;  %v2557_v38 = vmul.f32 %v5854_v2, %v10443_v3  ;;  %v2558_v5 = vmul.f32 %v5855_v39, %v10443_v3 }
 0x1ca   :  { %v2559_v57 = vmul.f32 %v5856_v41, %v10443_v3  ;;  %v2560_v9 = vmul.f32 %v5857_v58, %v10443_v3  ;;  %v2561_v55 = vadd.f32 %v2541_v7, %v10498_v50  ;;  %v2562_v53 = vadd.f32 %v2542_v11, %v10501_v62  ;;  %v5860_v3 = vld [vmem:[%s14207_s0 + $0x58] sm:$0xff]  ;;  %v5865_v62 = vld [vmem:[%s14207_s0 + $0x1c0] sm:$0xff] }
 0x1cb   :  { %v2563_v33 = vadd.f32 %v2543_v15, %v10504_v51  ;;  %v2564_v46 = vadd.f32 %v2544_v47, %v10522_v23  ;;  %v2565_v21 = vadd.f32 %v2545_v35, %v10525_v19  ;;  %v2566_v4 = vadd.f32 %v2546_v31, %v10528_v60  ;;  %v5864_v50 = vld [vmem:[%s14207_s0 + $0x1b8] sm:$0xff]  ;;  %v5877_v47 = vld [vmem:[%s14207_s0 + $0x4a0] sm:$0xff]  ;;  %v5878_v35 = vld [vmem:[%s14207_s0 + $0x4a8] sm:$0xf] }
 0x1cc   :  { %v2567_v24 = vadd.f32 %v2547_v48, %v2505_v61  ;;  %v2568_v6 = vadd.f32 %v2548_v18, %v2506_v45  ;;  %v2569_v43 = vadd.f32 %v2549_v29, %v2507_v37  ;;  %v2570_v51 = vadd.f32 %v2550_v27, %v10537_v63  ;;  %v5861_v61 = vld [vmem:[%s14207_s0 + $0x60] sm:$0xff]  ;;  %v5862_v45 = vld [vmem:[%s14207_s0 + $0x68] sm:$0xff]  ;;  %v5863_v37 = vld [vmem:[%s14207_s0 + $0x70] sm:$0xf] }
 0x1cd   :  { %v2571_v23 = vadd.f32 %v2551_v12, %v2509_v42  ;;  %v2572_v19 = vadd.f32 %v2552_v20, %v2510_v14  ;;  %v2573_v60 = vadd.f32 %v2553_v16, %v2511_v34  ;;  %v2574_v63 = vadd.f32 %v2554_v54, %v2512_v26  ;;  %v5868_v26 = vld [vmem:[%s14207_s0 + $0x1d8] sm:$0xf] }
 0x1ce   :  { %v2575_v42 = vadd.f32 %v2555_v28, %v2513_v44  ;;  %v2576_v14 = vadd.f32 %v2556_v10, %v2514_v40  ;;  %v2577_v34 = vadd.f32 %v2557_v38, %v2515_v22  ;;  %v2578_v52 = vadd.f32 %v2558_v5, %v2516_v13  ;;  %v5871_v44 = vld [vmem:[%s14207_s0 + $0x330] sm:$0xff]  ;;  %v5872_v40 = vld [vmem:[%s14207_s0 + $0x338] sm:$0xff]  ;;  %v5873_v13 = vld [vmem:[%s14207_s0 + $0x340] sm:$0xf] }
 0x1cf   :  { %v2579_v59 = vadd.f32 %v2559_v57, %v2517_v49  ;;  %v2580_v7 = vadd.f32 %v2560_v9, %v2518_v25  ;;  %v2603_v22 = vmul.f32 %v5859_v56, %v10446_v30  ;;  %v5874_v49 = vld [vmem:[%s14207_s0 + $0x488] sm:$0xff]  ;;  %v5875_v25 = vld [vmem:[%s14207_s0 + $0x490] sm:$0xff]  ;;  %v2604_v0 = vmul.f32 %v5860_v3, %v10446_v30  ;;  %v5876_v15 = vld [vmem:[%s14207_s0 + $0x498] sm:$0xff] }
 0x1d0   :  { %v2605_v17 = vmul.f32 %v5861_v61, %v10446_v30  ;;  %v2606_v2 = vmul.f32 %v5862_v45, %v10446_v30  ;;  %v2607_v11 = vmul.f32 %v5863_v37, %v10446_v30  ;;  %v2608_v39 = vmul.f32 %v5864_v50, %v10446_v30  ;;  %v5880_v50 = vld [vmem:[%s14207_s0 + $0x78] sm:$0xff] }
 0x1d1   :  { %v2609_v41 = vmul.f32 %v5865_v62, %v10446_v30  ;;  %v2610_v58 = vmul.f32 %v5866_v1, %v10446_v30  ;;  %v2611_v31 = vmul.f32 %v5867_v32, %v10446_v30  ;;  %v2612_v48 = vmul.f32 %v5868_v26, %v10446_v30  ;;  %v5884_v1 = vld [vmem:[%s14207_s0 + $0x98] sm:$0xf]  ;;  %v5887_v32 = vld [vmem:[%s14207_s0 + $0x1f0] sm:$0xff] }
 0x1d2   :  { %v2613_v18 = vmul.f32 %v5869_v36, %v10446_v30  ;;  %v2614_v29 = vmul.f32 %v5870_v8, %v10446_v30  ;;  %v2615_v27 = vmul.f32 %v5871_v44, %v10446_v30  ;;  %v2616_v12 = vmul.f32 %v5872_v40, %v10446_v30  ;;  %v5888_v8 = vld [vmem:[%s14207_s0 + $0x1f8] sm:$0xff]  ;;  %v5893_v44 = vld [vmem:[%s14207_s0 + $0x360] sm:$0xff] }
 0x1d3   :  { %v2617_v20 = vmul.f32 %v5873_v13, %v10446_v30  ;;  %v2618_v16 = vmul.f32 %v5874_v49, %v10446_v30  ;;  %v2619_v54 = vmul.f32 %v5875_v25, %v10446_v30  ;;  %v2620_v28 = vmul.f32 %v5876_v15, %v10446_v30  ;;  %v5892_v26 = vld [vmem:[%s14207_s0 + $0x358] sm:$0xff] }
 0x1d4   :  { %v2621_v10 = vmul.f32 %v5877_v47, %v10446_v30  ;;  %v2622_v38 = vmul.f32 %v5878_v35, %v10446_v30  ;;  %v10715_v5 = vadd.f32 %v2603_v22, %v2561_v55  ;;  %v10717_v57 = vadd.f32 %v2604_v0, %v2562_v53  ;;  %v5881_v55 = vld [vmem:[%s14207_s0 + $0x80] sm:$0xff] }
 0x1d5   :  { %v10719_v9 = vadd.f32 %v2605_v17, %v2563_v33  ;;  %v10721_v56 = vadd.f32 %v2606_v2, %v2564_v46  ;;  %v10723_v3 = vadd.f32 %v2607_v11, %v2565_v21  ;;  %v10728_v62 = vadd.f32 %v2608_v39, %v2566_v4  ;;  %v5885_v53 = vld [vmem:[%s14207_s0 + $0x1e0] sm:$0xff]  ;;  %v5886_v33 = vld [vmem:[%s14207_s0 + $0x1e8] sm:$0xff]  ;;  %v5899_v2 = vld [vmem:[%s14207_s0 + $0x4d0] sm:$0xf] }
 0x1d6   :  { %v10730_v61 = vadd.f32 %v2609_v41, %v2567_v24  ;;  %v10732_v45 = vadd.f32 %v2610_v58, %v2568_v6  ;;  %v10734_v30 = vadd.f32 %v2611_v31, %v2569_v43  ;;  %v10745_v46 = vadd.f32 %v2612_v48, %v2570_v51  ;;  %v5882_v6 = vld [vmem:[%s14207_s0 + $0x88] sm:$0xff]  ;;  %v5883_v43 = vld [vmem:[%s14207_s0 + $0x90] sm:$0xff]  ;;  %v5897_v0 = vld [vmem:[%s14207_s0 + $0x4c0] sm:$0xff] }
 0x1d7   :  { %v10747_v21 = vadd.f32 %v2613_v18, %v2571_v23  ;;  %v10749_v4 = vadd.f32 %v2614_v29, %v2572_v19  ;;  %v10751_v24 = vadd.f32 %v2615_v27, %v2573_v60  ;;  %v5890_v51 = vld [vmem:[%s14207_s0 + $0x348] sm:$0xff]  ;;  %v5891_v23 = vld [vmem:[%s14207_s0 + $0x350] sm:$0xff]  ;;  %v10765_v19 = vadd.f32 %v2616_v12, %v2574_v63 }
 0x1d8   :  { %v10767_v60 = vadd.f32 %v2617_v20, %v2575_v42  ;;  %v10769_v37 = vadd.f32 %v2618_v16, %v2576_v14  ;;  %v10771_v36 = vadd.f32 %v2619_v54, %v2577_v34  ;;  %v10782_v63 = vadd.f32 %v2620_v28, %v2578_v52  ;;  %v5889_v34 = vld [vmem:[%s14207_s0 + $0x200] sm:$0xf]  ;;  %v5894_v52 = vld [vmem:[%s14207_s0 + $0x368] sm:$0xf] }
 0x1d9   :  { %v10784_v42 = vadd.f32 %v2621_v10, %v2579_v59  ;;  %v10786_v14 = vadd.f32 %v2622_v38, %v2580_v7  ;;  %v2664_v40 = vstv %s10702_s19  ;;  %v5895_v59 = vld [vmem:[%s14207_s0 + $0x4b0] sm:$0xff]  ;;  %v5896_v7 = vld [vmem:[%s14207_s0 + $0x4b8] sm:$0xff]  ;;  %v5898_v17 = vld [vmem:[%s14207_s0 + $0x4c8] sm:$0xff]  ;;  %s12556_s19 = sld [smem:[#allocation3 + $0x206]] }
 0x1da   :  { %v2665_v22 = vmul.f32 %v5880_v50, %v2664_v40  ;;  %v2666_v13 = vmul.f32 %v5881_v55, %v2664_v40  ;;  %v2667_v49 = vmul.f32 %v5882_v6, %v2664_v40  ;;  %v2668_v25 = vmul.f32 %v5883_v43, %v2664_v40  ;;  %v5904_v6 = vld [vmem:[%s14207_s0 + $0xb8] sm:$0xff] }
 0x1db   :  { %v2669_v11 = vmul.f32 %v5884_v1, %v2664_v40  ;;  %v2670_v15 = vmul.f32 %v5885_v53, %v2664_v40  ;;  %v2671_v47 = vmul.f32 %v5886_v33, %v2664_v40  ;;  %v2672_v35 = vmul.f32 %v5887_v32, %v2664_v40 }
 0x1dc   :  { %v2673_v39 = vmul.f32 %v5888_v8, %v2664_v40  ;;  %v2674_v41 = vmul.f32 %v5889_v34, %v2664_v40  ;;  %v2675_v58 = vmul.f32 %v5890_v51, %v2664_v40  ;;  %v2676_v31 = vmul.f32 %v5891_v23, %v2664_v40  ;;  %v5905_v23 = vld [vmem:[%s14207_s0 + $0xc0] sm:$0xf] }
 0x1dd   :  { %v2677_v48 = vmul.f32 %v5892_v26, %v2664_v40  ;;  %v2678_v18 = vmul.f32 %v5893_v44, %v2664_v40  ;;  %v2679_v29 = vmul.f32 %v5894_v52, %v2664_v40  ;;  %v2680_v27 = vmul.f32 %v5895_v59, %v2664_v40  ;;  %v5910_v26 = vld [vmem:[%s14207_s0 + $0x228] sm:$0xf]  ;;  %v5913_v44 = vld [vmem:[%s14207_s0 + $0x380] sm:$0xff]  ;;  %v5916_v59 = vld [vmem:[%s14207_s0 + $0x4d8] sm:$0xff] }
 0x1de   :  { %v2681_v12 = vmul.f32 %v5896_v7, %v2664_v40  ;;  %v2682_v20 = vmul.f32 %v5897_v0, %v2664_v40  ;;  %v2683_v16 = vmul.f32 %v5898_v17, %v2664_v40  ;;  %v2684_v54 = vmul.f32 %v5899_v2, %v2664_v40  ;;  %v5917_v7 = vld [vmem:[%s14207_s0 + $0x4e0] sm:$0xff]  ;;  %v5918_v0 = vld [vmem:[%s14207_s0 + $0x4e8] sm:$0xff]  ;;  %v5919_v17 = vld [vmem:[%s14207_s0 + $0x4f0] sm:$0xff] }
 0x1df   :  { %v10825_v28 = vadd.f32 %v2665_v22, %v10715_v5  ;;  %v10828_v10 = vadd.f32 %v2666_v13, %v10717_v57  ;;  %v10831_v38 = vadd.f32 %v2667_v49, %v10719_v9  ;;  %v10834_v50 = vadd.f32 %v2668_v25, %v10721_v56  ;;  %v5901_v57 = vld [vmem:[%s14207_s0 + $0xa0] sm:$0xff]  ;;  %v5902_v9 = vld [vmem:[%s14207_s0 + $0xa8] sm:$0xff]  ;;  %v5920_v2 = vld [vmem:[%s14207_s0 + $0x4f8] sm:$0xf] }
 0x1e0   :  { %v10837_v55 = vadd.f32 %v2669_v11, %v10723_v3  ;;  %v10840_v53 = vadd.f32 %v2670_v15, %v10728_v62  ;;  %v10843_v33 = vadd.f32 %v2671_v47, %v10730_v61  ;;  %v10846_v5 = vadd.f32 %v2672_v35, %v10732_v45  ;;  %v5903_v45 = vld [vmem:[%s14207_s0 + $0xb0] sm:$0xff] }
 0x1e1   :  { %v10855_v56 = vadd.f32 %v2673_v39, %v10734_v30  ;;  %v10858_v3 = vadd.f32 %v2674_v41, %v10745_v46  ;;  %v10861_v62 = vadd.f32 %v2675_v58, %v10747_v21  ;;  %v10864_v61 = vadd.f32 %v2676_v31, %v10749_v4  ;;  %v5906_v30 = vld [vmem:[%s14207_s0 + $0x208] sm:$0xff]  ;;  %v5907_v46 = vld [vmem:[%s14207_s0 + $0x210] sm:$0xff] }
 0x1e2   :  { %v10879_v21 = vadd.f32 %v2677_v48, %v10751_v24  ;;  %v10882_v4 = vadd.f32 %v2678_v18, %v10765_v19  ;;  %v10885_v43 = vadd.f32 %v2679_v29, %v10767_v60  ;;  %v10888_v51 = vadd.f32 %v2680_v27, %v10769_v37  ;;  %v5908_v24 = vld [vmem:[%s14207_s0 + $0x218] sm:$0xff]  ;;  %v5909_v19 = vld [vmem:[%s14207_s0 + $0x220] sm:$0xff]  ;;  %v5911_v60 = vld [vmem:[%s14207_s0 + $0x370] sm:$0xff] }
 0x1e3   :  { %v5912_v37 = vld [vmem:[%s14207_s0 + $0x378] sm:$0xff]  ;;  %v10906_v1 = vadd.f32 %v2681_v12, %v10771_v36  ;;  %v10909_v32 = vadd.f32 %v2682_v20, %v10782_v63  ;;  %v10912_v8 = vadd.f32 %v2683_v16, %v10784_v42  ;;  %v10915_v34 = vadd.f32 %v2684_v54, %v10786_v14  ;;  %v5914_v36 = vld [vmem:[%s14207_s0 + $0x388] sm:$0xff]  ;;  %v5915_v14 = vld [vmem:[%s14207_s0 + $0x390] sm:$0xf] }
 0x1e4   :  { %v2726_v63 = vstv %s10807_s12  ;;  %v10928_v40 = vstv %s10818_s17  ;;  %v10931_v42 = vstv %s10820_s8  ;;  %v10934_v52 = vstv %s10822_s20  ;;  %s11228_s8 = sld [smem:[#allocation3 + $0x5]]  ;;  %s11234_s20 = sld [smem:[#allocation6 + $0x4]] }
 0x1e5   :  { %v2727_v22 = vmul.f32 %v5901_v57, %v2726_v63  ;;  %v2728_v13 = vmul.f32 %v5902_v9, %v2726_v63  ;;  %v2729_v49 = vmul.f32 %v5903_v45, %v2726_v63  ;;  %v2730_v25 = vmul.f32 %v5904_v6, %v2726_v63  ;;  %s11545_s17 = sld [smem:[#allocation3 + $0x105]]  ;;  %s12543_s12 = sld [smem:[#allocation3 + $0x106]] }
 0x1e6   :  { %v2731_v11 = vmul.f32 %v5905_v23, %v2726_v63  ;;  %v2732_v15 = vmul.f32 %v5906_v30, %v2726_v63  ;;  %v2733_v47 = vmul.f32 %v5907_v46, %v2726_v63  ;;  %v2734_v35 = vmul.f32 %v5908_v24, %v2726_v63  ;;  %v5922_v30 = vld [vmem:[%s14207_s0 + $0xc8] sm:$0xff] }
 0x1e7   :  { %v2735_v39 = vmul.f32 %v5909_v19, %v2726_v63  ;;  %v2736_v41 = vmul.f32 %v5910_v26, %v2726_v63  ;;  %v2737_v58 = vmul.f32 %v5911_v60, %v2726_v63  ;;  %v2738_v31 = vmul.f32 %v5912_v37, %v2726_v63  ;;  %v5925_v60 = vld [vmem:[%s14207_s0 + $0xe0] sm:$0xff]  ;;  %v5932_v37 = vld [vmem:[%s14207_s0 + $0x398] sm:$0xff] }
 0x1e8   :  { %v2739_v48 = vmul.f32 %v5913_v44, %v2726_v63  ;;  %v2740_v18 = vmul.f32 %v5914_v36, %v2726_v63  ;;  %v2741_v29 = vmul.f32 %v5915_v14, %v2726_v63  ;;  %v2742_v27 = vmul.f32 %v5916_v59, %v2726_v63  ;;  %v5926_v44 = vld [vmem:[%s14207_s0 + $0xe8] sm:$0xf]  ;;  %v5929_v36 = vld [vmem:[%s14207_s0 + $0x240] sm:$0xff]  ;;  %v5931_v14 = vld [vmem:[%s14207_s0 + $0x250] sm:$0xf] }
 0x1e9   :  { %v2743_v12 = vmul.f32 %v5917_v7, %v2726_v63  ;;  %v2744_v20 = vmul.f32 %v5918_v0, %v2726_v63  ;;  %v2745_v16 = vmul.f32 %v5919_v17, %v2726_v63  ;;  %v2746_v54 = vmul.f32 %v5920_v2, %v2726_v63  ;;  %v5930_v63 = vld [vmem:[%s14207_s0 + $0x248] sm:$0xff]  ;;  %v5935_v7 = vld [vmem:[%s14207_s0 + $0x3b0] sm:$0xff]  ;;  %v5940_v0 = vld [vmem:[%s14207_s0 + $0x518] sm:$0xff] }
 0x1ea   :  { %v2747_v57 = vadd.f32 %v2727_v22, %v10825_v28  ;;  %v2748_v9 = vadd.f32 %v2728_v13, %v10828_v10  ;;  %v2749_v45 = vadd.f32 %v2729_v49, %v10831_v38  ;;  %v2750_v6 = vadd.f32 %v2730_v25, %v10834_v50  ;;  %v5923_v28 = vld [vmem:[%s14207_s0 + $0xd0] sm:$0xff]  ;;  %v5928_v38 = vld [vmem:[%s14207_s0 + $0x238] sm:$0xff]  ;;  %v5934_v59 = vld [vmem:[%s14207_s0 + $0x3a8] sm:$0xff] }
 0x1eb   :  { %v2751_v46 = vadd.f32 %v2731_v11, %v10837_v55  ;;  %v2752_v23 = vadd.f32 %v2732_v15, %v10840_v53  ;;  %v2753_v24 = vadd.f32 %v2733_v47, %v10843_v33  ;;  %v2754_v19 = vadd.f32 %v2734_v35, %v10846_v5  ;;  %v5927_v10 = vld [vmem:[%s14207_s0 + $0x230] sm:$0xff]  ;;  %v5924_v5 = vld [vmem:[%s14207_s0 + $0xd8] sm:$0xff]  ;;  %v5941_v17 = vld [vmem:[%s14207_s0 + $0x520] sm:$0xf] }
 0x1ec   :  { %v2755_v50 = vadd.f32 %v2735_v39, %v10855_v56  ;;  %v2756_v55 = vadd.f32 %v2736_v41, %v10858_v3  ;;  %v2757_v53 = vadd.f32 %v2737_v58, %v10861_v62  ;;  %v2758_v33 = vadd.f32 %v2738_v31, %v10864_v61  ;;  %v5933_v56 = vld [vmem:[%s14207_s0 + $0x3a0] sm:$0xff]  ;;  %v5939_v25 = vld [vmem:[%s14207_s0 + $0x510] sm:$0xff] }
 0x1ed   :  { %v2759_v3 = vadd.f32 %v2739_v48, %v10879_v21  ;;  %v2760_v62 = vadd.f32 %v2740_v18, %v10882_v4  ;;  %v2761_v61 = vadd.f32 %v2741_v29, %v10885_v43  ;;  %v2762_v26 = vadd.f32 %v2742_v27, %v10888_v51 }
 0x1ee   :  { %v2763_v21 = vadd.f32 %v2743_v12, %v10906_v1  ;;  %v2764_v4 = vadd.f32 %v2744_v20, %v10909_v32  ;;  %v2765_v43 = vadd.f32 %v2745_v16, %v10912_v8  ;;  %v2766_v51 = vadd.f32 %v2746_v54, %v10915_v34  ;;  %v5936_v1 = vld [vmem:[%s14207_s0 + $0x3b8] sm:$0xf]  ;;  %v5937_v32 = vld [vmem:[%s14207_s0 + $0x500] sm:$0xff]  ;;  %v5938_v8 = vld [vmem:[%s14207_s0 + $0x508] sm:$0xff] }
 0x1ef   :  { %v2789_v34 = vmul.f32 %v5922_v30, %v10928_v40  ;;  %v2790_v22 = vmul.f32 %v5923_v28, %v10928_v40  ;;  %v2791_v13 = vmul.f32 %v5924_v5, %v10928_v40  ;;  %v2792_v49 = vmul.f32 %v5925_v60, %v10928_v40 }
 0x1f0   :  { %v2793_v2 = vmul.f32 %v5926_v44, %v10928_v40  ;;  %v2794_v11 = vmul.f32 %v5927_v10, %v10928_v40  ;;  %v2795_v15 = vmul.f32 %v5928_v38, %v10928_v40  ;;  %v2796_v47 = vmul.f32 %v5929_v36, %v10928_v40  ;;  %v5943_v38 = vld [vmem:[%s14207_s0 + $0xf0] sm:$0xff]  ;;  %v5944_v44 = vld [vmem:[%s14207_s0 + $0xf8] sm:$0xff] }
 0x1f1   :  { %v2797_v35 = vmul.f32 %v5930_v63, %v10928_v40  ;;  %v2798_v39 = vmul.f32 %v5931_v14, %v10928_v40  ;;  %v2799_v41 = vmul.f32 %v5932_v37, %v10928_v40  ;;  %v2800_v58 = vmul.f32 %v5933_v56, %v10928_v40  ;;  %v5947_v63 = vld [vmem:[%s14207_s0 + $0x110] sm:$0xf]  ;;  %v5950_v14 = vld [vmem:[%s14207_s0 + $0x268] sm:$0xff] }
 0x1f2   :  { %v2801_v31 = vmul.f32 %v5934_v59, %v10928_v40  ;;  %v2802_v48 = vmul.f32 %v5935_v7, %v10928_v40  ;;  %v2803_v18 = vmul.f32 %v5936_v1, %v10928_v40  ;;  %v2804_v29 = vmul.f32 %v5937_v32, %v10928_v40  ;;  %v5951_v59 = vld [vmem:[%s14207_s0 + $0x270] sm:$0xff] }
 0x1f3   :  { %v2805_v27 = vmul.f32 %v5938_v8, %v10928_v40  ;;  %v2806_v12 = vmul.f32 %v5939_v25, %v10928_v40  ;;  %v2807_v20 = vmul.f32 %v5940_v0, %v10928_v40  ;;  %v2808_v16 = vmul.f32 %v5941_v17, %v10928_v40  ;;  %v5948_v40 = vld [vmem:[%s14207_s0 + $0x258] sm:$0xff]  ;;  %v5962_v25 = vld [vmem:[%s14207_s0 + $0x548] sm:$0xf] }
 0x1f4   :  { %v2809_v54 = vadd.f32 %v2789_v34, %v2747_v57  ;;  %v2810_v30 = vadd.f32 %v2790_v22, %v2748_v9  ;;  %v2811_v28 = vadd.f32 %v2791_v13, %v2749_v45  ;;  %v2812_v10 = vadd.f32 %v2792_v49, %v2750_v6  ;;  %v5949_v57 = vld [vmem:[%s14207_s0 + $0x260] sm:$0xff]  ;;  %v5960_v13 = vld [vmem:[%s14207_s0 + $0x538] sm:$0xff] }
 0x1f5   :  { %v2813_v5 = vadd.f32 %v2793_v2, %v2751_v46  ;;  %v2814_v60 = vadd.f32 %v2794_v11, %v2752_v23  ;;  %v2815_v37 = vadd.f32 %v2795_v15, %v2753_v24  ;;  %v2816_v56 = vadd.f32 %v2796_v47, %v2754_v19  ;;  %v5945_v46 = vld [vmem:[%s14207_s0 + $0x100] sm:$0xff]  ;;  %v5946_v23 = vld [vmem:[%s14207_s0 + $0x108] sm:$0xff] }
 0x1f6   :  { %v2817_v9 = vadd.f32 %v2797_v35, %v2755_v50  ;;  %v2818_v45 = vadd.f32 %v2798_v39, %v2756_v55  ;;  %v2819_v6 = vadd.f32 %v2799_v41, %v2757_v53  ;;  %v2820_v36 = vadd.f32 %v2800_v58, %v2758_v33  ;;  %v5953_v24 = vld [vmem:[%s14207_s0 + $0x3c0] sm:$0xff]  ;;  %v5954_v19 = vld [vmem:[%s14207_s0 + $0x3c8] sm:$0xff] }
 0x1f7   :  { %v2821_v50 = vadd.f32 %v2801_v31, %v2759_v3  ;;  %v2822_v55 = vadd.f32 %v2802_v48, %v2760_v62  ;;  %v2823_v53 = vadd.f32 %v2803_v18, %v2761_v61  ;;  %v2824_v33 = vadd.f32 %v2804_v29, %v2762_v26  ;;  %v5952_v3 = vld [vmem:[%s14207_s0 + $0x278] sm:$0xf]  ;;  %v5955_v62 = vld [vmem:[%s14207_s0 + $0x3d0] sm:$0xff]  ;;  %v5957_v26 = vld [vmem:[%s14207_s0 + $0x3e0] sm:$0xf] }
 0x1f8   :  { %v2825_v7 = vadd.f32 %v2805_v27, %v2763_v21  ;;  %v2826_v1 = vadd.f32 %v2806_v12, %v2764_v4  ;;  %v2827_v32 = vadd.f32 %v2807_v20, %v2765_v43  ;;  %v2828_v8 = vadd.f32 %v2808_v16, %v2766_v51  ;;  %v5956_v61 = vld [vmem:[%s14207_s0 + $0x3d8] sm:$0xff]  ;;  %v5958_v21 = vld [vmem:[%s14207_s0 + $0x528] sm:$0xff]  ;;  %v5959_v4 = vld [vmem:[%s14207_s0 + $0x530] sm:$0xff] }
 0x1f9   :  { %v2851_v43 = vmul.f32 %v5943_v38, %v10931_v42  ;;  %v2852_v51 = vmul.f32 %v5944_v44, %v10931_v42  ;;  %v2853_v34 = vmul.f32 %v5945_v46, %v10931_v42  ;;  %v2854_v22 = vmul.f32 %v5946_v23, %v10931_v42  ;;  %v5961_v49 = vld [vmem:[%s14207_s0 + $0x540] sm:$0xff] }
 0x1fa   :  { %v2855_v0 = vmul.f32 %v5947_v63, %v10931_v42  ;;  %v2856_v17 = vmul.f32 %v5948_v40, %v10931_v42  ;;  %v2857_v2 = vmul.f32 %v5949_v57, %v10931_v42  ;;  %v2858_v11 = vmul.f32 %v5950_v14, %v10931_v42  ;;  %v5964_v40 = vld [vmem:[%s14207_s0 + $0x118] sm:$0xff]  ;;  %v5975_v63 = vld [vmem:[%s14207_s0 + $0x3f0] sm:$0xff] }
 0x1fb   :  { %v2859_v15 = vmul.f32 %v5951_v59, %v10931_v42  ;;  %v2860_v47 = vmul.f32 %v5952_v3, %v10931_v42  ;;  %v2861_v35 = vmul.f32 %v5953_v24, %v10931_v42  ;;  %v2862_v39 = vmul.f32 %v5954_v19, %v10931_v42  ;;  %v5974_v19 = vld [vmem:[%s14207_s0 + $0x3e8] sm:$0xff]  ;;  %v5968_v14 = vld [vmem:[%s14207_s0 + $0x138] sm:$0xf]  ;;  %v5971_v59 = vld [vmem:[%s14207_s0 + $0x290] sm:$0xff] }
 0x1fc   :  { %v2863_v41 = vmul.f32 %v5955_v62, %v10931_v42  ;;  %v2864_v58 = vmul.f32 %v5956_v61, %v10931_v42  ;;  %v2865_v31 = vmul.f32 %v5957_v26, %v10931_v42  ;;  %v2866_v48 = vmul.f32 %v5958_v21, %v10931_v42  ;;  %v5972_v3 = vld [vmem:[%s14207_s0 + $0x298] sm:$0xff]  ;;  %v5977_v26 = vld [vmem:[%s14207_s0 + $0x400] sm:$0xff] }
 0x1fd   :  { %v2867_v18 = vmul.f32 %v5959_v4, %v10931_v42  ;;  %v2868_v29 = vmul.f32 %v5960_v13, %v10931_v42  ;;  %v2869_v27 = vmul.f32 %v5961_v49, %v10931_v42  ;;  %v2870_v12 = vmul.f32 %v5962_v25, %v10931_v42  ;;  %v5965_v42 = vld [vmem:[%s14207_s0 + $0x120] sm:$0xff] }
 0x1fe   :  { %v11134_v20 = vadd.f32 %v2851_v43, %v2809_v54  ;;  %v11136_v16 = vadd.f32 %v2852_v51, %v2810_v30  ;;  %v11138_v38 = vadd.f32 %v2853_v34, %v2811_v28  ;;  %v11140_v44 = vadd.f32 %v2854_v22, %v2812_v10  ;;  %v5969_v54 = vld [vmem:[%s14207_s0 + $0x280] sm:$0xff]  ;;  %v5970_v30 = vld [vmem:[%s14207_s0 + $0x288] sm:$0xff]  ;;  %v5983_v22 = vld [vmem:[%s14207_s0 + $0x570] sm:$0xf] }
 0x1ff   :  { %v11145_v57 = vadd.f32 %v2855_v0, %v2813_v5  ;;  %v11147_v46 = vadd.f32 %v2856_v17, %v2814_v60  ;;  %v11149_v23 = vadd.f32 %v2857_v2, %v2815_v37  ;;  %v11151_v24 = vadd.f32 %v2858_v11, %v2816_v56  ;;  %v5966_v37 = vld [vmem:[%s14207_s0 + $0x128] sm:$0xff]  ;;  %v5967_v56 = vld [vmem:[%s14207_s0 + $0x130] sm:$0xff]  ;;  %v5981_v51 = vld [vmem:[%s14207_s0 + $0x560] sm:$0xff] }
 0x200   :  { %v2879_v28 = vadd.f32 %v2859_v15, %v2817_v9  ;;  %v2880_v10 = vadd.f32 %v2860_v47, %v2818_v45  ;;  %v2881_v5 = vadd.f32 %v2861_v35, %v2819_v6  ;;  %v2882_v60 = vadd.f32 %v2862_v39, %v2820_v36  ;;  %v5982_v34 = vld [vmem:[%s14207_s0 + $0x568] sm:$0xff] }
 0x201   :  { %v2883_v9 = vadd.f32 %v2863_v41, %v2821_v50  ;;  %v2884_v45 = vadd.f32 %v2864_v58, %v2822_v55  ;;  %v2885_v6 = vadd.f32 %v2865_v31, %v2823_v53  ;;  %v2886_v36 = vadd.f32 %v2866_v48, %v2824_v33  ;;  %v5973_v53 = vld [vmem:[%s14207_s0 + $0x2a0] sm:$0xf]  ;;  %v5976_v33 = vld [vmem:[%s14207_s0 + $0x3f8] sm:$0xff] }
 0x202   :  { %v11183_v62 = vadd.f32 %v2867_v18, %v2825_v7  ;;  %v11185_v61 = vadd.f32 %v2868_v29, %v2826_v1  ;;  %v11187_v50 = vadd.f32 %v2869_v27, %v2827_v32  ;;  %v11189_v55 = vadd.f32 %v2870_v12, %v2828_v8  ;;  %v5978_v7 = vld [vmem:[%s14207_s0 + $0x408] sm:$0xf]  ;;  %v5979_v1 = vld [vmem:[%s14207_s0 + $0x550] sm:$0xff]  ;;  %v5980_v32 = vld [vmem:[%s14207_s0 + $0x558] sm:$0xff] }
 0x203   :  { %v2913_v8 = vmul.f32 %v5964_v40, %v10934_v52  ;;  %v2914_v21 = vmul.f32 %v5965_v42, %v10934_v52  ;;  %v2915_v4 = vmul.f32 %v5966_v37, %v10934_v52  ;;  %v2916_v43 = vmul.f32 %v5967_v56, %v10934_v52  ;;  %v5991_v56 = vld [vmem:[%s14207_s0 + $0x2b0] sm:$0xff] }
 0x204   :  { %v2917_v13 = vmul.f32 %v5968_v14, %v10934_v52  ;;  %v2918_v49 = vmul.f32 %v5969_v54, %v10934_v52  ;;  %v2919_v25 = vmul.f32 %v5970_v30, %v10934_v52  ;;  %v2920_v0 = vmul.f32 %v5971_v59, %v10934_v52  ;;  %v5993_v14 = vld [vmem:[%s14207_s0 + $0x2c0] sm:$0xff] }
 0x205   :  { %v2921_v17 = vmul.f32 %v5972_v3, %v10934_v52  ;;  %v2922_v2 = vmul.f32 %v5973_v53, %v10934_v52  ;;  %v2923_v11 = vmul.f32 %v5974_v19, %v10934_v52  ;;  %v2924_v15 = vmul.f32 %v5975_v63, %v10934_v52  ;;  %v5989_v19 = vld [vmem:[%s14207_s0 + $0x160] sm:$0xf]  ;;  %v5992_v63 = vld [vmem:[%s14207_s0 + $0x2b8] sm:$0xff]  ;;  %v5994_v53 = vld [vmem:[%s14207_s0 + $0x2c8] sm:$0xf] }
 0x206   :  { %v2925_v47 = vmul.f32 %v5976_v33, %v10934_v52  ;;  %v2926_v35 = vmul.f32 %v5977_v26, %v10934_v52  ;;  %v2927_v39 = vmul.f32 %v5978_v7, %v10934_v52  ;;  %v2928_v41 = vmul.f32 %v5979_v1, %v10934_v52  ;;  %v5997_v33 = vld [vmem:[%s14207_s0 + $0x420] sm:$0xff]  ;;  %v5998_v26 = vld [vmem:[%s14207_s0 + $0x428] sm:$0xff]  ;;  %v6000_v1 = vld [vmem:[%s14207_s0 + $0x578] sm:$0xff] }
 0x207   :  { %v2929_v58 = vmul.f32 %v5980_v32, %v10934_v52  ;;  %v2930_v31 = vmul.f32 %v5981_v51, %v10934_v52  ;;  %v2931_v48 = vmul.f32 %v5982_v34, %v10934_v52  ;;  %v2932_v18 = vmul.f32 %v5983_v22, %v10934_v52  ;;  %v6001_v32 = vld [vmem:[%s14207_s0 + $0x580] sm:$0xff]  ;;  %v6002_v51 = vld [vmem:[%s14207_s0 + $0x588] sm:$0xff]  ;;  %v6003_v34 = vld [vmem:[%s14207_s0 + $0x590] sm:$0xff] }
 0x208   :  { %v11247_v29 = vadd.f32 %v2913_v8, %v11134_v20  ;;  %v11250_v27 = vadd.f32 %v2914_v21, %v11136_v16  ;;  %v11253_v12 = vadd.f32 %v2915_v4, %v11138_v38  ;;  %v11256_v40 = vadd.f32 %v2916_v43, %v11140_v44  ;;  %v5985_v16 = vld [vmem:[%s14207_s0 + $0x140] sm:$0xff]  ;;  %v5986_v38 = vld [vmem:[%s14207_s0 + $0x148] sm:$0xff]  ;;  %v6004_v22 = vld [vmem:[%s14207_s0 + $0x598] sm:$0xf] }
 0x209   :  { %v11259_v42 = vadd.f32 %v2917_v13, %v11145_v57  ;;  %v11262_v54 = vadd.f32 %v2918_v49, %v11147_v46  ;;  %v11265_v52 = vadd.f32 %v2919_v25, %v11149_v23  ;;  %v11268_v20 = vadd.f32 %v2920_v0, %v11151_v24  ;;  %v5987_v46 = vld [vmem:[%s14207_s0 + $0x150] sm:$0xff]  ;;  %v5988_v23 = vld [vmem:[%s14207_s0 + $0x158] sm:$0xff]  ;;  %v5990_v24 = vld [vmem:[%s14207_s0 + $0x2a8] sm:$0xff] }
 0x20a   :  { %v2941_v44 = vadd.f32 %v2921_v17, %v2879_v28  ;;  %v2942_v57 = vadd.f32 %v2922_v2, %v2880_v10  ;;  %v2943_v30 = vadd.f32 %v2923_v11, %v2881_v5  ;;  %v2944_v37 = vadd.f32 %v2924_v15, %v2882_v60 }
 0x20b   :  { %v2945_v28 = vadd.f32 %v2925_v47, %v2883_v9  ;;  %v2946_v10 = vadd.f32 %v2926_v35, %v2884_v45  ;;  %v2947_v5 = vadd.f32 %v2927_v39, %v2885_v6  ;;  %v2948_v60 = vadd.f32 %v2928_v41, %v2886_v36  ;;  %v5995_v9 = vld [vmem:[%s14207_s0 + $0x410] sm:$0xff]  ;;  %v5996_v45 = vld [vmem:[%s14207_s0 + $0x418] sm:$0xff] }
 0x20c   :  { %v2949_v6 = vadd.f32 %v2929_v58, %v11183_v62  ;;  %v2950_v36 = vadd.f32 %v2930_v31, %v11185_v61  ;;  %v2951_v59 = vadd.f32 %v2931_v48, %v11187_v50  ;;  %v2952_v3 = vadd.f32 %v2932_v18, %v11189_v55  ;;  %v5999_v55 = vld [vmem:[%s14207_s0 + $0x430] sm:$0xf] }
 0x20d   :  { %v2974_v7 = vstv %s11213_s6  ;;  %v11318_v62 = vstv %s11234_s20  ;;  %v11321_v61 = vstv %s11228_s8  ;;  %v11324_v50 = vstv %s11236_s29  ;;  %s11671_s29 = sld [smem:[#allocation3 + $0x205]]  ;;  %s12957_s6 = sld [smem:[#allocation3 + $0x306]] }
 0x20e   :  { %v2975_v8 = vmul.f32 %v5985_v16, %v2974_v7  ;;  %v2976_v21 = vmul.f32 %v5986_v38, %v2974_v7  ;;  %v2977_v4 = vmul.f32 %v5987_v46, %v2974_v7  ;;  %v2978_v43 = vmul.f32 %v5988_v23, %v2974_v7  ;;  %s13548_s20 = sld [smem:[#allocation3 + $0x187]] }
 0x20f   :  { %v2979_v13 = vmul.f32 %v5989_v19, %v2974_v7  ;;  %v2980_v49 = vmul.f32 %v5990_v24, %v2974_v7  ;;  %v2981_v25 = vmul.f32 %v5991_v56, %v2974_v7  ;;  %v2982_v0 = vmul.f32 %v5992_v63, %v2974_v7 }
 0x210   :  { %v2983_v17 = vmul.f32 %v5993_v14, %v2974_v7  ;;  %v2984_v2 = vmul.f32 %v5994_v53, %v2974_v7  ;;  %v2985_v11 = vmul.f32 %v5995_v9, %v2974_v7  ;;  %v2986_v15 = vmul.f32 %v5996_v45, %v2974_v7 }
 0x211   :  { %v2987_v47 = vmul.f32 %v5997_v33, %v2974_v7  ;;  %v2988_v35 = vmul.f32 %v5998_v26, %v2974_v7  ;;  %v2989_v39 = vmul.f32 %v5999_v55, %v2974_v7  ;;  %v2990_v41 = vmul.f32 %v6000_v1, %v2974_v7 }
 0x212   :  { %v2991_v58 = vmul.f32 %v6001_v32, %v2974_v7  ;;  %v2992_v31 = vmul.f32 %v6002_v51, %v2974_v7  ;;  %v2993_v48 = vmul.f32 %v6003_v34, %v2974_v7  ;;  %v2994_v18 = vmul.f32 %v6004_v22, %v2974_v7 }
 0x213   :  { %v2995_v16 = vadd.f32 %v2975_v8, %v11247_v29  ;;  %v2996_v38 = vadd.f32 %v2976_v21, %v11250_v27  ;;  %v2997_v46 = vadd.f32 %v2977_v4, %v11253_v12  ;;  %v2998_v23 = vadd.f32 %v2978_v43, %v11256_v40 }
 0x214   :  { %v2999_v24 = vadd.f32 %v2979_v13, %v11259_v42  ;;  %v3000_v56 = vadd.f32 %v2980_v49, %v11262_v54  ;;  %v3001_v19 = vadd.f32 %v2981_v25, %v11265_v52  ;;  %v3002_v63 = vadd.f32 %v2982_v0, %v11268_v20 }
 0x215   :  { %v3003_v14 = vadd.f32 %v2983_v17, %v2941_v44  ;;  %v3004_v9 = vadd.f32 %v2984_v2, %v2942_v57  ;;  %v3005_v45 = vadd.f32 %v2985_v11, %v2943_v30  ;;  %v3006_v53 = vadd.f32 %v2986_v15, %v2944_v37 }
 0x216   :  { %v3007_v33 = vadd.f32 %v2987_v47, %v2945_v28  ;;  %v3008_v29 = vadd.f32 %v2988_v35, %v2946_v10  ;;  %v3009_v26 = vadd.f32 %v2989_v39, %v2947_v5  ;;  %v3010_v27 = vadd.f32 %v2990_v41, %v2948_v60 }
 0x217   :  { %v3011_v7 = vadd.f32 %v2991_v58, %v2949_v6  ;;  %v3012_v12 = vadd.f32 %v2992_v31, %v2950_v36  ;;  %v3013_v55 = vadd.f32 %v2993_v48, %v2951_v59  ;;  %v3014_v40 = vadd.f32 %v2994_v18, %v2952_v3  ;;  %v3082_v48 = vld [vmem:[%s14207_s0] sm:$0xff] }
 0x218   :  { %v3017_v42 = vadd.f32 %v11318_v62, %v2995_v16  ;;  %v3018_v54 = vadd.f32 %v11318_v62, %v2996_v38  ;;  %v3019_v52 = vadd.f32 %v11318_v62, %v2997_v46  ;;  %v3020_v20 = vadd.f32 %v11318_v62, %v2998_v23  ;;  %v3083_v23 = vld [vmem:[%s14207_s0 + $0x8] sm:$0xff] }
 0x219   :  { %v3021_v44 = vadd.f32 %v11318_v62, %v2999_v24  ;;  %v3022_v57 = vadd.f32 %v11318_v62, %v3000_v56  ;;  %v3023_v30 = vadd.f32 %v11318_v62, %v3001_v19  ;;  %v3024_v37 = vadd.f32 %v11318_v62, %v3002_v63  ;;  %v3084_v24 = vld [vmem:[%s14207_s0 + $0x10] sm:$0xff]  ;;  %v3087_v56 = vld [vmem:[%s14207_s0 + $0x168] sm:$0xff] }
 0x21a   :  { %v3025_v28 = vadd.f32 %v11318_v62, %v3003_v14  ;;  %v3026_v10 = vadd.f32 %v11318_v62, %v3004_v9  ;;  %v3027_v5 = vadd.f32 %v11318_v62, %v3005_v45  ;;  %v3028_v60 = vadd.f32 %v11318_v62, %v3006_v53  ;;  %v3088_v45 = vld [vmem:[%s14207_s0 + $0x170] sm:$0xff]  ;;  %v3089_v53 = vld [vmem:[%s14207_s0 + $0x178] sm:$0xff] }
 0x21b   :  { %v3029_v6 = vadd.f32 %v11318_v62, %v3007_v33  ;;  %v3030_v36 = vadd.f32 %v11318_v62, %v3008_v29  ;;  %v3031_v59 = vadd.f32 %v11318_v62, %v3009_v26  ;;  %v3032_v3 = vadd.f32 %v11318_v62, %v3010_v27 }
 0x21c   :  { %v3033_v1 = vadd.f32 %v11318_v62, %v3011_v7  ;;  %v3034_v32 = vadd.f32 %v11318_v62, %v3012_v12  ;;  %v3035_v8 = vadd.f32 %v11318_v62, %v3013_v55  ;;  %v3036_v21 = vadd.f32 %v11318_v62, %v3014_v40  ;;  %v3085_v7 = vld [vmem:[%s14207_s0 + $0x18] sm:$0xff]  ;;  %v3086_v12 = vld [vmem:[%s14207_s0 + $0x20] sm:$0xf]  ;;  %v3092_v55 = vld [vmem:[%s14207_s0 + $0x2d0] sm:$0xff] }
 0x21d   :  { %v3037_v4 = vmax.f32 %v3017_v42, 0.0  ;;  %v3038_v43 = vmax.f32 %v3018_v54, 0.0  ;;  %v3039_v51 = vmax.f32 %v3019_v52, 0.0  ;;  %v3040_v34 = vmax.f32 %v3020_v20, 0.0  ;;  %v3093_v40 = vld [vmem:[%s14207_s0 + $0x2d8] sm:$0xff]  ;;  %v3094_v42 = vld [vmem:[%s14207_s0 + $0x2e0] sm:$0xff] }
 0x21e   :  { %v3041_v22 = vmax.f32 %v3021_v44, 0.0  ;;  %v3042_v13 = vmax.f32 %v3022_v57, 0.0  ;;  %v3043_v49 = vmax.f32 %v3023_v30, 0.0  ;;  %v3044_v25 = vmax.f32 %v3024_v37, 0.0  ;;  %v3090_v52 = vld [vmem:[%s14207_s0 + $0x180] sm:$0xff]  ;;  %v3097_v44 = vld [vmem:[%s14207_s0 + $0x438] sm:$0xff] }
 0x21f   :  { %v3045_v0 = vmax.f32 %v3025_v28, 0.0  ;;  %v3046_v17 = vmax.f32 %v3026_v10, 0.0  ;;  %v3047_v2 = vmax.f32 %v3027_v5, 0.0  ;;  %v3048_v11 = vmax.f32 %v3028_v60, 0.0  ;;  %v3091_v20 = vld [vmem:[%s14207_s0 + $0x188] sm:$0xf] }
 0x220   :  { %v3049_v15 = vmax.f32 %v3029_v6, 0.0  ;;  %v3050_v47 = vmax.f32 %v3030_v36, 0.0  ;;  %v3051_v35 = vmax.f32 %v3031_v59, 0.0  ;;  %v3052_v39 = vmax.f32 %v3032_v3, 0.0  ;;  %v3098_v57 = vld [vmem:[%s14207_s0 + $0x440] sm:$0xff]  ;;  %v3095_v36 = vld [vmem:[%s14207_s0 + $0x2e8] sm:$0xff] }
 0x221   :  { %v3053_v41 = vmax.f32 %v3033_v1, 0.0  ;;  %v3054_v58 = vmax.f32 %v3034_v32, 0.0  ;;  %v3055_v31 = vmax.f32 %v3035_v8, 0.0  ;;  %v3056_v62 = vmax.f32 %v3036_v21, 0.0  ;;  %v3096_v59 = vld [vmem:[%s14207_s0 + $0x2f0] sm:$0xf] }
 0x222   :  { %v3057_v18 = vmax.f32 %v3037_v4, %v3042_v13  ;;  %v3060_v16 = vmax.f32 %v3038_v43, %v3043_v49  ;;  %v3063_v38 = vmax.f32 %v3039_v51, %v3044_v25  ;;  %v3066_v46 = vmax.f32 %v3040_v34, %v3045_v0  ;;  %v3099_v3 = vld [vmem:[%s14207_s0 + $0x448] sm:$0xff]  ;;  %v3100_v32 = vld [vmem:[%s14207_s0 + $0x450] sm:$0xff]  ;;  %v3101_v8 = vld [vmem:[%s14207_s0 + $0x458] sm:$0xf] }
 0x223   :  { %v3069_v19 = vsel %vm648_vm0, %v3041_v22, -inf  ;;  %v3070_v63 = vsel %vm648_vm0, %v3046_v17, -inf  ;;  %v3072_v14 = vsel %vm648_vm0, %v3051_v35, -inf  ;;  %v3074_v9 = vsel %vm648_vm0, %v3056_v62, -inf  ;;  %v6008_v51 = vld [vmem:[%s14207_s0 + $0x28] sm:$0xff]  ;;  %v6009_v25 = vld [vmem:[%s14207_s0 + $0x30] sm:$0xff] }
 0x224   :  { %v3058_v33 = vmax.f32 %v3057_v18, %v3047_v2  ;;  %v3061_v29 = vmax.f32 %v3060_v16, %v3048_v11  ;;  %v3064_v26 = vmax.f32 %v3063_v38, %v3049_v15  ;;  %v3067_v27 = vmax.f32 %v3066_v46, %v3050_v47  ;;  %v6010_v0 = vld [vmem:[%s14207_s0 + $0x38] sm:$0xff]  ;;  %v6013_v17 = vld [vmem:[%s14207_s0 + $0x190] sm:$0xff]  ;;  %v6011_v35 = vld [vmem:[%s14207_s0 + $0x40] sm:$0xff] }
 0x225   :  { %v3071_v54 = vmax.f32 %v3069_v19, %v3070_v63  ;;  %v11422_v30 = vmul.f32 %v11321_v61, %v3082_v48  ;;  %v11425_v37 = vmul.f32 %v11321_v61, %v3083_v23  ;;  %v11428_v28 = vmul.f32 %v11321_v61, %v3084_v24  ;;  %v6015_v16 = vld [vmem:[%s14207_s0 + $0x1a0] sm:$0xff]  ;;  %v6016_v38 = vld [vmem:[%s14207_s0 + $0x1a8] sm:$0xff]  ;;  %v6017_v46 = vld [vmem:[%s14207_s0 + $0x1b0] sm:$0xf] }
 0x226   :  { %v3059_v10 = vmax.f32 %v3058_v33, %v3052_v39  ;;  %v3062_v5 = vmax.f32 %v3061_v29, %v3053_v41  ;;  %v3065_v60 = vmax.f32 %v3064_v26, %v3054_v58  ;;  %v3068_v6 = vmax.f32 %v3067_v27, %v3055_v31  ;;  %v6012_v39 = vld [vmem:[%s14207_s0 + $0x48] sm:$0xf]  ;;  %v6014_v41 = vld [vmem:[%s14207_s0 + $0x198] sm:$0xff]  ;;  %v6019_v19 = vld [vmem:[%s14207_s0 + $0x300] sm:$0xff] }
 0x227   :  { %v3073_v1 = vmax.f32 %v3071_v54, %v3072_v14  ;;  %v11446_v21 = vmul.f32 %v11321_v61, %v3085_v7  ;;  %v11449_v4 = vmul.f32 %v11321_v61, %v3086_v12  ;;  %v11452_v43 = vmul.f32 %v11321_v61, %v3087_v56  ;;  %v6018_v58 = vld [vmem:[%s14207_s0 + $0x2f8] sm:$0xff]  ;;  %v6020_v63 = vld [vmem:[%s14207_s0 + $0x308] sm:$0xff]  ;;  %v6021_v14 = vld [vmem:[%s14207_s0 + $0x310] sm:$0xff] }
 0x228   :  { %3076 = vst [vmem:[#allocation2 + $0xa0] sm:$0xff] %v3059_v10  ;;  %3077 = vst [vmem:[#allocation2 + $0xa8] sm:$0xff] %v3062_v5  ;;  %v11458_v34 = vmul.f32 %v11321_v61, %v3088_v45  ;;  %v11461_v22 = vmul.f32 %v11321_v61, %v3089_v53  ;;  %v11464_v13 = vmul.f32 %v11321_v61, %v3090_v52  ;;  %v6022_v45 = vld [vmem:[%s14207_s0 + $0x318] sm:$0xf]  ;;  %v6024_v53 = vld [vmem:[%s14207_s0 + $0x468] sm:$0xff] }
 0x229   :  { %3078 = vst [vmem:[#allocation2 + $0xb0] sm:$0xff] %v3065_v60  ;;  %3079 = vst [vmem:[#allocation2 + $0xb8] sm:$0xff] %v3068_v6  ;;  %v11467_v49 = vmul.f32 %v11321_v61, %v3091_v20  ;;  %v3075_v2 = vmax.f32 %v3073_v1, %v3074_v9  ;;  %v3114_v11 = vmul.f32 %v11321_v61, %v3092_v55  ;;  %v6025_v7 = vld [vmem:[%s14207_s0 + $0x470] sm:$0xff]  ;;  %v6026_v12 = vld [vmem:[%s14207_s0 + $0x478] sm:$0xff] }
 0x22a   :  { %v3115_v15 = vmul.f32 %v11321_v61, %v3093_v40  ;;  %v3116_v47 = vmul.f32 %v11321_v61, %v3094_v42  ;;  %v3117_v31 = vmul.f32 %v11321_v61, %v3095_v36  ;;  %v3118_v62 = vmul.f32 %v11321_v61, %v3096_v59  ;;  %v6027_v55 = vld [vmem:[%s14207_s0 + $0x480] sm:$0xf] }
 0x22b   :  { %v3119_v48 = vmul.f32 %v11321_v61, %v3097_v44  ;;  %v3120_v18 = vmul.f32 %v11321_v61, %v3098_v57  ;;  %3080 = vst [vmem:[#allocation2 + $0xc0] sm:$0xf] %v3075_v2  ;;  %v3121_v23 = vmul.f32 %v11321_v61, %v3099_v3  ;;  %v3122_v24 = vmul.f32 %v11321_v61, %v3100_v32 }
 0x22c   :  { %v3123_v56 = vmul.f32 %v11321_v61, %v3101_v8  ;;  %v3146_v9 = vmul.f32 %v6008_v51, %v11324_v50  ;;  %v6023_v61 = vld [vmem:[%s14207_s0 + $0x460] sm:$0xff]  ;;  %v3147_v33 = vmul.f32 %v6009_v25, %v11324_v50  ;;  %v3148_v29 = vmul.f32 %v6010_v0, %v11324_v50 }
 0x22d   :  { %v3149_v26 = vmul.f32 %v6011_v35, %v11324_v50  ;;  %v3150_v27 = vmul.f32 %v6012_v39, %v11324_v50  ;;  %v3151_v40 = vmul.f32 %v6013_v17, %v11324_v50  ;;  %v3152_v42 = vmul.f32 %v6014_v41, %v11324_v50  ;;  %v6029_v17 = vld [vmem:[%s14207_s0 + $0x50] sm:$0xff]  ;;  %v6032_v35 = vld [vmem:[%s14207_s0 + $0x68] sm:$0xff] }
 0x22e   :  { %v3153_v54 = vmul.f32 %v6015_v16, %v11324_v50  ;;  %v3154_v52 = vmul.f32 %v6016_v38, %v11324_v50  ;;  %v3155_v20 = vmul.f32 %v6017_v46, %v11324_v50  ;;  %v3156_v44 = vmul.f32 %v6018_v58, %v11324_v50  ;;  %v6033_v39 = vld [vmem:[%s14207_s0 + $0x70] sm:$0xf]  ;;  %v6036_v16 = vld [vmem:[%s14207_s0 + $0x1c8] sm:$0xff] }
 0x22f   :  { %v3157_v57 = vmul.f32 %v6019_v19, %v11324_v50  ;;  %v3158_v10 = vmul.f32 %v6020_v63, %v11324_v50  ;;  %v3159_v5 = vmul.f32 %v6021_v14, %v11324_v50  ;;  %v3160_v60 = vmul.f32 %v6022_v45, %v11324_v50  ;;  %v6037_v38 = vld [vmem:[%s14207_s0 + $0x1d0] sm:$0xff]  ;;  %v6040_v46 = vld [vmem:[%s14207_s0 + $0x328] sm:$0xff]  ;;  %v6042_v63 = vld [vmem:[%s14207_s0 + $0x338] sm:$0xff] }
 0x230   :  { %v3161_v6 = vmul.f32 %v6023_v61, %v11324_v50  ;;  %v3162_v36 = vmul.f32 %v6024_v53, %v11324_v50  ;;  %v3163_v59 = vmul.f32 %v6025_v7, %v11324_v50  ;;  %v3164_v3 = vmul.f32 %v6026_v12, %v11324_v50  ;;  %v6041_v19 = vld [vmem:[%s14207_s0 + $0x330] sm:$0xff] }
 0x231   :  { %v3165_v1 = vmul.f32 %v6027_v55, %v11324_v50  ;;  %v11559_v32 = vadd.f32 %v3146_v9, %v11422_v30  ;;  %v11562_v8 = vadd.f32 %v3147_v33, %v11425_v37  ;;  %v11565_v51 = vadd.f32 %v3148_v29, %v11428_v28  ;;  %v6046_v33 = vld [vmem:[%s14207_s0 + $0x498] sm:$0xff]  ;;  %v6047_v29 = vld [vmem:[%s14207_s0 + $0x4a0] sm:$0xff] }
 0x232   :  { %v11568_v25 = vadd.f32 %v3149_v26, %v11446_v21  ;;  %v11571_v0 = vadd.f32 %v3150_v27, %v11449_v4  ;;  %v11577_v50 = vadd.f32 %v3151_v40, %v11452_v43  ;;  %v11580_v30 = vadd.f32 %v3152_v42, %v11458_v34  ;;  %v6030_v21 = vld [vmem:[%s14207_s0 + $0x58] sm:$0xff]  ;;  %v6031_v4 = vld [vmem:[%s14207_s0 + $0x60] sm:$0xff]  ;;  %v6048_v26 = vld [vmem:[%s14207_s0 + $0x4a8] sm:$0xf] }
 0x233   :  { %v11583_v37 = vadd.f32 %v3153_v54, %v11461_v22  ;;  %v11586_v28 = vadd.f32 %v3154_v52, %v11464_v13  ;;  %v6034_v43 = vld [vmem:[%s14207_s0 + $0x1b8] sm:$0xff]  ;;  %v11598_v34 = vadd.f32 %v3155_v20, %v11467_v49  ;;  %v11600_v22 = vadd.f32 %v3156_v44, %v3114_v11  ;;  %v6035_v49 = vld [vmem:[%s14207_s0 + $0x1c0] sm:$0xff] }
 0x234   :  { %v11602_v2 = vadd.f32 %v3157_v57, %v3115_v15  ;;  %v11604_v13 = vadd.f32 %v3158_v10, %v3116_v47  ;;  %v6039_v11 = vld [vmem:[%s14207_s0 + $0x320] sm:$0xff]  ;;  %v11618_v15 = vadd.f32 %v3159_v5, %v3117_v31  ;;  %v11620_v47 = vadd.f32 %v3160_v60, %v3118_v62 }
 0x235   :  { %v11622_v41 = vadd.f32 %v3161_v6, %v3119_v48  ;;  %v11624_v58 = vadd.f32 %v3162_v36, %v3120_v18  ;;  %v11635_v31 = vadd.f32 %v3163_v59, %v3121_v23  ;;  %v11637_v62 = vadd.f32 %v3164_v3, %v3122_v24  ;;  %v6038_v18 = vld [vmem:[%s14207_s0 + $0x1d8] sm:$0xf]  ;;  %v6043_v23 = vld [vmem:[%s14207_s0 + $0x340] sm:$0xf]  ;;  %v6044_v24 = vld [vmem:[%s14207_s0 + $0x488] sm:$0xff] }
 0x236   :  { %v11639_v48 = vadd.f32 %v3165_v1, %v3123_v56  ;;  %v3207_v14 = vstv %s11545_s17  ;;  %v6045_v56 = vld [vmem:[%s14207_s0 + $0x490] sm:$0xff] }
 0x237   :  { %v3208_v9 = vmul.f32 %v6029_v17, %v3207_v14  ;;  %v3209_v45 = vmul.f32 %v6030_v21, %v3207_v14  ;;  %v3210_v61 = vmul.f32 %v6031_v4, %v3207_v14  ;;  %v3211_v53 = vmul.f32 %v6032_v35, %v3207_v14  ;;  %v6053_v35 = vld [vmem:[%s14207_s0 + $0x90] sm:$0xff] }
 0x238   :  { %v3212_v27 = vmul.f32 %v6033_v39, %v3207_v14  ;;  %v3213_v7 = vmul.f32 %v6034_v43, %v3207_v14  ;;  %v3214_v12 = vmul.f32 %v6035_v49, %v3207_v14  ;;  %v3215_v55 = vmul.f32 %v6036_v16, %v3207_v14  ;;  %v6054_v39 = vld [vmem:[%s14207_s0 + $0x98] sm:$0xf]  ;;  %v6057_v16 = vld [vmem:[%s14207_s0 + $0x1f0] sm:$0xff] }
 0x239   :  { %v3216_v40 = vmul.f32 %v6037_v38, %v3207_v14  ;;  %v3217_v42 = vmul.f32 %v6038_v18, %v3207_v14  ;;  %v3218_v54 = vmul.f32 %v6039_v11, %v3207_v14  ;;  %v3219_v52 = vmul.f32 %v6040_v46, %v3207_v14 }
 0x23a   :  { %v3220_v20 = vmul.f32 %v6041_v19, %v3207_v14  ;;  %v3221_v44 = vmul.f32 %v6042_v63, %v3207_v14  ;;  %v3222_v57 = vmul.f32 %v6043_v23, %v3207_v14  ;;  %v3223_v10 = vmul.f32 %v6044_v24, %v3207_v14  ;;  %v6061_v19 = vld [vmem:[%s14207_s0 + $0x350] sm:$0xff]  ;;  %v6062_v63 = vld [vmem:[%s14207_s0 + $0x358] sm:$0xff] }
 0x23b   :  { %v3224_v5 = vmul.f32 %v6045_v56, %v3207_v14  ;;  %v3225_v60 = vmul.f32 %v6046_v33, %v3207_v14  ;;  %v3226_v6 = vmul.f32 %v6047_v29, %v3207_v14  ;;  %v3227_v36 = vmul.f32 %v6048_v26, %v3207_v14  ;;  %v6065_v24 = vld [vmem:[%s14207_s0 + $0x4b0] sm:$0xff]  ;;  %v6066_v56 = vld [vmem:[%s14207_s0 + $0x4b8] sm:$0xff]  ;;  %v6067_v33 = vld [vmem:[%s14207_s0 + $0x4c0] sm:$0xff] }
 0x23c   :  { %v11678_v59 = vadd.f32 %v3208_v9, %v11559_v32  ;;  %v11681_v3 = vadd.f32 %v3209_v45, %v11562_v8  ;;  %v11684_v1 = vadd.f32 %v3210_v61, %v11565_v51  ;;  %v11687_v17 = vadd.f32 %v3211_v53, %v11568_v25  ;;  %v6050_v8 = vld [vmem:[%s14207_s0 + $0x78] sm:$0xff]  ;;  %v6051_v51 = vld [vmem:[%s14207_s0 + $0x80] sm:$0xff]  ;;  %v6052_v25 = vld [vmem:[%s14207_s0 + $0x88] sm:$0xff] }
 0x23d   :  { %v11690_v21 = vadd.f32 %v3212_v27, %v11571_v0  ;;  %v11693_v4 = vadd.f32 %v3213_v7, %v11577_v50  ;;  %v11696_v43 = vadd.f32 %v3214_v12, %v11580_v30  ;;  %v11699_v32 = vadd.f32 %v3215_v55, %v11583_v37  ;;  %v6068_v29 = vld [vmem:[%s14207_s0 + $0x4c8] sm:$0xff]  ;;  %v6069_v26 = vld [vmem:[%s14207_s0 + $0x4d0] sm:$0xf] }
 0x23e   :  { %v11711_v0 = vadd.f32 %v3216_v40, %v11586_v28  ;;  %v11714_v50 = vadd.f32 %v3217_v42, %v11598_v34  ;;  %v11717_v30 = vadd.f32 %v3218_v54, %v11600_v22  ;;  %v11720_v37 = vadd.f32 %v3219_v52, %v11602_v2  ;;  %v6055_v28 = vld [vmem:[%s14207_s0 + $0x1e0] sm:$0xff]  ;;  %v6056_v34 = vld [vmem:[%s14207_s0 + $0x1e8] sm:$0xff] }
 0x23f   :  { %v11735_v22 = vadd.f32 %v3220_v20, %v11604_v13  ;;  %v11738_v2 = vadd.f32 %v3221_v44, %v11618_v15  ;;  %v11741_v49 = vadd.f32 %v3222_v57, %v11620_v47  ;;  %v11744_v11 = vadd.f32 %v3223_v10, %v11622_v41  ;;  %v6058_v13 = vld [vmem:[%s14207_s0 + $0x1f8] sm:$0xff]  ;;  %v6059_v15 = vld [vmem:[%s14207_s0 + $0x200] sm:$0xf]  ;;  %v6060_v47 = vld [vmem:[%s14207_s0 + $0x348] sm:$0xff] }
 0x240   :  { %v11759_v38 = vadd.f32 %v3224_v5, %v11624_v58  ;;  %v11762_v41 = vadd.f32 %v3225_v60, %v11635_v31  ;;  %v11765_v46 = vadd.f32 %v3226_v6, %v11637_v62  ;;  %v11768_v18 = vadd.f32 %v3227_v36, %v11639_v48  ;;  %v6063_v58 = vld [vmem:[%s14207_s0 + $0x360] sm:$0xff]  ;;  %v6064_v48 = vld [vmem:[%s14207_s0 + $0x368] sm:$0xf] }
 0x241   :  { %v3269_v31 = vstv %s11660_s16  ;;  %v11781_v14 = vstv %s11671_s29  ;;  %v11784_v62 = vstv %s11673_s23  ;;  %v11787_v23 = vstv %s11675_s14  ;;  %s12097_s23 = sld [smem:[#allocation3 + $0x405]]  ;;  %s12390_s16 = sld [smem:[#allocation3 + $0x86]] }
 0x242   :  { %v3270_v9 = vmul.f32 %v6050_v8, %v3269_v31  ;;  %v3271_v45 = vmul.f32 %v6051_v51, %v3269_v31  ;;  %v3272_v61 = vmul.f32 %v6052_v25, %v3269_v31  ;;  %v3273_v53 = vmul.f32 %v6053_v35, %v3269_v31  ;;  %s12103_s14 = sld [smem:[#allocation6 + $0x5]]  ;;  %s13762_s29 = sld [smem:[#allocation3 + $0x387]] }
 0x243   :  { %v3274_v27 = vmul.f32 %v6054_v39, %v3269_v31  ;;  %v3275_v7 = vmul.f32 %v6055_v28, %v3269_v31  ;;  %v3276_v12 = vmul.f32 %v6056_v34, %v3269_v31  ;;  %v3277_v55 = vmul.f32 %v6057_v16, %v3269_v31  ;;  %v6071_v39 = vld [vmem:[%s14207_s0 + $0xa0] sm:$0xff] }
 0x244   :  { %v3278_v40 = vmul.f32 %v6058_v13, %v3269_v31  ;;  %v3279_v42 = vmul.f32 %v6059_v15, %v3269_v31  ;;  %v3280_v54 = vmul.f32 %v6060_v47, %v3269_v31  ;;  %v3281_v52 = vmul.f32 %v6061_v19, %v3269_v31  ;;  %v6075_v15 = vld [vmem:[%s14207_s0 + $0xc0] sm:$0xf]  ;;  %v6077_v47 = vld [vmem:[%s14207_s0 + $0x210] sm:$0xff] }
 0x245   :  { %v3282_v20 = vmul.f32 %v6062_v63, %v3269_v31  ;;  %v3283_v44 = vmul.f32 %v6063_v58, %v3269_v31  ;;  %v3284_v57 = vmul.f32 %v6064_v48, %v3269_v31  ;;  %v3285_v10 = vmul.f32 %v6065_v24, %v3269_v31  ;;  %v6078_v63 = vld [vmem:[%s14207_s0 + $0x218] sm:$0xff]  ;;  %v6079_v58 = vld [vmem:[%s14207_s0 + $0x220] sm:$0xff] }
 0x246   :  { %v3286_v5 = vmul.f32 %v6066_v56, %v3269_v31  ;;  %v3287_v60 = vmul.f32 %v6067_v33, %v3269_v31  ;;  %v3288_v6 = vmul.f32 %v6068_v29, %v3269_v31  ;;  %v3289_v36 = vmul.f32 %v6069_v26, %v3269_v31  ;;  %v6080_v31 = vld [vmem:[%s14207_s0 + $0x228] sm:$0xf]  ;;  %v6082_v48 = vld [vmem:[%s14207_s0 + $0x378] sm:$0xff]  ;;  %v6083_v24 = vld [vmem:[%s14207_s0 + $0x380] sm:$0xff] }
 0x247   :  { %v3290_v8 = vadd.f32 %v3270_v9, %v11678_v59  ;;  %v3291_v51 = vadd.f32 %v3271_v45, %v11681_v3  ;;  %v3292_v25 = vadd.f32 %v3272_v61, %v11684_v1  ;;  %v3293_v35 = vadd.f32 %v3273_v53, %v11687_v17  ;;  %v6072_v59 = vld [vmem:[%s14207_s0 + $0xa8] sm:$0xff]  ;;  %v6073_v3 = vld [vmem:[%s14207_s0 + $0xb0] sm:$0xff]  ;;  %v6090_v29 = vld [vmem:[%s14207_s0 + $0x4f8] sm:$0xf] }
 0x248   :  { %v3294_v28 = vadd.f32 %v3274_v27, %v11690_v21  ;;  %v3295_v34 = vadd.f32 %v3275_v7, %v11693_v4  ;;  %v3296_v16 = vadd.f32 %v3276_v12, %v11696_v43  ;;  %v3297_v13 = vadd.f32 %v3277_v55, %v11699_v32  ;;  %v6076_v1 = vld [vmem:[%s14207_s0 + $0x208] sm:$0xff]  ;;  %v6074_v32 = vld [vmem:[%s14207_s0 + $0xb8] sm:$0xff]  ;;  %v6089_v33 = vld [vmem:[%s14207_s0 + $0x4f0] sm:$0xff] }
 0x249   :  { %v3298_v17 = vadd.f32 %v3278_v40, %v11711_v0  ;;  %v3299_v21 = vadd.f32 %v3279_v42, %v11714_v50  ;;  %v3300_v4 = vadd.f32 %v3280_v54, %v11717_v30  ;;  %v3301_v43 = vadd.f32 %v3281_v52, %v11720_v37  ;;  %v6081_v0 = vld [vmem:[%s14207_s0 + $0x370] sm:$0xff]  ;;  %v6084_v56 = vld [vmem:[%s14207_s0 + $0x388] sm:$0xff] }
 0x24a   :  { %v3302_v50 = vadd.f32 %v3282_v20, %v11735_v22  ;;  %v3303_v30 = vadd.f32 %v3283_v44, %v11738_v2  ;;  %v3304_v37 = vadd.f32 %v3284_v57, %v11741_v49  ;;  %v3305_v19 = vadd.f32 %v3285_v10, %v11744_v11  ;;  %v6088_v53 = vld [vmem:[%s14207_s0 + $0x4e8] sm:$0xff] }
 0x24b   :  { %v3306_v22 = vadd.f32 %v3286_v5, %v11759_v38  ;;  %v3307_v2 = vadd.f32 %v3287_v60, %v11762_v41  ;;  %v3308_v49 = vadd.f32 %v3288_v6, %v11765_v46  ;;  %v3309_v11 = vadd.f32 %v3289_v36, %v11768_v18  ;;  %v6085_v38 = vld [vmem:[%s14207_s0 + $0x390] sm:$0xf]  ;;  %v6086_v41 = vld [vmem:[%s14207_s0 + $0x4d8] sm:$0xff]  ;;  %v6087_v46 = vld [vmem:[%s14207_s0 + $0x4e0] sm:$0xff] }
 0x24c   :  { %v3332_v18 = vmul.f32 %v6071_v39, %v11781_v14  ;;  %v3333_v9 = vmul.f32 %v6072_v59, %v11781_v14  ;;  %v3334_v45 = vmul.f32 %v6073_v3, %v11781_v14  ;;  %v3335_v61 = vmul.f32 %v6074_v32, %v11781_v14 }
 0x24d   :  { %v3336_v26 = vmul.f32 %v6075_v15, %v11781_v14  ;;  %v3337_v27 = vmul.f32 %v6076_v1, %v11781_v14  ;;  %v3338_v7 = vmul.f32 %v6077_v47, %v11781_v14  ;;  %v3339_v12 = vmul.f32 %v6078_v63, %v11781_v14  ;;  %v6092_v1 = vld [vmem:[%s14207_s0 + $0xc8] sm:$0xff]  ;;  %v6093_v63 = vld [vmem:[%s14207_s0 + $0xd0] sm:$0xff] }
 0x24e   :  { %v3340_v55 = vmul.f32 %v6079_v58, %v11781_v14  ;;  %v3341_v40 = vmul.f32 %v6080_v31, %v11781_v14  ;;  %v3342_v42 = vmul.f32 %v6081_v0, %v11781_v14  ;;  %v3343_v54 = vmul.f32 %v6082_v48, %v11781_v14  ;;  %v6099_v31 = vld [vmem:[%s14207_s0 + $0x240] sm:$0xff]  ;;  %v6100_v48 = vld [vmem:[%s14207_s0 + $0x248] sm:$0xff] }
 0x24f   :  { %v3344_v52 = vmul.f32 %v6083_v24, %v11781_v14  ;;  %v3345_v20 = vmul.f32 %v6084_v56, %v11781_v14  ;;  %v3346_v44 = vmul.f32 %v6085_v38, %v11781_v14  ;;  %v3347_v57 = vmul.f32 %v6086_v41, %v11781_v14  ;;  %v6101_v24 = vld [vmem:[%s14207_s0 + $0x250] sm:$0xf] }
 0x250   :  { %v3348_v10 = vmul.f32 %v6087_v46, %v11781_v14  ;;  %v3349_v5 = vmul.f32 %v6088_v53, %v11781_v14  ;;  %v3350_v60 = vmul.f32 %v6089_v33, %v11781_v14  ;;  %v3351_v6 = vmul.f32 %v6090_v29, %v11781_v14  ;;  %v6094_v14 = vld [vmem:[%s14207_s0 + $0xd8] sm:$0xff]  ;;  %v6111_v53 = vld [vmem:[%s14207_s0 + $0x520] sm:$0xf] }
 0x251   :  { %v3352_v36 = vadd.f32 %v3332_v18, %v3290_v8  ;;  %v3353_v39 = vadd.f32 %v3333_v9, %v3291_v51  ;;  %v3354_v59 = vadd.f32 %v3334_v45, %v3292_v25  ;;  %v3355_v3 = vadd.f32 %v3335_v61, %v3293_v35  ;;  %v6097_v8 = vld [vmem:[%s14207_s0 + $0x230] sm:$0xff]  ;;  %v6110_v61 = vld [vmem:[%s14207_s0 + $0x518] sm:$0xff] }
 0x252   :  { %v3356_v32 = vadd.f32 %v3336_v26, %v3294_v28  ;;  %v3357_v15 = vadd.f32 %v3337_v27, %v3295_v34  ;;  %v3358_v47 = vadd.f32 %v3338_v7, %v3296_v16  ;;  %v3359_v0 = vadd.f32 %v3339_v12, %v3297_v13  ;;  %v6095_v28 = vld [vmem:[%s14207_s0 + $0xe0] sm:$0xff]  ;;  %v6096_v34 = vld [vmem:[%s14207_s0 + $0xe8] sm:$0xf]  ;;  %v6098_v16 = vld [vmem:[%s14207_s0 + $0x238] sm:$0xff] }
 0x253   :  { %v3360_v51 = vadd.f32 %v3340_v55, %v3298_v17  ;;  %v3361_v25 = vadd.f32 %v3341_v40, %v3299_v21  ;;  %v3362_v35 = vadd.f32 %v3342_v42, %v3300_v4  ;;  %v3363_v58 = vadd.f32 %v3343_v54, %v3301_v43  ;;  %v6102_v13 = vld [vmem:[%s14207_s0 + $0x398] sm:$0xff]  ;;  %v6109_v45 = vld [vmem:[%s14207_s0 + $0x510] sm:$0xff] }
 0x254   :  { %v3364_v17 = vadd.f32 %v3344_v52, %v3302_v50  ;;  %v3365_v21 = vadd.f32 %v3345_v20, %v3303_v30  ;;  %v3366_v4 = vadd.f32 %v3346_v44, %v3304_v37  ;;  %v3367_v43 = vadd.f32 %v3347_v57, %v3305_v19  ;;  %v6103_v50 = vld [vmem:[%s14207_s0 + $0x3a0] sm:$0xff]  ;;  %v6104_v30 = vld [vmem:[%s14207_s0 + $0x3a8] sm:$0xff]  ;;  %v6105_v37 = vld [vmem:[%s14207_s0 + $0x3b0] sm:$0xff] }
 0x255   :  { %v3368_v56 = vadd.f32 %v3348_v10, %v3306_v22  ;;  %v3369_v38 = vadd.f32 %v3349_v5, %v3307_v2  ;;  %v3370_v41 = vadd.f32 %v3350_v60, %v3308_v49  ;;  %v3371_v46 = vadd.f32 %v3351_v6, %v3309_v11  ;;  %v6106_v19 = vld [vmem:[%s14207_s0 + $0x3b8] sm:$0xf]  ;;  %v6107_v22 = vld [vmem:[%s14207_s0 + $0x500] sm:$0xff]  ;;  %v6108_v2 = vld [vmem:[%s14207_s0 + $0x508] sm:$0xff] }
 0x256   :  { %v3394_v49 = vmul.f32 %v6092_v1, %v11784_v62  ;;  %v3395_v11 = vmul.f32 %v6093_v63, %v11784_v62  ;;  %v3396_v18 = vmul.f32 %v6094_v14, %v11784_v62  ;;  %v3397_v9 = vmul.f32 %v6095_v28, %v11784_v62  ;;  %v6113_v14 = vld [vmem:[%s14207_s0 + $0xf0] sm:$0xff] }
 0x257   :  { %v3398_v33 = vmul.f32 %v6096_v34, %v11784_v62  ;;  %v3399_v29 = vmul.f32 %v6097_v8, %v11784_v62  ;;  %v3400_v26 = vmul.f32 %v6098_v16, %v11784_v62  ;;  %v3401_v27 = vmul.f32 %v6099_v31, %v11784_v62 }
 0x258   :  { %v3402_v7 = vmul.f32 %v6100_v48, %v11784_v62  ;;  %v3403_v12 = vmul.f32 %v6101_v24, %v11784_v62  ;;  %v3404_v55 = vmul.f32 %v6102_v13, %v11784_v62  ;;  %v3405_v40 = vmul.f32 %v6103_v50, %v11784_v62  ;;  %v6119_v13 = vld [vmem:[%s14207_s0 + $0x260] sm:$0xff]  ;;  %v6120_v48 = vld [vmem:[%s14207_s0 + $0x268] sm:$0xff]  ;;  %v6121_v24 = vld [vmem:[%s14207_s0 + $0x270] sm:$0xff] }
 0x259   :  { %v3406_v42 = vmul.f32 %v6104_v30, %v11784_v62  ;;  %v3407_v54 = vmul.f32 %v6105_v37, %v11784_v62  ;;  %v3408_v52 = vmul.f32 %v6106_v19, %v11784_v62  ;;  %v3409_v20 = vmul.f32 %v6107_v22, %v11784_v62  ;;  %v6122_v50 = vld [vmem:[%s14207_s0 + $0x278] sm:$0xf]  ;;  %v6124_v30 = vld [vmem:[%s14207_s0 + $0x3c8] sm:$0xff]  ;;  %v6125_v37 = vld [vmem:[%s14207_s0 + $0x3d0] sm:$0xff] }
 0x25a   :  { %v3410_v44 = vmul.f32 %v6108_v2, %v11784_v62  ;;  %v3411_v57 = vmul.f32 %v6109_v45, %v11784_v62  ;;  %v3412_v10 = vmul.f32 %v6110_v61, %v11784_v62  ;;  %v3413_v5 = vmul.f32 %v6111_v53, %v11784_v62  ;;  %v6114_v62 = vld [vmem:[%s14207_s0 + $0xf8] sm:$0xff] }
 0x25b   :  { %v11987_v60 = vadd.f32 %v3394_v49, %v3352_v36  ;;  %v11989_v6 = vadd.f32 %v3395_v11, %v3353_v39  ;;  %v11991_v1 = vadd.f32 %v3396_v18, %v3354_v59  ;;  %v11993_v63 = vadd.f32 %v3397_v9, %v3355_v3  ;;  %v6115_v36 = vld [vmem:[%s14207_s0 + $0x100] sm:$0xff]  ;;  %v6118_v39 = vld [vmem:[%s14207_s0 + $0x258] sm:$0xff]  ;;  %v6132_v9 = vld [vmem:[%s14207_s0 + $0x548] sm:$0xf] }
 0x25c   :  { %v11998_v8 = vadd.f32 %v3398_v33, %v3356_v32  ;;  %v12000_v28 = vadd.f32 %v3399_v29, %v3357_v15  ;;  %v12002_v34 = vadd.f32 %v3400_v26, %v3358_v47  ;;  %v12004_v16 = vadd.f32 %v3401_v27, %v3359_v0  ;;  %v6116_v47 = vld [vmem:[%s14207_s0 + $0x108] sm:$0xff]  ;;  %v6117_v0 = vld [vmem:[%s14207_s0 + $0x110] sm:$0xf]  ;;  %v6126_v19 = vld [vmem:[%s14207_s0 + $0x3d8] sm:$0xff] }
 0x25d   :  { %v12015_v59 = vadd.f32 %v3402_v7, %v3360_v51  ;;  %v12017_v3 = vadd.f32 %v3403_v12, %v3361_v25  ;;  %v12019_v32 = vadd.f32 %v3404_v55, %v3362_v35  ;;  %v12021_v15 = vadd.f32 %v3405_v40, %v3363_v58  ;;  %v6123_v51 = vld [vmem:[%s14207_s0 + $0x3c0] sm:$0xff]  ;;  %v6130_v11 = vld [vmem:[%s14207_s0 + $0x538] sm:$0xff] }
 0x25e   :  { %v12035_v25 = vadd.f32 %v3406_v42, %v3364_v17  ;;  %v12037_v35 = vadd.f32 %v3407_v54, %v3365_v21  ;;  %v12039_v58 = vadd.f32 %v3408_v52, %v3366_v4  ;;  %v12041_v31 = vadd.f32 %v3409_v20, %v3367_v43  ;;  %v6131_v18 = vld [vmem:[%s14207_s0 + $0x540] sm:$0xff] }
 0x25f   :  { %v12052_v17 = vadd.f32 %v3410_v44, %v3368_v56  ;;  %v12054_v21 = vadd.f32 %v3411_v57, %v3369_v38  ;;  %v12056_v4 = vadd.f32 %v3412_v10, %v3370_v41  ;;  %v12058_v43 = vadd.f32 %v3413_v5, %v3371_v46  ;;  %v6127_v56 = vld [vmem:[%s14207_s0 + $0x3e0] sm:$0xf]  ;;  %v6128_v38 = vld [vmem:[%s14207_s0 + $0x528] sm:$0xff]  ;;  %v6129_v41 = vld [vmem:[%s14207_s0 + $0x530] sm:$0xff] }
 0x260   :  { %v3456_v46 = vmul.f32 %v6113_v14, %v11787_v23  ;;  %v3457_v22 = vmul.f32 %v6114_v62, %v11787_v23  ;;  %v3458_v2 = vmul.f32 %v6115_v36, %v11787_v23  ;;  %v3459_v49 = vmul.f32 %v6116_v47, %v11787_v23  ;;  %v6138_v47 = vld [vmem:[%s14207_s0 + $0x138] sm:$0xf] }
 0x261   :  { %v3460_v45 = vmul.f32 %v6117_v0, %v11787_v23  ;;  %v3461_v61 = vmul.f32 %v6118_v39, %v11787_v23  ;;  %v3462_v53 = vmul.f32 %v6119_v13, %v11787_v23  ;;  %v3463_v33 = vmul.f32 %v6120_v48, %v11787_v23  ;;  %v6137_v39 = vld [vmem:[%s14207_s0 + $0x130] sm:$0xff] }
 0x262   :  { %v3464_v29 = vmul.f32 %v6121_v24, %v11787_v23  ;;  %v3465_v26 = vmul.f32 %v6122_v50, %v11787_v23  ;;  %v3466_v27 = vmul.f32 %v6123_v51, %v11787_v23  ;;  %v3467_v7 = vmul.f32 %v6124_v30, %v11787_v23  ;;  %v6141_v51 = vld [vmem:[%s14207_s0 + $0x290] sm:$0xff] }
 0x263   :  { %v3468_v12 = vmul.f32 %v6125_v37, %v11787_v23  ;;  %v3469_v55 = vmul.f32 %v6126_v19, %v11787_v23  ;;  %v3470_v40 = vmul.f32 %v6127_v56, %v11787_v23  ;;  %v3471_v42 = vmul.f32 %v6128_v38, %v11787_v23  ;;  %v6145_v30 = vld [vmem:[%s14207_s0 + $0x3f0] sm:$0xff]  ;;  %v6146_v37 = vld [vmem:[%s14207_s0 + $0x3f8] sm:$0xff] }
 0x264   :  { %v3472_v54 = vmul.f32 %v6129_v41, %v11787_v23  ;;  %v3473_v52 = vmul.f32 %v6130_v11, %v11787_v23  ;;  %v3474_v20 = vmul.f32 %v6131_v18, %v11787_v23  ;;  %v3475_v44 = vmul.f32 %v6132_v9, %v11787_v23  ;;  %v6149_v38 = vld [vmem:[%s14207_s0 + $0x550] sm:$0xff]  ;;  %v6150_v41 = vld [vmem:[%s14207_s0 + $0x558] sm:$0xff]  ;;  %v6151_v11 = vld [vmem:[%s14207_s0 + $0x560] sm:$0xff] }
 0x265   :  { %v12116_v57 = vadd.f32 %v3456_v46, %v11987_v60  ;;  %v12119_v10 = vadd.f32 %v3457_v22, %v11989_v6  ;;  %v12122_v5 = vadd.f32 %v3458_v2, %v11991_v1  ;;  %v12125_v14 = vadd.f32 %v3459_v49, %v11993_v63  ;;  %v6134_v6 = vld [vmem:[%s14207_s0 + $0x118] sm:$0xff]  ;;  %v6135_v1 = vld [vmem:[%s14207_s0 + $0x120] sm:$0xff]  ;;  %v6136_v63 = vld [vmem:[%s14207_s0 + $0x128] sm:$0xff] }
 0x266   :  { %v12128_v62 = vadd.f32 %v3460_v45, %v11998_v8  ;;  %v12131_v36 = vadd.f32 %v3461_v61, %v12000_v28  ;;  %v12134_v23 = vadd.f32 %v3462_v53, %v12002_v34  ;;  %v12137_v60 = vadd.f32 %v3463_v33, %v12004_v16  ;;  %v6152_v18 = vld [vmem:[%s14207_s0 + $0x568] sm:$0xff]  ;;  %v6153_v9 = vld [vmem:[%s14207_s0 + $0x570] sm:$0xf] }
 0x267   :  { %v12149_v8 = vadd.f32 %v3464_v29, %v12015_v59  ;;  %v12152_v28 = vadd.f32 %v3465_v26, %v12017_v3  ;;  %v12155_v34 = vadd.f32 %v3466_v27, %v12019_v32  ;;  %v12158_v16 = vadd.f32 %v3467_v7, %v12021_v15  ;;  %v6139_v59 = vld [vmem:[%s14207_s0 + $0x280] sm:$0xff]  ;;  %v6140_v3 = vld [vmem:[%s14207_s0 + $0x288] sm:$0xff] }
 0x268   :  { %v12173_v32 = vadd.f32 %v3468_v12, %v12035_v25  ;;  %v12176_v15 = vadd.f32 %v3469_v55, %v12037_v35  ;;  %v12179_v0 = vadd.f32 %v3470_v40, %v12039_v58  ;;  %v12182_v13 = vadd.f32 %v3471_v42, %v12041_v31  ;;  %v6142_v25 = vld [vmem:[%s14207_s0 + $0x298] sm:$0xff]  ;;  %v6143_v35 = vld [vmem:[%s14207_s0 + $0x2a0] sm:$0xf]  ;;  %v6144_v58 = vld [vmem:[%s14207_s0 + $0x3e8] sm:$0xff] }
 0x269   :  { %v12197_v48 = vadd.f32 %v3472_v54, %v12052_v17  ;;  %v12200_v31 = vadd.f32 %v3473_v52, %v12054_v21  ;;  %v12203_v24 = vadd.f32 %v3474_v20, %v12056_v4  ;;  %v12206_v50 = vadd.f32 %v3475_v44, %v12058_v43  ;;  %v6147_v17 = vld [vmem:[%s14207_s0 + $0x400] sm:$0xff]  ;;  %v6148_v43 = vld [vmem:[%s14207_s0 + $0x408] sm:$0xf] }
 0x26a   :  { %v3517_v21 = vstv %s12082_s15  ;;  %v12219_v19 = vstv %s12097_s23  ;;  %v12222_v4 = vstv %s12103_s14  ;;  %v12225_v56 = vstv %s12105_s13  ;;  %s13323_s15 = sld [smem:[#allocation3 + $0x107]] }
 0x26b   :  { %v3518_v46 = vmul.f32 %v6134_v6, %v3517_v21  ;;  %v3519_v22 = vmul.f32 %v6135_v1, %v3517_v21  ;;  %v3520_v2 = vmul.f32 %v6136_v63, %v3517_v21  ;;  %v3521_v49 = vmul.f32 %v6137_v39, %v3517_v21  ;;  %s13741_s14 = sld [smem:[#allocation3 + $0x287]] }
 0x26c   :  { %v3522_v45 = vmul.f32 %v6138_v47, %v3517_v21  ;;  %v3523_v61 = vmul.f32 %v6139_v59, %v3517_v21  ;;  %v3524_v53 = vmul.f32 %v6140_v3, %v3517_v21  ;;  %v3525_v33 = vmul.f32 %v6141_v51, %v3517_v21  ;;  %v6155_v47 = vld [vmem:[%s14207_s0 + $0x140] sm:$0xff] }
 0x26d   :  { %v3526_v29 = vmul.f32 %v6142_v25, %v3517_v21  ;;  %v3527_v26 = vmul.f32 %v6143_v35, %v3517_v21  ;;  %v3528_v27 = vmul.f32 %v6144_v58, %v3517_v21  ;;  %v3529_v7 = vmul.f32 %v6145_v30, %v3517_v21  ;;  %v6159_v35 = vld [vmem:[%s14207_s0 + $0x160] sm:$0xf]  ;;  %v6161_v58 = vld [vmem:[%s14207_s0 + $0x2b0] sm:$0xff] }
 0x26e   :  { %v3530_v12 = vmul.f32 %v6146_v37, %v3517_v21  ;;  %v3531_v55 = vmul.f32 %v6147_v17, %v3517_v21  ;;  %v3532_v40 = vmul.f32 %v6148_v43, %v3517_v21  ;;  %v3533_v42 = vmul.f32 %v6149_v38, %v3517_v21  ;;  %v6162_v37 = vld [vmem:[%s14207_s0 + $0x2b8] sm:$0xff]  ;;  %v6163_v17 = vld [vmem:[%s14207_s0 + $0x2c0] sm:$0xff] }
 0x26f   :  { %v3534_v54 = vmul.f32 %v6150_v41, %v3517_v21  ;;  %v3535_v52 = vmul.f32 %v6151_v11, %v3517_v21  ;;  %v3536_v20 = vmul.f32 %v6152_v18, %v3517_v21  ;;  %v3537_v44 = vmul.f32 %v6153_v9, %v3517_v21  ;;  %v6164_v21 = vld [vmem:[%s14207_s0 + $0x2c8] sm:$0xf]  ;;  %v6166_v43 = vld [vmem:[%s14207_s0 + $0x418] sm:$0xff]  ;;  %v6167_v38 = vld [vmem:[%s14207_s0 + $0x420] sm:$0xff] }
 0x270   :  { %v3538_v6 = vadd.f32 %v3518_v46, %v12116_v57  ;;  %v3539_v1 = vadd.f32 %v3519_v22, %v12119_v10  ;;  %v3540_v63 = vadd.f32 %v3520_v2, %v12122_v5  ;;  %v3541_v39 = vadd.f32 %v3521_v49, %v12125_v14  ;;  %v6156_v57 = vld [vmem:[%s14207_s0 + $0x148] sm:$0xff]  ;;  %v6157_v10 = vld [vmem:[%s14207_s0 + $0x150] sm:$0xff]  ;;  %v6174_v18 = vld [vmem:[%s14207_s0 + $0x598] sm:$0xf] }
 0x271   :  { %v3542_v59 = vadd.f32 %v3522_v45, %v12128_v62  ;;  %v3543_v3 = vadd.f32 %v3523_v61, %v12131_v36  ;;  %v3544_v51 = vadd.f32 %v3524_v53, %v12134_v23  ;;  %v3545_v25 = vadd.f32 %v3525_v33, %v12137_v60  ;;  %v6160_v5 = vld [vmem:[%s14207_s0 + $0x2a8] sm:$0xff]  ;;  %v6158_v60 = vld [vmem:[%s14207_s0 + $0x158] sm:$0xff]  ;;  %v6173_v11 = vld [vmem:[%s14207_s0 + $0x590] sm:$0xff] }
 0x272   :  { %v3546_v14 = vadd.f32 %v3526_v29, %v12149_v8  ;;  %v3547_v62 = vadd.f32 %v3527_v26, %v12152_v28  ;;  %v3548_v36 = vadd.f32 %v3528_v27, %v12155_v34  ;;  %v3549_v23 = vadd.f32 %v3529_v7, %v12158_v16  ;;  %v6165_v8 = vld [vmem:[%s14207_s0 + $0x410] sm:$0xff]  ;;  %v6168_v41 = vld [vmem:[%s14207_s0 + $0x428] sm:$0xff] }
 0x273   :  { %v3550_v28 = vadd.f32 %v3530_v12, %v12173_v32  ;;  %v3551_v34 = vadd.f32 %v3531_v55, %v12176_v15  ;;  %v3552_v16 = vadd.f32 %v3532_v40, %v12179_v0  ;;  %v3553_v30 = vadd.f32 %v3533_v42, %v12182_v13  ;;  %v6172_v49 = vld [vmem:[%s14207_s0 + $0x588] sm:$0xff] }
 0x274   :  { %v3554_v32 = vadd.f32 %v3534_v54, %v12197_v48  ;;  %v3555_v15 = vadd.f32 %v3535_v52, %v12200_v31  ;;  %v3556_v0 = vadd.f32 %v3536_v20, %v12203_v24  ;;  %v3557_v13 = vadd.f32 %v3537_v44, %v12206_v50  ;;  %v6169_v48 = vld [vmem:[%s14207_s0 + $0x430] sm:$0xf]  ;;  %v6170_v31 = vld [vmem:[%s14207_s0 + $0x578] sm:$0xff]  ;;  %v6171_v24 = vld [vmem:[%s14207_s0 + $0x580] sm:$0xff] }
 0x275   :  { %v3580_v50 = vmul.f32 %v6155_v47, %v12219_v19  ;;  %v3581_v46 = vmul.f32 %v6156_v57, %v12219_v19  ;;  %v3582_v22 = vmul.f32 %v6157_v10, %v12219_v19  ;;  %v3583_v2 = vmul.f32 %v6158_v60, %v12219_v19 }
 0x276   :  { %v3584_v9 = vmul.f32 %v6159_v35, %v12219_v19  ;;  %v3585_v45 = vmul.f32 %v6160_v5, %v12219_v19  ;;  %v3586_v61 = vmul.f32 %v6161_v58, %v12219_v19  ;;  %v3587_v53 = vmul.f32 %v6162_v37, %v12219_v19 }
 0x277   :  { %v3588_v33 = vmul.f32 %v6163_v17, %v12219_v19  ;;  %v3589_v29 = vmul.f32 %v6164_v21, %v12219_v19  ;;  %v3590_v26 = vmul.f32 %v6165_v8, %v12219_v19  ;;  %v3591_v27 = vmul.f32 %v6166_v43, %v12219_v19 }
 0x278   :  { %v3592_v7 = vmul.f32 %v6167_v38, %v12219_v19  ;;  %v3593_v12 = vmul.f32 %v6168_v41, %v12219_v19  ;;  %v3594_v55 = vmul.f32 %v6169_v48, %v12219_v19  ;;  %v3595_v40 = vmul.f32 %v6170_v31, %v12219_v19 }
 0x279   :  { %v3596_v42 = vmul.f32 %v6171_v24, %v12219_v19  ;;  %v3597_v54 = vmul.f32 %v6172_v49, %v12219_v19  ;;  %v3598_v52 = vmul.f32 %v6173_v11, %v12219_v19  ;;  %v3599_v20 = vmul.f32 %v6174_v18, %v12219_v19 }
 0x27a   :  { %v3600_v44 = vadd.f32 %v3580_v50, %v3538_v6  ;;  %v3601_v47 = vadd.f32 %v3581_v46, %v3539_v1  ;;  %v3602_v57 = vadd.f32 %v3582_v22, %v3540_v63  ;;  %v3603_v10 = vadd.f32 %v3583_v2, %v3541_v39 }
 0x27b   :  { %v3604_v5 = vadd.f32 %v3584_v9, %v3542_v59  ;;  %v3605_v60 = vadd.f32 %v3585_v45, %v3543_v3  ;;  %v3606_v35 = vadd.f32 %v3586_v61, %v3544_v51  ;;  %v3607_v58 = vadd.f32 %v3587_v53, %v3545_v25 }
 0x27c   :  { %v3608_v8 = vadd.f32 %v3588_v33, %v3546_v14  ;;  %v3609_v37 = vadd.f32 %v3589_v29, %v3547_v62  ;;  %v3610_v17 = vadd.f32 %v3590_v26, %v3548_v36  ;;  %v3611_v21 = vadd.f32 %v3591_v27, %v3549_v23 }
 0x27d   :  { %v3612_v43 = vadd.f32 %v3592_v7, %v3550_v28  ;;  %v3613_v38 = vadd.f32 %v3593_v12, %v3551_v34  ;;  %v3614_v41 = vadd.f32 %v3594_v55, %v3552_v16  ;;  %v3615_v48 = vadd.f32 %v3595_v40, %v3553_v30 }
 0x27e   :  { %v3616_v31 = vadd.f32 %v3596_v42, %v3554_v32  ;;  %v3617_v24 = vadd.f32 %v3597_v54, %v3555_v15  ;;  %v3618_v49 = vadd.f32 %v3598_v52, %v3556_v0  ;;  %v3619_v19 = vadd.f32 %v3599_v20, %v3557_v13  ;;  %v3689_v54 = vld [vmem:[%s14207_s0 + $0x10] sm:$0xff] }
 0x27f   :  { %v3622_v6 = vadd.f32 %v12222_v4, %v3600_v44  ;;  %v3623_v1 = vadd.f32 %v12222_v4, %v3601_v47  ;;  %v3624_v63 = vadd.f32 %v12222_v4, %v3602_v57  ;;  %v3625_v39 = vadd.f32 %v12222_v4, %v3603_v10  ;;  %v3687_v57 = vld [vmem:[%s14207_s0] sm:$0xff]  ;;  %v3688_v10 = vld [vmem:[%s14207_s0 + $0x8] sm:$0xff] }
 0x280   :  { %v3626_v59 = vadd.f32 %v12222_v4, %v3604_v5  ;;  %v3627_v3 = vadd.f32 %v12222_v4, %v3605_v60  ;;  %v3628_v51 = vadd.f32 %v12222_v4, %v3606_v35  ;;  %v3629_v25 = vadd.f32 %v12222_v4, %v3607_v58  ;;  %v3690_v5 = vld [vmem:[%s14207_s0 + $0x18] sm:$0xff]  ;;  %v3691_v60 = vld [vmem:[%s14207_s0 + $0x20] sm:$0xf] }
 0x281   :  { %v3630_v14 = vadd.f32 %v12222_v4, %v3608_v8  ;;  %v3631_v62 = vadd.f32 %v12222_v4, %v3609_v37  ;;  %v3632_v36 = vadd.f32 %v12222_v4, %v3610_v17  ;;  %v3633_v23 = vadd.f32 %v12222_v4, %v3611_v21  ;;  %v3694_v17 = vld [vmem:[%s14207_s0 + $0x178] sm:$0xff]  ;;  %v3695_v21 = vld [vmem:[%s14207_s0 + $0x180] sm:$0xff] }
 0x282   :  { %v3634_v28 = vadd.f32 %v12222_v4, %v3612_v43  ;;  %v3635_v34 = vadd.f32 %v12222_v4, %v3613_v38  ;;  %v3636_v16 = vadd.f32 %v12222_v4, %v3614_v41  ;;  %v3637_v30 = vadd.f32 %v12222_v4, %v3615_v48 }
 0x283   :  { %v3638_v32 = vadd.f32 %v12222_v4, %v3616_v31  ;;  %v3639_v15 = vadd.f32 %v12222_v4, %v3617_v24  ;;  %v3640_v0 = vadd.f32 %v12222_v4, %v3618_v49  ;;  %v3641_v13 = vadd.f32 %v12222_v4, %v3619_v19  ;;  %v3692_v31 = vld [vmem:[%s14207_s0 + $0x168] sm:$0xff]  ;;  %v3699_v49 = vld [vmem:[%s14207_s0 + $0x2e0] sm:$0xff] }
 0x284   :  { %v3642_v50 = vmax.f32 %v3622_v6, 0.0  ;;  %v3643_v46 = vmax.f32 %v3623_v1, 0.0  ;;  %v3644_v22 = vmax.f32 %v3624_v63, 0.0  ;;  %v3645_v2 = vmax.f32 %v3625_v39, 0.0  ;;  %v3696_v24 = vld [vmem:[%s14207_s0 + $0x188] sm:$0xf] }
 0x285   :  { %v3646_v11 = vmax.f32 %v3626_v59, 0.0  ;;  %v3647_v18 = vmax.f32 %v3627_v3, 0.0  ;;  %v3648_v9 = vmax.f32 %v3628_v51, 0.0  ;;  %v3649_v45 = vmax.f32 %v3629_v25, 0.0  ;;  %v3693_v6 = vld [vmem:[%s14207_s0 + $0x170] sm:$0xff]  ;;  %v3700_v1 = vld [vmem:[%s14207_s0 + $0x2e8] sm:$0xff] }
 0x286   :  { %v3650_v61 = vmax.f32 %v3630_v14, 0.0  ;;  %v3651_v53 = vmax.f32 %v3631_v62, 0.0  ;;  %v3652_v33 = vmax.f32 %v3632_v36, 0.0  ;;  %v3653_v29 = vmax.f32 %v3633_v23, 0.0  ;;  %v3701_v63 = vld [vmem:[%s14207_s0 + $0x2f0] sm:$0xf] }
 0x287   :  { %v3654_v26 = vmax.f32 %v3634_v28, 0.0  ;;  %v3655_v27 = vmax.f32 %v3635_v34, 0.0  ;;  %v3656_v7 = vmax.f32 %v3636_v16, 0.0  ;;  %v3657_v12 = vmax.f32 %v3637_v30, 0.0  ;;  %v3697_v36 = vld [vmem:[%s14207_s0 + $0x2d0] sm:$0xff]  ;;  %v3698_v23 = vld [vmem:[%s14207_s0 + $0x2d8] sm:$0xff] }
 0x288   :  { %v3658_v55 = vmax.f32 %v3638_v32, 0.0  ;;  %v3659_v40 = vmax.f32 %v3639_v15, 0.0  ;;  %v3660_v42 = vmax.f32 %v3640_v0, 0.0  ;;  %v3661_v4 = vmax.f32 %v3641_v13, 0.0  ;;  %v3704_v28 = vld [vmem:[%s14207_s0 + $0x448] sm:$0xff]  ;;  %v3705_v34 = vld [vmem:[%s14207_s0 + $0x450] sm:$0xff] }
 0x289   :  { %v3662_v52 = vmax.f32 %v3642_v50, %v3647_v18  ;;  %v3665_v20 = vmax.f32 %v3643_v46, %v3648_v9  ;;  %v3668_v44 = vmax.f32 %v3644_v22, %v3649_v45  ;;  %v3671_v47 = vmax.f32 %v3645_v2, %v3650_v61  ;;  %v3702_v30 = vld [vmem:[%s14207_s0 + $0x438] sm:$0xff]  ;;  %v3703_v32 = vld [vmem:[%s14207_s0 + $0x440] sm:$0xff] }
 0x28a   :  { %v3674_v35 = vsel %vm648_vm0, %v3646_v11, -inf  ;;  %v3675_v58 = vsel %vm648_vm0, %v3651_v53, -inf  ;;  %v3677_v8 = vsel %vm648_vm0, %v3656_v7, -inf  ;;  %v3679_v37 = vsel %vm648_vm0, %v3661_v4, -inf  ;;  %v3706_v15 = vld [vmem:[%s14207_s0 + $0x458] sm:$0xf] }
 0x28b   :  { %v3663_v43 = vmax.f32 %v3662_v52, %v3652_v33  ;;  %v3666_v38 = vmax.f32 %v3665_v20, %v3653_v29  ;;  %v3669_v41 = vmax.f32 %v3668_v44, %v3654_v26  ;;  %v3672_v48 = vmax.f32 %v3671_v47, %v3655_v27  ;;  %v6180_v18 = vld [vmem:[%s14207_s0 + $0x38] sm:$0xff]  ;;  %v6181_v9 = vld [vmem:[%s14207_s0 + $0x40] sm:$0xff]  ;;  %v6178_v26 = vld [vmem:[%s14207_s0 + $0x28] sm:$0xff] }
 0x28c   :  { %v3676_v19 = vmax.f32 %v3674_v35, %v3675_v58  ;;  %v12411_v39 = vmul.f32 %v12225_v56, %v3687_v57  ;;  %v12414_v59 = vmul.f32 %v12225_v56, %v3688_v10  ;;  %v12417_v3 = vmul.f32 %v12225_v56, %v3689_v54  ;;  %v6185_v45 = vld [vmem:[%s14207_s0 + $0x1a0] sm:$0xff]  ;;  %v6179_v27 = vld [vmem:[%s14207_s0 + $0x30] sm:$0xff]  ;;  %v6186_v7 = vld [vmem:[%s14207_s0 + $0x1a8] sm:$0xff] }
 0x28d   :  { %v3664_v51 = vmax.f32 %v3663_v43, %v3657_v12  ;;  %v3667_v25 = vmax.f32 %v3666_v38, %v3658_v55  ;;  %v3670_v14 = vmax.f32 %v3669_v41, %v3659_v40  ;;  %v3673_v62 = vmax.f32 %v3672_v48, %v3660_v42  ;;  %v6182_v4 = vld [vmem:[%s14207_s0 + $0x48] sm:$0xf]  ;;  %v6183_v54 = vld [vmem:[%s14207_s0 + $0x190] sm:$0xff]  ;;  %v6184_v52 = vld [vmem:[%s14207_s0 + $0x198] sm:$0xff] }
 0x28e   :  { %v3678_v16 = vmax.f32 %v3676_v19, %v3677_v8  ;;  %v12441_v0 = vmul.f32 %v12225_v56, %v3690_v5  ;;  %v12444_v13 = vmul.f32 %v12225_v56, %v3691_v60  ;;  %v12447_v50 = vmul.f32 %v12225_v56, %v3692_v31  ;;  %v6190_v20 = vld [vmem:[%s14207_s0 + $0x308] sm:$0xff]  ;;  %v6191_v44 = vld [vmem:[%s14207_s0 + $0x310] sm:$0xff]  ;;  %v6188_v60 = vld [vmem:[%s14207_s0 + $0x2f8] sm:$0xff] }
 0x28f   :  { %3681 = vst [vmem:[#allocation2 + $0xc8] sm:$0xff] %v3664_v51  ;;  %3682 = vst [vmem:[#allocation2 + $0xd0] sm:$0xff] %v3667_v25  ;;  %v12450_v46 = vmul.f32 %v12225_v56, %v3693_v6  ;;  %v12453_v22 = vmul.f32 %v12225_v56, %v3694_v17  ;;  %v12456_v2 = vmul.f32 %v12225_v56, %v3695_v21  ;;  %v6187_v5 = vld [vmem:[%s14207_s0 + $0x1b0] sm:$0xf]  ;;  %v6189_v35 = vld [vmem:[%s14207_s0 + $0x300] sm:$0xff]  ;;  %v3750_v58 = vstv %s12390_s16  ;;  %s13321_s16 = sld [smem:[#allocation3 + $0x87]] }
 0x290   :  { %3683 = vst [vmem:[#allocation2 + $0xd8] sm:$0xff] %v3670_v14  ;;  %3684 = vst [vmem:[#allocation2 + $0xe0] sm:$0xff] %v3673_v62  ;;  %v12459_v11 = vmul.f32 %v12225_v56, %v3696_v24  ;;  %v3680_v61 = vmax.f32 %v3678_v16, %v3679_v37  ;;  %v12471_v53 = vmul.f32 %v12225_v56, %v3697_v36  ;;  %v6192_v8 = vld [vmem:[%s14207_s0 + $0x318] sm:$0xf]  ;;  %v6194_v37 = vld [vmem:[%s14207_s0 + $0x468] sm:$0xff] }
 0x291   :  { %v12474_v33 = vmul.f32 %v12225_v56, %v3698_v23  ;;  %v12477_v29 = vmul.f32 %v12225_v56, %v3699_v49  ;;  %v12489_v12 = vmul.f32 %v12225_v56, %v3700_v1  ;;  %v12492_v55 = vmul.f32 %v12225_v56, %v3701_v63  ;;  %v6195_v41 = vld [vmem:[%s14207_s0 + $0x470] sm:$0xff]  ;;  %v6196_v48 = vld [vmem:[%s14207_s0 + $0x478] sm:$0xff]  ;;  %v6197_v31 = vld [vmem:[%s14207_s0 + $0x480] sm:$0xf] }
 0x292   :  { %v12495_v40 = vmul.f32 %v12225_v56, %v3702_v30  ;;  %v12498_v42 = vmul.f32 %v12225_v56, %v3703_v32  ;;  %3685 = vst [vmem:[#allocation2 + $0xe8] sm:$0xf] %v3680_v61  ;;  %v12516_v47 = vmul.f32 %v12225_v56, %v3704_v28  ;;  %v12519_v57 = vmul.f32 %v12225_v56, %v3705_v34 }
 0x293   :  { %v12522_v10 = vmul.f32 %v12225_v56, %v3706_v15  ;;  %v6193_v56 = vld [vmem:[%s14207_s0 + $0x460] sm:$0xff]  ;;  %v3751_v17 = vmul.f32 %v6178_v26, %v3750_v58  ;;  %v3752_v21 = vmul.f32 %v6179_v27, %v3750_v58  ;;  %v3753_v43 = vmul.f32 %v6180_v18, %v3750_v58  ;;  %v6200_v27 = vld [vmem:[%s14207_s0 + $0x58] sm:$0xff] }
 0x294   :  { %v3754_v38 = vmul.f32 %v6181_v9, %v3750_v58  ;;  %v3755_v24 = vmul.f32 %v6182_v4, %v3750_v58  ;;  %v3756_v49 = vmul.f32 %v6183_v54, %v3750_v58  ;;  %v3757_v19 = vmul.f32 %v6184_v52, %v3750_v58  ;;  %v6203_v4 = vld [vmem:[%s14207_s0 + $0x70] sm:$0xf] }
 0x295   :  { %v3758_v6 = vmul.f32 %v6185_v45, %v3750_v58  ;;  %v3759_v1 = vmul.f32 %v6186_v7, %v3750_v58  ;;  %v3760_v63 = vmul.f32 %v6187_v5, %v3750_v58  ;;  %v3761_v51 = vmul.f32 %v6188_v60, %v3750_v58  ;;  %v6209_v5 = vld [vmem:[%s14207_s0 + $0x320] sm:$0xff] }
 0x296   :  { %v3762_v25 = vmul.f32 %v6189_v35, %v3750_v58  ;;  %v3763_v14 = vmul.f32 %v6190_v20, %v3750_v58  ;;  %v3764_v62 = vmul.f32 %v6191_v44, %v3750_v58  ;;  %v3765_v36 = vmul.f32 %v6192_v8, %v3750_v58  ;;  %v6208_v44 = vld [vmem:[%s14207_s0 + $0x1d8] sm:$0xf]  ;;  %v6213_v8 = vld [vmem:[%s14207_s0 + $0x340] sm:$0xf] }
 0x297   :  { %v3766_v23 = vmul.f32 %v6193_v56, %v3750_v58  ;;  %v3767_v28 = vmul.f32 %v6194_v37, %v3750_v58  ;;  %v3768_v34 = vmul.f32 %v6195_v41, %v3750_v58  ;;  %v3769_v16 = vmul.f32 %v6196_v48, %v3750_v58  ;;  %v6214_v56 = vld [vmem:[%s14207_s0 + $0x488] sm:$0xff]  ;;  %v6215_v37 = vld [vmem:[%s14207_s0 + $0x490] sm:$0xff]  ;;  %v6216_v41 = vld [vmem:[%s14207_s0 + $0x498] sm:$0xff] }
 0x298   :  { %v3770_v30 = vmul.f32 %v6197_v31, %v3750_v58  ;;  %v12561_v32 = vadd.f32 %v3751_v17, %v12411_v39  ;;  %v12564_v15 = vadd.f32 %v3752_v21, %v12414_v59  ;;  %v12567_v18 = vadd.f32 %v3753_v43, %v12417_v3  ;;  %v6201_v59 = vld [vmem:[%s14207_s0 + $0x60] sm:$0xff]  ;;  %v6202_v3 = vld [vmem:[%s14207_s0 + $0x68] sm:$0xff] }
 0x299   :  { %v12570_v9 = vadd.f32 %v3754_v38, %v12441_v0  ;;  %v12573_v45 = vadd.f32 %v3755_v24, %v12444_v13  ;;  %v12576_v61 = vadd.f32 %v3756_v49, %v12447_v50  ;;  %v12579_v26 = vadd.f32 %v3757_v19, %v12450_v46  ;;  %v6217_v48 = vld [vmem:[%s14207_s0 + $0x4a0] sm:$0xff]  ;;  %v6218_v31 = vld [vmem:[%s14207_s0 + $0x4a8] sm:$0xf] }
 0x29a   :  { %v12582_v39 = vadd.f32 %v3758_v6, %v12453_v22  ;;  %v12591_v0 = vadd.f32 %v3759_v1, %v12456_v2  ;;  %v12594_v13 = vadd.f32 %v3760_v63, %v12459_v11  ;;  %v12597_v50 = vadd.f32 %v3761_v51, %v12471_v53  ;;  %v6199_v22 = vld [vmem:[%s14207_s0 + $0x50] sm:$0xff]  ;;  %v6206_v2 = vld [vmem:[%s14207_s0 + $0x1c8] sm:$0xff] }
 0x29b   :  { %v12600_v46 = vadd.f32 %v3762_v25, %v12474_v33  ;;  %v12612_v11 = vadd.f32 %v3763_v14, %v12477_v29  ;;  %v12615_v53 = vadd.f32 %v3764_v62, %v12489_v12  ;;  %v12618_v33 = vadd.f32 %v3765_v36, %v12492_v55  ;;  %v6204_v29 = vld [vmem:[%s14207_s0 + $0x1b8] sm:$0xff]  ;;  %v6205_v12 = vld [vmem:[%s14207_s0 + $0x1c0] sm:$0xff]  ;;  %v6207_v55 = vld [vmem:[%s14207_s0 + $0x1d0] sm:$0xff] }
 0x29c   :  { %v12621_v7 = vadd.f32 %v3766_v23, %v12495_v40  ;;  %v12636_v40 = vadd.f32 %v3767_v28, %v12498_v42  ;;  %v12639_v54 = vadd.f32 %v3768_v34, %v12516_v47  ;;  %v12642_v52 = vadd.f32 %v3769_v16, %v12519_v57  ;;  %v6210_v42 = vld [vmem:[%s14207_s0 + $0x328] sm:$0xff]  ;;  %v6211_v47 = vld [vmem:[%s14207_s0 + $0x330] sm:$0xff]  ;;  %v6212_v57 = vld [vmem:[%s14207_s0 + $0x338] sm:$0xff] }
 0x29d   :  { %v12645_v20 = vadd.f32 %v3770_v30, %v12522_v10  ;;  %v3812_v10 = vstv %s12543_s12  ;;  %v12664_v60 = vstv %s12554_s1  ;;  %v12667_v35 = vstv %s12556_s19  ;;  %s12972_s19 = sld [smem:[#allocation3 + $0x386]] }
 0x29e   :  { %v12670_v58 = vstv %s12558_s11  ;;  %v3813_v17 = vmul.f32 %v6199_v22, %v3812_v10  ;;  %v3814_v21 = vmul.f32 %v6200_v27, %v3812_v10  ;;  %v3815_v43 = vmul.f32 %v6201_v59, %v3812_v10  ;;  %s12978_s11 = sld [smem:[#allocation3 + $0x406]] }
 0x29f   :  { %v3816_v38 = vmul.f32 %v6202_v3, %v3812_v10  ;;  %v3817_v24 = vmul.f32 %v6203_v4, %v3812_v10  ;;  %v3818_v49 = vmul.f32 %v6204_v29, %v3812_v10  ;;  %v3819_v19 = vmul.f32 %v6205_v12, %v3812_v10 }
 0x2a0   :  { %v3820_v6 = vmul.f32 %v6206_v2, %v3812_v10  ;;  %v3821_v1 = vmul.f32 %v6207_v55, %v3812_v10  ;;  %v3822_v63 = vmul.f32 %v6208_v44, %v3812_v10  ;;  %v3823_v51 = vmul.f32 %v6209_v5, %v3812_v10  ;;  %v6222_v55 = vld [vmem:[%s14207_s0 + $0x88] sm:$0xff]  ;;  %v6228_v44 = vld [vmem:[%s14207_s0 + $0x1f8] sm:$0xff] }
 0x2a1   :  { %v3824_v25 = vmul.f32 %v6210_v42, %v3812_v10  ;;  %v3825_v14 = vmul.f32 %v6211_v47, %v3812_v10  ;;  %v3826_v62 = vmul.f32 %v6212_v57, %v3812_v10  ;;  %v3827_v36 = vmul.f32 %v6213_v8, %v3812_v10  ;;  %v6224_v5 = vld [vmem:[%s14207_s0 + $0x98] sm:$0xf]  ;;  %v6225_v42 = vld [vmem:[%s14207_s0 + $0x1e0] sm:$0xff]  ;;  %v6226_v47 = vld [vmem:[%s14207_s0 + $0x1e8] sm:$0xff] }
 0x2a2   :  { %v3828_v23 = vmul.f32 %v6214_v56, %v3812_v10  ;;  %v3829_v28 = vmul.f32 %v6215_v37, %v3812_v10  ;;  %v3830_v34 = vmul.f32 %v6216_v41, %v3812_v10  ;;  %v3831_v16 = vmul.f32 %v6217_v48, %v3812_v10  ;;  %v6229_v8 = vld [vmem:[%s14207_s0 + $0x200] sm:$0xf]  ;;  %v6230_v56 = vld [vmem:[%s14207_s0 + $0x348] sm:$0xff]  ;;  %v6231_v37 = vld [vmem:[%s14207_s0 + $0x350] sm:$0xff] }
 0x2a3   :  { %v3832_v30 = vmul.f32 %v6218_v31, %v3812_v10  ;;  %v3833_v59 = vadd.f32 %v3813_v17, %v12561_v32  ;;  %v3834_v3 = vadd.f32 %v3814_v21, %v12564_v15  ;;  %v3835_v22 = vadd.f32 %v3815_v43, %v12567_v18  ;;  %v6223_v32 = vld [vmem:[%s14207_s0 + $0x90] sm:$0xff]  ;;  %v6238_v41 = vld [vmem:[%s14207_s0 + $0x4c8] sm:$0xff] }
 0x2a4   :  { %v3836_v27 = vadd.f32 %v3816_v38, %v12570_v9  ;;  %v3837_v2 = vadd.f32 %v3817_v24, %v12573_v45  ;;  %v3838_v4 = vadd.f32 %v3818_v49, %v12576_v61  ;;  %v3839_v29 = vadd.f32 %v3819_v19, %v12579_v26  ;;  %v6227_v15 = vld [vmem:[%s14207_s0 + $0x1f0] sm:$0xff]  ;;  %v6220_v26 = vld [vmem:[%s14207_s0 + $0x78] sm:$0xff]  ;;  %v6237_v38 = vld [vmem:[%s14207_s0 + $0x4c0] sm:$0xff] }
 0x2a5   :  { %v3840_v12 = vadd.f32 %v3820_v6, %v12582_v39  ;;  %v3841_v18 = vadd.f32 %v3821_v1, %v12591_v0  ;;  %v3842_v9 = vadd.f32 %v3822_v63, %v12594_v13  ;;  %v3843_v45 = vadd.f32 %v3823_v51, %v12597_v50  ;;  %v6221_v39 = vld [vmem:[%s14207_s0 + $0x80] sm:$0xff]  ;;  %v6239_v48 = vld [vmem:[%s14207_s0 + $0x4d0] sm:$0xf] }
 0x2a6   :  { %v3844_v61 = vadd.f32 %v3824_v25, %v12600_v46  ;;  %v3845_v0 = vadd.f32 %v3825_v14, %v12612_v11  ;;  %v3846_v13 = vadd.f32 %v3826_v62, %v12615_v53  ;;  %v3847_v50 = vadd.f32 %v3827_v36, %v12618_v33  ;;  %v6232_v11 = vld [vmem:[%s14207_s0 + $0x358] sm:$0xff]  ;;  %v6233_v53 = vld [vmem:[%s14207_s0 + $0x360] sm:$0xff] }
 0x2a7   :  { %v3848_v46 = vadd.f32 %v3828_v23, %v12621_v7  ;;  %v3849_v33 = vadd.f32 %v3829_v28, %v12636_v40  ;;  %v3850_v7 = vadd.f32 %v3830_v34, %v12639_v54  ;;  %v3851_v57 = vadd.f32 %v3831_v16, %v12642_v52  ;;  %v6234_v40 = vld [vmem:[%s14207_s0 + $0x368] sm:$0xf]  ;;  %v6235_v54 = vld [vmem:[%s14207_s0 + $0x4b0] sm:$0xff]  ;;  %v6236_v52 = vld [vmem:[%s14207_s0 + $0x4b8] sm:$0xff] }
 0x2a8   :  { %v3852_v10 = vadd.f32 %v3832_v30, %v12645_v20  ;;  %v3875_v20 = vmul.f32 %v6220_v26, %v12664_v60  ;;  %v3876_v17 = vmul.f32 %v6221_v39, %v12664_v60  ;;  %v3877_v21 = vmul.f32 %v6222_v55, %v12664_v60 }
 0x2a9   :  { %v3878_v43 = vmul.f32 %v6223_v32, %v12664_v60  ;;  %v3879_v31 = vmul.f32 %v6224_v5, %v12664_v60  ;;  %v3880_v24 = vmul.f32 %v6225_v42, %v12664_v60  ;;  %v3881_v49 = vmul.f32 %v6226_v47, %v12664_v60  ;;  %v6243_v42 = vld [vmem:[%s14207_s0 + $0xb0] sm:$0xff]  ;;  %v6244_v47 = vld [vmem:[%s14207_s0 + $0xb8] sm:$0xff] }
 0x2aa   :  { %v3882_v19 = vmul.f32 %v6227_v15, %v12664_v60  ;;  %v3883_v6 = vmul.f32 %v6228_v44, %v12664_v60  ;;  %v3884_v1 = vmul.f32 %v6229_v8, %v12664_v60  ;;  %v3885_v63 = vmul.f32 %v6230_v56, %v12664_v60 }
 0x2ab   :  { %v3886_v51 = vmul.f32 %v6231_v37, %v12664_v60  ;;  %v3887_v25 = vmul.f32 %v6232_v11, %v12664_v60  ;;  %v3888_v14 = vmul.f32 %v6233_v53, %v12664_v60  ;;  %v3889_v62 = vmul.f32 %v6234_v40, %v12664_v60  ;;  %v6250_v37 = vld [vmem:[%s14207_s0 + $0x228] sm:$0xf]  ;;  %v6251_v40 = vld [vmem:[%s14207_s0 + $0x370] sm:$0xff] }
 0x2ac   :  { %v3890_v36 = vmul.f32 %v6235_v54, %v12664_v60  ;;  %v3891_v23 = vmul.f32 %v6236_v52, %v12664_v60  ;;  %v3892_v28 = vmul.f32 %v6237_v38, %v12664_v60  ;;  %v3893_v34 = vmul.f32 %v6238_v41, %v12664_v60  ;;  %v6252_v54 = vld [vmem:[%s14207_s0 + $0x378] sm:$0xff]  ;;  %v6255_v52 = vld [vmem:[%s14207_s0 + $0x390] sm:$0xf] }
 0x2ad   :  { %v3894_v16 = vmul.f32 %v6239_v48, %v12664_v60  ;;  %v3895_v30 = vadd.f32 %v3875_v20, %v3833_v59  ;;  %v3896_v55 = vadd.f32 %v3876_v17, %v3834_v3  ;;  %v3897_v32 = vadd.f32 %v3877_v21, %v3835_v22  ;;  %v6248_v60 = vld [vmem:[%s14207_s0 + $0x218] sm:$0xff]  ;;  %v6258_v21 = vld [vmem:[%s14207_s0 + $0x4e8] sm:$0xff] }
 0x2ae   :  { %v3898_v15 = vadd.f32 %v3878_v43, %v3836_v27  ;;  %v3899_v26 = vadd.f32 %v3879_v31, %v3837_v2  ;;  %v3900_v39 = vadd.f32 %v3880_v24, %v3838_v4  ;;  %v3901_v44 = vadd.f32 %v3881_v49, %v3839_v29  ;;  %v6241_v2 = vld [vmem:[%s14207_s0 + $0xa0] sm:$0xff]  ;;  %v6242_v4 = vld [vmem:[%s14207_s0 + $0xa8] sm:$0xff]  ;;  %v6259_v43 = vld [vmem:[%s14207_s0 + $0x4f0] sm:$0xff] }
 0x2af   :  { %v3902_v5 = vadd.f32 %v3882_v19, %v3840_v12  ;;  %v3903_v59 = vadd.f32 %v3883_v6, %v3841_v18  ;;  %v3904_v3 = vadd.f32 %v3884_v1, %v3842_v9  ;;  %v3905_v22 = vadd.f32 %v3885_v63, %v3843_v45  ;;  %v6249_v29 = vld [vmem:[%s14207_s0 + $0x220] sm:$0xff]  ;;  %v6246_v9 = vld [vmem:[%s14207_s0 + $0x208] sm:$0xff]  ;;  %v6247_v45 = vld [vmem:[%s14207_s0 + $0x210] sm:$0xff] }
 0x2b0   :  { %v3906_v27 = vadd.f32 %v3886_v51, %v3844_v61  ;;  %v3907_v12 = vadd.f32 %v3887_v25, %v3845_v0  ;;  %v3908_v11 = vadd.f32 %v3888_v14, %v3846_v13  ;;  %v3909_v53 = vadd.f32 %v3889_v62, %v3847_v50  ;;  %v6245_v18 = vld [vmem:[%s14207_s0 + $0xc0] sm:$0xf]  ;;  %v6254_v0 = vld [vmem:[%s14207_s0 + $0x388] sm:$0xff]  ;;  %v6260_v38 = vld [vmem:[%s14207_s0 + $0x4f8] sm:$0xf] }
 0x2b1   :  { %v3910_v8 = vadd.f32 %v3890_v36, %v3848_v46  ;;  %v6253_v61 = vld [vmem:[%s14207_s0 + $0x380] sm:$0xff]  ;;  %v3911_v13 = vadd.f32 %v3891_v23, %v3849_v33  ;;  %v3912_v50 = vadd.f32 %v3892_v28, %v3850_v7  ;;  %v3913_v46 = vadd.f32 %v3893_v34, %v3851_v57  ;;  %v6256_v33 = vld [vmem:[%s14207_s0 + $0x4d8] sm:$0xff] }
 0x2b2   :  { %v3914_v56 = vadd.f32 %v3894_v16, %v3852_v10  ;;  %v6257_v7 = vld [vmem:[%s14207_s0 + $0x4e0] sm:$0xff]  ;;  %v3937_v57 = vmul.f32 %v6241_v2, %v12667_v35  ;;  %v3938_v10 = vmul.f32 %v6242_v4, %v12667_v35  ;;  %v3939_v20 = vmul.f32 %v6243_v42, %v12667_v35 }
 0x2b3   :  { %v3940_v17 = vmul.f32 %v6244_v47, %v12667_v35  ;;  %v3941_v41 = vmul.f32 %v6245_v18, %v12667_v35  ;;  %v3942_v48 = vmul.f32 %v6246_v9, %v12667_v35  ;;  %v3943_v31 = vmul.f32 %v6247_v45, %v12667_v35  ;;  %v6270_v18 = vld [vmem:[%s14207_s0 + $0x248] sm:$0xff]  ;;  %v6267_v45 = vld [vmem:[%s14207_s0 + $0x230] sm:$0xff] }
 0x2b4   :  { %v3944_v24 = vmul.f32 %v6248_v60, %v12667_v35  ;;  %v3945_v49 = vmul.f32 %v6249_v29, %v12667_v35  ;;  %v3946_v19 = vmul.f32 %v6250_v37, %v12667_v35  ;;  %v3947_v6 = vmul.f32 %v6251_v40, %v12667_v35  ;;  %v6266_v9 = vld [vmem:[%s14207_s0 + $0xe8] sm:$0xf]  ;;  %v6271_v40 = vld [vmem:[%s14207_s0 + $0x250] sm:$0xf] }
 0x2b5   :  { %v3948_v1 = vmul.f32 %v6252_v54, %v12667_v35  ;;  %v3949_v63 = vmul.f32 %v6253_v61, %v12667_v35  ;;  %v3950_v51 = vmul.f32 %v6254_v0, %v12667_v35  ;;  %v3951_v25 = vmul.f32 %v6255_v52, %v12667_v35  ;;  %v6268_v61 = vld [vmem:[%s14207_s0 + $0x238] sm:$0xff]  ;;  %v6273_v52 = vld [vmem:[%s14207_s0 + $0x3a0] sm:$0xff] }
 0x2b6   :  { %v3952_v14 = vmul.f32 %v6256_v33, %v12667_v35  ;;  %v3953_v62 = vmul.f32 %v6257_v7, %v12667_v35  ;;  %v3954_v36 = vmul.f32 %v6258_v21, %v12667_v35  ;;  %v3955_v23 = vmul.f32 %v6259_v43, %v12667_v35  ;;  %v6272_v54 = vld [vmem:[%s14207_s0 + $0x398] sm:$0xff] }
 0x2b7   :  { %v3956_v28 = vmul.f32 %v6260_v38, %v12667_v35  ;;  %v12870_v34 = vadd.f32 %v3937_v57, %v3895_v30  ;;  %v12872_v16 = vadd.f32 %v3938_v10, %v3896_v55  ;;  %v12874_v42 = vadd.f32 %v3939_v20, %v3897_v32  ;;  %v6264_v35 = vld [vmem:[%s14207_s0 + $0xd8] sm:$0xff]  ;;  %v6265_v30 = vld [vmem:[%s14207_s0 + $0xe0] sm:$0xff]  ;;  %v6279_v10 = vld [vmem:[%s14207_s0 + $0x510] sm:$0xff] }
 0x2b8   :  { %v12876_v47 = vadd.f32 %v3940_v17, %v3898_v15  ;;  %v12878_v60 = vadd.f32 %v3941_v41, %v3899_v26  ;;  %v12880_v2 = vadd.f32 %v3942_v48, %v3900_v39  ;;  %v12882_v4 = vadd.f32 %v3943_v31, %v3901_v44  ;;  %v6269_v55 = vld [vmem:[%s14207_s0 + $0x240] sm:$0xff]  ;;  %v6262_v44 = vld [vmem:[%s14207_s0 + $0xc8] sm:$0xff]  ;;  %v6276_v33 = vld [vmem:[%s14207_s0 + $0x3b8] sm:$0xf] }
 0x2b9   :  { %v12884_v29 = vadd.f32 %v3944_v24, %v3902_v5  ;;  %v12895_v32 = vadd.f32 %v3945_v49, %v3903_v59  ;;  %v12897_v15 = vadd.f32 %v3946_v19, %v3904_v3  ;;  %v12899_v26 = vadd.f32 %v3947_v6, %v3905_v22  ;;  %v6263_v5 = vld [vmem:[%s14207_s0 + $0xd0] sm:$0xff]  ;;  %v6280_v20 = vld [vmem:[%s14207_s0 + $0x518] sm:$0xff]  ;;  %v6281_v17 = vld [vmem:[%s14207_s0 + $0x520] sm:$0xf] }
 0x2ba   :  { %v12901_v39 = vadd.f32 %v3948_v1, %v3906_v27  ;;  %v12912_v59 = vadd.f32 %v3949_v63, %v3907_v12  ;;  %v12914_v3 = vadd.f32 %v3950_v51, %v3908_v11  ;;  %v12916_v22 = vadd.f32 %v3951_v25, %v3909_v53  ;;  %v6274_v12 = vld [vmem:[%s14207_s0 + $0x3a8] sm:$0xff]  ;;  %v6275_v11 = vld [vmem:[%s14207_s0 + $0x3b0] sm:$0xff] }
 0x2bb   :  { %v12918_v27 = vadd.f32 %v3952_v14, %v3910_v8  ;;  %v3973_v53 = vadd.f32 %v3953_v62, %v3911_v13  ;;  %v3974_v8 = vadd.f32 %v3954_v36, %v3912_v50  ;;  %v3975_v0 = vadd.f32 %v3955_v23, %v3913_v46  ;;  %v6277_v13 = vld [vmem:[%s14207_s0 + $0x500] sm:$0xff]  ;;  %v6278_v50 = vld [vmem:[%s14207_s0 + $0x508] sm:$0xff] }
 0x2bc   :  { %v3976_v37 = vadd.f32 %v3956_v28, %v3914_v56  ;;  %v3999_v46 = vmul.f32 %v6262_v44, %v12670_v58  ;;  %v4000_v56 = vmul.f32 %v6263_v5, %v12670_v58  ;;  %v4001_v7 = vmul.f32 %v6264_v35, %v12670_v58  ;;  %v6284_v44 = vld [vmem:[%s14207_s0 + $0xf8] sm:$0xff] }
 0x2bd   :  { %v4002_v57 = vmul.f32 %v6265_v30, %v12670_v58  ;;  %v4003_v21 = vmul.f32 %v6266_v9, %v12670_v58  ;;  %v4004_v43 = vmul.f32 %v6267_v45, %v12670_v58  ;;  %v4005_v38 = vmul.f32 %v6268_v61, %v12670_v58 }
 0x2be   :  { %v4006_v41 = vmul.f32 %v6269_v55, %v12670_v58  ;;  %v4007_v48 = vmul.f32 %v6270_v18, %v12670_v58  ;;  %v4008_v31 = vmul.f32 %v6271_v40, %v12670_v58  ;;  %v4009_v24 = vmul.f32 %v6272_v54, %v12670_v58  ;;  %v6287_v18 = vld [vmem:[%s14207_s0 + $0x110] sm:$0xf]  ;;  %v6294_v40 = vld [vmem:[%s14207_s0 + $0x3c8] sm:$0xff] }
 0x2bf   :  { %v4010_v49 = vmul.f32 %v6273_v52, %v12670_v58  ;;  %v4011_v19 = vmul.f32 %v6274_v12, %v12670_v58  ;;  %v4012_v6 = vmul.f32 %v6275_v11, %v12670_v58  ;;  %v4013_v1 = vmul.f32 %v6276_v33, %v12670_v58  ;;  %v6292_v12 = vld [vmem:[%s14207_s0 + $0x278] sm:$0xf]  ;;  %v6293_v11 = vld [vmem:[%s14207_s0 + $0x3c0] sm:$0xff] }
 0x2c0   :  { %v4014_v63 = vmul.f32 %v6277_v13, %v12670_v58  ;;  %v4015_v51 = vmul.f32 %v6278_v50, %v12670_v58  ;;  %v4016_v25 = vmul.f32 %v6279_v10, %v12670_v58  ;;  %v4017_v14 = vmul.f32 %v6280_v20, %v12670_v58  ;;  %v6297_v33 = vld [vmem:[%s14207_s0 + $0x3e0] sm:$0xf]  ;;  %v6298_v13 = vld [vmem:[%s14207_s0 + $0x528] sm:$0xff]  ;;  %v6299_v50 = vld [vmem:[%s14207_s0 + $0x530] sm:$0xff] }
 0x2c1   :  { %v4018_v62 = vmul.f32 %v6281_v17, %v12670_v58  ;;  %v12991_v36 = vadd.f32 %v3999_v46, %v12870_v34  ;;  %v12994_v23 = vadd.f32 %v4000_v56, %v12872_v16  ;;  %v12997_v28 = vadd.f32 %v4001_v7, %v12874_v42  ;;  %v6285_v16 = vld [vmem:[%s14207_s0 + $0x100] sm:$0xff]  ;;  %v6286_v42 = vld [vmem:[%s14207_s0 + $0x108] sm:$0xff]  ;;  %v6300_v10 = vld [vmem:[%s14207_s0 + $0x538] sm:$0xff] }
 0x2c2   :  { %v13000_v35 = vadd.f32 %v4002_v57, %v12876_v47  ;;  %v13003_v30 = vadd.f32 %v4003_v21, %v12878_v60  ;;  %v13006_v55 = vadd.f32 %v4004_v43, %v12880_v2  ;;  %v13009_v58 = vadd.f32 %v4005_v38, %v12882_v4  ;;  %v6301_v20 = vld [vmem:[%s14207_s0 + $0x540] sm:$0xff]  ;;  %v6302_v17 = vld [vmem:[%s14207_s0 + $0x548] sm:$0xf] }
 0x2c3   :  { %v13012_v34 = vadd.f32 %v4006_v41, %v12884_v29  ;;  %v13021_v47 = vadd.f32 %v4007_v48, %v12895_v32  ;;  %v13024_v60 = vadd.f32 %v4008_v31, %v12897_v15  ;;  %v13027_v2 = vadd.f32 %v4009_v24, %v12899_v26  ;;  %v6283_v29 = vld [vmem:[%s14207_s0 + $0xf0] sm:$0xff]  ;;  %v6290_v32 = vld [vmem:[%s14207_s0 + $0x268] sm:$0xff] }
 0x2c4   :  { %v13030_v4 = vadd.f32 %v4010_v49, %v12901_v39  ;;  %v13042_v15 = vadd.f32 %v4011_v19, %v12912_v59  ;;  %v13045_v26 = vadd.f32 %v4012_v6, %v12914_v3  ;;  %v13048_v39 = vadd.f32 %v4013_v1, %v12916_v22  ;;  %v6288_v59 = vld [vmem:[%s14207_s0 + $0x258] sm:$0xff]  ;;  %v6289_v3 = vld [vmem:[%s14207_s0 + $0x260] sm:$0xff]  ;;  %v6291_v22 = vld [vmem:[%s14207_s0 + $0x270] sm:$0xff] }
 0x2c5   :  { %v13051_v5 = vadd.f32 %v4014_v63, %v12918_v27  ;;  %v13065_v27 = vadd.f32 %v4015_v51, %v3973_v53  ;;  %v13067_v9 = vadd.f32 %v4016_v25, %v3974_v8  ;;  %v13069_v45 = vadd.f32 %v4017_v14, %v3975_v0  ;;  %v6295_v53 = vld [vmem:[%s14207_s0 + $0x3d0] sm:$0xff]  ;;  %v6296_v8 = vld [vmem:[%s14207_s0 + $0x3d8] sm:$0xff] }
 0x2c6   :  { %v13071_v61 = vadd.f32 %v4018_v62, %v3976_v37  ;;  %v4060_v0 = vstv %s12957_s6  ;;  %v13090_v37 = vstv %s12972_s19  ;;  %v13093_v54 = vstv %s12978_s11 }
 0x2c7   :  { %v13096_v52 = vstv %s12980_s25  ;;  %v4061_v46 = vmul.f32 %v6283_v29, %v4060_v0  ;;  %v4062_v56 = vmul.f32 %v6284_v44, %v4060_v0  ;;  %v4063_v7 = vmul.f32 %v6285_v16, %v4060_v0 }
 0x2c8   :  { %v4064_v57 = vmul.f32 %v6286_v42, %v4060_v0  ;;  %v4065_v21 = vmul.f32 %v6287_v18, %v4060_v0  ;;  %v4066_v43 = vmul.f32 %v6288_v59, %v4060_v0  ;;  %v4067_v38 = vmul.f32 %v6289_v3, %v4060_v0 }
 0x2c9   :  { %v4068_v41 = vmul.f32 %v6290_v32, %v4060_v0  ;;  %v4069_v48 = vmul.f32 %v6291_v22, %v4060_v0  ;;  %v4070_v31 = vmul.f32 %v6292_v12, %v4060_v0  ;;  %v4071_v24 = vmul.f32 %v6293_v11, %v4060_v0  ;;  %v6306_v22 = vld [vmem:[%s14207_s0 + $0x128] sm:$0xff]  ;;  %v6312_v12 = vld [vmem:[%s14207_s0 + $0x298] sm:$0xff] }
 0x2ca   :  { %v4072_v49 = vmul.f32 %v6294_v40, %v4060_v0  ;;  %v4073_v19 = vmul.f32 %v6295_v53, %v4060_v0  ;;  %v4074_v6 = vmul.f32 %v6296_v8, %v4060_v0  ;;  %v4075_v1 = vmul.f32 %v6297_v33, %v4060_v0  ;;  %v6308_v11 = vld [vmem:[%s14207_s0 + $0x138] sm:$0xf]  ;;  %v6309_v40 = vld [vmem:[%s14207_s0 + $0x280] sm:$0xff]  ;;  %v6310_v53 = vld [vmem:[%s14207_s0 + $0x288] sm:$0xff] }
 0x2cb   :  { %v4076_v63 = vmul.f32 %v6298_v13, %v4060_v0  ;;  %v4077_v51 = vmul.f32 %v6299_v50, %v4060_v0  ;;  %v4078_v25 = vmul.f32 %v6300_v10, %v4060_v0  ;;  %v4079_v14 = vmul.f32 %v6301_v20, %v4060_v0  ;;  %v6313_v33 = vld [vmem:[%s14207_s0 + $0x2a0] sm:$0xf]  ;;  %v6314_v13 = vld [vmem:[%s14207_s0 + $0x3e8] sm:$0xff]  ;;  %v6315_v50 = vld [vmem:[%s14207_s0 + $0x3f0] sm:$0xff] }
 0x2cc   :  { %v4080_v62 = vmul.f32 %v6302_v17, %v4060_v0  ;;  %v4081_v16 = vadd.f32 %v4061_v46, %v12991_v36  ;;  %v4082_v42 = vadd.f32 %v4062_v56, %v12994_v23  ;;  %v4083_v29 = vadd.f32 %v4063_v7, %v12997_v28  ;;  %v6307_v36 = vld [vmem:[%s14207_s0 + $0x130] sm:$0xff]  ;;  %v6322_v10 = vld [vmem:[%s14207_s0 + $0x568] sm:$0xff] }
 0x2cd   :  { %v4084_v44 = vadd.f32 %v4064_v57, %v13000_v35  ;;  %v4085_v32 = vadd.f32 %v4065_v21, %v13003_v30  ;;  %v4086_v18 = vadd.f32 %v4066_v43, %v13006_v55  ;;  %v4087_v59 = vadd.f32 %v4067_v38, %v13009_v58  ;;  %v6311_v23 = vld [vmem:[%s14207_s0 + $0x290] sm:$0xff]  ;;  %v6304_v58 = vld [vmem:[%s14207_s0 + $0x118] sm:$0xff]  ;;  %v6321_v57 = vld [vmem:[%s14207_s0 + $0x560] sm:$0xff] }
 0x2ce   :  { %v4088_v3 = vadd.f32 %v4068_v41, %v13012_v34  ;;  %v4089_v28 = vadd.f32 %v4069_v48, %v13021_v47  ;;  %v4090_v35 = vadd.f32 %v4070_v31, %v13024_v60  ;;  %v4091_v30 = vadd.f32 %v4071_v24, %v13027_v2  ;;  %v6305_v34 = vld [vmem:[%s14207_s0 + $0x120] sm:$0xff]  ;;  %v6323_v20 = vld [vmem:[%s14207_s0 + $0x570] sm:$0xf] }
 0x2cf   :  { %v4092_v55 = vadd.f32 %v4072_v49, %v13030_v4  ;;  %v4093_v47 = vadd.f32 %v4073_v19, %v13042_v15  ;;  %v4094_v60 = vadd.f32 %v4074_v6, %v13045_v26  ;;  %v4095_v2 = vadd.f32 %v4075_v1, %v13048_v39  ;;  %v6316_v15 = vld [vmem:[%s14207_s0 + $0x3f8] sm:$0xff]  ;;  %v6317_v26 = vld [vmem:[%s14207_s0 + $0x400] sm:$0xff] }
 0x2d0   :  { %v4096_v4 = vadd.f32 %v4076_v63, %v13051_v5  ;;  %v4097_v39 = vadd.f32 %v4077_v51, %v13065_v27  ;;  %v4098_v5 = vadd.f32 %v4078_v25, %v13067_v9  ;;  %v4099_v8 = vadd.f32 %v4079_v14, %v13069_v45  ;;  %v6318_v27 = vld [vmem:[%s14207_s0 + $0x408] sm:$0xf]  ;;  %v6319_v9 = vld [vmem:[%s14207_s0 + $0x550] sm:$0xff]  ;;  %v6320_v45 = vld [vmem:[%s14207_s0 + $0x558] sm:$0xff] }
 0x2d1   :  { %v4100_v0 = vadd.f32 %v4080_v62, %v13071_v61  ;;  %v4123_v61 = vmul.f32 %v6304_v58, %v13090_v37  ;;  %v4124_v46 = vmul.f32 %v6305_v34, %v13090_v37  ;;  %v4125_v56 = vmul.f32 %v6306_v22, %v13090_v37 }
 0x2d2   :  { %v4126_v7 = vmul.f32 %v6307_v36, %v13090_v37  ;;  %v4127_v17 = vmul.f32 %v6308_v11, %v13090_v37  ;;  %v4128_v21 = vmul.f32 %v6309_v40, %v13090_v37  ;;  %v4129_v43 = vmul.f32 %v6310_v53, %v13090_v37  ;;  %v6327_v40 = vld [vmem:[%s14207_s0 + $0x150] sm:$0xff]  ;;  %v6328_v53 = vld [vmem:[%s14207_s0 + $0x158] sm:$0xff] }
 0x2d3   :  { %v4130_v38 = vmul.f32 %v6311_v23, %v13090_v37  ;;  %v4131_v41 = vmul.f32 %v6312_v12, %v13090_v37  ;;  %v4132_v48 = vmul.f32 %v6313_v33, %v13090_v37  ;;  %v4133_v31 = vmul.f32 %v6314_v13, %v13090_v37 }
 0x2d4   :  { %v4134_v24 = vmul.f32 %v6315_v50, %v13090_v37  ;;  %v4135_v49 = vmul.f32 %v6316_v15, %v13090_v37  ;;  %v4136_v19 = vmul.f32 %v6317_v26, %v13090_v37  ;;  %v4137_v6 = vmul.f32 %v6318_v27, %v13090_v37  ;;  %v6334_v50 = vld [vmem:[%s14207_s0 + $0x2c8] sm:$0xf]  ;;  %v6335_v27 = vld [vmem:[%s14207_s0 + $0x410] sm:$0xff] }
 0x2d5   :  { %v4138_v1 = vmul.f32 %v6319_v9, %v13090_v37  ;;  %v4139_v63 = vmul.f32 %v6320_v45, %v13090_v37  ;;  %v4140_v51 = vmul.f32 %v6321_v57, %v13090_v37  ;;  %v4141_v25 = vmul.f32 %v6322_v10, %v13090_v37  ;;  %v6336_v9 = vld [vmem:[%s14207_s0 + $0x418] sm:$0xff]  ;;  %v6339_v45 = vld [vmem:[%s14207_s0 + $0x430] sm:$0xf] }
 0x2d6   :  { %v4142_v14 = vmul.f32 %v6323_v20, %v13090_v37  ;;  %v4143_v62 = vadd.f32 %v4123_v61, %v4081_v16  ;;  %v4144_v22 = vadd.f32 %v4124_v46, %v4082_v42  ;;  %v4145_v36 = vadd.f32 %v4125_v56, %v4083_v29  ;;  %v6332_v37 = vld [vmem:[%s14207_s0 + $0x2b8] sm:$0xff]  ;;  %v6342_v56 = vld [vmem:[%s14207_s0 + $0x588] sm:$0xff] }
 0x2d7   :  { %v4146_v23 = vadd.f32 %v4126_v7, %v4084_v44  ;;  %v4147_v58 = vadd.f32 %v4127_v17, %v4085_v32  ;;  %v4148_v34 = vadd.f32 %v4128_v21, %v4086_v18  ;;  %v4149_v12 = vadd.f32 %v4129_v43, %v4087_v59  ;;  %v6325_v32 = vld [vmem:[%s14207_s0 + $0x140] sm:$0xff]  ;;  %v6326_v18 = vld [vmem:[%s14207_s0 + $0x148] sm:$0xff]  ;;  %v6343_v7 = vld [vmem:[%s14207_s0 + $0x590] sm:$0xff] }
 0x2d8   :  { %v4150_v11 = vadd.f32 %v4130_v38, %v4088_v3  ;;  %v4151_v16 = vadd.f32 %v4131_v41, %v4089_v28  ;;  %v4152_v42 = vadd.f32 %v4132_v48, %v4090_v35  ;;  %v4153_v29 = vadd.f32 %v4133_v31, %v4091_v30  ;;  %v6333_v59 = vld [vmem:[%s14207_s0 + $0x2c0] sm:$0xff]  ;;  %v6330_v35 = vld [vmem:[%s14207_s0 + $0x2a8] sm:$0xff]  ;;  %v6331_v30 = vld [vmem:[%s14207_s0 + $0x2b0] sm:$0xff] }
 0x2d9   :  { %v4154_v44 = vadd.f32 %v4134_v24, %v4092_v55  ;;  %v4155_v3 = vadd.f32 %v4135_v49, %v4093_v47  ;;  %v4156_v15 = vadd.f32 %v4136_v19, %v4094_v60  ;;  %v4157_v26 = vadd.f32 %v4137_v6, %v4095_v2  ;;  %v6329_v28 = vld [vmem:[%s14207_s0 + $0x160] sm:$0xf]  ;;  %v6338_v47 = vld [vmem:[%s14207_s0 + $0x428] sm:$0xff]  ;;  %v6344_v57 = vld [vmem:[%s14207_s0 + $0x598] sm:$0xf] }
 0x2da   :  { %v4158_v33 = vadd.f32 %v4138_v1, %v4096_v4  ;;  %v6337_v55 = vld [vmem:[%s14207_s0 + $0x420] sm:$0xff]  ;;  %v4159_v60 = vadd.f32 %v4139_v63, %v4097_v39  ;;  %v4160_v2 = vadd.f32 %v4140_v51, %v4098_v5  ;;  %v4161_v4 = vadd.f32 %v4141_v25, %v4099_v8  ;;  %v6340_v39 = vld [vmem:[%s14207_s0 + $0x578] sm:$0xff]  ;;  %v4898_v25 = vld [vmem:[%s14210_s3 + $0x8] sm:$0xff] }
 0x2db   :  { %v4162_v13 = vadd.f32 %v4142_v14, %v4100_v0  ;;  %v6341_v5 = vld [vmem:[%s14207_s0 + $0x580] sm:$0xff]  ;;  %v4185_v8 = vmul.f32 %v6325_v32, %v13093_v54  ;;  %v4186_v0 = vmul.f32 %v6326_v18, %v13093_v54  ;;  %v4187_v61 = vmul.f32 %v6327_v40, %v13093_v54  ;;  %5026 = vmatprep.mubr.f32.mxu0 %v4898_v25 }
 0x2dc   :  { %v4188_v46 = vmul.f32 %v6328_v53, %v13093_v54  ;;  %v4189_v10 = vmul.f32 %v6329_v28, %v13093_v54  ;;  %v4190_v20 = vmul.f32 %v6330_v35, %v13093_v54  ;;  %v4191_v17 = vmul.f32 %v6331_v30, %v13093_v54 }
 0x2dd   :  { %v4192_v21 = vmul.f32 %v6332_v37, %v13093_v54  ;;  %v4193_v43 = vmul.f32 %v6333_v59, %v13093_v54  ;;  %v4194_v38 = vmul.f32 %v6334_v50, %v13093_v54  ;;  %v4195_v41 = vmul.f32 %v6335_v27, %v13093_v54 }
 0x2de   :  { %v4196_v48 = vmul.f32 %v6336_v9, %v13093_v54  ;;  %v4197_v31 = vmul.f32 %v6337_v55, %v13093_v54  ;;  %v4198_v24 = vmul.f32 %v6338_v47, %v13093_v54  ;;  %v4199_v49 = vmul.f32 %v6339_v45, %v13093_v54 }
 0x2df   :  { %v4200_v19 = vmul.f32 %v6340_v39, %v13093_v54  ;;  %v4201_v6 = vmul.f32 %v6341_v5, %v13093_v54  ;;  %v4202_v1 = vmul.f32 %v6342_v56, %v13093_v54  ;;  %v4203_v63 = vmul.f32 %v6343_v7, %v13093_v54 }
 0x2e0   :  { %v4204_v51 = vmul.f32 %v6344_v57, %v13093_v54  ;;  %v4205_v14 = vadd.f32 %v4185_v8, %v4143_v62  ;;  %v4206_v40 = vadd.f32 %v4186_v0, %v4144_v22  ;;  %v4207_v53 = vadd.f32 %v4187_v61, %v4145_v36 }
 0x2e1   :  { %v4208_v37 = vadd.f32 %v4188_v46, %v4146_v23  ;;  %v4209_v32 = vadd.f32 %v4189_v10, %v4147_v58  ;;  %v4210_v18 = vadd.f32 %v4190_v20, %v4148_v34  ;;  %v4211_v59 = vadd.f32 %v4191_v17, %v4149_v12 }
 0x2e2   :  { %v4212_v28 = vadd.f32 %v4192_v21, %v4150_v11  ;;  %v4213_v35 = vadd.f32 %v4193_v43, %v4151_v16  ;;  %v4214_v30 = vadd.f32 %v4194_v38, %v4152_v42  ;;  %v4215_v55 = vadd.f32 %v4195_v41, %v4153_v29 }
 0x2e3   :  { %v4216_v47 = vadd.f32 %v4196_v48, %v4154_v44  ;;  %v4217_v50 = vadd.f32 %v4197_v31, %v4155_v3  ;;  %v4218_v27 = vadd.f32 %v4198_v24, %v4156_v15  ;;  %v4219_v54 = vadd.f32 %v4199_v49, %v4157_v26 }
 0x2e4   :  { %v4220_v9 = vadd.f32 %v4200_v19, %v4158_v33  ;;  %v4221_v45 = vadd.f32 %v4201_v6, %v4159_v60  ;;  %v4222_v39 = vadd.f32 %v4202_v1, %v4160_v2  ;;  %v4223_v5 = vadd.f32 %v4203_v63, %v4161_v4 }
 0x2e5   :  { %v4224_v62 = vadd.f32 %v4204_v51, %v4162_v13  ;;  %v4227_v22 = vadd.f32 %v13096_v52, %v4205_v14  ;;  %v4228_v36 = vadd.f32 %v13096_v52, %v4206_v40  ;;  %v4229_v23 = vadd.f32 %v13096_v52, %v4207_v53  ;;  %v4292_v14 = vld [vmem:[%s14207_s0] sm:$0xff] }
 0x2e6   :  { %v4230_v58 = vadd.f32 %v13096_v52, %v4208_v37  ;;  %v4231_v34 = vadd.f32 %v13096_v52, %v4209_v32  ;;  %v4232_v12 = vadd.f32 %v13096_v52, %v4210_v18  ;;  %v4233_v11 = vadd.f32 %v13096_v52, %v4211_v59  ;;  %v4293_v18 = vld [vmem:[%s14207_s0 + $0x8] sm:$0xff]  ;;  %v4296_v59 = vld [vmem:[%s14207_s0 + $0x20] sm:$0xf] }
 0x2e7   :  { %v4234_v16 = vadd.f32 %v13096_v52, %v4212_v28  ;;  %v4235_v42 = vadd.f32 %v13096_v52, %v4213_v35  ;;  %v4236_v29 = vadd.f32 %v13096_v52, %v4214_v30  ;;  %v4237_v44 = vadd.f32 %v13096_v52, %v4215_v55  ;;  %v4297_v28 = vld [vmem:[%s14207_s0 + $0x168] sm:$0xff] }
 0x2e8   :  { %v4238_v3 = vadd.f32 %v13096_v52, %v4216_v47  ;;  %v4239_v15 = vadd.f32 %v13096_v52, %v4217_v50  ;;  %v4240_v26 = vadd.f32 %v13096_v52, %v4218_v27  ;;  %v4241_v33 = vadd.f32 %v13096_v52, %v4219_v54  ;;  %v4294_v50 = vld [vmem:[%s14207_s0 + $0x10] sm:$0xff]  ;;  %v4299_v54 = vld [vmem:[%s14207_s0 + $0x178] sm:$0xff] }
 0x2e9   :  { %v4242_v60 = vadd.f32 %v13096_v52, %v4220_v9  ;;  %v4243_v2 = vadd.f32 %v13096_v52, %v4221_v45  ;;  %v4244_v4 = vadd.f32 %v13096_v52, %v4222_v39  ;;  %v4245_v13 = vadd.f32 %v13096_v52, %v4223_v5  ;;  %v4298_v27 = vld [vmem:[%s14207_s0 + $0x170] sm:$0xff]  ;;  %v4301_v9 = vld [vmem:[%s14207_s0 + $0x188] sm:$0xf]  ;;  %v4295_v39 = vld [vmem:[%s14207_s0 + $0x18] sm:$0xff] }
 0x2ea   :  { %v4246_v8 = vadd.f32 %v13096_v52, %v4224_v62  ;;  %v4247_v0 = vmax.f32 %v4227_v22, 0.0  ;;  %v4248_v61 = vmax.f32 %v4228_v36, 0.0  ;;  %v4249_v46 = vmax.f32 %v4229_v23, 0.0  ;;  %v4302_v5 = vld [vmem:[%s14207_s0 + $0x2d0] sm:$0xff] }
 0x2eb   :  { %v4250_v56 = vmax.f32 %v4230_v58, 0.0  ;;  %v4251_v7 = vmax.f32 %v4231_v34, 0.0  ;;  %v4252_v57 = vmax.f32 %v4232_v12, 0.0  ;;  %v4253_v10 = vmax.f32 %v4233_v11, 0.0  ;;  %v4300_v11 = vld [vmem:[%s14207_s0 + $0x180] sm:$0xff] }
 0x2ec   :  { %v4254_v20 = vmax.f32 %v4234_v16, 0.0  ;;  %v4255_v17 = vmax.f32 %v4235_v42, 0.0  ;;  %v4256_v21 = vmax.f32 %v4236_v29, 0.0  ;;  %v4257_v43 = vmax.f32 %v4237_v44, 0.0  ;;  %v4303_v16 = vld [vmem:[%s14207_s0 + $0x2d8] sm:$0xff] }
 0x2ed   :  { %v4258_v38 = vmax.f32 %v4238_v3, 0.0  ;;  %v4259_v41 = vmax.f32 %v4239_v15, 0.0  ;;  %v4260_v52 = vmax.f32 %v4240_v26, 0.0  ;;  %v4261_v48 = vmax.f32 %v4241_v33, 0.0  ;;  %v4306_v42 = vld [vmem:[%s14207_s0 + $0x2f0] sm:$0xf] }
 0x2ee   :  { %v4262_v31 = vmax.f32 %v4242_v60, 0.0  ;;  %v4263_v24 = vmax.f32 %v4243_v2, 0.0  ;;  %v4264_v49 = vmax.f32 %v4244_v4, 0.0  ;;  %v4265_v19 = vmax.f32 %v4245_v13, 0.0  ;;  %v4307_v29 = vld [vmem:[%s14207_s0 + $0x438] sm:$0xff]  ;;  %v4304_v3 = vld [vmem:[%s14207_s0 + $0x2e0] sm:$0xff] }
 0x2ef   :  { %v4266_v6 = vmax.f32 %v4246_v8, 0.0  ;;  %v4267_v1 = vmax.f32 %v4247_v0, %v4252_v57  ;;  %v4270_v63 = vmax.f32 %v4248_v61, %v4253_v10  ;;  %v4273_v51 = vmax.f32 %v4249_v46, %v4254_v20  ;;  %v4305_v15 = vld [vmem:[%s14207_s0 + $0x2e8] sm:$0xff]  ;;  %v4308_v26 = vld [vmem:[%s14207_s0 + $0x440] sm:$0xff]  ;;  %v4311_v33 = vld [vmem:[%s14207_s0 + $0x458] sm:$0xf] }
 0x2f0   :  { %v4276_v25 = vmax.f32 %v4250_v56, %v4255_v17  ;;  %v4279_v40 = vsel %vm648_vm0, %v4251_v7, -inf  ;;  %v4280_v53 = vsel %vm648_vm0, %v4256_v21, -inf  ;;  %v4282_v37 = vsel %vm648_vm0, %v4261_v48, -inf  ;;  %v4309_v13 = vld [vmem:[%s14207_s0 + $0x448] sm:$0xff]  ;;  %v4310_v8 = vld [vmem:[%s14207_s0 + $0x450] sm:$0xff] }
 0x2f1   :  { %v4284_v32 = vsel %vm648_vm0, %v4266_v6, -inf  ;;  %v4268_v35 = vmax.f32 %v4267_v1, %v4257_v43  ;;  %v4271_v30 = vmax.f32 %v4270_v63, %v4258_v38  ;;  %v4274_v55 = vmax.f32 %v4273_v51, %v4259_v41  ;;  %v6352_v7 = vld [vmem:[%s14207_s0 + $0x48] sm:$0xf]  ;;  %v6349_v43 = vld [vmem:[%s14207_s0 + $0x30] sm:$0xff]  ;;  %v6358_v6 = vld [vmem:[%s14207_s0 + $0x2f8] sm:$0xff] }
 0x2f2   :  { %v4277_v47 = vmax.f32 %v4276_v25, %v4260_v52  ;;  %v4281_v45 = vmax.f32 %v4279_v40, %v4280_v53  ;;  %v4313_v62 = vstv %s13319_s21  ;;  %v13361_v22 = vstv %s13321_s16  ;;  %v6348_v21 = vld [vmem:[%s14207_s0 + $0x28] sm:$0xff]  ;;  %v6353_v38 = vld [vmem:[%s14207_s0 + $0x190] sm:$0xff] }
 0x2f3   :  { %v13364_v36 = vstv %s13323_s15  ;;  %v4269_v23 = vmax.f32 %v4268_v35, %v4262_v31  ;;  %v4272_v58 = vmax.f32 %v4271_v30, %v4263_v24  ;;  %v4275_v34 = vmax.f32 %v4274_v55, %v4264_v49  ;;  %v6357_v41 = vld [vmem:[%s14207_s0 + $0x1b0] sm:$0xf]  ;;  %v6350_v49 = vld [vmem:[%s14207_s0 + $0x38] sm:$0xff]  ;;  %v6355_v40 = vld [vmem:[%s14207_s0 + $0x1a0] sm:$0xff] }
 0x2f4   :  { %v4278_v12 = vmax.f32 %v4277_v47, %v4265_v19  ;;  %v4283_v44 = vmax.f32 %v4281_v45, %v4282_v37  ;;  %v13390_v60 = vmul.f32 %v4313_v62, %v4292_v14  ;;  %v13392_v2 = vmul.f32 %v4313_v62, %v4293_v18  ;;  %v6351_v19 = vld [vmem:[%s14207_s0 + $0x40] sm:$0xff]  ;;  %v6354_v14 = vld [vmem:[%s14207_s0 + $0x198] sm:$0xff]  ;;  %v6356_v53 = vld [vmem:[%s14207_s0 + $0x1a8] sm:$0xff] }
 0x2f5   :  { %v13394_v4 = vmul.f32 %v4313_v62, %v4294_v50  ;;  %4286 = vst [vmem:[#allocation2 + $0xf0] sm:$0xff] %v4269_v23  ;;  %4287 = vst [vmem:[#allocation2 + $0xf8] sm:$0xff] %v4272_v58  ;;  %v4317_v0 = vmul.f32 %v4313_v62, %v4295_v39  ;;  %v4318_v61 = vmul.f32 %v4313_v62, %v4296_v59  ;;  %v6362_v37 = vld [vmem:[%s14207_s0 + $0x318] sm:$0xf]  ;;  %v6359_v59 = vld [vmem:[%s14207_s0 + $0x300] sm:$0xff] }
 0x2f6   :  { %4288 = vst [vmem:[#allocation2 + $0x100] sm:$0xff] %v4275_v34  ;;  %4289 = vst [vmem:[#allocation2 + $0x108] sm:$0xff] %v4278_v12  ;;  %v4319_v46 = vmul.f32 %v4313_v62, %v4297_v28  ;;  %v13402_v56 = vmul.f32 %v4313_v62, %v4298_v27  ;;  %v4285_v57 = vmax.f32 %v4283_v44, %v4284_v32  ;;  %v6360_v28 = vld [vmem:[%s14207_s0 + $0x308] sm:$0xff]  ;;  %v6361_v35 = vld [vmem:[%s14207_s0 + $0x310] sm:$0xff] }
 0x2f7   :  { %v4321_v10 = vmul.f32 %v4313_v62, %v4299_v54  ;;  %v4322_v20 = vmul.f32 %v4313_v62, %v4300_v11  ;;  %v4323_v17 = vmul.f32 %v4313_v62, %v4301_v9  ;;  %v4324_v52 = vmul.f32 %v4313_v62, %v4302_v5  ;;  %v6363_v47 = vld [vmem:[%s14207_s0 + $0x460] sm:$0xff]  ;;  %v6364_v50 = vld [vmem:[%s14207_s0 + $0x468] sm:$0xff]  ;;  %v6365_v27 = vld [vmem:[%s14207_s0 + $0x470] sm:$0xff] }
 0x2f8   :  { %v4325_v48 = vmul.f32 %v4313_v62, %v4303_v16  ;;  %v4326_v31 = vmul.f32 %v4313_v62, %v4304_v3  ;;  %v4327_v24 = vmul.f32 %v4313_v62, %v4305_v15  ;;  %4290 = vst [vmem:[#allocation2 + $0x110] sm:$0xf] %v4285_v57  ;;  %v4328_v1 = vmul.f32 %v4313_v62, %v4306_v42  ;;  %v6366_v5 = vld [vmem:[%s14207_s0 + $0x478] sm:$0xff] }
 0x2f9   :  { %v4329_v63 = vmul.f32 %v4313_v62, %v4307_v29  ;;  %v4330_v51 = vmul.f32 %v4313_v62, %v4308_v26  ;;  %v4331_v25 = vmul.f32 %v4313_v62, %v4309_v13  ;;  %v4332_v32 = vmul.f32 %v4313_v62, %v4310_v8 }
 0x2fa   :  { %v4333_v18 = vmul.f32 %v4313_v62, %v4311_v33  ;;  %v4356_v30 = vmul.f32 %v6348_v21, %v13361_v22  ;;  %v4357_v55 = vmul.f32 %v6349_v43, %v13361_v22  ;;  %v4358_v54 = vmul.f32 %v6350_v49, %v13361_v22  ;;  %v6367_v62 = vld [vmem:[%s14207_s0 + $0x480] sm:$0xf] }
 0x2fb   :  { %v4359_v9 = vmul.f32 %v6351_v19, %v13361_v22  ;;  %v4360_v45 = vmul.f32 %v6352_v7, %v13361_v22  ;;  %v4361_v39 = vmul.f32 %v6353_v38, %v13361_v22  ;;  %v4362_v23 = vmul.f32 %v6354_v14, %v13361_v22 }
 0x2fc   :  { %v4363_v58 = vmul.f32 %v6355_v40, %v13361_v22  ;;  %v4364_v34 = vmul.f32 %v6356_v53, %v13361_v22  ;;  %v4365_v12 = vmul.f32 %v6357_v41, %v13361_v22  ;;  %v4366_v11 = vmul.f32 %v6358_v6, %v13361_v22  ;;  %v6373_v41 = vld [vmem:[%s14207_s0 + $0x70] sm:$0xf] }
 0x2fd   :  { %v4367_v16 = vmul.f32 %v6359_v59, %v13361_v22  ;;  %v4368_v42 = vmul.f32 %v6360_v28, %v13361_v22  ;;  %v4369_v29 = vmul.f32 %v6361_v35, %v13361_v22  ;;  %v4370_v44 = vmul.f32 %v6362_v37, %v13361_v22  ;;  %v6382_v28 = vld [vmem:[%s14207_s0 + $0x338] sm:$0xff] }
 0x2fe   :  { %v4371_v3 = vmul.f32 %v6363_v47, %v13361_v22  ;;  %v4372_v15 = vmul.f32 %v6364_v50, %v13361_v22  ;;  %v4373_v26 = vmul.f32 %v6365_v27, %v13361_v22  ;;  %v4374_v33 = vmul.f32 %v6366_v5, %v13361_v22 }
 0x2ff   :  { %v4375_v13 = vmul.f32 %v6367_v62, %v13361_v22  ;;  %v4376_v8 = vadd.f32 %v4356_v30, %v13390_v60  ;;  %v4377_v7 = vadd.f32 %v4357_v55, %v13392_v2  ;;  %v4378_v57 = vadd.f32 %v4358_v54, %v13394_v4  ;;  %v6369_v22 = vld [vmem:[%s14207_s0 + $0x50] sm:$0xff]  ;;  %v6370_v60 = vld [vmem:[%s14207_s0 + $0x58] sm:$0xff] }
 0x300   :  { %v4379_v21 = vadd.f32 %v4359_v9, %v4317_v0  ;;  %v4380_v43 = vadd.f32 %v4360_v45, %v4318_v61  ;;  %v4381_v38 = vadd.f32 %v4361_v39, %v4319_v46  ;;  %v4382_v49 = vadd.f32 %v4362_v23, %v13402_v56  ;;  %v6374_v2 = vld [vmem:[%s14207_s0 + $0x1b8] sm:$0xff]  ;;  %v6387_v9 = vld [vmem:[%s14207_s0 + $0x4a0] sm:$0xff]  ;;  %v6388_v45 = vld [vmem:[%s14207_s0 + $0x4a8] sm:$0xf] }
 0x301   :  { %v4383_v19 = vadd.f32 %v4363_v58, %v4321_v10  ;;  %v4384_v6 = vadd.f32 %v4364_v34, %v4322_v20  ;;  %v4385_v14 = vadd.f32 %v4365_v12, %v4323_v17  ;;  %v6378_v4 = vld [vmem:[%s14207_s0 + $0x1d8] sm:$0xf]  ;;  %v4386_v0 = vadd.f32 %v4366_v11, %v4324_v52  ;;  %v6371_v10 = vld [vmem:[%s14207_s0 + $0x60] sm:$0xff]  ;;  %v6372_v20 = vld [vmem:[%s14207_s0 + $0x68] sm:$0xff] }
 0x302   :  { %v4387_v61 = vadd.f32 %v4367_v16, %v4325_v48  ;;  %v4388_v46 = vadd.f32 %v4368_v42, %v4326_v31  ;;  %v4389_v56 = vadd.f32 %v4369_v29, %v4327_v24  ;;  %v6379_v17 = vld [vmem:[%s14207_s0 + $0x320] sm:$0xff]  ;;  %v4390_v40 = vadd.f32 %v4370_v44, %v4328_v1  ;;  %v6376_v48 = vld [vmem:[%s14207_s0 + $0x1c8] sm:$0xff]  ;;  %v6377_v31 = vld [vmem:[%s14207_s0 + $0x1d0] sm:$0xff] }
 0x303   :  { %v4391_v53 = vadd.f32 %v4371_v3, %v4329_v63  ;;  %v4392_v37 = vadd.f32 %v4372_v15, %v4330_v51  ;;  %v4393_v59 = vadd.f32 %v4373_v26, %v4331_v25  ;;  %v6375_v52 = vld [vmem:[%s14207_s0 + $0x1c0] sm:$0xff]  ;;  %v4394_v1 = vadd.f32 %v4374_v33, %v4332_v32  ;;  %v6380_v51 = vld [vmem:[%s14207_s0 + $0x328] sm:$0xff]  ;;  %v6381_v25 = vld [vmem:[%s14207_s0 + $0x330] sm:$0xff] }
 0x304   :  { %v6383_v24 = vld [vmem:[%s14207_s0 + $0x340] sm:$0xf]  ;;  %v4395_v63 = vadd.f32 %v4375_v13, %v4333_v18  ;;  %v4418_v35 = vmul.f32 %v6369_v22, %v13364_v36  ;;  %v4419_v30 = vmul.f32 %v6370_v60, %v13364_v36  ;;  %v6384_v32 = vld [vmem:[%s14207_s0 + $0x488] sm:$0xff]  ;;  %v6385_v18 = vld [vmem:[%s14207_s0 + $0x490] sm:$0xff]  ;;  %v4420_v47 = vmul.f32 %v6371_v10, %v13364_v36 }
 0x305   :  { %v6386_v55 = vld [vmem:[%s14207_s0 + $0x498] sm:$0xff]  ;;  %v4421_v50 = vmul.f32 %v6372_v20, %v13364_v36  ;;  %v4422_v27 = vmul.f32 %v6373_v41, %v13364_v36  ;;  %v4423_v54 = vmul.f32 %v6374_v2, %v13364_v36  ;;  %v4424_v39 = vmul.f32 %v6375_v52, %v13364_v36  ;;  %v6396_v52 = vld [vmem:[%s14207_s0 + $0x1e8] sm:$0xff] }
 0x306   :  { %v4425_v5 = vmul.f32 %v6376_v48, %v13364_v36  ;;  %v4426_v62 = vmul.f32 %v6377_v31, %v13364_v36  ;;  %v4427_v23 = vmul.f32 %v6378_v4, %v13364_v36  ;;  %v4428_v58 = vmul.f32 %v6379_v17, %v13364_v36  ;;  %v6390_v17 = vld [vmem:[%s14207_s0 + $0x78] sm:$0xff]  ;;  %v6397_v48 = vld [vmem:[%s14207_s0 + $0x1f0] sm:$0xff] }
 0x307   :  { %v4429_v34 = vmul.f32 %v6380_v51, %v13364_v36  ;;  %v4430_v12 = vmul.f32 %v6381_v25, %v13364_v36  ;;  %v4431_v11 = vmul.f32 %v6382_v28, %v13364_v36  ;;  %v4432_v16 = vmul.f32 %v6383_v24, %v13364_v36  ;;  %v6398_v31 = vld [vmem:[%s14207_s0 + $0x1f8] sm:$0xff]  ;;  %v6403_v28 = vld [vmem:[%s14207_s0 + $0x360] sm:$0xff] }
 0x308   :  { %v4433_v42 = vmul.f32 %v6384_v32, %v13364_v36  ;;  %v4434_v29 = vmul.f32 %v6385_v18, %v13364_v36  ;;  %v4435_v44 = vmul.f32 %v6386_v55, %v13364_v36  ;;  %v4436_v3 = vmul.f32 %v6387_v9, %v13364_v36  ;;  %v6402_v24 = vld [vmem:[%s14207_s0 + $0x358] sm:$0xff]  ;;  %v6407_v55 = vld [vmem:[%s14207_s0 + $0x4c0] sm:$0xff] }
 0x309   :  { %v4437_v15 = vmul.f32 %v6388_v45, %v13364_v36  ;;  %v4438_v26 = vadd.f32 %v4418_v35, %v4376_v8  ;;  %v4439_v33 = vadd.f32 %v4419_v30, %v4377_v7  ;;  %v4440_v13 = vadd.f32 %v4420_v47, %v4378_v57  ;;  %v6394_v36 = vld [vmem:[%s14207_s0 + $0x98] sm:$0xf]  ;;  %v6395_v8 = vld [vmem:[%s14207_s0 + $0x1e0] sm:$0xff]  ;;  %v6408_v47 = vld [vmem:[%s14207_s0 + $0x4c8] sm:$0xff] }
 0x30a   :  { %v4441_v41 = vadd.f32 %v4421_v50, %v4379_v21  ;;  %v4442_v22 = vadd.f32 %v4422_v27, %v4380_v43  ;;  %v4443_v60 = vadd.f32 %v4423_v54, %v4381_v38  ;;  %v4444_v2 = vadd.f32 %v4424_v39, %v4382_v49  ;;  %v6391_v38 = vld [vmem:[%s14207_s0 + $0x80] sm:$0xff]  ;;  %v6392_v49 = vld [vmem:[%s14207_s0 + $0x88] sm:$0xff]  ;;  %v6409_v50 = vld [vmem:[%s14207_s0 + $0x4d0] sm:$0xf] }
 0x30b   :  { %v4445_v4 = vadd.f32 %v4425_v5, %v4383_v19  ;;  %v13572_v10 = vadd.f32 %v4426_v62, %v4384_v6  ;;  %v13574_v20 = vadd.f32 %v4427_v23, %v4385_v14  ;;  %v4448_v7 = vadd.f32 %v4428_v58, %v4386_v0  ;;  %v6393_v19 = vld [vmem:[%s14207_s0 + $0x90] sm:$0xff]  ;;  %v6399_v6 = vld [vmem:[%s14207_s0 + $0x200] sm:$0xf]  ;;  %v6400_v14 = vld [vmem:[%s14207_s0 + $0x348] sm:$0xff] }
 0x30c   :  { %v4449_v57 = vadd.f32 %v4429_v34, %v4387_v61  ;;  %v13585_v21 = vadd.f32 %v4430_v12, %v4388_v46  ;;  %v13587_v43 = vadd.f32 %v4431_v11, %v4389_v56  ;;  %v4452_v0 = vadd.f32 %v4432_v16, %v4390_v40  ;;  %v6404_v40 = vld [vmem:[%s14207_s0 + $0x368] sm:$0xf] }
 0x30d   :  { %v4453_v61 = vadd.f32 %v4433_v42, %v4391_v53  ;;  %v13604_v46 = vadd.f32 %v4434_v29, %v4392_v37  ;;  %v13606_v56 = vadd.f32 %v4435_v44, %v4393_v59  ;;  %v4456_v53 = vadd.f32 %v4436_v3, %v4394_v1  ;;  %v6401_v59 = vld [vmem:[%s14207_s0 + $0x350] sm:$0xff] }
 0x30e   :  { %v4457_v37 = vadd.f32 %v4437_v15, %v4395_v63  ;;  %v4479_v51 = vstv %s13548_s20  ;;  %v13628_v25 = vstv %s13560_s22  ;;  %v6405_v1 = vld [vmem:[%s14207_s0 + $0x4b0] sm:$0xff]  ;;  %v6406_v63 = vld [vmem:[%s14207_s0 + $0x4b8] sm:$0xff] }
 0x30f   :  { %v4480_v35 = vmul.f32 %v6390_v17, %v4479_v51  ;;  %v4481_v30 = vmul.f32 %v6391_v38, %v4479_v51  ;;  %v4482_v32 = vmul.f32 %v6392_v49, %v4479_v51  ;;  %v4483_v18 = vmul.f32 %v6393_v19, %v4479_v51 }
 0x310   :  { %v4484_v27 = vmul.f32 %v6394_v36, %v4479_v51  ;;  %v4485_v54 = vmul.f32 %v6395_v8, %v4479_v51  ;;  %v4486_v9 = vmul.f32 %v6396_v52, %v4479_v51  ;;  %v4487_v45 = vmul.f32 %v6397_v48, %v4479_v51  ;;  %v6417_v48 = vld [vmem:[%s14207_s0 + $0x210] sm:$0xff] }
 0x311   :  { %v4488_v39 = vmul.f32 %v6398_v31, %v4479_v51  ;;  %v4489_v5 = vmul.f32 %v6399_v6, %v4479_v51  ;;  %v4490_v62 = vmul.f32 %v6400_v14, %v4479_v51  ;;  %v4491_v23 = vmul.f32 %v6401_v59, %v4479_v51  ;;  %v6411_v6 = vld [vmem:[%s14207_s0 + $0xa0] sm:$0xff]  ;;  %v6414_v14 = vld [vmem:[%s14207_s0 + $0xb8] sm:$0xff] }
 0x312   :  { %v4492_v58 = vmul.f32 %v6402_v24, %v4479_v51  ;;  %v4493_v34 = vmul.f32 %v6403_v28, %v4479_v51  ;;  %v4494_v12 = vmul.f32 %v6404_v40, %v4479_v51  ;;  %v4495_v11 = vmul.f32 %v6405_v1, %v4479_v51  ;;  %v6418_v31 = vld [vmem:[%s14207_s0 + $0x218] sm:$0xff]  ;;  %v6421_v24 = vld [vmem:[%s14207_s0 + $0x370] sm:$0xff] }
 0x313   :  { %v4496_v16 = vmul.f32 %v6406_v63, %v4479_v51  ;;  %v4497_v42 = vmul.f32 %v6407_v55, %v4479_v51  ;;  %v4498_v29 = vmul.f32 %v6408_v47, %v4479_v51  ;;  %v4499_v44 = vmul.f32 %v6409_v50, %v4479_v51  ;;  %v6422_v51 = vld [vmem:[%s14207_s0 + $0x378] sm:$0xff] }
 0x314   :  { %v13648_v3 = vadd.f32 %v4480_v35, %v4438_v26  ;;  %v13650_v15 = vadd.f32 %v4481_v30, %v4439_v33  ;;  %v13652_v17 = vadd.f32 %v4482_v32, %v4440_v13  ;;  %v13654_v36 = vadd.f32 %v4483_v18, %v4441_v41  ;;  %v6415_v26 = vld [vmem:[%s14207_s0 + $0xc0] sm:$0xf]  ;;  %v6416_v33 = vld [vmem:[%s14207_s0 + $0x208] sm:$0xff]  ;;  %v6429_v32 = vld [vmem:[%s14207_s0 + $0x4f0] sm:$0xff] }
 0x315   :  { %v13656_v8 = vadd.f32 %v4484_v27, %v4442_v22  ;;  %v13658_v38 = vadd.f32 %v4485_v54, %v4443_v60  ;;  %v13660_v49 = vadd.f32 %v4486_v9, %v4444_v2  ;;  %v13662_v19 = vadd.f32 %v4487_v45, %v4445_v4  ;;  %v6412_v2 = vld [vmem:[%s14207_s0 + $0xa8] sm:$0xff]  ;;  %v6413_v4 = vld [vmem:[%s14207_s0 + $0xb0] sm:$0xff]  ;;  %v6430_v18 = vld [vmem:[%s14207_s0 + $0x4f8] sm:$0xf] }
 0x316   :  { %v4508_v13 = vadd.f32 %v4488_v39, %v13572_v10  ;;  %v4509_v41 = vadd.f32 %v4489_v5, %v13574_v20  ;;  %v4510_v22 = vadd.f32 %v4490_v62, %v4448_v7  ;;  %v4511_v60 = vadd.f32 %v4491_v23, %v4449_v57  ;;  %v6420_v10 = vld [vmem:[%s14207_s0 + $0x228] sm:$0xf] }
 0x317   :  { %v13688_v20 = vadd.f32 %v4492_v58, %v13585_v21  ;;  %v13691_v7 = vadd.f32 %v4493_v34, %v13587_v43  ;;  %v13693_v57 = vadd.f32 %v4494_v12, %v4452_v0  ;;  %v13695_v52 = vadd.f32 %v4495_v11, %v4453_v61  ;;  %v6419_v21 = vld [vmem:[%s14207_s0 + $0x220] sm:$0xff]  ;;  %v6425_v43 = vld [vmem:[%s14207_s0 + $0x390] sm:$0xf]  ;;  %v6428_v30 = vld [vmem:[%s14207_s0 + $0x4e8] sm:$0xff] }
 0x318   :  { %v13710_v0 = vadd.f32 %v4496_v16, %v13604_v46  ;;  %v13713_v61 = vadd.f32 %v4497_v42, %v13606_v56  ;;  %v13715_v40 = vadd.f32 %v4498_v29, %v4456_v53  ;;  %v13717_v59 = vadd.f32 %v4499_v44, %v4457_v37  ;;  %v6423_v46 = vld [vmem:[%s14207_s0 + $0x380] sm:$0xff]  ;;  %v6424_v56 = vld [vmem:[%s14207_s0 + $0x388] sm:$0xff]  ;;  %v6426_v53 = vld [vmem:[%s14207_s0 + $0x4d8] sm:$0xff] }
 0x319   :  { %v6427_v37 = vld [vmem:[%s14207_s0 + $0x4e0] sm:$0xff]  ;;  %v4542_v28 = vmul.f32 %v6411_v6, %v13628_v25  ;;  %v4543_v1 = vmul.f32 %v6412_v2, %v13628_v25  ;;  %v4544_v63 = vmul.f32 %v6413_v4, %v13628_v25  ;;  %v4545_v35 = vmul.f32 %v6414_v14, %v13628_v25 }
 0x31a   :  { %v4546_v55 = vmul.f32 %v6415_v26, %v13628_v25  ;;  %v4547_v47 = vmul.f32 %v6416_v33, %v13628_v25  ;;  %v4548_v50 = vmul.f32 %v6417_v48, %v13628_v25  ;;  %v4549_v27 = vmul.f32 %v6418_v31, %v13628_v25 }
 0x31b   :  { %v4550_v54 = vmul.f32 %v6419_v21, %v13628_v25  ;;  %v4551_v9 = vmul.f32 %v6420_v10, %v13628_v25  ;;  %v4552_v45 = vmul.f32 %v6421_v24, %v13628_v25  ;;  %v4553_v39 = vmul.f32 %v6422_v51, %v13628_v25  ;;  %v6438_v10 = vld [vmem:[%s14207_s0 + $0x238] sm:$0xff]  ;;  %v6443_v24 = vld [vmem:[%s14207_s0 + $0x3a0] sm:$0xff] }
 0x31c   :  { %v4554_v5 = vmul.f32 %v6423_v46, %v13628_v25  ;;  %v4555_v62 = vmul.f32 %v6424_v56, %v13628_v25  ;;  %v4556_v23 = vmul.f32 %v6425_v43, %v13628_v25  ;;  %v4557_v58 = vmul.f32 %v6426_v53, %v13628_v25  ;;  %v6442_v43 = vld [vmem:[%s14207_s0 + $0x398] sm:$0xff]  ;;  %v6445_v56 = vld [vmem:[%s14207_s0 + $0x3b0] sm:$0xff]  ;;  %v6447_v53 = vld [vmem:[%s14207_s0 + $0x500] sm:$0xff] }
 0x31d   :  { %v4558_v34 = vmul.f32 %v6427_v37, %v13628_v25  ;;  %v4559_v12 = vmul.f32 %v6428_v30, %v13628_v25  ;;  %v4560_v11 = vmul.f32 %v6429_v32, %v13628_v25  ;;  %v4561_v16 = vmul.f32 %v6430_v18, %v13628_v25  ;;  %v6448_v37 = vld [vmem:[%s14207_s0 + $0x508] sm:$0xff]  ;;  %v6449_v30 = vld [vmem:[%s14207_s0 + $0x510] sm:$0xff]  ;;  %v6450_v32 = vld [vmem:[%s14207_s0 + $0x518] sm:$0xff] }
 0x31e   :  { %v13775_v42 = vadd.f32 %v4542_v28, %v13648_v3  ;;  %v13778_v29 = vadd.f32 %v4543_v1, %v13650_v15  ;;  %v13781_v44 = vadd.f32 %v4544_v63, %v13652_v17  ;;  %v13784_v6 = vadd.f32 %v4545_v35, %v13654_v36  ;;  %v6432_v15 = vld [vmem:[%s14207_s0 + $0xc8] sm:$0xff]  ;;  %v6451_v18 = vld [vmem:[%s14207_s0 + $0x520] sm:$0xf] }
 0x31f   :  { %v13787_v26 = vadd.f32 %v4546_v55, %v13656_v8  ;;  %v13790_v33 = vadd.f32 %v4547_v47, %v13658_v38  ;;  %v13793_v25 = vadd.f32 %v4548_v50, %v13660_v49  ;;  %v13796_v3 = vadd.f32 %v4549_v27, %v13662_v19  ;;  %v6433_v38 = vld [vmem:[%s14207_s0 + $0xd0] sm:$0xff]  ;;  %v6434_v49 = vld [vmem:[%s14207_s0 + $0xd8] sm:$0xff]  ;;  %v6435_v19 = vld [vmem:[%s14207_s0 + $0xe0] sm:$0xff] }
 0x320   :  { %v13801_v17 = vadd.f32 %v4550_v54, %v4508_v13  ;;  %v13803_v36 = vadd.f32 %v4551_v9, %v4509_v41  ;;  %v13805_v2 = vadd.f32 %v4552_v45, %v4510_v22  ;;  %v13807_v8 = vadd.f32 %v4553_v39, %v4511_v60  ;;  %v6436_v13 = vld [vmem:[%s14207_s0 + $0xe8] sm:$0xf]  ;;  %v6437_v41 = vld [vmem:[%s14207_s0 + $0x230] sm:$0xff] }
 0x321   :  { %v13825_v22 = vadd.f32 %v4554_v5, %v13688_v20  ;;  %v13828_v60 = vadd.f32 %v4555_v62, %v13691_v7  ;;  %v13831_v4 = vadd.f32 %v4556_v23, %v13693_v57  ;;  %v13834_v14 = vadd.f32 %v4557_v58, %v13695_v52  ;;  %v6439_v20 = vld [vmem:[%s14207_s0 + $0x240] sm:$0xff]  ;;  %v6440_v7 = vld [vmem:[%s14207_s0 + $0x248] sm:$0xff]  ;;  %v6441_v57 = vld [vmem:[%s14207_s0 + $0x250] sm:$0xf] }
 0x322   :  { %v13849_v52 = vadd.f32 %v4558_v34, %v13710_v0  ;;  %v13852_v48 = vadd.f32 %v4559_v12, %v13713_v61  ;;  %v13855_v31 = vadd.f32 %v4560_v11, %v13715_v40  ;;  %v13858_v21 = vadd.f32 %v4561_v16, %v13717_v59  ;;  %v6444_v0 = vld [vmem:[%s14207_s0 + $0x3a8] sm:$0xff]  ;;  %v6446_v61 = vld [vmem:[%s14207_s0 + $0x3b8] sm:$0xf] }
 0x323   :  { %v4603_v40 = vstv %s13741_s14  ;;  %v13874_v51 = vstv %s13756_s7  ;;  %v13877_v59 = vstv %s13762_s29  ;;  %v13880_v46 = vstv %s13764_s28  ;;  %s14152_s7 = sld [smem:[#allocation6 + $0x7]] }
 0x324   :  { %v4604_v28 = vmul.f32 %v6432_v15, %v4603_v40  ;;  %v4605_v1 = vmul.f32 %v6433_v38, %v4603_v40  ;;  %v4606_v63 = vmul.f32 %v6434_v49, %v4603_v40  ;;  %v4607_v35 = vmul.f32 %v6435_v19, %v4603_v40 }
 0x325   :  { %v4608_v55 = vmul.f32 %v6436_v13, %v4603_v40  ;;  %v4609_v47 = vmul.f32 %v6437_v41, %v4603_v40  ;;  %v4610_v50 = vmul.f32 %v6438_v10, %v4603_v40  ;;  %v4611_v27 = vmul.f32 %v6439_v20, %v4603_v40 }
 0x326   :  { %v4612_v54 = vmul.f32 %v6440_v7, %v4603_v40  ;;  %v4613_v9 = vmul.f32 %v6441_v57, %v4603_v40  ;;  %v4614_v45 = vmul.f32 %v6442_v43, %v4603_v40  ;;  %v4615_v39 = vmul.f32 %v6443_v24, %v4603_v40  ;;  %v6453_v7 = vld [vmem:[%s14207_s0 + $0xf0] sm:$0xff]  ;;  %v6456_v57 = vld [vmem:[%s14207_s0 + $0x108] sm:$0xff]  ;;  %v6459_v24 = vld [vmem:[%s14207_s0 + $0x260] sm:$0xff] }
 0x327   :  { %v4616_v5 = vmul.f32 %v6444_v0, %v4603_v40  ;;  %v4617_v62 = vmul.f32 %v6445_v56, %v4603_v40  ;;  %v4618_v23 = vmul.f32 %v6446_v61, %v4603_v40  ;;  %v4619_v58 = vmul.f32 %v6447_v53, %v4603_v40  ;;  %v6460_v0 = vld [vmem:[%s14207_s0 + $0x268] sm:$0xff]  ;;  %v6461_v61 = vld [vmem:[%s14207_s0 + $0x270] sm:$0xff]  ;;  %v6463_v56 = vld [vmem:[%s14207_s0 + $0x3c0] sm:$0xff] }
 0x328   :  { %v4620_v34 = vmul.f32 %v6448_v37, %v4603_v40  ;;  %v4621_v12 = vmul.f32 %v6449_v30, %v4603_v40  ;;  %v4622_v11 = vmul.f32 %v6450_v32, %v4603_v40  ;;  %v4623_v16 = vmul.f32 %v6451_v18, %v4603_v40  ;;  %v6464_v53 = vld [vmem:[%s14207_s0 + $0x3c8] sm:$0xff]  ;;  %v6465_v37 = vld [vmem:[%s14207_s0 + $0x3d0] sm:$0xff]  ;;  %v6471_v30 = vld [vmem:[%s14207_s0 + $0x540] sm:$0xff] }
 0x329   :  { %v4624_v15 = vadd.f32 %v4604_v28, %v13775_v42  ;;  %v4625_v38 = vadd.f32 %v4605_v1, %v13778_v29  ;;  %v4626_v49 = vadd.f32 %v4606_v63, %v13781_v44  ;;  %v4627_v19 = vadd.f32 %v4607_v35, %v13784_v6  ;;  %v6457_v42 = vld [vmem:[%s14207_s0 + $0x110] sm:$0xf]  ;;  %v6458_v29 = vld [vmem:[%s14207_s0 + $0x258] sm:$0xff]  ;;  %v6472_v32 = vld [vmem:[%s14207_s0 + $0x548] sm:$0xf] }
 0x32a   :  { %v4628_v13 = vadd.f32 %v4608_v55, %v13787_v26  ;;  %v4629_v41 = vadd.f32 %v4609_v47, %v13790_v33  ;;  %v4630_v10 = vadd.f32 %v4610_v50, %v13793_v25  ;;  %v4631_v20 = vadd.f32 %v4611_v27, %v13796_v3  ;;  %v6454_v25 = vld [vmem:[%s14207_s0 + $0xf8] sm:$0xff]  ;;  %v6455_v3 = vld [vmem:[%s14207_s0 + $0x100] sm:$0xff] }
 0x32b   :  { %v4632_v44 = vadd.f32 %v4612_v54, %v13801_v17  ;;  %v4633_v6 = vadd.f32 %v4613_v9, %v13803_v36  ;;  %v4634_v26 = vadd.f32 %v4614_v45, %v13805_v2  ;;  %v4635_v33 = vadd.f32 %v4615_v39, %v13807_v8  ;;  %v6462_v17 = vld [vmem:[%s14207_s0 + $0x278] sm:$0xf] }
 0x32c   :  { %v4636_v36 = vadd.f32 %v4616_v5, %v13825_v22  ;;  %v4637_v2 = vadd.f32 %v4617_v62, %v13828_v60  ;;  %v4638_v8 = vadd.f32 %v4618_v23, %v13831_v4  ;;  %v4639_v43 = vadd.f32 %v4619_v58, %v13834_v14  ;;  %v6467_v22 = vld [vmem:[%s14207_s0 + $0x3e0] sm:$0xf]  ;;  %v6470_v35 = vld [vmem:[%s14207_s0 + $0x538] sm:$0xff] }
 0x32d   :  { %v4640_v60 = vadd.f32 %v4620_v34, %v13849_v52  ;;  %v4641_v4 = vadd.f32 %v4621_v12, %v13852_v48  ;;  %v4642_v14 = vadd.f32 %v4622_v11, %v13855_v31  ;;  %v4643_v40 = vadd.f32 %v4623_v16, %v13858_v21  ;;  %v6466_v52 = vld [vmem:[%s14207_s0 + $0x3d8] sm:$0xff]  ;;  %v6468_v48 = vld [vmem:[%s14207_s0 + $0x528] sm:$0xff]  ;;  %v6469_v31 = vld [vmem:[%s14207_s0 + $0x530] sm:$0xff] }
 0x32e   :  { %v4666_v21 = vmul.f32 %v6453_v7, %v13874_v51  ;;  %v4667_v28 = vmul.f32 %v6454_v25, %v13874_v51  ;;  %v4668_v1 = vmul.f32 %v6455_v3, %v13874_v51  ;;  %v4669_v63 = vmul.f32 %v6456_v57, %v13874_v51 }
 0x32f   :  { %v4670_v18 = vmul.f32 %v6457_v42, %v13874_v51  ;;  %v4671_v55 = vmul.f32 %v6458_v29, %v13874_v51  ;;  %v4672_v47 = vmul.f32 %v6459_v24, %v13874_v51  ;;  %v4673_v50 = vmul.f32 %v6460_v0, %v13874_v51  ;;  %v6474_v24 = vld [vmem:[%s14207_s0 + $0x118] sm:$0xff] }
 0x330   :  { %v4674_v27 = vmul.f32 %v6461_v61, %v13874_v51  ;;  %v4675_v54 = vmul.f32 %v6462_v17, %v13874_v51  ;;  %v4676_v9 = vmul.f32 %v6463_v56, %v13874_v51  ;;  %v4677_v45 = vmul.f32 %v6464_v53, %v13874_v51  ;;  %v6478_v0 = vld [vmem:[%s14207_s0 + $0x138] sm:$0xf]  ;;  %v6480_v61 = vld [vmem:[%s14207_s0 + $0x288] sm:$0xff] }
 0x331   :  { %v4678_v39 = vmul.f32 %v6465_v37, %v13874_v51  ;;  %v4679_v5 = vmul.f32 %v6466_v52, %v13874_v51  ;;  %v4680_v62 = vmul.f32 %v6467_v22, %v13874_v51  ;;  %v4681_v23 = vmul.f32 %v6468_v48, %v13874_v51  ;;  %v6481_v22 = vld [vmem:[%s14207_s0 + $0x290] sm:$0xff]  ;;  %v6482_v56 = vld [vmem:[%s14207_s0 + $0x298] sm:$0xff]  ;;  %v6488_v53 = vld [vmem:[%s14207_s0 + $0x408] sm:$0xf] }
 0x332   :  { %v4682_v58 = vmul.f32 %v6469_v31, %v13874_v51  ;;  %v4683_v34 = vmul.f32 %v6470_v35, %v13874_v51  ;;  %v4684_v12 = vmul.f32 %v6471_v30, %v13874_v51  ;;  %v4685_v11 = vmul.f32 %v6472_v32, %v13874_v51  ;;  %v6479_v51 = vld [vmem:[%s14207_s0 + $0x280] sm:$0xff]  ;;  %v6484_v37 = vld [vmem:[%s14207_s0 + $0x3e8] sm:$0xff]  ;;  %v6485_v52 = vld [vmem:[%s14207_s0 + $0x3f0] sm:$0xff] }
 0x333   :  { %v4686_v16 = vadd.f32 %v4666_v21, %v4624_v15  ;;  %v4687_v7 = vadd.f32 %v4667_v28, %v4625_v38  ;;  %v4688_v42 = vadd.f32 %v4668_v1, %v4626_v49  ;;  %v4689_v29 = vadd.f32 %v4669_v63, %v4627_v19  ;;  %v6486_v48 = vld [vmem:[%s14207_s0 + $0x3f8] sm:$0xff]  ;;  %v6487_v31 = vld [vmem:[%s14207_s0 + $0x400] sm:$0xff]  ;;  %v6492_v63 = vld [vmem:[%s14207_s0 + $0x568] sm:$0xff] }
 0x334   :  { %v4690_v25 = vadd.f32 %v4670_v18, %v4628_v13  ;;  %v4691_v3 = vadd.f32 %v4671_v55, %v4629_v41  ;;  %v4692_v57 = vadd.f32 %v4672_v47, %v4630_v10  ;;  %v4693_v17 = vadd.f32 %v4673_v50, %v4631_v20  ;;  %v6475_v13 = vld [vmem:[%s14207_s0 + $0x120] sm:$0xff]  ;;  %v6476_v41 = vld [vmem:[%s14207_s0 + $0x128] sm:$0xff]  ;;  %v6477_v10 = vld [vmem:[%s14207_s0 + $0x130] sm:$0xff] }
 0x335   :  { %v4694_v15 = vadd.f32 %v4674_v27, %v4632_v44  ;;  %v4695_v38 = vadd.f32 %v4675_v54, %v4633_v6  ;;  %v4696_v49 = vadd.f32 %v4676_v9, %v4634_v26  ;;  %v4697_v19 = vadd.f32 %v4677_v45, %v4635_v33  ;;  %v6483_v20 = vld [vmem:[%s14207_s0 + $0x2a0] sm:$0xf]  ;;  %v6493_v35 = vld [vmem:[%s14207_s0 + $0x570] sm:$0xf] }
 0x336   :  { %v4698_v44 = vadd.f32 %v4678_v39, %v4636_v36  ;;  %v4699_v6 = vadd.f32 %v4679_v5, %v4637_v2  ;;  %v4700_v26 = vadd.f32 %v4680_v62, %v4638_v8  ;;  %v4701_v33 = vadd.f32 %v4681_v23, %v4639_v43  ;;  %v6491_v1 = vld [vmem:[%s14207_s0 + $0x560] sm:$0xff] }
 0x337   :  { %v4702_v36 = vadd.f32 %v4682_v58, %v4640_v60  ;;  %v4703_v2 = vadd.f32 %v4683_v34, %v4641_v4  ;;  %v4704_v8 = vadd.f32 %v4684_v12, %v4642_v14  ;;  %v4705_v43 = vadd.f32 %v4685_v11, %v4643_v40  ;;  %v6489_v60 = vld [vmem:[%s14207_s0 + $0x550] sm:$0xff]  ;;  %v6490_v4 = vld [vmem:[%s14207_s0 + $0x558] sm:$0xff] }
 0x338   :  { %v4728_v14 = vmul.f32 %v6474_v24, %v13877_v59  ;;  %v4729_v40 = vmul.f32 %v6475_v13, %v13877_v59  ;;  %v4730_v21 = vmul.f32 %v6476_v41, %v13877_v59  ;;  %v4731_v28 = vmul.f32 %v6477_v10, %v13877_v59 }
 0x339   :  { %v4732_v30 = vmul.f32 %v6478_v0, %v13877_v59  ;;  %v4733_v32 = vmul.f32 %v6479_v51, %v13877_v59  ;;  %v4734_v18 = vmul.f32 %v6480_v61, %v13877_v59  ;;  %v4735_v55 = vmul.f32 %v6481_v22, %v13877_v59  ;;  %v6499_v61 = vld [vmem:[%s14207_s0 + $0x160] sm:$0xf]  ;;  %v6501_v22 = vld [vmem:[%s14207_s0 + $0x2b0] sm:$0xff] }
 0x33a   :  { %v4736_v47 = vmul.f32 %v6482_v56, %v13877_v59  ;;  %v4737_v50 = vmul.f32 %v6483_v20, %v13877_v59  ;;  %v4738_v27 = vmul.f32 %v6484_v37, %v13877_v59  ;;  %v4739_v54 = vmul.f32 %v6485_v52, %v13877_v59  ;;  %v6495_v20 = vld [vmem:[%s14207_s0 + $0x140] sm:$0xff]  ;;  %v6502_v56 = vld [vmem:[%s14207_s0 + $0x2b8] sm:$0xff]  ;;  %v6509_v37 = vld [vmem:[%s14207_s0 + $0x430] sm:$0xf] }
 0x33b   :  { %v4740_v9 = vmul.f32 %v6486_v48, %v13877_v59  ;;  %v4741_v45 = vmul.f32 %v6487_v31, %v13877_v59  ;;  %v4742_v39 = vmul.f32 %v6488_v53, %v13877_v59  ;;  %v4743_v5 = vmul.f32 %v6489_v60, %v13877_v59  ;;  %v6503_v53 = vld [vmem:[%s14207_s0 + $0x2c0] sm:$0xff]  ;;  %v6505_v52 = vld [vmem:[%s14207_s0 + $0x410] sm:$0xff]  ;;  %v6506_v48 = vld [vmem:[%s14207_s0 + $0x418] sm:$0xff] }
 0x33c   :  { %v4744_v62 = vmul.f32 %v6490_v4, %v13877_v59  ;;  %v4745_v23 = vmul.f32 %v6491_v1, %v13877_v59  ;;  %v4746_v58 = vmul.f32 %v6492_v63, %v13877_v59  ;;  %v4747_v34 = vmul.f32 %v6493_v35, %v13877_v59  ;;  %v6500_v59 = vld [vmem:[%s14207_s0 + $0x2a8] sm:$0xff]  ;;  %v6507_v31 = vld [vmem:[%s14207_s0 + $0x420] sm:$0xff] }
 0x33d   :  { %v4748_v12 = vadd.f32 %v4728_v14, %v4686_v16  ;;  %v4749_v11 = vadd.f32 %v4729_v40, %v4687_v7  ;;  %v4750_v24 = vadd.f32 %v4730_v21, %v4688_v42  ;;  %v4751_v0 = vadd.f32 %v4731_v28, %v4689_v29  ;;  %v6508_v60 = vld [vmem:[%s14207_s0 + $0x428] sm:$0xff]  ;;  %v6513_v21 = vld [vmem:[%s14207_s0 + $0x590] sm:$0xff]  ;;  %v6514_v28 = vld [vmem:[%s14207_s0 + $0x598] sm:$0xf] }
 0x33e   :  { %v4752_v51 = vadd.f32 %v4732_v30, %v4690_v25  ;;  %v4753_v13 = vadd.f32 %v4733_v32, %v4691_v3  ;;  %v4754_v41 = vadd.f32 %v4734_v18, %v4692_v57  ;;  %v4755_v10 = vadd.f32 %v4735_v55, %v4693_v17  ;;  %v6496_v25 = vld [vmem:[%s14207_s0 + $0x148] sm:$0xff]  ;;  %v6497_v3 = vld [vmem:[%s14207_s0 + $0x150] sm:$0xff]  ;;  %v6498_v57 = vld [vmem:[%s14207_s0 + $0x158] sm:$0xff] }
 0x33f   :  { %v4756_v16 = vadd.f32 %v4736_v47, %v4694_v15  ;;  %v4757_v7 = vadd.f32 %v4737_v50, %v4695_v38  ;;  %v4758_v42 = vadd.f32 %v4738_v27, %v4696_v49  ;;  %v4759_v29 = vadd.f32 %v4739_v54, %v4697_v19  ;;  %v6504_v17 = vld [vmem:[%s14207_s0 + $0x2c8] sm:$0xf] }
 0x340   :  { %v4760_v15 = vadd.f32 %v4740_v9, %v4698_v44  ;;  %v4761_v38 = vadd.f32 %v4741_v45, %v4699_v6  ;;  %v4762_v49 = vadd.f32 %v4742_v39, %v4700_v26  ;;  %v4763_v19 = vadd.f32 %v4743_v5, %v4701_v33  ;;  %v6512_v40 = vld [vmem:[%s14207_s0 + $0x588] sm:$0xff] }
 0x341   :  { %v4764_v44 = vadd.f32 %v4744_v62, %v4702_v36  ;;  %v4765_v6 = vadd.f32 %v4745_v23, %v4703_v2  ;;  %v4766_v26 = vadd.f32 %v4746_v58, %v4704_v8  ;;  %v4767_v33 = vadd.f32 %v4747_v34, %v4705_v43  ;;  %v6510_v36 = vld [vmem:[%s14207_s0 + $0x578] sm:$0xff]  ;;  %v6511_v2 = vld [vmem:[%s14207_s0 + $0x580] sm:$0xff] }
 0x342   :  { %v4790_v8 = vmul.f32 %v6495_v20, %v13880_v46  ;;  %v4791_v43 = vmul.f32 %v6496_v25, %v13880_v46  ;;  %v4792_v4 = vmul.f32 %v6497_v3, %v13880_v46  ;;  %v4793_v14 = vmul.f32 %v6498_v57, %v13880_v46 }
 0x343   :  { %v4794_v1 = vmul.f32 %v6499_v61, %v13880_v46  ;;  %v4795_v63 = vmul.f32 %v6500_v59, %v13880_v46  ;;  %v4796_v35 = vmul.f32 %v6501_v22, %v13880_v46  ;;  %v4797_v30 = vmul.f32 %v6502_v56, %v13880_v46 }
 0x344   :  { %v4798_v32 = vmul.f32 %v6503_v53, %v13880_v46  ;;  %v4799_v18 = vmul.f32 %v6504_v17, %v13880_v46  ;;  %v4800_v55 = vmul.f32 %v6505_v52, %v13880_v46  ;;  %v4801_v47 = vmul.f32 %v6506_v48, %v13880_v46  ;;  %v4919_v53 = vld [vmem:[#allocation2 + $0x80] sm:$0xff] }
 0x345   :  { %v4802_v50 = vmul.f32 %v6507_v31, %v13880_v46  ;;  %v4803_v27 = vmul.f32 %v6508_v60, %v13880_v46  ;;  %v4804_v54 = vmul.f32 %v6509_v37, %v13880_v46  ;;  %v4805_v9 = vmul.f32 %v6510_v36, %v13880_v46  ;;  %v4920_v37 = vld [vmem:[#allocation2 + $0x88] sm:$0xff] }
 0x346   :  { %v4806_v45 = vmul.f32 %v6511_v2, %v13880_v46  ;;  %v4807_v39 = vmul.f32 %v6512_v40, %v13880_v46  ;;  %v4808_v5 = vmul.f32 %v6513_v21, %v13880_v46  ;;  %v4809_v62 = vmul.f32 %v6514_v28, %v13880_v46  ;;  %v4899_v46 = vld [vmem:[%s14210_s3 + $0x10] sm:$0xff]  ;;  %v4943_v28 = vld [vmem:[%s14211_s4] sm:$0xff] }
 0x347   :  { %v4810_v23 = vadd.f32 %v4790_v8, %v4748_v12  ;;  %v4811_v58 = vadd.f32 %v4791_v43, %v4749_v11  ;;  %v4812_v34 = vadd.f32 %v4792_v4, %v4750_v24  ;;  %v4813_v20 = vadd.f32 %v4793_v14, %v4751_v0  ;;  %6583 = vmatprep.mubr.msk.f32.mxu1 %vm4955_vm1, %v4899_v46 }
 0x348   :  { %v4814_v61 = vadd.f32 %v4794_v1, %v4752_v51  ;;  %v4815_v59 = vadd.f32 %v4795_v63, %v4753_v13  ;;  %v4816_v25 = vadd.f32 %v4796_v35, %v4754_v41  ;;  %v4817_v3 = vadd.f32 %v4797_v30, %v4755_v10 }
 0x349   :  { %v4818_v57 = vadd.f32 %v4798_v32, %v4756_v16  ;;  %v4819_v17 = vadd.f32 %v4799_v18, %v4757_v7  ;;  %v4820_v22 = vadd.f32 %v4800_v55, %v4758_v42  ;;  %v4821_v56 = vadd.f32 %v4801_v47, %v4759_v29  ;;  %v4944_v42 = vld [vmem:[%s14211_s4 + $0x8] sm:$0x3] }
 0x34a   :  { %v4822_v52 = vadd.f32 %v4802_v50, %v4760_v15  ;;  %v4823_v48 = vadd.f32 %v4803_v27, %v4761_v38  ;;  %v4824_v31 = vadd.f32 %v4804_v54, %v4762_v49  ;;  %v4825_v60 = vadd.f32 %v4805_v9, %v4763_v19 }
 0x34b   :  { %v4826_v12 = vadd.f32 %v4806_v45, %v4764_v44  ;;  %v4827_v11 = vadd.f32 %v4807_v39, %v4765_v6  ;;  %v4828_v24 = vadd.f32 %v4808_v5, %v4766_v26  ;;  %v4829_v0 = vadd.f32 %v4809_v62, %v4767_v33 }
 0x34c   :  { %v4831_v51 = vstv %s14152_s7  ;;  %v6586_v13 = vpack.c.bf16 %v4920_v37, %v4919_v53  ;;  %v6705_v33 = vmov 0  }
 0x34d   :  { %v4832_v41 = vadd.f32 %v4831_v51, %v4810_v23  ;;  %v4833_v10 = vadd.f32 %v4831_v51, %v4811_v58  ;;  %v4834_v16 = vadd.f32 %v4831_v51, %v4812_v34  ;;  %v4835_v7 = vadd.f32 %v4831_v51, %v4813_v20  ;;  %6641 = vset.pattern.permute.xlu0 %v6705_v33 }
 0x34e   :  { %v4836_v29 = vadd.f32 %v4831_v51, %v4814_v61  ;;  %v4837_v15 = vadd.f32 %v4831_v51, %v4815_v59  ;;  %v4838_v38 = vadd.f32 %v4831_v51, %v4816_v25  ;;  %v4839_v49 = vadd.f32 %v4831_v51, %v4817_v3  ;;  %6587 = vmatprep.subr.bf16.mxu0 %v6586_v13  ;;  %v4903_v61 = vld [vmem:[#allocation2] sm:$0xff]  ;;  %v4924_v13 = vld [vmem:[#allocation2 + $0xa8] sm:$0xff] }
 0x34f   :  { %v4840_v19 = vadd.f32 %v4831_v51, %v4818_v57  ;;  %v4841_v44 = vadd.f32 %v4831_v51, %v4819_v17  ;;  %v4842_v6 = vadd.f32 %v4831_v51, %v4820_v22  ;;  %v4843_v26 = vadd.f32 %v4831_v51, %v4821_v56  ;;  %4952 = vperm.xlu0 %6641, %v4944_v42   ;;  %v4904_v17 = vld [vmem:[#allocation2 + $0x8] sm:$0xff]  ;;  %v4921_v22 = vld [vmem:[#allocation2 + $0x90] sm:$0xff]  ;;  %v4922_v56 = vld [vmem:[#allocation2 + $0x98] sm:$0xff] }
 0x350   :  { %v4844_v36 = vadd.f32 %v4831_v51, %v4822_v52  ;;  %v4845_v2 = vadd.f32 %v4831_v51, %v4823_v48  ;;  %v4846_v8 = vadd.f32 %v4831_v51, %v4824_v31  ;;  %v4847_v43 = vadd.f32 %v4831_v51, %v4825_v60 }
 0x351   :  { %v4848_v4 = vadd.f32 %v4831_v51, %v4826_v12  ;;  %v4849_v14 = vadd.f32 %v4831_v51, %v4827_v11  ;;  %v4850_v40 = vadd.f32 %v4831_v51, %v4828_v24  ;;  %v4851_v21 = vadd.f32 %v4831_v51, %v4829_v0  ;;  %v4905_v12 = vld [vmem:[#allocation2 + $0x10] sm:$0xff]  ;;  %v4906_v11 = vld [vmem:[#allocation2 + $0x18] sm:$0xff]  ;;  %v4923_v51 = vld [vmem:[#allocation2 + $0xa0] sm:$0xff] }
 0x352   :  { %v4852_v1 = vmax.f32 %v4832_v41, 0.0  ;;  %v4853_v63 = vmax.f32 %v4833_v10, 0.0  ;;  %v4854_v35 = vmax.f32 %v4834_v16, 0.0  ;;  %v4855_v30 = vmax.f32 %v4835_v7, 0.0 }
 0x353   :  { %v4856_v32 = vmax.f32 %v4836_v29, 0.0  ;;  %v4857_v18 = vmax.f32 %v4837_v15, 0.0  ;;  %v4858_v55 = vmax.f32 %v4838_v38, 0.0  ;;  %v4859_v47 = vmax.f32 %v4839_v49, 0.0  ;;  %4947 = vperm.xlu0 %6641, %v4943_v28   ;;  %v4935_v15 = vld [vmem:[#allocation2 + $0x100] sm:$0xff]  ;;  %v4936_v38 = vld [vmem:[#allocation2 + $0x108] sm:$0xff] }
 0x354   :  { %v4860_v50 = vmax.f32 %v4840_v19, 0.0  ;;  %v4861_v27 = vmax.f32 %v4841_v44, 0.0  ;;  %v4862_v54 = vmax.f32 %v4842_v6, 0.0  ;;  %v4863_v9 = vmax.f32 %v4843_v26, 0.0  ;;  %v4937_v19 = vld [vmem:[#allocation2 + $0x110] sm:$0xff]  ;;  %v4907_v6 = vld [vmem:[#allocation2 + $0x20] sm:$0xff] }
 0x355   :  { %v4864_v45 = vmax.f32 %v4844_v36, 0.0  ;;  %v4865_v39 = vmax.f32 %v4845_v2, 0.0  ;;  %v4866_v5 = vmax.f32 %v4846_v8, 0.0  ;;  %v4867_v62 = vmax.f32 %v4847_v43, 0.0  ;;  %v4908_v26 = vld [vmem:[#allocation2 + $0x28] sm:$0xff]  ;;  %v4925_v2 = vld [vmem:[#allocation2 + $0xb0] sm:$0xff] }
 0x356   :  { %v4868_v23 = vmax.f32 %v4848_v4, 0.0  ;;  %v4869_v58 = vmax.f32 %v4849_v14, 0.0  ;;  %v4870_v34 = vmax.f32 %v4850_v40, 0.0  ;;  %v4871_v20 = vmax.f32 %v4851_v21, 0.0  ;;  %v4926_v8 = vld [vmem:[#allocation2 + $0xb8] sm:$0xff]  ;;  %v4909_v40 = vld [vmem:[#allocation2 + $0x30] sm:$0xff] }
 0x357   :  { %v4872_v59 = vmax.f32 %v4852_v1, %v4857_v18  ;;  %v4875_v25 = vmax.f32 %v4853_v63, %v4858_v55  ;;  %v4878_v3 = vmax.f32 %v4854_v35, %v4859_v47  ;;  %v4881_v57 = vmax.f32 %v4855_v30, %v4860_v50  ;;  %v4910_v21 = vld [vmem:[#allocation2 + $0x38] sm:$0xff]  ;;  %v4927_v1 = vld [vmem:[#allocation2 + $0xc0] sm:$0xff]  ;;  %v4928_v63 = vld [vmem:[#allocation2 + $0xc8] sm:$0xff] }
 0x358   :  { %v4884_v53 = vsel %vm648_vm0, %v4856_v32, -inf  ;;  %v4885_v37 = vsel %vm648_vm0, %v4861_v27, -inf  ;;  %v4887_v52 = vsel %vm648_vm0, %v4866_v5, -inf  ;;  %v4889_v0 = vsel %vm648_vm0, %v4871_v20, -inf  ;;  %v4911_v32 = vld [vmem:[#allocation2 + $0x40] sm:$0xff]  ;;  %v4912_v18 = vld [vmem:[#allocation2 + $0x48] sm:$0xff] }
 0x359   :  { %v4873_v48 = vmax.f32 %v4872_v59, %v4862_v54  ;;  %v4876_v31 = vmax.f32 %v4875_v25, %v4863_v9  ;;  %v4879_v60 = vmax.f32 %v4878_v3, %v4864_v45  ;;  %v4882_v46 = vmax.f32 %v4881_v57, %v4865_v39  ;;  %v4929_v47 = vld [vmem:[#allocation2 + $0xd0] sm:$0xff]  ;;  %v4930_v50 = vld [vmem:[#allocation2 + $0xd8] sm:$0xff]  ;;  %v4915_v20 = vld [vmem:[#allocation2 + $0x60] sm:$0xff] }
 0x35a   :  { %v4886_v24 = vmax.f32 %v4884_v53, %v4885_v37  ;;  %v6588_v41 = vpack.c.bf16 %v4904_v17, %v4903_v61  ;;  %v6590_v10 = vpack.c.bf16 %v4922_v56, %v4921_v22  ;;  %v6592_v44 = vpack.c.bf16 %v4906_v11, %v4905_v12  ;;  %v4913_v45 = vld [vmem:[#allocation2 + $0x50] sm:$0xff]  ;;  %v4914_v39 = vld [vmem:[#allocation2 + $0x58] sm:$0xff]  ;;  %v4916_v61 = vld [vmem:[#allocation2 + $0x68] sm:$0xff] }
 0x35b   :  { %v4874_v16 = vmax.f32 %v4873_v48, %v4867_v62  ;;  %v4877_v7 = vmax.f32 %v4876_v31, %v4868_v23  ;;  %v4880_v42 = vmax.f32 %v4879_v60, %v4869_v58  ;;  %v4883_v29 = vmax.f32 %v4882_v46, %v4870_v34  ;;  %v4931_v62 = vld [vmem:[#allocation2 + $0xe0] sm:$0xff]  ;;  %v4932_v23 = vld [vmem:[#allocation2 + $0xe8] sm:$0xff]  ;;  %v4933_v25 = vld [vmem:[#allocation2 + $0xf0] sm:$0xff] }
 0x35c   :  { %v4888_v49 = vmax.f32 %v4886_v24, %v4887_v52  ;;  %6589 = vmatpush3.bf16.msra.mxu0 %v6588_v41  ;;  %v6594_v33 = vpack.c.bf16 %v4924_v13, %v4923_v51  ;;  %v6618_v43 = vpack.c.bf16 %v4936_v38, %v4935_v15  ;;  %v6596_v14 = vpack.c.bf16 %v4908_v26, %v4907_v6  ;;  %v4902_v34 = vld [vmem:[%s14210_s3 + $0x28] sm:$0x3]  ;;  %v4934_v3 = vld [vmem:[#allocation2 + $0xf8] sm:$0xff]  ;;  %v4917_v17 = vld [vmem:[#allocation2 + $0x70] sm:$0xff] }
 0x35d   :  { %6591 = vmatprep.subr.bf16.mxu0 %v6590_v10  ;;  %v6622_v4 = vpack.c.bf16 %v4874_v16, %v4937_v19  ;;  %v6598_v28 = vpack.c.bf16 %v4926_v8, %v4925_v2  ;;  %v6626_v35 = vpack.c.bf16 %v4880_v42, %v4877_v7  ;;  %v6600_v30 = vpack.c.bf16 %v4910_v21, %v4909_v40  ;;  %v4918_v22 = vld [vmem:[#allocation2 + $0x78] sm:$0xff]  ;;  %v4897_v37 = vld [vmem:[%s14210_s3] sm:$0xff] }
 0x35e   :  { %v4890_v36 = vmax.f32 %v4888_v49, %v4889_v0  ;;  %6619 = vmatprep.subr.bf16.mxu1 %v6618_v43  ;;  %v6602_v55 = vpack.c.bf16 %v4928_v63, %v4927_v1  ;;  %v6604_v54 = vpack.c.bf16 %v4912_v18, %v4911_v32  ;;  %v6606_v5 = vpack.c.bf16 %v4930_v50, %v4929_v47  ;;  %v4901_v52 = vld [vmem:[%s14210_s3 + $0x20] sm:$0x3]  ;;  %v4900_v48 = vld [vmem:[%s14210_s3 + $0x18] sm:$0x3]  ;;  %s6706_s3 = smov [#allocation8]  }
 0x35f   :  { %6621 = vmatpush3.bf16.msra.mxu1 %v6618_v43  ;;  %v6608_v58 = vpack.c.bf16 %v4914_v39, %v4913_v45  ;;  %v6610_v59 = vpack.c.bf16 %v4932_v23, %v4931_v62  ;;  %v6612_v57 = vpack.c.bf16 %v4916_v61, %v4915_v20  ;;  %v6614_v56 = vpack.c.bf16 %v4934_v3, %v4933_v25  ;;  %s5146_s22 = sshll.u32 %s6706_s3, 4  ;;  %s5147_s22 = int_to_ptr.vmem [resolvable:$true] %s5146_s22 }
 0x360   :  { %4895 = vst [vmem:[#allocation2 + $0x138] sm:$0xf] %v4890_v36  ;;  %6593 = vmatpush3.bf16.msra.mxu0 %v6592_v44  ;;  %6623 = vmatprep.subr.bf16.mxu1 %v6622_v4  ;;  %v6616_v53 = vpack.c.bf16 %v4918_v22, %v4917_v17  ;;  %s6672_s6 = scalar_lea.vmem %s5147_s22, 256  ;;  %p6677_p11 = scmp.lt.s32.totalorder %s5147_s22, %s5147_s22 }
 0x361   :  { %6595 = vmatprep.subr.bf16.mxu0 %v6594_v33  ;;  %p6673_p10 = scmp.ne.s32.totalorder %s5147_s22, %s6672_s6  ;;  %p6678_p12 = scmp.lt.s32.totalorder %s6672_s6, %s6672_s6 }
 0x363   :  { %6625 = vmatpush3.bf16.msra.mxu1 %v6622_v4  ;;  %p6679_p13 = por %p6678_p12, %p6677_p11 }
 0x364   :  { %6597 = vmatpush3.bf16.msra.mxu0 %v6596_v14  ;;  %6627 = vmatprep.subr.bf16.mxu1 %v6626_v35 }
 0x365   :  { %6599 = vmatprep.subr.bf16.mxu0 %v6598_v28  ;;  %p6680_p0 = pnand %p6679_p13, %p6673_p10 }
 0x367   :  { %v4942_v27 = vld [vmem:[#allocation2 + $0x138] sm:$0xff]  ;;  %6629 = vmatpush3.bf16.msra.mxu1 %v6626_v35 }
 0x368   :  { %6601 = vmatpush3.bf16.msra.mxu0 %v6600_v30  ;;  %v6630_v9 = vpack.c.bf16 %v4942_v27, %v4883_v29 }
 0x369   :  { %6603 = vmatprep.subr.bf16.mxu0 %v6602_v55 }
 0x36a   :  { %6631 = vmatprep.subr.bf16.mxu1 %v6630_v9 }
 0x36b   :  { %6633 = vmatpush3.bf16.msra.mxu1 %v6630_v9 }
 0x36c   :  { %6605 = vmatpush3.bf16.msra.mxu0 %v6604_v54 }
 0x36d   :  { %6607 = vmatprep.subr.bf16.mxu0 %v6606_v5 }
 0x36e   :  { %6584 = vmatmul.mubr.msk.f32.vlgmr.msra.gmra.mrb[0].mxu1 %vm4955_vm1, %v4902_v34 }
 0x370   :  { %6609 = vmatpush3.bf16.msra.mxu0 %v6608_v58 }
 0x371   :  { %6611 = vmatprep.subr.bf16.mxu0 %v6610_v59 }
 0x374   :  { %6613 = vmatpush3.bf16.msra.mxu0 %v6612_v57 }
 0x375   :  { %6615 = vmatprep.subr.bf16.mxu0 %v6614_v56 }
 0x378   :  { %6617 = vmatpush3.bf16.msra.mxu0 %v6616_v53 }
 0x37b   :  { %5027 = vmatmul.mubr.f32.vlgmr.msra.gmra.mrb[0].mxu0 %v4897_v37 }
 0x37c   :  { %5031 = vmatprep.mubr.f32.mxu0 %v4901_v52 }
 0x37f   :  { %5032 = vmatmul.mubr.f32.gmra.mrb[2].mxu0 %v4900_v48 }
 0x3ce   :  { %v4953_v46 = vpop.permute.xlu0 %4952 }
 0x3d2   :  { %v4948_v24 = vpop.permute.xlu0 %4947 }
 0x441   :  { %v6585_v31 = vpop.f32.mrb[0].mxu1 }
 0x442   :  { %v5103_v60 = vpop.f32.mrb[1].mxu1 }
 0x44e   :  { %v6551_v12 = vpop.f32.mrb[0].mxu0 }
 0x44f   :  { %v6552_v11 = vpop.f32.mrb[1].mxu0 }
 0x450   :  { %v6553_v0 = vadd.f32 %v6552_v11, %v6551_v12 }
 0x452   :  { %v5029_v51 = vadd.f32 %v6553_v0, %v4948_v24  ;;  %v6554_v13 = vpop.f32.mrb[2].mxu0 }
 0x453   :  { %v6555_v41 = vpop.f32.mrb[3].mxu0 }
 0x454   :  { %v6556_v10 = vadd.f32 %v6555_v41, %v6554_v13  ;;  %v5104_v16 = vadd.f32 %v5103_v60, %v5029_v51 }
 0x456   :  { %v5034_v7 = vadd.f32 %v6556_v10, %v4953_v46 }
 0x458   :  { %v5109_v42 = vadd.f32 %v6585_v31, %v5034_v7 }
 0x45a   :  { %v5113_v29 = vsel %vm5112_vm2, %v5109_v42, -inf }
 0x45b   :  { %v5114_v15 = vmax.f32 %v5104_v16, %v5113_v29 }
 0x45d   :  { %v5115_v38 = vrot.slane %v5114_v15, 4 }
 0x45f   :  { %v5116_v49 = vmax.f32 %v5114_v15, %v5115_v38 }
 0x461   :  { %v5117_v19 = vrot.slane %v5116_v49, 2 }
 0x463   :  { %v5118_v44 = vmax.f32 %v5116_v49, %v5117_v19 }
 0x465   :  { %v5119_v6 = vrot.slane %v5118_v44, 1 }
 0x467   :  { %v5120_v26 = vmax.f32 %v5118_v44, %v5119_v6 }
 0x469   :  { %v5121_v33 = vsub.f32 %v5104_v16, %v5120_v26  ;;  %v5122_v36 = vsub.f32 %v5109_v42, %v5120_v26 }
 0x46b   :  { %v5123_v2 = vmul.f32 1.442695, %v5121_v33  ;;  %v5125_v8 = vmul.f32 1.442695, %v5122_v36 }
 0x46d   :  { %6642 = vpow2.f32 %v5123_v2 }
 0x46e   :  { %6644 = vpow2.f32 %v5125_v8 }
 0x477   :  { %v6643_v43 = vpop.eup %6642 }
 0x478   :  { %v6645_v4 = vpop.eup %6644 }
 0x479   :  { %v5127_v14 = vsel %vm5112_vm2, %v6645_v4, 0.0 }
 0x47a   :  { %v5128_v40 = vadd.f32 %v6643_v43, %v5127_v14 }
 0x47c   :  { %v5129_v21 = vrot.slane %v5128_v40, 4 }
 0x47e   :  { %v5130_v28 = vadd.f32 %v5129_v21, %v5128_v40 }
 0x480   :  { %v5131_v1 = vrot.slane %v5130_v28, 2 }
 0x482   :  { %v5132_v63 = vadd.f32 %v5131_v1, %v5130_v28 }
 0x484   :  { %v5133_v35 = vrot.slane %v5132_v63, 1 }
 0x486   :  { %v5134_v30 = vadd.f32 %v5133_v35, %v5132_v63 }
 0x488   :  { %6646 = vlog2.f32 %v5134_v30 }
 0x492   :  { %v6647_v32 = vpop.eup %6646 }
 0x493   :  { %v5136_v18 = vmul.f32 0.6931472, %v6647_v32 }
 0x495   :  { %v5137_v55 = vsub.f32 %v5121_v33, %v5136_v18  ;;  %v5138_v47 = vsub.f32 %v5122_v36, %v5136_v18 }
 0x497   :  { %5139 = vst [vmem:[#allocation8] sm:$0xff] %v5137_v55  ;;  %5140 = vst [vmem:[#allocation8 + $0x8] sm:$0x3] %v5138_v47 }
 0x498   :  { %6683 = shalt.err (!%p6680_p0)
}
 0x499   :  { %s6684_s25 = scalar_lea.hbm %s14212_s5, 256 }
 0x49a   :  { %p6685_p1 = scmp.ne.s32.totalorder %s14212_s5, %s6684_s25  ;;  %p6688_p2 = scmp.lt.u32.totalorder %s6684_s25, %s14212_s5 }
 0x49c   :  { %p6690_p3 = pnand %p6688_p2, %p6685_p1 }
 0x49e   :  { %6693 = shalt.err (!%p6690_p3)
}
 0x49f   :  { %5152 = dma.vmem_to_hbm [thread:$0]  %s5147_s22, 256, %s14212_s5, [#allocation4], %s6701_s26, %s6701_s26, %s6702_s27  }
 0x4a0   :  { %6698 = dma.done.wait [#allocation4], 256  }
 0x4a1   :  { %6699 = vsyncadd [#allocation4], 4294967040 }
 0x4a2   :  { %5156 = vsyncpa [#allocation4], 1 }
 0x4a3   :  { %5157 = vsyncpa [#allocation5], 1 }
 0x4a4   :  { %5158 = vsyncpa [#allocation7], 1 }

</bundles_post_ra>
